<compile_context>
chip_gen: v7x
topology: tpu7x:2x2x1
jax: 0.10.0
libtpu: 0.0.40
codegen_flags: <defaults>
</compile_context>

<pallas_src>
import functools

import jax
import jax.numpy as jnp
from jax.experimental import pallas as pl
from jax.experimental.pallas import tpu as pltpu

LANE = 128  # TPU lane width: channel dims are padded to a multiple of this.
_TAPS = tuple((ky, kx) for ky in range(3) for kx in range(3))


def _round_up(x, m):
    return (x + m - 1) // m * m


def _fold_bn_into_conv(w_oihw, gamma, beta, mean, var, eps):
    """Fold eval-mode BatchNorm into the conv: HWIO weights (pre-scaled) + bias."""
    scale = gamma / jnp.sqrt(var + eps)                      # (Cout,)
    bias = beta - mean * scale                               # (Cout,)
    w_hwio = jnp.transpose(w_oihw, (2, 3, 1, 0)) * scale     # (3, 3, Cin, Cout)
    return w_hwio.astype(jnp.float32), bias.astype(jnp.float32)


def _basic_block_kernel(x_ref, w1_ref, b1_ref, w2_ref, b2_ref, o_ref,
                        xp_ref, hp_ref, acc_ref, *,
                        H, W, Cin, p2, stride, Ho, Wo, cdtype):
    """Fused Conv3x3(s=1,p=1)+BN1+ReLU -> Conv3x3(stride,p2)+BN2 for one image.

    x_ref  : (1, H, W, Cin)            NHWC input tile (native channel count)
    w1_ref : (3, 3, Cin_pad, Cp)       stage-1 weights, BN1 scale folded, bf16
    b1_ref : (1, Cp)                   stage-1 folded BN bias, f32
    w2_ref : (3, 3, Cp, Cp)            stage-2 weights, BN2 scale folded, bf16
    b2_ref : (1, Cp)                   stage-2 folded BN bias, f32
    o_ref  : (1, Ho, Wo, Cp)           NHWC output tile (channel-padded)
    xp_ref : (H+2, W+2, Cin_pad)       VMEM: zero-padded input (halo + channels)
    hp_ref : (H+2*p2, W+2*p2, Cp)      VMEM: zero-padded intermediate activation
    acc_ref: (H*W, Cp) f32             VMEM accumulator, reused by both stages
    """
    Cinp = xp_ref.shape[-1]
    Cp = hp_ref.shape[-1]

    # Zero halos / padded channels every step (scratch is per-core; safe under
    # megacore batch splitting). Cost is negligible vs the 18 matmuls.
    xp_ref[...] = jnp.zeros_like(xp_ref)
    hp_ref[...] = jnp.zeros_like(hp_ref)

    # ---- stage 1: in-VMEM padding (spatial halo + channel pad) ------------
    xp_ref[1:1 + H, 1:1 + W, 0:Cin] = x_ref[0].astype(cdtype)

    # 3x3 conv as 9 shifted (H*W, Cin_pad) @ (Cin_pad, Cp) MXU matmuls,
    # accumulated in f32 in VMEM scratch.
    for t, (ky, kx) in enumerate(_TAPS):
        lhs = xp_ref[ky:ky + H, kx:kx + W, :].reshape(H * W, Cinp)
        d = jnp.dot(lhs, w1_ref[ky, kx, :, :],
                    preferred_element_type=jnp.float32)
        if t == 0:
            acc_ref[...] = d
        else:
            acc_ref[...] += d

    # BN1 bias (scale already folded into w1) + ReLU, written straight into the
    # zero-halo intermediate buffer used by stage 2 (no HBM round-trip).
    h = jnp.maximum(acc_ref[...] + b1_ref[...], 0.0).astype(cdtype)
    hp_ref[p2:p2 + H, p2:p2 + W, :] = h.reshape(H, W, Cp)

    # ---- stage 2: Conv3x3(stride, p2) + BN2 --------------------------------
    M2 = Ho * Wo
    for t, (ky, kx) in enumerate(_TAPS):
        if stride == 1:
            patch = hp_ref[ky:ky + Ho, kx:kx + Wo, :]
        else:
            # In-kernel striding: only the strided output window is computed.
            patch = hp_ref[pl.ds(ky, Ho, stride=stride),
                           pl.ds(kx, Wo, stride=stride), :]
        d = jnp.dot(patch.reshape(M2, Cp), w2_ref[ky, kx, :, :],
                    preferred_element_type=jnp.float32)
        if t == 0:
            acc_ref[0:M2, :] = d
        else:
            acc_ref[0:M2, :] += d

    y = acc_ref[0:M2, :] + b2_ref[...]
    o_ref[...] = y.reshape(1, Ho, Wo, Cp).astype(o_ref.dtype)   # lane-dense store


def basic_block_forward(x_nchw, params, *, downsample=False, stride=1,
                        eps=1e-5, compute_dtype=jnp.bfloat16):
    """BasicBlock forward, NCHW in / NCHW out (matches the PyTorch module)."""
    if downsample:
        p2 = 0 if stride == 1 else 1
    else:
        p2 = 1

    N, Cin, H, W = x_nchw.shape
    Cout = params["conv1_w"].shape[0]
    Cinp = _round_up(Cin, LANE)
    Cp = _round_up(Cout, LANE)

    # --- fold BN into conv weights, pad channels, cast to bf16 (once) -------
    w1, b1 = _fold_bn_into_conv(params["conv1_w"], params["bn1_gamma"],
                                params["bn1_beta"], params["bn1_mean"],
                                params["bn1_var"], eps)
    w2, b2 = _fold_bn_into_conv(params["conv2_w"], params["bn2_gamma"],
                                params["bn2_beta"], params["bn2_mean"],
                                params["bn2_var"], eps)
    w1p = jnp.pad(w1, ((0, 0), (0, 0), (0, Cinp - Cin), (0, Cp - Cout))).astype(compute_dtype)
    w2p = jnp.pad(w2, ((0, 0), (0, 0), (0, Cp - Cout), (0, Cp - Cout))).astype(compute_dtype)
    b1p = jnp.pad(b1, (0, Cp - Cout)).reshape(1, Cp)
    b2p = jnp.pad(b2, (0, Cp - Cout)).reshape(1, Cp)

    # Only NCHW<->NHWC glue at the module boundary (one fused XLA op each way).
    x_nhwc = jnp.transpose(x_nchw, (0, 2, 3, 1))

    Hp2, Wp2 = H + 2 * p2, W + 2 * p2
    Ho = (Hp2 - 3) // stride + 1
    Wo = (Wp2 - 3) // stride + 1

    kernel = functools.partial(_basic_block_kernel, H=H, W=W, Cin=Cin, p2=p2,
                               stride=stride, Ho=Ho, Wo=Wo, cdtype=compute_dtype)

    # Explicit VMEM budget (v6e can go well past the 32 MiB scoped default).
    cb = jnp.dtype(compute_dtype).itemsize
    xb = jnp.dtype(x_nchw.dtype).itemsize
    est = 2 * (H * W * Cin * xb            # input block (double-buffered)
               + 9 * Cinp * Cp * cb        # w1 block
               + 9 * Cp * Cp * cb          # w2 block
               + 2 * Cp * 4                # bias blocks
               + Ho * Wo * Cp * xb)        # output block
    est += (H + 2) * (W + 2) * Cinp * cb   # padded-input scratch
    est += Hp2 * Wp2 * Cp * cb             # padded-intermediate scratch
    est += H * W * Cp * 4                  # f32 accumulator scratch
    vmem_limit = int(max(32 * 1024 * 1024, min(2 * est, 100 * 1024 * 1024)))

    y = pl.pallas_call(
        kernel,
        out_shape=jax.ShapeDtypeStruct((N, Ho, Wo, Cp), x_nchw.dtype),
        grid_spec=pltpu.PrefetchScalarGridSpec(
            num_scalar_prefetch=0,
            grid=(N,),
            in_specs=[
                pl.BlockSpec((1, H, W, Cin), lambda n: (n, 0, 0, 0)),
                pl.BlockSpec((3, 3, Cinp, Cp), lambda n: (0, 0, 0, 0)),
                pl.BlockSpec((1, Cp), lambda n: (0, 0)),
                pl.BlockSpec((3, 3, Cp, Cp), lambda n: (0, 0, 0, 0)),
                pl.BlockSpec((1, Cp), lambda n: (0, 0)),
            ],
            out_specs=pl.BlockSpec((1, Ho, Wo, Cp), lambda n: (n, 0, 0, 0)),
            scratch_shapes=[
                pltpu.VMEM((H + 2, W + 2, Cinp), compute_dtype),   # padded input
                pltpu.VMEM((Hp2, Wp2, Cp), compute_dtype),         # padded stage-1 act
                pltpu.VMEM((H * W, Cp), jnp.float32),              # f32 accumulator
            ]),
        compiler_params=pltpu.CompilerParams(
            dimension_semantics=("parallel",),     # batch feeds both TCs on v7x
            vmem_limit_bytes=vmem_limit),
    )(x_nhwc, w1p, b1p, w2p, b2p)

    # Strip channel padding + back to NCHW (single fused XLA op).
    return jnp.transpose(y[..., :Cout], (0, 3, 1, 2))


def init_basic_block_params(key, in_channels, out_channels):
    ks = jax.random.split(key, 8)
    p = {}
    p["conv1_w"] = 0.1 * jax.random.normal(ks[0], (out_channels, in_channels, 3, 3), jnp.float32)
    p["bn1_gamma"] = 1.0 + 0.1 * jax.random.normal(ks[1], (out_channels,), jnp.float32)
    p["bn1_beta"] = 0.1 * jax.random.normal(ks[2], (out_channels,), jnp.float32)
    p["bn1_mean"] = 0.1 * jax.random.normal(ks[3], (out_channels,), jnp.float32)
    p["bn1_var"] = 1.0 + 0.1 * jax.random.uniform(ks[3], (out_channels,), jnp.float32)
    p["conv2_w"] = 0.1 * jax.random.normal(ks[4], (out_channels, out_channels, 3, 3), jnp.float32)
    p["bn2_gamma"] = 1.0 + 0.1 * jax.random.normal(ks[5], (out_channels,), jnp.float32)
    p["bn2_beta"] = 0.1 * jax.random.normal(ks[6], (out_channels,), jnp.float32)
    p["bn2_mean"] = 0.1 * jax.random.normal(ks[7], (out_channels,), jnp.float32)
    p["bn2_var"] = 1.0 + 0.1 * jax.random.uniform(ks[7], (out_channels,), jnp.float32)
    return p


def _reference_forward(x_nchw, params, *, downsample=False, stride=1, eps=1e-5,
                       compute_dtype=jnp.bfloat16):
    """Pure-JAX (lax.conv) reference with the same folded weights / matmul dtype."""
    if downsample:
        p2 = 0 if stride == 1 else 1
    else:
        p2 = 1
    w1, b1 = _fold_bn_into_conv(params["conv1_w"], params["bn1_gamma"],
                                params["bn1_beta"], params["bn1_mean"],
                                params["bn1_var"], eps)
    w2, b2 = _fold_bn_into_conv(params["conv2_w"], params["bn2_gamma"],
                                params["bn2_beta"], params["bn2_mean"],
                                params["bn2_var"], eps)
    dn = ("NHWC", "HWIO", "NHWC")
    x = jnp.transpose(x_nchw, (0, 2, 3, 1)).astype(compute_dtype)
    h = jax.lax.conv_general_dilated(
        x, w1.astype(compute_dtype), (1, 1), [(1, 1), (1, 1)],
        dimension_numbers=dn, preferred_element_type=jnp.float32)
    h = jnp.maximum(h + b1, 0.0).astype(compute_dtype)
    y = jax.lax.conv_general_dilated(
        h, w2.astype(compute_dtype), (stride, stride), [(p2, p2), (p2, p2)],
        dimension_numbers=dn, preferred_element_type=jnp.float32)
    y = y + b2
    return jnp.transpose(y, (0, 3, 1, 2)).astype(x_nchw.dtype)


if __name__ == "__main__":
    key = jax.random.PRNGKey(0)
    k_x, k_p = jax.random.split(key)

    # BasicBlock(in_channels=4, out_channels=8, downsample=False, stride=1)
    in_channels, out_channels = 4, 8
    x = jax.random.normal(k_x, (2, in_channels, 16, 16), jnp.float32)
    params = init_basic_block_params(k_p, in_channels, out_channels)

    fwd = jax.jit(functools.partial(basic_block_forward, downsample=False, stride=1))
    out = jax.block_until_ready(fwd(x, params))

    # Reference 1: same folded weights + bf16 matmul operands (tight check).
    ref_matched = jax.block_until_ready(
        _reference_forward(x, params, downsample=False, stride=1,
                           compute_dtype=jnp.bfloat16))
    # Reference 2: full-f32 path (loose semantic check vs the PyTorch math).
    ref_f32 = jax.block_until_ready(
        _reference_forward(x, params, downsample=False, stride=1,
                           compute_dtype=jnp.float32))

    assert out.shape == ref_matched.shape == (2, out_channels, 16, 16)
    err_matched = float(jnp.max(jnp.abs(out - ref_matched)))
    err_f32 = float(jnp.max(jnp.abs(out - ref_f32)))
    assert err_matched < 2e-2, f"mismatch vs matched-precision reference: {err_matched}"
    assert err_f32 < 1.5e-1, f"mismatch vs f32 reference: {err_f32}"

    print("KERNEL_OK")
</pallas_src>

<mosaic_0001>
module attributes {stable_mosaic.version = 11 : i64} {
  func.func @_basic_block_kernel(%arg0: i32, %arg1: memref<1x16x16x4xf32, #tpu.memory_space<vmem>>, %arg2: memref<3x3x128x128xbf16, #tpu.memory_space<vmem>>, %arg3: memref<1x128xf32, #tpu.memory_space<vmem>>, %arg4: memref<3x3x128x128xbf16, #tpu.memory_space<vmem>>, %arg5: memref<1x128xf32, #tpu.memory_space<vmem>>, %arg6: memref<1x16x16x128xf32, #tpu.memory_space<vmem>>, %arg7: memref<18x18x128xbf16, #tpu.memory_space<vmem>>, %arg8: memref<18x18x128xbf16, #tpu.memory_space<vmem>>, %arg9: memref<256x128xf32, #tpu.memory_space<vmem>>) attributes {dimension_semantics = [#tpu.dimension_semantics<parallel>], iteration_bounds = array<i64: 2>, scalar_prefetch = 0 : i64, scratch_operands = 3 : i64, tpu.core_type = #tpu.core_type<tc>, window_params = [{transform_indices = @transform_0, window_bounds = array<i64: 1, 16, 16, 4>}, {pipeline_mode = #tpu.pipeline_mode<synchronous>, transform_indices = @transform_1, window_bounds = array<i64: 3, 3, 128, 128>}, {pipeline_mode = #tpu.pipeline_mode<synchronous>, transform_indices = @transform_2, window_bounds = array<i64: 1, 128>}, {pipeline_mode = #tpu.pipeline_mode<synchronous>, transform_indices = @transform_3, window_bounds = array<i64: 3, 3, 128, 128>}, {pipeline_mode = #tpu.pipeline_mode<synchronous>, transform_indices = @transform_4, window_bounds = array<i64: 1, 128>}, {transform_indices = @transform_5, window_bounds = array<i64: 1, 16, 16, 128>}]} {
    %cst = arith.constant 0.000000e+00 : bf16
    %0 = vector.broadcast %cst : bf16 to vector<18x18x128xbf16>
    %c0 = arith.constant 0 : index
    %c0_0 = arith.constant 0 : index
    %c0_1 = arith.constant 0 : index
    %1 = vector.load %arg7[%c0, %c0_0, %c0_1] : memref<18x18x128xbf16, #tpu.memory_space<vmem>>, vector<18x18x128xbf16>
    tpu.vector_store %arg7[%c0, %c0_0, %c0_1], %0 {strides = array<i32>} : memref<18x18x128xbf16, #tpu.memory_space<vmem>>, vector<18x18x128xbf16>,
    %cst_2 = arith.constant 0.000000e+00 : bf16
    %2 = vector.broadcast %cst_2 : bf16 to vector<18x18x128xbf16>
    %c0_3 = arith.constant 0 : index
    %c0_4 = arith.constant 0 : index
    %c0_5 = arith.constant 0 : index
    %3 = vector.load %arg8[%c0_3, %c0_4, %c0_5] : memref<18x18x128xbf16, #tpu.memory_space<vmem>>, vector<18x18x128xbf16>
    tpu.vector_store %arg8[%c0_3, %c0_4, %c0_5], %2 {strides = array<i32>} : memref<18x18x128xbf16, #tpu.memory_space<vmem>>, vector<18x18x128xbf16>,
    %c0_6 = arith.constant 0 : index
    %c0_7 = arith.constant 0 : index
    %c0_8 = arith.constant 0 : index
    %c0_9 = arith.constant 0 : index
    %4 = vector.load %arg1[%c0_6, %c0_7, %c0_8, %c0_9] : memref<1x16x16x4xf32, #tpu.memory_space<vmem>>, vector<1x16x16x4xf32>
    %5 = vector.shape_cast %4 : vector<1x16x16x4xf32> to vector<16x16x4xf32>
    %6 = arith.truncf %5 : vector<16x16x4xf32> to vector<16x16x4xbf16>
    %c1 = arith.constant 1 : index
    %c1_10 = arith.constant 1 : index
    %c0_11 = arith.constant 0 : index
    %7 = vector.load %arg7[%c1, %c1_10, %c0_11] : memref<18x18x128xbf16, #tpu.memory_space<vmem>>, vector<16x16x4xbf16>
    tpu.vector_store %arg7[%c1, %c1_10, %c0_11], %6 {strides = array<i32>} : memref<18x18x128xbf16, #tpu.memory_space<vmem>>, vector<16x16x4xbf16>,
    %c0_12 = arith.constant 0 : index
    %c0_13 = arith.constant 0 : index
    %c0_14 = arith.constant 0 : index
    %8 = vector.load %arg7[%c0_12, %c0_13, %c0_14] : memref<18x18x128xbf16, #tpu.memory_space<vmem>>, vector<16x16x128xbf16>
    %9 = vector.shape_cast %8 : vector<16x16x128xbf16> to vector<256x128xbf16>
    %c0_15 = arith.constant 0 : index
    %c0_16 = arith.constant 0 : index
    %c0_17 = arith.constant 0 : index
    %c0_18 = arith.constant 0 : index
    %10 = vector.load %arg2[%c0_15, %c0_16, %c0_17, %c0_18] : memref<3x3x128x128xbf16, #tpu.memory_space<vmem>>, vector<1x1x128x128xbf16>
    %11 = vector.shape_cast %10 : vector<1x1x128x128xbf16> to vector<128x128xbf16>
    %cst_19 = arith.constant dense<0.000000e+00> : vector<256x128xf32>
    %12 = tpu.matmul %9, %11, %cst_19 {dimension_numbers = #tpu.dot_dimension_numbers<[1], [0], [0], [1], [0, 0, 1, 1], [], []>} : vector<256x128xbf16>, vector<128x128xbf16>, vector<256x128xf32> -> vector<256x128xf32>
    %c0_20 = arith.constant 0 : index
    %c0_21 = arith.constant 0 : index
    %13 = vector.load %arg9[%c0_20, %c0_21] : memref<256x128xf32, #tpu.memory_space<vmem>>, vector<256x128xf32>
    tpu.vector_store %arg9[%c0_20, %c0_21], %12 {strides = array<i32>} : memref<256x128xf32, #tpu.memory_space<vmem>>, vector<256x128xf32>,
    %c0_22 = arith.constant 0 : index
    %c1_23 = arith.constant 1 : index
    %c0_24 = arith.constant 0 : index
    %14 = vector.load %arg7[%c0_22, %c1_23, %c0_24] : memref<18x18x128xbf16, #tpu.memory_space<vmem>>, vector<16x16x128xbf16>
    %15 = vector.shape_cast %14 : vector<16x16x128xbf16> to vector<256x128xbf16>
    %c0_25 = arith.constant 0 : index
    %c1_26 = arith.constant 1 : index
    %c0_27 = arith.constant 0 : index
    %c0_28 = arith.constant 0 : index
    %16 = vector.load %arg2[%c0_25, %c1_26, %c0_27, %c0_28] : memref<3x3x128x128xbf16, #tpu.memory_space<vmem>>, vector<1x1x128x128xbf16>
    %17 = vector.shape_cast %16 : vector<1x1x128x128xbf16> to vector<128x128xbf16>
    %cst_29 = arith.constant dense<0.000000e+00> : vector<256x128xf32>
    %18 = tpu.matmul %15, %17, %cst_29 {dimension_numbers = #tpu.dot_dimension_numbers<[1], [0], [0], [1], [0, 0, 1, 1], [], []>} : vector<256x128xbf16>, vector<128x128xbf16>, vector<256x128xf32> -> vector<256x128xf32>
    %c0_30 = arith.constant 0 : index
    %c0_31 = arith.constant 0 : index
    %19 = vector.load %arg9[%c0_30, %c0_31] : memref<256x128xf32, #tpu.memory_space<vmem>>, vector<256x128xf32>
    %20 = arith.addf %19, %18 : vector<256x128xf32>
    %c0_32 = arith.constant 0 : index
    %c0_33 = arith.constant 0 : index
    %21 = vector.load %arg9[%c0_32, %c0_33] : memref<256x128xf32, #tpu.memory_space<vmem>>, vector<256x128xf32>
    tpu.vector_store %arg9[%c0_32, %c0_33], %20 {strides = array<i32>} : memref<256x128xf32, #tpu.memory_space<vmem>>, vector<256x128xf32>,
    %c0_34 = arith.constant 0 : index
    %c2 = arith.constant 2 : index
    %c0_35 = arith.constant 0 : index
    %22 = vector.load %arg7[%c0_34, %c2, %c0_35] : memref<18x18x128xbf16, #tpu.memory_space<vmem>>, vector<16x16x128xbf16>
    %23 = vector.shape_cast %22 : vector<16x16x128xbf16> to vector<256x128xbf16>
    %c0_36 = arith.constant 0 : index
    %c2_37 = arith.constant 2 : index
    %c0_38 = arith.constant 0 : index
    %c0_39 = arith.constant 0 : index
    %24 = vector.load %arg2[%c0_36, %c2_37, %c0_38, %c0_39] : memref<3x3x128x128xbf16, #tpu.memory_space<vmem>>, vector<1x1x128x128xbf16>
    %25 = vector.shape_cast %24 : vector<1x1x128x128xbf16> to vector<128x128xbf16>
    %cst_40 = arith.constant dense<0.000000e+00> : vector<256x128xf32>
    %26 = tpu.matmul %23, %25, %cst_40 {dimension_numbers = #tpu.dot_dimension_numbers<[1], [0], [0], [1], [0, 0, 1, 1], [], []>} : vector<256x128xbf16>, vector<128x128xbf16>, vector<256x128xf32> -> vector<256x128xf32>
    %c0_41 = arith.constant 0 : index
    %c0_42 = arith.constant 0 : index
    %27 = vector.load %arg9[%c0_41, %c0_42] : memref<256x128xf32, #tpu.memory_space<vmem>>, vector<256x128xf32>
    %28 = arith.addf %27, %26 : vector<256x128xf32>
    %c0_43 = arith.constant 0 : index
    %c0_44 = arith.constant 0 : index
    %29 = vector.load %arg9[%c0_43, %c0_44] : memref<256x128xf32, #tpu.memory_space<vmem>>, vector<256x128xf32>
    tpu.vector_store %arg9[%c0_43, %c0_44], %28 {strides = array<i32>} : memref<256x128xf32, #tpu.memory_space<vmem>>, vector<256x128xf32>,
    %c1_45 = arith.constant 1 : index
    %c0_46 = arith.constant 0 : index
    %c0_47 = arith.constant 0 : index
    %30 = vector.load %arg7[%c1_45, %c0_46, %c0_47] : memref<18x18x128xbf16, #tpu.memory_space<vmem>>, vector<16x16x128xbf16>
    %31 = vector.shape_cast %30 : vector<16x16x128xbf16> to vector<256x128xbf16>
    %c1_48 = arith.constant 1 : index
    %c0_49 = arith.constant 0 : index
    %c0_50 = arith.constant 0 : index
    %c0_51 = arith.constant 0 : index
    %32 = vector.load %arg2[%c1_48, %c0_49, %c0_50, %c0_51] : memref<3x3x128x128xbf16, #tpu.memory_space<vmem>>, vector<1x1x128x128xbf16>
    %33 = vector.shape_cast %32 : vector<1x1x128x128xbf16> to vector<128x128xbf16>
    %cst_52 = arith.constant dense<0.000000e+00> : vector<256x128xf32>
    %34 = tpu.matmul %31, %33, %cst_52 {dimension_numbers = #tpu.dot_dimension_numbers<[1], [0], [0], [1], [0, 0, 1, 1], [], []>} : vector<256x128xbf16>, vector<128x128xbf16>, vector<256x128xf32> -> vector<256x128xf32>
    %c0_53 = arith.constant 0 : index
    %c0_54 = arith.constant 0 : index
    %35 = vector.load %arg9[%c0_53, %c0_54] : memref<256x128xf32, #tpu.memory_space<vmem>>, vector<256x128xf32>
    %36 = arith.addf %35, %34 : vector<256x128xf32>
    %c0_55 = arith.constant 0 : index
    %c0_56 = arith.constant 0 : index
    %37 = vector.load %arg9[%c0_55, %c0_56] : memref<256x128xf32, #tpu.memory_space<vmem>>, vector<256x128xf32>
    tpu.vector_store %arg9[%c0_55, %c0_56], %36 {strides = array<i32>} : memref<256x128xf32, #tpu.memory_space<vmem>>, vector<256x128xf32>,
    %c1_57 = arith.constant 1 : index
    %c1_58 = arith.constant 1 : index
    %c0_59 = arith.constant 0 : index
    %38 = vector.load %arg7[%c1_57, %c1_58, %c0_59] : memref<18x18x128xbf16, #tpu.memory_space<vmem>>, vector<16x16x128xbf16>
    %39 = vector.shape_cast %38 : vector<16x16x128xbf16> to vector<256x128xbf16>
    %c1_60 = arith.constant 1 : index
    %c1_61 = arith.constant 1 : index
    %c0_62 = arith.constant 0 : index
    %c0_63 = arith.constant 0 : index
    %40 = vector.load %arg2[%c1_60, %c1_61, %c0_62, %c0_63] : memref<3x3x128x128xbf16, #tpu.memory_space<vmem>>, vector<1x1x128x128xbf16>
    %41 = vector.shape_cast %40 : vector<1x1x128x128xbf16> to vector<128x128xbf16>
    %cst_64 = arith.constant dense<0.000000e+00> : vector<256x128xf32>
    %42 = tpu.matmul %39, %41, %cst_64 {dimension_numbers = #tpu.dot_dimension_numbers<[1], [0], [0], [1], [0, 0, 1, 1], [], []>} : vector<256x128xbf16>, vector<128x128xbf16>, vector<256x128xf32> -> vector<256x128xf32>
    %c0_65 = arith.constant 0 : index
    %c0_66 = arith.constant 0 : index
    %43 = vector.load %arg9[%c0_65, %c0_66] : memref<256x128xf32, #tpu.memory_space<vmem>>, vector<256x128xf32>
    %44 = arith.addf %43, %42 : vector<256x128xf32>
    %c0_67 = arith.constant 0 : index
    %c0_68 = arith.constant 0 : index
    %45 = vector.load %arg9[%c0_67, %c0_68] : memref<256x128xf32, #tpu.memory_space<vmem>>, vector<256x128xf32>
    tpu.vector_store %arg9[%c0_67, %c0_68], %44 {strides = array<i32>} : memref<256x128xf32, #tpu.memory_space<vmem>>, vector<256x128xf32>,
    %c1_69 = arith.constant 1 : index
    %c2_70 = arith.constant 2 : index
    %c0_71 = arith.constant 0 : index
    %46 = vector.load %arg7[%c1_69, %c2_70, %c0_71] : memref<18x18x128xbf16, #tpu.memory_space<vmem>>, vector<16x16x128xbf16>
    %47 = vector.shape_cast %46 : vector<16x16x128xbf16> to vector<256x128xbf16>
    %c1_72 = arith.constant 1 : index
    %c2_73 = arith.constant 2 : index
    %c0_74 = arith.constant 0 : index
    %c0_75 = arith.constant 0 : index
    %48 = vector.load %arg2[%c1_72, %c2_73, %c0_74, %c0_75] : memref<3x3x128x128xbf16, #tpu.memory_space<vmem>>, vector<1x1x128x128xbf16>
    %49 = vector.shape_cast %48 : vector<1x1x128x128xbf16> to vector<128x128xbf16>
    %cst_76 = arith.constant dense<0.000000e+00> : vector<256x128xf32>
    %50 = tpu.matmul %47, %49, %cst_76 {dimension_numbers = #tpu.dot_dimension_numbers<[1], [0], [0], [1], [0, 0, 1, 1], [], []>} : vector<256x128xbf16>, vector<128x128xbf16>, vector<256x128xf32> -> vector<256x128xf32>
    %c0_77 = arith.constant 0 : index
    %c0_78 = arith.constant 0 : index
    %51 = vector.load %arg9[%c0_77, %c0_78] : memref<256x128xf32, #tpu.memory_space<vmem>>, vector<256x128xf32>
    %52 = arith.addf %51, %50 : vector<256x128xf32>
    %c0_79 = arith.constant 0 : index
    %c0_80 = arith.constant 0 : index
    %53 = vector.load %arg9[%c0_79, %c0_80] : memref<256x128xf32, #tpu.memory_space<vmem>>, vector<256x128xf32>
    tpu.vector_store %arg9[%c0_79, %c0_80], %52 {strides = array<i32>} : memref<256x128xf32, #tpu.memory_space<vmem>>, vector<256x128xf32>,
    %c2_81 = arith.constant 2 : index
    %c0_82 = arith.constant 0 : index
    %c0_83 = arith.constant 0 : index
    %54 = vector.load %arg7[%c2_81, %c0_82, %c0_83] : memref<18x18x128xbf16, #tpu.memory_space<vmem>>, vector<16x16x128xbf16>
    %55 = vector.shape_cast %54 : vector<16x16x128xbf16> to vector<256x128xbf16>
    %c2_84 = arith.constant 2 : index
    %c0_85 = arith.constant 0 : index
    %c0_86 = arith.constant 0 : index
    %c0_87 = arith.constant 0 : index
    %56 = vector.load %arg2[%c2_84, %c0_85, %c0_86, %c0_87] : memref<3x3x128x128xbf16, #tpu.memory_space<vmem>>, vector<1x1x128x128xbf16>
    %57 = vector.shape_cast %56 : vector<1x1x128x128xbf16> to vector<128x128xbf16>
    %cst_88 = arith.constant dense<0.000000e+00> : vector<256x128xf32>
    %58 = tpu.matmul %55, %57, %cst_88 {dimension_numbers = #tpu.dot_dimension_numbers<[1], [0], [0], [1], [0, 0, 1, 1], [], []>} : vector<256x128xbf16>, vector<128x128xbf16>, vector<256x128xf32> -> vector<256x128xf32>
    %c0_89 = arith.constant 0 : index
    %c0_90 = arith.constant 0 : index
    %59 = vector.load %arg9[%c0_89, %c0_90] : memref<256x128xf32, #tpu.memory_space<vmem>>, vector<256x128xf32>
    %60 = arith.addf %59, %58 : vector<256x128xf32>
    %c0_91 = arith.constant 0 : index
    %c0_92 = arith.constant 0 : index
    %61 = vector.load %arg9[%c0_91, %c0_92] : memref<256x128xf32, #tpu.memory_space<vmem>>, vector<256x128xf32>
    tpu.vector_store %arg9[%c0_91, %c0_92], %60 {strides = array<i32>} : memref<256x128xf32, #tpu.memory_space<vmem>>, vector<256x128xf32>,
    %c2_93 = arith.constant 2 : index
    %c1_94 = arith.constant 1 : index
    %c0_95 = arith.constant 0 : index
    %62 = vector.load %arg7[%c2_93, %c1_94, %c0_95] : memref<18x18x128xbf16, #tpu.memory_space<vmem>>, vector<16x16x128xbf16>
    %63 = vector.shape_cast %62 : vector<16x16x128xbf16> to vector<256x128xbf16>
    %c2_96 = arith.constant 2 : index
    %c1_97 = arith.constant 1 : index
    %c0_98 = arith.constant 0 : index
    %c0_99 = arith.constant 0 : index
    %64 = vector.load %arg2[%c2_96, %c1_97, %c0_98, %c0_99] : memref<3x3x128x128xbf16, #tpu.memory_space<vmem>>, vector<1x1x128x128xbf16>
    %65 = vector.shape_cast %64 : vector<1x1x128x128xbf16> to vector<128x128xbf16>
    %cst_100 = arith.constant dense<0.000000e+00> : vector<256x128xf32>
    %66 = tpu.matmul %63, %65, %cst_100 {dimension_numbers = #tpu.dot_dimension_numbers<[1], [0], [0], [1], [0, 0, 1, 1], [], []>} : vector<256x128xbf16>, vector<128x128xbf16>, vector<256x128xf32> -> vector<256x128xf32>
    %c0_101 = arith.constant 0 : index
    %c0_102 = arith.constant 0 : index
    %67 = vector.load %arg9[%c0_101, %c0_102] : memref<256x128xf32, #tpu.memory_space<vmem>>, vector<256x128xf32>
    %68 = arith.addf %67, %66 : vector<256x128xf32>
    %c0_103 = arith.constant 0 : index
    %c0_104 = arith.constant 0 : index
    %69 = vector.load %arg9[%c0_103, %c0_104] : memref<256x128xf32, #tpu.memory_space<vmem>>, vector<256x128xf32>
    tpu.vector_store %arg9[%c0_103, %c0_104], %68 {strides = array<i32>} : memref<256x128xf32, #tpu.memory_space<vmem>>, vector<256x128xf32>,
    %c2_105 = arith.constant 2 : index
    %c2_106 = arith.constant 2 : index
    %c0_107 = arith.constant 0 : index
    %70 = vector.load %arg7[%c2_105, %c2_106, %c0_107] : memref<18x18x128xbf16, #tpu.memory_space<vmem>>, vector<16x16x128xbf16>
    %71 = vector.shape_cast %70 : vector<16x16x128xbf16> to vector<256x128xbf16>
    %c2_108 = arith.constant 2 : index
    %c2_109 = arith.constant 2 : index
    %c0_110 = arith.constant 0 : index
    %c0_111 = arith.constant 0 : index
    %72 = vector.load %arg2[%c2_108, %c2_109, %c0_110, %c0_111] : memref<3x3x128x128xbf16, #tpu.memory_space<vmem>>, vector<1x1x128x128xbf16>
    %73 = vector.shape_cast %72 : vector<1x1x128x128xbf16> to vector<128x128xbf16>
    %cst_112 = arith.constant dense<0.000000e+00> : vector<256x128xf32>
    %74 = tpu.matmul %71, %73, %cst_112 {dimension_numbers = #tpu.dot_dimension_numbers<[1], [0], [0], [1], [0, 0, 1, 1], [], []>} : vector<256x128xbf16>, vector<128x128xbf16>, vector<256x128xf32> -> vector<256x128xf32>
    %c0_113 = arith.constant 0 : index
    %c0_114 = arith.constant 0 : index
    %75 = vector.load %arg9[%c0_113, %c0_114] : memref<256x128xf32, #tpu.memory_space<vmem>>, vector<256x128xf32>
    %76 = arith.addf %75, %74 : vector<256x128xf32>
    %c0_115 = arith.constant 0 : index
    %c0_116 = arith.constant 0 : index
    %77 = vector.load %arg9[%c0_115, %c0_116] : memref<256x128xf32, #tpu.memory_space<vmem>>, vector<256x128xf32>
    tpu.vector_store %arg9[%c0_115, %c0_116], %76 {strides = array<i32>} : memref<256x128xf32, #tpu.memory_space<vmem>>, vector<256x128xf32>,
    %c0_117 = arith.constant 0 : index
    %c0_118 = arith.constant 0 : index
    %78 = vector.load %arg9[%c0_117, %c0_118] : memref<256x128xf32, #tpu.memory_space<vmem>>, vector<256x128xf32>
    %c0_119 = arith.constant 0 : index
    %c0_120 = arith.constant 0 : index
    %79 = vector.load %arg3[%c0_119, %c0_120] : memref<1x128xf32, #tpu.memory_space<vmem>>, vector<1x128xf32>
    %80 = vector.broadcast %79 : vector<1x128xf32> to vector<256x128xf32>
    %81 = arith.addf %78, %80 : vector<256x128xf32>
    %cst_121 = arith.constant 0.000000e+00 : f32
    %82 = vector.broadcast %cst_121 : f32 to vector<256x128xf32>
    %83 = arith.maximumf %81, %82 : vector<256x128xf32>
    %84 = arith.truncf %83 : vector<256x128xf32> to vector<256x128xbf16>
    %85 = vector.shape_cast %84 : vector<256x128xbf16> to vector<16x16x128xbf16>
    %c1_122 = arith.constant 1 : index
    %c1_123 = arith.constant 1 : index
    %c0_124 = arith.constant 0 : index
    %86 = vector.load %arg8[%c1_122, %c1_123, %c0_124] : memref<18x18x128xbf16, #tpu.memory_space<vmem>>, vector<16x16x128xbf16>
    tpu.vector_store %arg8[%c1_122, %c1_123, %c0_124], %85 {strides = array<i32>} : memref<18x18x128xbf16, #tpu.memory_space<vmem>>, vector<16x16x128xbf16>,
    %c0_125 = arith.constant 0 : index
    %c0_126 = arith.constant 0 : index
    %c0_127 = arith.constant 0 : index
    %87 = vector.load %arg8[%c0_125, %c0_126, %c0_127] : memref<18x18x128xbf16, #tpu.memory_space<vmem>>, vector<16x16x128xbf16>
    %88 = vector.shape_cast %87 : vector<16x16x128xbf16> to vector<256x128xbf16>
    %c0_128 = arith.constant 0 : index
    %c0_129 = arith.constant 0 : index
    %c0_130 = arith.constant 0 : index
    %c0_131 = arith.constant 0 : index
    %89 = vector.load %arg4[%c0_128, %c0_129, %c0_130, %c0_131] : memref<3x3x128x128xbf16, #tpu.memory_space<vmem>>, vector<1x1x128x128xbf16>
    %90 = vector.shape_cast %89 : vector<1x1x128x128xbf16> to vector<128x128xbf16>
    %cst_132 = arith.constant dense<0.000000e+00> : vector<256x128xf32>
    %91 = tpu.matmul %88, %90, %cst_132 {dimension_numbers = #tpu.dot_dimension_numbers<[1], [0], [0], [1], [0, 0, 1, 1], [], []>} : vector<256x128xbf16>, vector<128x128xbf16>, vector<256x128xf32> -> vector<256x128xf32>
    %c0_133 = arith.constant 0 : index
    %c0_134 = arith.constant 0 : index
    %92 = vector.load %arg9[%c0_133, %c0_134] : memref<256x128xf32, #tpu.memory_space<vmem>>, vector<256x128xf32>
    tpu.vector_store %arg9[%c0_133, %c0_134], %91 {strides = array<i32>} : memref<256x128xf32, #tpu.memory_space<vmem>>, vector<256x128xf32>,
    %c0_135 = arith.constant 0 : index
    %c1_136 = arith.constant 1 : index
    %c0_137 = arith.constant 0 : index
    %93 = vector.load %arg8[%c0_135, %c1_136, %c0_137] : memref<18x18x128xbf16, #tpu.memory_space<vmem>>, vector<16x16x128xbf16>
    %94 = vector.shape_cast %93 : vector<16x16x128xbf16> to vector<256x128xbf16>
    %c0_138 = arith.constant 0 : index
    %c1_139 = arith.constant 1 : index
    %c0_140 = arith.constant 0 : index
    %c0_141 = arith.constant 0 : index
    %95 = vector.load %arg4[%c0_138, %c1_139, %c0_140, %c0_141] : memref<3x3x128x128xbf16, #tpu.memory_space<vmem>>, vector<1x1x128x128xbf16>
    %96 = vector.shape_cast %95 : vector<1x1x128x128xbf16> to vector<128x128xbf16>
    %cst_142 = arith.constant dense<0.000000e+00> : vector<256x128xf32>
    %97 = tpu.matmul %94, %96, %cst_142 {dimension_numbers = #tpu.dot_dimension_numbers<[1], [0], [0], [1], [0, 0, 1, 1], [], []>} : vector<256x128xbf16>, vector<128x128xbf16>, vector<256x128xf32> -> vector<256x128xf32>
    %c0_143 = arith.constant 0 : index
    %c0_144 = arith.constant 0 : index
    %98 = vector.load %arg9[%c0_143, %c0_144] : memref<256x128xf32, #tpu.memory_space<vmem>>, vector<256x128xf32>
    %99 = arith.addf %98, %97 : vector<256x128xf32>
    %c0_145 = arith.constant 0 : index
    %c0_146 = arith.constant 0 : index
    %100 = vector.load %arg9[%c0_145, %c0_146] : memref<256x128xf32, #tpu.memory_space<vmem>>, vector<256x128xf32>
    tpu.vector_store %arg9[%c0_145, %c0_146], %99 {strides = array<i32>} : memref<256x128xf32, #tpu.memory_space<vmem>>, vector<256x128xf32>,
    %c0_147 = arith.constant 0 : index
    %c2_148 = arith.constant 2 : index
    %c0_149 = arith.constant 0 : index
    %101 = vector.load %arg8[%c0_147, %c2_148, %c0_149] : memref<18x18x128xbf16, #tpu.memory_space<vmem>>, vector<16x16x128xbf16>
    %102 = vector.shape_cast %101 : vector<16x16x128xbf16> to vector<256x128xbf16>
    %c0_150 = arith.constant 0 : index
    %c2_151 = arith.constant 2 : index
    %c0_152 = arith.constant 0 : index
    %c0_153 = arith.constant 0 : index
    %103 = vector.load %arg4[%c0_150, %c2_151, %c0_152, %c0_153] : memref<3x3x128x128xbf16, #tpu.memory_space<vmem>>, vector<1x1x128x128xbf16>
    %104 = vector.shape_cast %103 : vector<1x1x128x128xbf16> to vector<128x128xbf16>
    %cst_154 = arith.constant dense<0.000000e+00> : vector<256x128xf32>
    %105 = tpu.matmul %102, %104, %cst_154 {dimension_numbers = #tpu.dot_dimension_numbers<[1], [0], [0], [1], [0, 0, 1, 1], [], []>} : vector<256x128xbf16>, vector<128x128xbf16>, vector<256x128xf32> -> vector<256x128xf32>
    %c0_155 = arith.constant 0 : index
    %c0_156 = arith.constant 0 : index
    %106 = vector.load %arg9[%c0_155, %c0_156] : memref<256x128xf32, #tpu.memory_space<vmem>>, vector<256x128xf32>
    %107 = arith.addf %106, %105 : vector<256x128xf32>
    %c0_157 = arith.constant 0 : index
    %c0_158 = arith.constant 0 : index
    %108 = vector.load %arg9[%c0_157, %c0_158] : memref<256x128xf32, #tpu.memory_space<vmem>>, vector<256x128xf32>
    tpu.vector_store %arg9[%c0_157, %c0_158], %107 {strides = array<i32>} : memref<256x128xf32, #tpu.memory_space<vmem>>, vector<256x128xf32>,
    %c1_159 = arith.constant 1 : index
    %c0_160 = arith.constant 0 : index
    %c0_161 = arith.constant 0 : index
    %109 = vector.load %arg8[%c1_159, %c0_160, %c0_161] : memref<18x18x128xbf16, #tpu.memory_space<vmem>>, vector<16x16x128xbf16>
    %110 = vector.shape_cast %109 : vector<16x16x128xbf16> to vector<256x128xbf16>
    %c1_162 = arith.constant 1 : index
    %c0_163 = arith.constant 0 : index
    %c0_164 = arith.constant 0 : index
    %c0_165 = arith.constant 0 : index
    %111 = vector.load %arg4[%c1_162, %c0_163, %c0_164, %c0_165] : memref<3x3x128x128xbf16, #tpu.memory_space<vmem>>, vector<1x1x128x128xbf16>
    %112 = vector.shape_cast %111 : vector<1x1x128x128xbf16> to vector<128x128xbf16>
    %cst_166 = arith.constant dense<0.000000e+00> : vector<256x128xf32>
    %113 = tpu.matmul %110, %112, %cst_166 {dimension_numbers = #tpu.dot_dimension_numbers<[1], [0], [0], [1], [0, 0, 1, 1], [], []>} : vector<256x128xbf16>, vector<128x128xbf16>, vector<256x128xf32> -> vector<256x128xf32>
    %c0_167 = arith.constant 0 : index
    %c0_168 = arith.constant 0 : index
    %114 = vector.load %arg9[%c0_167, %c0_168] : memref<256x128xf32, #tpu.memory_space<vmem>>, vector<256x128xf32>
    %115 = arith.addf %114, %113 : vector<256x128xf32>
    %c0_169 = arith.constant 0 : index
    %c0_170 = arith.constant 0 : index
    %116 = vector.load %arg9[%c0_169, %c0_170] : memref<256x128xf32, #tpu.memory_space<vmem>>, vector<256x128xf32>
    tpu.vector_store %arg9[%c0_169, %c0_170], %115 {strides = array<i32>} : memref<256x128xf32, #tpu.memory_space<vmem>>, vector<256x128xf32>,
    %c1_171 = arith.constant 1 : index
    %c1_172 = arith.constant 1 : index
    %c0_173 = arith.constant 0 : index
    %117 = vector.load %arg8[%c1_171, %c1_172, %c0_173] : memref<18x18x128xbf16, #tpu.memory_space<vmem>>, vector<16x16x128xbf16>
    %118 = vector.shape_cast %117 : vector<16x16x128xbf16> to vector<256x128xbf16>
    %c1_174 = arith.constant 1 : index
    %c1_175 = arith.constant 1 : index
    %c0_176 = arith.constant 0 : index
    %c0_177 = arith.constant 0 : index
    %119 = vector.load %arg4[%c1_174, %c1_175, %c0_176, %c0_177] : memref<3x3x128x128xbf16, #tpu.memory_space<vmem>>, vector<1x1x128x128xbf16>
    %120 = vector.shape_cast %119 : vector<1x1x128x128xbf16> to vector<128x128xbf16>
    %cst_178 = arith.constant dense<0.000000e+00> : vector<256x128xf32>
    %121 = tpu.matmul %118, %120, %cst_178 {dimension_numbers = #tpu.dot_dimension_numbers<[1], [0], [0], [1], [0, 0, 1, 1], [], []>} : vector<256x128xbf16>, vector<128x128xbf16>, vector<256x128xf32> -> vector<256x128xf32>
    %c0_179 = arith.constant 0 : index
    %c0_180 = arith.constant 0 : index
    %122 = vector.load %arg9[%c0_179, %c0_180] : memref<256x128xf32, #tpu.memory_space<vmem>>, vector<256x128xf32>
    %123 = arith.addf %122, %121 : vector<256x128xf32>
    %c0_181 = arith.constant 0 : index
    %c0_182 = arith.constant 0 : index
    %124 = vector.load %arg9[%c0_181, %c0_182] : memref<256x128xf32, #tpu.memory_space<vmem>>, vector<256x128xf32>
    tpu.vector_store %arg9[%c0_181, %c0_182], %123 {strides = array<i32>} : memref<256x128xf32, #tpu.memory_space<vmem>>, vector<256x128xf32>,
    %c1_183 = arith.constant 1 : index
    %c2_184 = arith.constant 2 : index
    %c0_185 = arith.constant 0 : index
    %125 = vector.load %arg8[%c1_183, %c2_184, %c0_185] : memref<18x18x128xbf16, #tpu.memory_space<vmem>>, vector<16x16x128xbf16>
    %126 = vector.shape_cast %125 : vector<16x16x128xbf16> to vector<256x128xbf16>
    %c1_186 = arith.constant 1 : index
    %c2_187 = arith.constant 2 : index
    %c0_188 = arith.constant 0 : index
    %c0_189 = arith.constant 0 : index
    %127 = vector.load %arg4[%c1_186, %c2_187, %c0_188, %c0_189] : memref<3x3x128x128xbf16, #tpu.memory_space<vmem>>, vector<1x1x128x128xbf16>
    %128 = vector.shape_cast %127 : vector<1x1x128x128xbf16> to vector<128x128xbf16>
    %cst_190 = arith.constant dense<0.000000e+00> : vector<256x128xf32>
    %129 = tpu.matmul %126, %128, %cst_190 {dimension_numbers = #tpu.dot_dimension_numbers<[1], [0], [0], [1], [0, 0, 1, 1], [], []>} : vector<256x128xbf16>, vector<128x128xbf16>, vector<256x128xf32> -> vector<256x128xf32>
    %c0_191 = arith.constant 0 : index
    %c0_192 = arith.constant 0 : index
    %130 = vector.load %arg9[%c0_191, %c0_192] : memref<256x128xf32, #tpu.memory_space<vmem>>, vector<256x128xf32>
    %131 = arith.addf %130, %129 : vector<256x128xf32>
    %c0_193 = arith.constant 0 : index
    %c0_194 = arith.constant 0 : index
    %132 = vector.load %arg9[%c0_193, %c0_194] : memref<256x128xf32, #tpu.memory_space<vmem>>, vector<256x128xf32>
    tpu.vector_store %arg9[%c0_193, %c0_194], %131 {strides = array<i32>} : memref<256x128xf32, #tpu.memory_space<vmem>>, vector<256x128xf32>,
    %c2_195 = arith.constant 2 : index
    %c0_196 = arith.constant 0 : index
    %c0_197 = arith.constant 0 : index
    %133 = vector.load %arg8[%c2_195, %c0_196, %c0_197] : memref<18x18x128xbf16, #tpu.memory_space<vmem>>, vector<16x16x128xbf16>
    %134 = vector.shape_cast %133 : vector<16x16x128xbf16> to vector<256x128xbf16>
    %c2_198 = arith.constant 2 : index
    %c0_199 = arith.constant 0 : index
    %c0_200 = arith.constant 0 : index
    %c0_201 = arith.constant 0 : index
    %135 = vector.load %arg4[%c2_198, %c0_199, %c0_200, %c0_201] : memref<3x3x128x128xbf16, #tpu.memory_space<vmem>>, vector<1x1x128x128xbf16>
    %136 = vector.shape_cast %135 : vector<1x1x128x128xbf16> to vector<128x128xbf16>
    %cst_202 = arith.constant dense<0.000000e+00> : vector<256x128xf32>
    %137 = tpu.matmul %134, %136, %cst_202 {dimension_numbers = #tpu.dot_dimension_numbers<[1], [0], [0], [1], [0, 0, 1, 1], [], []>} : vector<256x128xbf16>, vector<128x128xbf16>, vector<256x128xf32> -> vector<256x128xf32>
    %c0_203 = arith.constant 0 : index
    %c0_204 = arith.constant 0 : index
    %138 = vector.load %arg9[%c0_203, %c0_204] : memref<256x128xf32, #tpu.memory_space<vmem>>, vector<256x128xf32>
    %139 = arith.addf %138, %137 : vector<256x128xf32>
    %c0_205 = arith.constant 0 : index
    %c0_206 = arith.constant 0 : index
    %140 = vector.load %arg9[%c0_205, %c0_206] : memref<256x128xf32, #tpu.memory_space<vmem>>, vector<256x128xf32>
    tpu.vector_store %arg9[%c0_205, %c0_206], %139 {strides = array<i32>} : memref<256x128xf32, #tpu.memory_space<vmem>>, vector<256x128xf32>,
    %c2_207 = arith.constant 2 : index
    %c1_208 = arith.constant 1 : index
    %c0_209 = arith.constant 0 : index
    %141 = vector.load %arg8[%c2_207, %c1_208, %c0_209] : memref<18x18x128xbf16, #tpu.memory_space<vmem>>, vector<16x16x128xbf16>
    %142 = vector.shape_cast %141 : vector<16x16x128xbf16> to vector<256x128xbf16>
    %c2_210 = arith.constant 2 : index
    %c1_211 = arith.constant 1 : index
    %c0_212 = arith.constant 0 : index
    %c0_213 = arith.constant 0 : index
    %143 = vector.load %arg4[%c2_210, %c1_211, %c0_212, %c0_213] : memref<3x3x128x128xbf16, #tpu.memory_space<vmem>>, vector<1x1x128x128xbf16>
    %144 = vector.shape_cast %143 : vector<1x1x128x128xbf16> to vector<128x128xbf16>
    %cst_214 = arith.constant dense<0.000000e+00> : vector<256x128xf32>
    %145 = tpu.matmul %142, %144, %cst_214 {dimension_numbers = #tpu.dot_dimension_numbers<[1], [0], [0], [1], [0, 0, 1, 1], [], []>} : vector<256x128xbf16>, vector<128x128xbf16>, vector<256x128xf32> -> vector<256x128xf32>
    %c0_215 = arith.constant 0 : index
    %c0_216 = arith.constant 0 : index
    %146 = vector.load %arg9[%c0_215, %c0_216] : memref<256x128xf32, #tpu.memory_space<vmem>>, vector<256x128xf32>
    %147 = arith.addf %146, %145 : vector<256x128xf32>
    %c0_217 = arith.constant 0 : index
    %c0_218 = arith.constant 0 : index
    %148 = vector.load %arg9[%c0_217, %c0_218] : memref<256x128xf32, #tpu.memory_space<vmem>>, vector<256x128xf32>
    tpu.vector_store %arg9[%c0_217, %c0_218], %147 {strides = array<i32>} : memref<256x128xf32, #tpu.memory_space<vmem>>, vector<256x128xf32>,
    %c2_219 = arith.constant 2 : index
    %c2_220 = arith.constant 2 : index
    %c0_221 = arith.constant 0 : index
    %149 = vector.load %arg8[%c2_219, %c2_220, %c0_221] : memref<18x18x128xbf16, #tpu.memory_space<vmem>>, vector<16x16x128xbf16>
    %150 = vector.shape_cast %149 : vector<16x16x128xbf16> to vector<256x128xbf16>
    %c2_222 = arith.constant 2 : index
    %c2_223 = arith.constant 2 : index
    %c0_224 = arith.constant 0 : index
    %c0_225 = arith.constant 0 : index
    %151 = vector.load %arg4[%c2_222, %c2_223, %c0_224, %c0_225] : memref<3x3x128x128xbf16, #tpu.memory_space<vmem>>, vector<1x1x128x128xbf16>
    %152 = vector.shape_cast %151 : vector<1x1x128x128xbf16> to vector<128x128xbf16>
    %cst_226 = arith.constant dense<0.000000e+00> : vector<256x128xf32>
    %153 = tpu.matmul %150, %152, %cst_226 {dimension_numbers = #tpu.dot_dimension_numbers<[1], [0], [0], [1], [0, 0, 1, 1], [], []>} : vector<256x128xbf16>, vector<128x128xbf16>, vector<256x128xf32> -> vector<256x128xf32>
    %c0_227 = arith.constant 0 : index
    %c0_228 = arith.constant 0 : index
    %154 = vector.load %arg9[%c0_227, %c0_228] : memref<256x128xf32, #tpu.memory_space<vmem>>, vector<256x128xf32>
    %155 = arith.addf %154, %153 : vector<256x128xf32>
    %c0_229 = arith.constant 0 : index
    %c0_230 = arith.constant 0 : index
    %156 = vector.load %arg9[%c0_229, %c0_230] : memref<256x128xf32, #tpu.memory_space<vmem>>, vector<256x128xf32>
    tpu.vector_store %arg9[%c0_229, %c0_230], %155 {strides = array<i32>} : memref<256x128xf32, #tpu.memory_space<vmem>>, vector<256x128xf32>,
    %c0_231 = arith.constant 0 : index
    %c0_232 = arith.constant 0 : index
    %157 = vector.load %arg9[%c0_231, %c0_232] : memref<256x128xf32, #tpu.memory_space<vmem>>, vector<256x128xf32>
    %c0_233 = arith.constant 0 : index
    %c0_234 = arith.constant 0 : index
    %158 = vector.load %arg5[%c0_233, %c0_234] : memref<1x128xf32, #tpu.memory_space<vmem>>, vector<1x128xf32>
    %159 = vector.broadcast %158 : vector<1x128xf32> to vector<256x128xf32>
    %160 = arith.addf %157, %159 : vector<256x128xf32>
    %161 = vector.shape_cast %160 : vector<256x128xf32> to vector<1x16x16x128xf32>
    %c0_235 = arith.constant 0 : index
    %c0_236 = arith.constant 0 : index
    %c0_237 = arith.constant 0 : index
    %c0_238 = arith.constant 0 : index
    %162 = vector.load %arg6[%c0_235, %c0_236, %c0_237, %c0_238] : memref<1x16x16x128xf32, #tpu.memory_space<vmem>>, vector<1x16x16x128xf32>
    tpu.vector_store %arg6[%c0_235, %c0_236, %c0_237, %c0_238], %161 {strides = array<i32>} : memref<1x16x16x128xf32, #tpu.memory_space<vmem>>, vector<1x16x16x128xf32>,
    return
  }
  func.func @transform_0(%arg0: i32) -> (i32, i32, i32, i32) {
    %c0_i32 = arith.constant 0 : i32
    %c0_i32_0 = arith.constant 0 : i32
    %c0_i32_1 = arith.constant 0 : i32
    %c0_i32_2 = arith.constant 0 : i32
    return %arg0, %c0_i32, %c0_i32_0, %c0_i32_1 : i32, i32, i32, i32
  }
  func.func @transform_1(%arg0: i32) -> (i32, i32, i32, i32) {
    %c0_i32 = arith.constant 0 : i32
    %c0_i32_0 = arith.constant 0 : i32
    %c0_i32_1 = arith.constant 0 : i32
    %c0_i32_2 = arith.constant 0 : i32
    %c0_i32_3 = arith.constant 0 : i32
    return %c0_i32, %c0_i32_0, %c0_i32_1, %c0_i32_2 : i32, i32, i32, i32
  }
  func.func @transform_2(%arg0: i32) -> (i32, i32) {
    %c0_i32 = arith.constant 0 : i32
    %c0_i32_0 = arith.constant 0 : i32
    %c0_i32_1 = arith.constant 0 : i32
    return %c0_i32, %c0_i32_0 : i32, i32
  }
  func.func @transform_3(%arg0: i32) -> (i32, i32, i32, i32) {
    %c0_i32 = arith.constant 0 : i32
    %c0_i32_0 = arith.constant 0 : i32
    %c0_i32_1 = arith.constant 0 : i32
    %c0_i32_2 = arith.constant 0 : i32
    %c0_i32_3 = arith.constant 0 : i32
    return %c0_i32, %c0_i32_0, %c0_i32_1, %c0_i32_2 : i32, i32, i32, i32
  }
  func.func @transform_4(%arg0: i32) -> (i32, i32) {
    %c0_i32 = arith.constant 0 : i32
    %c0_i32_0 = arith.constant 0 : i32
    %c0_i32_1 = arith.constant 0 : i32
    return %c0_i32, %c0_i32_0 : i32, i32
  }
  func.func @transform_5(%arg0: i32) -> (i32, i32, i32, i32) {
    %c0_i32 = arith.constant 0 : i32
    %c0_i32_0 = arith.constant 0 : i32
    %c0_i32_1 = arith.constant 0 : i32
    %c0_i32_2 = arith.constant 0 : i32
    return %arg0, %c0_i32, %c0_i32_0, %c0_i32_1 : i32, i32, i32, i32
  }
}

</mosaic_0001>

<bundles_post_ra>
// kernel: basic_block_forward.1
= control target key start
LH: loop header
LB: loop body
LE: loop exit
PB: predicated region body
PF: predicated region fallthrough
CT: control target
= control target key end

     0   :  { %s15771_s18 = smov 0   ;;  %s18255_s0 = inlined_call_operand.vmem [shape: f32[2,16,16,4], index: 0, kind: input, shape index: {}]   ;;  %s18256_s1 = inlined_call_operand.vmem [shape: bf16[3,3,128,128], index: 1, kind: input, shape index: {}]   ;;  %s18257_s2 = inlined_call_operand.vmem [shape: f32[1,128], index: 2, kind: input, shape index: {}]   ;;  %s18258_s3 = inlined_call_operand.vmem [shape: bf16[3,3,128,128], index: 3, kind: input, shape index: {}]   ;;  %s18259_s4 = inlined_call_operand.vmem [shape: f32[1,128], index: 4, kind: input, shape index: {}]   ;;  %s18260_s5 = inlined_call_operand.vmem [shape: f32[2,16,16,128], index: 5, kind: output, shape index: {}]  }
   0x1 LB: > { %s12748_s19 = sadd.s32 4294967295, %s15738_s18   ;;  %p12752_p0 = scmp.ge.s32.totalorder %s15738_s18, 1  ;;  %s15738_s18 = sphi %s15771_s18, %s15_s18  }
   0x2   : > { %p187_p1 = scmp.lt.s32.totalorder %s15738_s18, 3 }
   0x4   : > { %p188_p2 = pnand %p12752_p0, %p187_p1 }
   0x6   : > { %191 = sbr.rel (%p188_p2) target bundleno = 1627 (0x65b), region = 40 }
   0xd   : > { %v15782_v0 = vld [vmem:[%s18256_s1] sm:$0xff]   ;;  %v15787_v1 = vld [vmem:[%s18256_s1 + $0x8] sm:$0xff]   ;;  %v15740_v2 = vmov 0   ;;  %p215_p3 = scmp.lt.s32.totalorder %s12748_s19, 1  ;;  %v15494_v3 = vld [vmem:[%s18256_s1 + $0x10] sm:$0xff]   ;;  %vm786_vm2 = vcmask 27648  }
   0xe   : > { %226 = vst [vmem:[#allocation2] sm:$0xf] %v15740_v2  ;;  %227 = vst [vmem:[#allocation2 + $0x4] sm:$0xf] %v15740_v2  ;;  %14107 = vmatprep.subr.bf16.mxu0 %v15782_v0  ;;  %v15495_v4 = vld [vmem:[%s18256_s1 + $0x18] sm:$0xff]   ;;  %vm794_vm3 = vcmask 24576  }
   0xf   : > { %228 = vst [vmem:[#allocation2 + $0x8] sm:$0x1] %v15740_v2  ;;  %229 = vst [vmem:[#allocation2 + $0xc] sm:$0xf] %v15740_v2  ;;  %14108 = vmatpush3.bf16.msra.mxu0 %v15782_v0  ;;  %s18300_s19 = smov (!%p215_p3, %s12748_s19), 1  ;;  %v15496_v10 = vld [vmem:[%s18256_s1 + $0x20] sm:$0xff]  }
  0x10   : > { %230 = vst [vmem:[#allocation2 + $0x10] sm:$0xf] %v15740_v2  ;;  %231 = vst [vmem:[#allocation2 + $0x14] sm:$0x1] %v15740_v2  ;;  %14109 = vmatprep.subr.bf16.mxu0 %v15787_v1  ;;  %s13609_s26 = sshll.u32 %s18300_s19, 8  ;;  %v18267_v11 = vmov 0 }
  0x11   : > { %232 = vst [vmem:[#allocation2 + $0x18] sm:$0xf] %v15740_v2  ;;  %233 = vst [vmem:[#allocation2 + $0x1c] sm:$0xf] %v15740_v2  ;;  %s15915_s29 = scalar_lea.vmem %s18255_s0, %s13609_s26  ;;  %vm462_vm0 = vsmask.f32 256  ;;  %s18186_s9 = scalar_lea.vmem %s18260_s5, %s13609_s26 }
  0x12   : > { %234 = vst [vmem:[#allocation2 + $0x20] sm:$0x1] %v15740_v2  ;;  %235 = vst [vmem:[#allocation2 + $0x24] sm:$0xf] %v15740_v2  ;;  %v334_v6 = vld [vmem:[%s15915_s29] sm:$0xff]  ;;  %v335_v7 = vld [vmem:[%s15915_s29 + $0x8] sm:$0xff] }
  0x13   : > { %236 = vst [vmem:[#allocation2 + $0x28] sm:$0xf] %v15740_v2  ;;  %237 = vst [vmem:[#allocation2 + $0x2c] sm:$0x1] %v15740_v2  ;;  %14110 = vmatpush3.bf16.msra.mxu0 %v15787_v1  ;;  %vm463_vm1 = vsmask.f32 4368  ;;  %v13611_v8 = vpack.c.bf16 %v334_v6, %v334_v6  ;;  %v13612_v9 = vpack.c.bf16 %v335_v7, %v335_v7 }
  0x14   : > { %238 = vst [vmem:[#allocation2 + $0x30] sm:$0xf] %v15740_v2  ;;  %239 = vst [vmem:[#allocation2 + $0x34] sm:$0xf] %v15740_v2  ;;  %14111 = vmatprep.subr.bf16.mxu0 %v15494_v3  ;;  %vm787_vm4 = vsmask.f32 7938 }
  0x15   : > { %240 = vst [vmem:[#allocation2 + $0x38] sm:$0x1] %v15740_v2  ;;  %241 = vst [vmem:[#allocation2 + $0x3c] sm:$0xf] %v15740_v2  ;;  %v15500_v5 = vld [vmem:[#allocation2] sm:$0xff]   ;;  %v466_v12 = vshrl.u32 %v13611_v8, 16 }
  0x16   : > { %242 = vst [vmem:[#allocation2 + $0x40] sm:$0xf] %v15740_v2  ;;  %243 = vst [vmem:[#allocation2 + $0x44] sm:$0x1] %v15740_v2  ;;  %14123 = vmatprep.mubr.bf16.mxu0 %v15500_v5  ;;  %v469_v13 = vshll.u32 %v13611_v8, 16  ;;  %v474_v14 = vshrl.u32 %v13612_v9, 16 }
  0x17   : > { %244 = vst [vmem:[#allocation2 + $0x48] sm:$0xf] %v15740_v2  ;;  %245 = vst [vmem:[#allocation2 + $0x4c] sm:$0xf] %v15740_v2  ;;  %14112 = vmatpush3.bf16.msra.mxu0 %v15494_v3  ;;  %v477_v15 = vshll.u32 %v13612_v9, 16  ;;  %v336_v16 = vld [vmem:[%s15915_s29 + $0x10] sm:$0xff] }
  0x18   : > { %246 = vst [vmem:[#allocation2 + $0x50] sm:$0x1] %v15740_v2  ;;  %247 = vst [vmem:[#allocation2 + $0x54] sm:$0xf] %v15740_v2  ;;  %14113 = vmatprep.subr.bf16.mxu0 %v15495_v4  ;;  %v789_v17 = vld [vmem:[#allocation2 + $0xc] sm:$0xf]  ;;  %v13613_v19 = vpack.c.bf16 %v336_v16, %v336_v16 }
  0x19   : > { %248 = vst [vmem:[#allocation2 + $0x58] sm:$0xf] %v15740_v2  ;;  %249 = vst [vmem:[#allocation2 + $0x5c] sm:$0x1] %v15740_v2  ;;  %v337_v18 = vld [vmem:[%s15915_s29 + $0x18] sm:$0xff]  ;;  %v338_v20 = vld [vmem:[%s15915_s29 + $0x20] sm:$0xff] }
  0x1a   : > { %250 = vst [vmem:[#allocation2 + $0x60] sm:$0xf] %v15740_v2  ;;  %251 = vst [vmem:[#allocation2 + $0x64] sm:$0xf] %v15740_v2  ;;  %v468_v21 = vrot.slane %v466_v12, 7  ;;  %v476_v22 = vrot.slane %v474_v14, 7  ;;  %v13614_v25 = vpack.c.bf16 %v337_v18, %v337_v18  ;;  %v13615_v27 = vpack.c.bf16 %v338_v20, %v338_v20 }
  0x1b   : > { %252 = vst [vmem:[#allocation2 + $0x68] sm:$0x1] %v15740_v2  ;;  %253 = vst [vmem:[#allocation2 + $0x6c] sm:$0xf] %v15740_v2  ;;  %v796_v24 = vld [vmem:[#allocation2 + $0x14] sm:$0x1]  ;;  %14114 = vmatpush3.bf16.msra.mxu0 %v15495_v4 }
  0x1c   : > { %254 = vst [vmem:[#allocation2 + $0x70] sm:$0xf] %v15740_v2  ;;  %255 = vst [vmem:[#allocation2 + $0x74] sm:$0x1] %v15740_v2  ;;  %v339_v26 = vld [vmem:[%s15915_s29 + $0x28] sm:$0xff]  ;;  %v483_v29 = vshrl.u32 %v13613_v19, 16  ;;  %14115 = vmatprep.subr.bf16.mxu0 %v15496_v10  ;;  %v471_v33 = vor.u32 %v469_v13, %v468_v21  ;;  %v479_v35 = vor.u32 %v477_v15, %v476_v22 }
  0x1d   : > { %256 = vst [vmem:[#allocation2 + $0x78] sm:$0xf] %v15740_v2  ;;  %257 = vst [vmem:[#allocation2 + $0x7c] sm:$0xf] %v15740_v2  ;;  %v486_v30 = vshll.u32 %v13613_v19, 16  ;;  %v13616_v31 = vpack.c.bf16 %v339_v26, %v339_v26  ;;  %v15497_v32 = vld [vmem:[%s18256_s1 + $0x28] sm:$0xff]  }
  0x1e   : > { %258 = vst [vmem:[#allocation2 + $0x80] sm:$0x1] %v15740_v2  ;;  %259 = vst [vmem:[#allocation2 + $0x84] sm:$0xf] %v15740_v2  ;;  %v472_v34 = vrot.slane %v468_v21, 4  ;;  %v481_v36 = vrot.slane %v476_v22, 4 }
  0x1f   : > { %260 = vst [vmem:[#allocation2 + $0x88] sm:$0xf] %v15740_v2  ;;  %261 = vst [vmem:[#allocation2 + $0x8c] sm:$0x1] %v15740_v2  ;;  %v485_v37 = vrot.slane %v483_v29, 7  ;;  %v491_v38 = vshrl.u32 %v13614_v25, 16  ;;  %14116 = vmatpush3.bf16.msra.mxu0 %v15496_v10 }
  0x20   : > { %262 = vst [vmem:[#allocation2 + $0x90] sm:$0xf] %v15740_v2  ;;  %263 = vst [vmem:[#allocation2 + $0x94] sm:$0xf] %v15740_v2  ;;  %v494_v39 = vshll.u32 %v13614_v25, 16  ;;  %v500_v40 = vshrl.u32 %v13615_v27, 16  ;;  %14117 = vmatprep.subr.bf16.mxu0 %v15497_v32 }
  0x21   : > { %264 = vst [vmem:[#allocation2 + $0x98] sm:$0x1] %v15740_v2  ;;  %265 = vst [vmem:[#allocation2 + $0x9c] sm:$0xf] %v15740_v2  ;;  %v340_v41 = vld [vmem:[%s15915_s29 + $0x30] sm:$0xff]  ;;  %v341_v42 = vld [vmem:[%s15915_s29 + $0x38] sm:$0xff]  ;;  %v488_v49 = vor.u32 %v486_v30, %v485_v37 }
  0x22   : > { %266 = vst [vmem:[#allocation2 + $0xa0] sm:$0xf] %v15740_v2  ;;  %267 = vst [vmem:[#allocation2 + $0xa4] sm:$0x1] %v15740_v2  ;;  %v799_v46 = vld [vmem:[#allocation2 + $0x18] sm:$0xf]  ;;  %v13617_v56 = vpack.c.bf16 %v340_v41, %v340_v41  ;;  %v13618_v57 = vpack.c.bf16 %v341_v42, %v341_v42 }
  0x23   : > { %268 = vst [vmem:[#allocation2 + $0xa8] sm:$0xf] %v15740_v2  ;;  %269 = vst [vmem:[#allocation2 + $0xac] sm:$0xf] %v15740_v2  ;;  %v503_v47 = vshll.u32 %v13615_v27, 16  ;;  %v15498_v48 = vld [vmem:[%s18256_s1 + $0x30] sm:$0xff]   ;;  %14118 = vmatpush3.bf16.msra.mxu0 %v15497_v32 }
  0x24   : > { %270 = vst [vmem:[#allocation2 + $0xb0] sm:$0x1] %v15740_v2  ;;  %271 = vst [vmem:[#allocation2 + $0xb4] sm:$0xf] %v15740_v2  ;;  %v489_v50 = vrot.slane %v485_v37, 4  ;;  %v15962_v51 = vrot.slane %v491_v38, 7  ;;  %14119 = vmatprep.subr.bf16.mxu0 %v15498_v48 }
  0x25   : > { %272 = vst [vmem:[#allocation2 + $0xb8] sm:$0xf] %v15740_v2  ;;  %273 = vst [vmem:[#allocation2 + $0xbc] sm:$0x1] %v15740_v2  ;;  %v502_v52 = vrot.slane %v500_v40, 7  ;;  %v508_v53 = vshrl.u32 %v13616_v31, 16 }
  0x26   : > { %274 = vst [vmem:[#allocation2 + $0xc0] sm:$0xf] %v15740_v2  ;;  %275 = vst [vmem:[#allocation2 + $0xc4] sm:$0xf] %v15740_v2  ;;  %v511_v54 = vshll.u32 %v13616_v31, 16  ;;  %v342_v58 = vld [vmem:[%s15915_s29 + $0x40] sm:$0xff]  ;;  %v496_v60 = vor.u32 %v494_v39, %v15962_v51 }
  0x27   : > { %276 = vst [vmem:[#allocation2 + $0xc8] sm:$0x1] %v15740_v2  ;;  %277 = vst [vmem:[#allocation2 + $0xcc] sm:$0xf] %v15740_v2  ;;  %v806_v55 = vld [vmem:[#allocation2 + $0x24] sm:$0xf]  ;;  %v505_v62 = vor.u32 %v503_v47, %v502_v52  ;;  %v13619_v13 = vpack.c.bf16 %v342_v58, %v342_v58  ;;  %14120 = vmatpush3.bf16.msra.mxu0 %v15498_v48 }
  0x28   : > { %278 = vst [vmem:[#allocation2 + $0xd0] sm:$0xf] %v15740_v2  ;;  %279 = vst [vmem:[#allocation2 + $0xd4] sm:$0x1] %v15740_v2  ;;  %v343_v59 = vld [vmem:[%s15915_s29 + $0x48] sm:$0xff]  ;;  %v344_v63 = vld [vmem:[%s15915_s29 + $0x50] sm:$0xff] }
  0x29   : > { %280 = vst [vmem:[#allocation3] sm:$0xf] %v15740_v2  ;;  %281 = vst [vmem:[#allocation3 + $0x4] sm:$0xf] %v15740_v2  ;;  %v345_v0 = vld [vmem:[%s15915_s29 + $0x58] sm:$0xff]  ;;  %v506_v1 = vrot.slane %v502_v52, 4  ;;  %v13621_v18 = vpack.c.bf16 %v344_v63, %v344_v63 }
  0x2a   : > { %282 = vst [vmem:[#allocation3 + $0x8] sm:$0x1] %v15740_v2  ;;  %283 = vst [vmem:[#allocation3 + $0xc] sm:$0xf] %v15740_v2  ;;  %v517_v3 = vshrl.u32 %v13617_v56, 16  ;;  %v520_v4 = vshll.u32 %v13617_v56, 16  ;;  %v13622_v19 = vpack.c.bf16 %v345_v0, %v345_v0 }
  0x2b   : > { %284 = vst [vmem:[#allocation3 + $0x10] sm:$0xf] %v15740_v2  ;;  %285 = vst [vmem:[#allocation3 + $0x14] sm:$0x1] %v15740_v2  ;;  %v525_v7 = vshrl.u32 %v13618_v57, 16  ;;  %v528_v8 = vshll.u32 %v13618_v57, 16 }
  0x2c   : > { %286 = vst [vmem:[#allocation3 + $0x18] sm:$0xf] %v15740_v2  ;;  %287 = vst [vmem:[#allocation3 + $0x1c] sm:$0xf] %v15740_v2  ;;  %v15499_v9 = vld [vmem:[%s18256_s1 + $0x38] sm:$0xff]   ;;  %v519_v12 = vrot.slane %v517_v3, 7 }
  0x2d   : > { %288 = vst [vmem:[#allocation3 + $0x20] sm:$0x1] %v15740_v2  ;;  %289 = vst [vmem:[#allocation3 + $0x24] sm:$0xf] %v15740_v2  ;;  %v346_v14 = vld [vmem:[%s15915_s29 + $0x60] sm:$0xff]  ;;  %v15983_v15 = vrot.slane %v525_v7, 7  ;;  %14121 = vmatprep.subr.bf16.mxu0 %v15499_v9 }
  0x2e   : > { %290 = vst [vmem:[#allocation3 + $0x28] sm:$0xf] %v15740_v2  ;;  %291 = vst [vmem:[#allocation3 + $0x2c] sm:$0x1] %v15740_v2  ;;  %v813_v16 = vld [vmem:[#allocation2 + $0x30] sm:$0xf]  ;;  %v522_v22 = vor.u32 %v520_v4, %v519_v12  ;;  %v13623_v31 = vpack.c.bf16 %v346_v14, %v346_v14  ;;  %14122 = vmatpush3.bf16.msra.mxu0 %v15499_v9 }
  0x2f   : > { %292 = vst [vmem:[#allocation3 + $0x30] sm:$0xf] %v15740_v2  ;;  %293 = vst [vmem:[#allocation3 + $0x34] sm:$0xf] %v15740_v2  ;;  %v498_v20 = vrot.slane %v15962_v51, 4  ;;  %v15502_v25 = vld [vmem:[%s18256_s1 + $0x40] sm:$0xff]   ;;  %v530_v26 = vor.u32 %v528_v8, %v15983_v15 }
  0x30   : > { %294 = vst [vmem:[#allocation3 + $0x38] sm:$0x1] %v15740_v2  ;;  %295 = vst [vmem:[#allocation3 + $0x3c] sm:$0xf] %v15740_v2  ;;  %v534_v27 = vshrl.u32 %v13619_v13, 16  ;;  %v537_v29 = vshll.u32 %v13619_v13, 16  ;;  %14155 = vmatprep.subr.bf16.mxu0 %v15502_v25 }
  0x31   : > { %296 = vst [vmem:[#allocation3 + $0x40] sm:$0xf] %v15740_v2  ;;  %297 = vst [vmem:[#allocation3 + $0x44] sm:$0x1] %v15740_v2  ;;  %v347_v30 = vld [vmem:[%s15915_s29 + $0x68] sm:$0xff]  ;;  %v348_v37 = vld [vmem:[%s15915_s29 + $0x70] sm:$0xff] }
  0x32   : > { %298 = vst [vmem:[#allocation3 + $0x48] sm:$0xf] %v15740_v2  ;;  %299 = vst [vmem:[#allocation3 + $0x4c] sm:$0xf] %v15740_v2  ;;  %v536_v39 = vrot.slane %v534_v27, 7  ;;  %v554_v40 = vshll.u32 %v13621_v18, 16  ;;  %v13624_v48 = vpack.c.bf16 %v347_v30, %v347_v30 }
  0x33   : > { %300 = vst [vmem:[#allocation3 + $0x50] sm:$0x1] %v15740_v2  ;;  %301 = vst [vmem:[#allocation3 + $0x54] sm:$0xf] %v15740_v2  ;;  %v559_v41 = vshrl.u32 %v13622_v19, 16  ;;  %v349_v42 = vld [vmem:[%s15915_s29 + $0x78] sm:$0xff] }
  0x34   : > { %302 = vst [vmem:[#allocation3 + $0x58] sm:$0xf] %v15740_v2  ;;  %303 = vst [vmem:[#allocation3 + $0x5c] sm:$0x1] %v15740_v2  ;;  %v827_v47 = vld [vmem:[#allocation2 + $0x48] sm:$0xf]  ;;  %v13626_v58 = vpack.c.bf16 %v349_v42, %v349_v42 }
  0x35   : > { %304 = vst [vmem:[#allocation3 + $0x60] sm:$0xf] %v15740_v2  ;;  %305 = vst [vmem:[#allocation3 + $0x64] sm:$0xf] %v15740_v2  ;;  %v540_v52 = vrot.slane %v536_v39, 4  ;;  %v579_v3 = vshll.u32 %v13624_v48, 16 }
  0x36   : > { %306 = vst [vmem:[#allocation3 + $0x68] sm:$0x1] %v15740_v2  ;;  %307 = vst [vmem:[#allocation3 + $0x6c] sm:$0xf] %v15740_v2  ;;  %v834_v4 = vld [vmem:[#allocation2 + $0x54] sm:$0xf] }
  0x37   : > { %308 = vst [vmem:[#allocation3 + $0x70] sm:$0xf] %v15740_v2  ;;  %309 = vst [vmem:[#allocation3 + $0x74] sm:$0x1] %v15740_v2  ;;  %vm1337_vm8 = vsmask.f32 3328 }
  0x38   : > { %310 = vst [vmem:[#allocation3 + $0x78] sm:$0xf] %v15740_v2  ;;  %311 = vst [vmem:[#allocation3 + $0x7c] sm:$0xf] %v15740_v2  ;;  %vm1338_vm9 = vsmask.f32 7440 }
  0x39   : > { %312 = vst [vmem:[#allocation3 + $0x80] sm:$0x1] %v15740_v2  ;;  %313 = vst [vmem:[#allocation3 + $0x84] sm:$0xf] %v15740_v2  ;;  %vm2206_vm11 = vcmask 1042432   ;;  %vm2207_vm12 = vcmask 1046532  }
  0x3a   : > { %314 = vst [vmem:[#allocation3 + $0x88] sm:$0xf] %v15740_v2  ;;  %315 = vst [vmem:[#allocation3 + $0x8c] sm:$0x1] %v15740_v2  ;;  %v15539_v23 = vld [vmem:[%s18256_s1 + $0xf8] sm:$0xff]   ;;  %vm6952_vm14 = vcmask 1043456  }
  0x3b   : > { %316 = vst [vmem:[#allocation3 + $0x90] sm:$0xf] %v15740_v2  ;;  %317 = vst [vmem:[#allocation3 + $0x94] sm:$0xf] %v15740_v2  ;;  %vm6958_vm15 = vcmask 1040384  }
  0x3c   : > { %318 = vst [vmem:[#allocation3 + $0x98] sm:$0x1] %v15740_v2  ;;  %319 = vst [vmem:[#allocation3 + $0x9c] sm:$0xf] %v15740_v2 }
  0x3d   : > { %320 = vst [vmem:[#allocation3 + $0xa0] sm:$0xf] %v15740_v2  ;;  %321 = vst [vmem:[#allocation3 + $0xa4] sm:$0x1] %v15740_v2 }
  0x3e   : > { %322 = vst [vmem:[#allocation3 + $0xa8] sm:$0xf] %v15740_v2  ;;  %323 = vst [vmem:[#allocation3 + $0xac] sm:$0xf] %v15740_v2 }
  0x3f   : > { %324 = vst [vmem:[#allocation3 + $0xb0] sm:$0x1] %v15740_v2  ;;  %325 = vst [vmem:[#allocation3 + $0xb4] sm:$0xf] %v15740_v2 }
  0x40   : > { %326 = vst [vmem:[#allocation3 + $0xb8] sm:$0xf] %v15740_v2  ;;  %327 = vst [vmem:[#allocation3 + $0xbc] sm:$0x1] %v15740_v2 }
  0x41   : > { %328 = vst [vmem:[#allocation3 + $0xc0] sm:$0xf] %v15740_v2  ;;  %329 = vst [vmem:[#allocation3 + $0xc4] sm:$0xf] %v15740_v2 }
  0x42   : > { %330 = vst [vmem:[#allocation3 + $0xc8] sm:$0x1] %v15740_v2  ;;  %331 = vst [vmem:[#allocation3 + $0xcc] sm:$0xf] %v15740_v2 }
  0x43   : > { %332 = vst [vmem:[#allocation3 + $0xd0] sm:$0xf] %v15740_v2  ;;  %333 = vst [vmem:[#allocation3 + $0xd4] sm:$0x1] %v15740_v2  ;;  %v15971_v2 = vrot.slane %v508_v53, 7  ;;  %v13625_v53 = vpack.c.bf16 %v348_v37, %v348_v37  ;;  %v353_v37 = vld [vmem:[%s15915_s29 + $0x98] sm:$0xff] }
  0x44   : > { %vm15927_vm5 = vmor %vm462_vm0, %vm463_vm1 }
  0x45   : > { %v18268_v11 = vsel %vm15927_vm5, 4294967295, %v18267_v11  ;;  %vm15936_vm6 = vmand %vm786_vm2, %vm787_vm4  ;;  %v480_v43 = vsel %vm15927_vm5, %v472_v34, %v479_v35  ;;  %v497_v5 = vsel %vm15927_vm5, %v489_v50, %v496_v60  ;;  %v513_v10 = vor.u32 %v511_v54, %v15971_v2  ;;  %v820_v35 = vld [vmem:[#allocation2 + $0x3c] sm:$0xf]  ;;  %v15505_v54 = vld [vmem:[%s18256_s1 + $0x48] sm:$0xff]  }
  0x46   : > { %18269 = vst [vmem:[#allocation5_spill] sm:$0xff] %v18268_v11  ;;  %vm15943_vm7 = vmand %vm794_vm3, %vm462_vm0  ;;  %v790_v44 = vsel %vm15936_vm6, %v471_v33, %v789_v17  ;;  %v800_v61 = vsel %vm15936_vm6, %v488_v49, %v799_v46  ;;  %v807_v6 = vsel %vm15936_vm6, %v505_v62, %v806_v55  ;;  %v13620_v17 = vpack.c.bf16 %v343_v59, %v343_v59 }
  0x47   : > { %v797_v45 = vsel %vm15943_vm7, %v481_v36, %v796_v24  ;;  %791 = vst [vmem:[#allocation2 + $0xc] sm:$0xf] %v790_v44  ;;  %793 = vst.msk [vmem:[#allocation2 + $0x10] sm:$0xf] %vm786_vm2, %v480_v43  ;;  %v514_v21 = vsel %vm15927_vm5, %v506_v1, %v513_v10  ;;  %v523_v24 = vrot.slane %v519_v12, 4  ;;  %v814_v32 = vsel %vm15936_vm6, %v522_v22, %v813_v16  ;;  %v350_v10 = vld [vmem:[%s15915_s29 + $0x80] sm:$0xff] }
  0x48   : > { %798 = vst [vmem:[#allocation2 + $0x14] sm:$0x1] %v797_v45  ;;  %801 = vst [vmem:[#allocation2 + $0x18] sm:$0xf] %v800_v61  ;;  %v542_v33 = vshrl.u32 %v13620_v17, 16  ;;  %v545_v34 = vshll.u32 %v13620_v17, 16  ;;  %v539_v50 = vor.u32 %v537_v29, %v536_v39  ;;  %v13627_v30 = vpack.c.bf16 %v350_v10, %v350_v10 }
  0x49   : > { %802 = vst.msk [vmem:[#allocation2 + $0x1c] sm:$0xf] %vm786_vm2, %v497_v5  ;;  %808 = vst [vmem:[#allocation2 + $0x24] sm:$0xf] %v807_v6  ;;  %v551_v36 = vshrl.u32 %v13621_v18, 16  ;;  %v531_v38 = vsel %vm15927_vm5, %v523_v24, %v530_v26  ;;  %v562_v46 = vshll.u32 %v13622_v19, 16 }
  0x4a   : > { %809 = vst.msk [vmem:[#allocation2 + $0x28] sm:$0xf] %vm786_vm2, %v514_v21  ;;  %815 = vst [vmem:[#allocation2 + $0x30] sm:$0xf] %v814_v32  ;;  %v16001_v44 = vrot.slane %v542_v33, 7  ;;  %v821_v59 = vsel %vm15936_vm6, %v539_v50, %v820_v35  ;;  %v16009_v60 = vrot.slane %v559_v41, 7 }
  0x4b   : > { %816 = vst.msk [vmem:[#allocation2 + $0x34] sm:$0xf] %vm786_vm2, %v531_v38  ;;  %v553_v45 = vrot.slane %v551_v36, 7  ;;  %v568_v61 = vshrl.u32 %v13623_v31, 16  ;;  %v571_v62 = vshll.u32 %v13623_v31, 16  ;;  %v576_v1 = vshrl.u32 %v13624_v48, 16  ;;  %vm16155_vm10 = vmor %vm1337_vm8, %vm1338_vm9 }
  0x4c   : > { %v547_v55 = vor.u32 %v545_v34, %v16001_v44  ;;  %822 = vst [vmem:[#allocation2 + $0x3c] sm:$0xf] %v821_v59  ;;  %v515_v5 = vrot.slane %v15971_v2, 4  ;;  %v15508_v6 = vld [vmem:[%s18256_s1 + $0x50] sm:$0xff]   ;;  %v564_v7 = vor.u32 %v562_v46, %v16009_v60  ;;  %v585_v9 = vshrl.u32 %v13625_v53, 16  ;;  %v351_v12 = vld [vmem:[%s15915_s29 + $0x88] sm:$0xff]  ;;  %vm16379_vm13 = vmor %vm2206_vm11, %vm2207_vm12 }
  0x4d   : > { %v556_v56 = vor.u32 %v554_v40, %v553_v45  ;;  %v557_v57 = vrot.slane %v553_v45, 4  ;;  %v570_v8 = vrot.slane %v568_v61, 7  ;;  %v16023_v13 = vrot.slane %v576_v1, 7  ;;  %v841_v24 = vld [vmem:[#allocation2 + $0x60] sm:$0xf]  ;;  %v352_v31 = vld [vmem:[%s15915_s29 + $0x90] sm:$0xff]  ;;  %vm17237_vm1 = vmand %vm6952_vm14, %vm787_vm4 }
  0x4e   : > { %v15501_v43 = vld [vmem:[#allocation2 + $0xc] sm:$0xff]   ;;  %v548_v63 = vsel %vm15927_vm5, %v540_v52, %v547_v55  ;;  %v588_v14 = vshll.u32 %v13625_v53, 16  ;;  %v593_v16 = vshrl.u32 %v13626_v58, 16  ;;  %v596_v17 = vshll.u32 %v13626_v58, 16  ;;  %v15511_v40 = vld [vmem:[%s18256_s1 + $0x58] sm:$0xff]  }
  0x4f   : > { %14124 = vmatmul.mubr.bf16.vlgmr.msra.gmra.mrb[0].mxu0 %v15501_v43  ;;  %v828_v0 = vsel %vm15936_vm6, %v556_v56, %v827_v47  ;;  %823 = vst.msk [vmem:[#allocation2 + $0x40] sm:$0xf] %vm786_vm2, %v548_v63  ;;  %v565_v18 = vsel %vm15927_vm5, %v557_v57, %v564_v7  ;;  %v573_v19 = vor.u32 %v571_v62, %v570_v8  ;;  %v574_v21 = vrot.slane %v570_v8, 4  ;;  %v354_v43 = vld [vmem:[%s15915_s29 + $0xa0] sm:$0xff]  ;;  %v355_v45 = vld [vmem:[%s15915_s29 + $0xa8] sm:$0xff]  ;;  %v356_v55 = vld [vmem:[%s15915_s29 + $0xb0] sm:$0xff] }
  0x50   : > { %v15503_v49 = vld [vmem:[#allocation2 + $0x18] sm:$0xff]   ;;  %14156 = vmatpush3.bf16.msra.mxu0 %v15502_v25  ;;  %829 = vst [vmem:[#allocation2 + $0x48] sm:$0xf] %v828_v0  ;;  %v587_v22 = vrot.slane %v585_v9, 7  ;;  %v532_v26 = vrot.slane %v15983_v15, 4  ;;  %v581_v27 = vor.u32 %v579_v3, %v16023_v13  ;;  %v16030_v29 = vrot.slane %v593_v16, 7 }
  0x51   : > { %14127 = vmatprep.mubr.bf16.mxu0 %v15503_v49  ;;  %14157 = vmatprep.subr.bf16.mxu0 %v15505_v54  ;;  %v15504_v25 = vld [vmem:[#allocation2 + $0x24] sm:$0xff]   ;;  %830 = vst.msk [vmem:[#allocation2 + $0x4c] sm:$0xf] %vm786_vm2, %v565_v18  ;;  %v835_v33 = vsel %vm15936_vm6, %v573_v19, %v834_v4  ;;  %v13628_v36 = vpack.c.bf16 %v351_v12, %v351_v12  ;;  %v549_v38 = vrot.slane %v16001_v44, 4  ;;  %v602_v42 = vshrl.u32 %v13627_v30, 16  ;;  %v357_v8 = vld [vmem:[%s15915_s29 + $0xb8] sm:$0xff] }
  0x52   : > { %v15506_v32 = vld [vmem:[#allocation2 + $0x30] sm:$0xff]   ;;  %v590_v34 = vor.u32 %v588_v14, %v587_v22  ;;  %v591_v35 = vrot.slane %v587_v22, 4  ;;  %v582_v39 = vsel %vm15927_vm5, %v574_v21, %v581_v27  ;;  %836 = vst [vmem:[#allocation2 + $0x54] sm:$0xf] %v835_v33  ;;  %v598_v41 = vor.u32 %v596_v17, %v16030_v29  ;;  %v848_v58 = vld [vmem:[#allocation2 + $0x6c] sm:$0xf] }
  0x53   : > { %837 = vst.msk [vmem:[#allocation2 + $0x58] sm:$0xf] %vm786_vm2, %v582_v39  ;;  %v605_v47 = vshll.u32 %v13627_v30, 16  ;;  %v610_v48 = vshrl.u32 %v13628_v36, 16  ;;  %v613_v49 = vshll.u32 %v13628_v36, 16  ;;  %v604_v52 = vrot.slane %v602_v42, 7 }
  0x54   : > { %14158 = vmatpush3.bf16.msra.mxu0 %v15505_v54  ;;  %v842_v46 = vsel %vm15936_vm6, %v590_v34, %v841_v24  ;;  %v599_v50 = vsel %vm15927_vm5, %v591_v35, %v598_v41  ;;  %v13629_v53 = vpack.c.bf16 %v352_v31, %v352_v31  ;;  %v13630_v54 = vpack.c.bf16 %v353_v37, %v353_v37  ;;  %v15514_v0 = vld [vmem:[%s18256_s1 + $0x60] sm:$0xff]   ;;  %v855_v16 = vld [vmem:[#allocation2 + $0x78] sm:$0xf]  ;;  %v15517_v33 = vld [vmem:[%s18256_s1 + $0x68] sm:$0xff]  }
  0x55   : > { %14159 = vmatprep.subr.bf16.mxu0 %v15508_v6  ;;  %843 = vst [vmem:[#allocation2 + $0x60] sm:$0xf] %v842_v46  ;;  %v566_v56 = vrot.slane %v16009_v60, 4  ;;  %844 = vst.msk [vmem:[#allocation2 + $0x64] sm:$0xf] %vm786_vm2, %v599_v50  ;;  %v16053_v57 = vrot.slane %v610_v48, 7  ;;  %v13631_v59 = vpack.c.bf16 %v354_v43, %v354_v43  ;;  %v13632_v61 = vpack.c.bf16 %v355_v45, %v355_v45 }
  0x56   : > { %v607_v62 = vor.u32 %v605_v47, %v604_v52  ;;  %v608_v63 = vrot.slane %v604_v52, 4  ;;  %v619_v1 = vshrl.u32 %v13629_v53, 16  ;;  %v622_v3 = vshll.u32 %v13629_v53, 16  ;;  %v15507_v10 = vld [vmem:[#allocation2 + $0x3c] sm:$0xff]   ;;  %v862_v27 = vld [vmem:[#allocation2 + $0x84] sm:$0xf] }
  0x57   : > { %14128 = vmatmul.mubr.bf16.gmra.mrb[4].mxu0 %v15504_v25  ;;  %v615_v4 = vor.u32 %v613_v49, %v16053_v57  ;;  %v630_v7 = vshll.u32 %v13630_v54, 16  ;;  %v13633_v9 = vpack.c.bf16 %v356_v55, %v356_v55  ;;  %v636_v17 = vshrl.u32 %v13631_v59, 16  ;;  %v359_v46 = vld [vmem:[%s15915_s29 + $0xc8] sm:$0xff]  ;;  %v360_v52 = vld [vmem:[%s15915_s29 + $0xd0] sm:$0xff] }
  0x58   : > { %14131 = vmatprep.mubr.bf16.mxu0 %v15506_v32  ;;  %14160 = vmatpush3.bf16.msra.mxu0 %v15508_v6  ;;  %v627_v6 = vshrl.u32 %v13630_v54, 16  ;;  %v849_v12 = vsel %vm15936_vm6, %v607_v62, %v848_v58  ;;  %v621_v14 = vrot.slane %v619_v1, 7  ;;  %v639_v18 = vshll.u32 %v13631_v59, 16  ;;  %v15509_v19 = vld [vmem:[#allocation2 + $0x48] sm:$0xff]   ;;  %v869_v58 = vld [vmem:[#allocation2 + $0x90] sm:$0xf] }
  0x59   : > { %14161 = vmatprep.subr.bf16.mxu0 %v15511_v40  ;;  %v616_v21 = vsel %vm15927_vm5, %v608_v63, %v615_v4  ;;  %850 = vst [vmem:[#allocation2 + $0x6c] sm:$0xf] %v849_v12  ;;  %v644_v24 = vshrl.u32 %v13632_v61, 16  ;;  %v647_v25 = vshll.u32 %v13632_v61, 16  ;;  %v638_v32 = vrot.slane %v636_v17, 7  ;;  %v15520_v61 = vld [vmem:[%s18256_s1 + $0x70] sm:$0xff]  }
  0x5a   : > { %v16064_v22 = vrot.slane %v627_v6, 7  ;;  %851 = vst.msk [vmem:[#allocation2 + $0x70] sm:$0xf] %vm786_vm2, %v616_v21  ;;  %v624_v30 = vor.u32 %v622_v3, %v621_v14  ;;  %v625_v31 = vrot.slane %v621_v14, 4  ;;  %v13634_v34 = vpack.c.bf16 %v357_v8, %v357_v8  ;;  %v361_v62 = vld [vmem:[%s15915_s29 + $0xd8] sm:$0xff] }
  0x5b   : > { %v583_v35 = vrot.slane %v16023_v13, 4  ;;  %v16072_v37 = vrot.slane %v644_v24, 7  ;;  %v653_v39 = vshrl.u32 %v13633_v9, 16  ;;  %v641_v42 = vor.u32 %v639_v18, %v638_v32  ;;  %v15510_v4 = vld [vmem:[#allocation2 + $0x54] sm:$0xff]   ;;  %v876_v17 = vld [vmem:[#allocation2 + $0x9c] sm:$0xf] }
  0x5c   : > { %14162 = vmatpush3.bf16.msra.mxu0 %v15511_v40  ;;  %v632_v36 = vor.u32 %v630_v7, %v16064_v22  ;;  %v358_v40 = vld [vmem:[%s15915_s29 + $0xc0] sm:$0xff]  ;;  %v856_v41 = vsel %vm15936_vm6, %v624_v30, %v855_v16  ;;  %v642_v43 = vrot.slane %v638_v32, 4  ;;  %v656_v45 = vshll.u32 %v13633_v9, 16  ;;  %v15523_v30 = vld [vmem:[%s18256_s1 + $0x78] sm:$0xff]  }
  0x5d   : > { %14163 = vmatprep.subr.bf16.mxu0 %v15514_v0  ;;  %v600_v47 = vrot.slane %v16030_v29, 4  ;;  %857 = vst [vmem:[#allocation2 + $0x78] sm:$0xf] %v856_v41  ;;  %v649_v49 = vor.u32 %v647_v25, %v16072_v37  ;;  %v655_v50 = vrot.slane %v653_v39, 7  ;;  %v863_v53 = vsel %vm15936_vm6, %v641_v42, %v862_v27 }
  0x5e   : > { %v633_v48 = vsel %vm15927_vm5, %v625_v31, %v632_v36  ;;  %v661_v54 = vshrl.u32 %v13634_v34, 16  ;;  %v664_v55 = vshll.u32 %v13634_v34, 16  ;;  %v13635_v59 = vpack.c.bf16 %v358_v40, %v358_v40  ;;  %864 = vst [vmem:[#allocation2 + $0x84] sm:$0xf] %v863_v53  ;;  %v363_v36 = vld [vmem:[%s15915_s29 + $0xe8] sm:$0xff] }
  0x5f   : > { %14132 = vmatmul.mubr.bf16.gmra.mrb[8].mxu0 %v15507_v10  ;;  %858 = vst.msk [vmem:[#allocation2 + $0x7c] sm:$0xf] %vm786_vm2, %v633_v48  ;;  %v650_v63 = vsel %vm15927_vm5, %v642_v43, %v649_v49  ;;  %v659_v1 = vrot.slane %v655_v50, 4  ;;  %v13636_v3 = vpack.c.bf16 %v359_v46, %v359_v46  ;;  %v13637_v9 = vpack.c.bf16 %v360_v52, %v360_v52  ;;  %v15512_v10 = vld [vmem:[#allocation2 + $0x60] sm:$0xff]   ;;  %v883_v48 = vld [vmem:[#allocation2 + $0xa8] sm:$0xf] }
  0x60   : > { %14135 = vmatprep.mubr.bf16.mxu0 %v15509_v19  ;;  %14164 = vmatpush3.bf16.msra.mxu0 %v15514_v0  ;;  %v658_v0 = vor.u32 %v656_v45, %v655_v50  ;;  %865 = vst.msk [vmem:[#allocation2 + $0x88] sm:$0xf] %vm786_vm2, %v650_v63  ;;  %v16093_v6 = vrot.slane %v661_v54, 7  ;;  %v670_v7 = vshrl.u32 %v13635_v59, 16  ;;  %v673_v8 = vshll.u32 %v13635_v59, 16  ;;  %v362_v19 = vld [vmem:[%s15915_s29 + $0xe0] sm:$0xff] }
  0x61   : > { %14165 = vmatprep.subr.bf16.mxu0 %v15517_v33  ;;  %v678_v14 = vshrl.u32 %v13636_v3, 16  ;;  %v681_v16 = vshll.u32 %v13636_v3, 16  ;;  %v13638_v18 = vpack.c.bf16 %v361_v62, %v361_v62  ;;  %v617_v21 = vrot.slane %v16053_v57, 4 }
  0x62   : > { %v870_v12 = vsel %vm15936_vm6, %v658_v0, %v869_v58  ;;  %v666_v24 = vor.u32 %v664_v55, %v16093_v6  ;;  %v672_v25 = vrot.slane %v670_v7, 7  ;;  %v687_v27 = vshrl.u32 %v13637_v9, 16  ;;  %v1289_v55 = vld [vmem:[#allocation2] sm:$0xf]  ;;  %v1290_v0 = vld [vmem:[#allocation2 + $0x4] sm:$0xf] }
  0x63   : > { %871 = vst [vmem:[#allocation2 + $0x90] sm:$0xf] %v870_v12  ;;  %v16103_v31 = vrot.slane %v678_v14, 7  ;;  %v690_v32 = vshll.u32 %v13637_v9, 16  ;;  %v698_v34 = vshll.u32 %v13638_v18, 16  ;;  %v634_v43 = vrot.slane %v16064_v22, 4 }
  0x64   : > { %14166 = vmatpush3.bf16.msra.mxu0 %v15517_v33  ;;  %v695_v33 = vshrl.u32 %v13638_v18, 16  ;;  %v667_v39 = vsel %vm15927_vm5, %v659_v1, %v666_v24  ;;  %v675_v40 = vor.u32 %v673_v8, %v672_v25  ;;  %v676_v41 = vrot.slane %v672_v25, 4  ;;  %v16118_v58 = vld [vmem:[%s18256_s1 + $0x80] sm:$0xff]   ;;  %v15513_v1 = vld [vmem:[#allocation2 + $0x6c] sm:$0xff]   ;;  %v890_v9 = vld [vmem:[#allocation2 + $0xb4] sm:$0xf] }
  0x65   : > { %14167 = vmatprep.subr.bf16.mxu0 %v15520_v61  ;;  %v689_v42 = vrot.slane %v687_v27, 7  ;;  %872 = vst.msk [vmem:[#allocation2 + $0x94] sm:$0xf] %vm786_vm2, %v667_v39  ;;  %v683_v45 = vor.u32 %v681_v16, %v16103_v31  ;;  %v13639_v49 = vpack.c.bf16 %v362_v19, %v362_v19  ;;  %v13640_v54 = vpack.c.bf16 %v363_v36, %v363_v36 }
  0x66   : > { %v16111_v46 = vrot.slane %v695_v33, 7  ;;  %v877_v50 = vsel %vm15936_vm6, %v675_v40, %v876_v17  ;;  %v651_v59 = vrot.slane %v16072_v37, 4  ;;  %v15515_v12 = vld [vmem:[#allocation2 + $0x78] sm:$0xff]   ;;  %v1291_v17 = vld [vmem:[#allocation2 + $0x8] sm:$0x1]  ;;  %v1341_v18 = vshrl.u32 %v1289_v55, 16 }
  0x67   : > { %14136 = vmatmul.mubr.bf16.gmra.mrb[12].mxu0 %v15510_v4  ;;  %v692_v52 = vor.u32 %v690_v32, %v689_v42  ;;  %v693_v53 = vrot.slane %v689_v42, 4  ;;  %878 = vst [vmem:[#allocation2 + $0x9c] sm:$0xf] %v877_v50  ;;  %v704_v63 = vshrl.u32 %v13639_v49, 16  ;;  %v707_v4 = vshll.u32 %v13639_v49, 16 }
  0x68   : > { %14139 = vmatprep.mubr.bf16.mxu0 %v15512_v10  ;;  %14168 = vmatpush3.bf16.msra.mxu0 %v15520_v61  ;;  %v684_v61 = vsel %vm15927_vm5, %v676_v41, %v683_v45  ;;  %v700_v62 = vor.u32 %v698_v34, %v16111_v46  ;;  %v712_v7 = vshrl.u32 %v13640_v54, 16  ;;  %v715_v8 = vshll.u32 %v13640_v54, 16  ;;  %v1292_v10 = vld [vmem:[#allocation2 + $0xc] sm:$0xf]  ;;  %v1293_v33 = vld [vmem:[#allocation2 + $0x10] sm:$0xf] }
  0x69   : > { %14169 = vmatprep.subr.bf16.mxu0 %v15523_v30  ;;  %879 = vst.msk [vmem:[#allocation2 + $0xa0] sm:$0xf] %vm786_vm2, %v684_v61  ;;  %v884_v3 = vsel %vm15936_vm6, %v692_v52, %v883_v48  ;;  %v706_v16 = vrot.slane %v704_v63, 7  ;;  %v1344_v19 = vshll.u32 %v1289_v55, 16  ;;  %v668_v24 = vrot.slane %v16093_v6, 4  ;;  %v15516_v55 = vld [vmem:[#allocation2 + $0x84] sm:$0xff]  }
  0x6a   : > { %v701_v14 = vsel %vm15927_vm5, %v693_v53, %v700_v62  ;;  %885 = vst [vmem:[#allocation2 + $0xa8] sm:$0xf] %v884_v3  ;;  %v16131_v25 = vrot.slane %v712_v7, 7  ;;  %v1350_v27 = vshll.u32 %v1290_v0, 16  ;;  %v1354_v32 = vshrl.u32 %v1290_v0, 16 }
  0x6b   : > { %886 = vst.msk [vmem:[#allocation2 + $0xac] sm:$0xf] %vm786_vm2, %v701_v14  ;;  %v709_v34 = vor.u32 %v707_v4, %v706_v16  ;;  %v710_v36 = vrot.slane %v706_v16, 4  ;;  %v1343_v39 = vrot.slane %v1341_v18, 4  ;;  %v803_v40 = vld [vmem:[#allocation2 + $0x20] sm:$0x1] }
  0x6c   : > { %14170 = vmatpush3.bf16.msra.mxu0 %v15523_v30  ;;  %v1346_v30 = vrot.slane %v1344_v19, 5  ;;  %v717_v41 = vor.u32 %v715_v8, %v16131_v25  ;;  %v16135_v42 = vrot.slane %v1350_v27, 5  ;;  %v1356_v45 = vrot.slane %v1354_v32, 4  ;;  %v1294_v48 = vld [vmem:[#allocation2 + $0x14] sm:$0x1] }
  0x6d   : > { %14203 = vmatprep.subr.bf16.mxu0 %v16118_v58  ;;  %v1295_v49 = vld [vmem:[#allocation2 + $0x18] sm:$0xf]  ;;  %v685_v50 = vrot.slane %v16103_v31, 4  ;;  %v891_v52 = vsel %vm15936_vm6, %v709_v34, %v890_v9  ;;  %v1365_v53 = vshrl.u32 %v1292_v10, 16  ;;  %v1296_v54 = vld [vmem:[#allocation2 + $0x1c] sm:$0xf]  ;;  %v804_v7 = vsel %vm15943_vm7, %v498_v20, %v803_v40 }
  0x6e   : > { %v718_v61 = vsel %vm15927_vm5, %v710_v36, %v717_v41  ;;  %892 = vst [vmem:[#allocation2 + $0xb4] sm:$0xf] %v891_v52  ;;  %v1360_v62 = vshll.u32 %v1291_v17, 16  ;;  %v1368_v63 = vshll.u32 %v1292_v10, 16  ;;  %v1374_v0 = vshll.u32 %v1293_v33, 16  ;;  %v15518_v9 = vld [vmem:[#allocation2 + $0x90] sm:$0xff]  }
  0x6f   : > { %14140 = vmatmul.mubr.bf16.gmra.mrb[16].mxu0 %v15513_v1  ;;  %893 = vst.msk [vmem:[#allocation2 + $0xb8] sm:$0xf] %vm786_vm2, %v718_v61  ;;  %v1347_v1 = vor.u32 %v1346_v30, %v1343_v39  ;;  %v1367_v3 = vrot.slane %v1365_v53, 4  ;;  %v1378_v4 = vshrl.u32 %v1293_v33, 16  ;;  %v810_v8 = vld [vmem:[#allocation2 + $0x2c] sm:$0x1]  ;;  %v1357_v14 = vor.u32 %v1356_v45, %v16135_v42 }
  0x70   : > { %14143 = vmatprep.mubr.bf16.mxu0 %v15515_v12  ;;  %v702_v12 = vrot.slane %v16111_v46, 4  ;;  %v1370_v16 = vrot.slane %v1368_v63, 5  ;;  %v16149_v17 = vrot.slane %v1374_v0, 5  ;;  %805 = vst [vmem:[#allocation2 + $0x20] sm:$0x1] %v804_v7  ;;  %v1384_v18 = vshll.u32 %v1294_v48, 16 }
  0x71   : > { %v1380_v10 = vrot.slane %v1378_v4, 4  ;;  %v1389_v19 = vshrl.u32 %v1295_v49, 16  ;;  %v1392_v27 = vshll.u32 %v1295_v49, 16  ;;  %v719_v32 = vrot.slane %v16131_v25, 4  ;;  %v1298_v20 = vld [vmem:[#allocation2 + $0x24] sm:$0xf] }
  0x72   : > { %v1362_v51 = vrot.slane %v1360_v62, 5  ;;  %v1371_v33 = vor.u32 %v1370_v16, %v1367_v3  ;;  %v1398_v34 = vshll.u32 %v1296_v54, 16  ;;  %v1348_v36 = vrot.slane %v1347_v1, 4  ;;  %v1299_v41 = vld [vmem:[#allocation2 + $0x28] sm:$0xf]  ;;  %v15519_v1 = vld [vmem:[#allocation2 + $0x9c] sm:$0xff]  }
  0x73   : > { %v1381_v39 = vor.u32 %v1380_v10, %v16149_v17  ;;  %v1391_v30 = vrot.slane %v1389_v19, 4  ;;  %v1394_v40 = vrot.slane %v1392_v27, 5  ;;  %v1358_v48 = vrot.slane %v1357_v14, 4  ;;  %v817_v61 = vld [vmem:[#allocation2 + $0x38] sm:$0x1]  ;;  %v15521_v27 = vld [vmem:[#allocation2 + $0xa8] sm:$0xff]  }
  0x74   : > { %v16159_v49 = vrot.slane %v1398_v34, 5  ;;  %v1402_v52 = vshrl.u32 %v1296_v54, 16  ;;  %v811_v53 = vsel %vm15943_vm7, %v515_v5, %v810_v8  ;;  %v1372_v62 = vrot.slane %v1371_v33, 4  ;;  %v1301_v10 = vld [vmem:[#allocation2 + $0x30] sm:$0xf] }
  0x75   : > { %v1386_v63 = vrot.slane %v1384_v18, 5  ;;  %812 = vst [vmem:[#allocation2 + $0x2c] sm:$0x1] %v811_v53  ;;  %v1416_v0 = vshll.u32 %v1298_v20, 16  ;;  %v1382_v3 = vrot.slane %v1381_v39, 4  ;;  %v1422_v7 = vshll.u32 %v1299_v41, 16 }
  0x76   : > { %v1404_v4 = vrot.slane %v1402_v52, 4  ;;  %v1426_v14 = vshrl.u32 %v1299_v41, 16  ;;  %v1353_v54 = vsel %vm16155_vm10, %v1348_v36, %v16135_v42  ;;  %v1395_v16 = vor.u32 %v1394_v40, %v1391_v30  ;;  %v1302_v5 = vld [vmem:[#allocation2 + $0x34] sm:$0xf]  ;;  %v824_v36 = vld [vmem:[#allocation2 + $0x44] sm:$0x1] }
  0x77   : > { %14144 = vmatmul.mubr.bf16.gmra.mrb[20].mxu0 %v15516_v55  ;;  %v1413_v55 = vshrl.u32 %v1298_v20, 16  ;;  %v1297_v2 = vld [vmem:[#allocation2 + $0x20] sm:$0x1]  ;;  %v1363_v8 = vsel %vm16155_vm10, %v1358_v48, %v1362_v51  ;;  %v1418_v19 = vrot.slane %v1416_v0, 5  ;;  %v16171_v34 = vrot.slane %v1422_v7, 5 }
  0x78   : > { %14147 = vmatprep.mubr.bf16.mxu0 %v15518_v9  ;;  %v1405_v9 = vor.u32 %v1404_v4, %v16159_v49  ;;  %v1408_v33 = vshll.u32 %v1297_v2, 16  ;;  %v1428_v20 = vrot.slane %v1426_v14, 4  ;;  %v818_v42 = vsel %vm15943_vm7, %v532_v26, %v817_v61  ;;  %v831_v14 = vld [vmem:[#allocation2 + $0x50] sm:$0x1]  ;;  %v880_v6 = vld [vmem:[#allocation2 + $0xa4] sm:$0x1] }
  0x79   : > { %v1415_v18 = vrot.slane %v1413_v55, 4  ;;  %v1377_v39 = vsel %vm16155_vm10, %v1372_v62, %v16149_v17  ;;  %v1387_v51 = vsel %vm16155_vm10, %v1382_v3, %v1386_v63  ;;  %819 = vst [vmem:[#allocation2 + $0x38] sm:$0x1] %v818_v42  ;;  %v1437_v30 = vshrl.u32 %v1301_v10, 16  ;;  %v1304_v55 = vld [vmem:[#allocation2 + $0x3c] sm:$0xf] }
  0x7a   : > { %v1440_v40 = vshll.u32 %v1301_v10, 16  ;;  %v12829_v41 = vcombine.low %v1353_v54, %v1363_v8  ;;  %v1396_v48 = vrot.slane %v1395_v16, 4  ;;  %v1446_v52 = vshll.u32 %v1302_v5, 16  ;;  %v1305_v62 = vld [vmem:[#allocation2 + $0x40] sm:$0xf] }
  0x7b   : > { %v1450_v53 = vshrl.u32 %v1302_v5, 16  ;;  %v1419_v0 = vor.u32 %v1418_v19, %v1415_v18  ;;  %v1439_v26 = vrot.slane %v1437_v30, 4  ;;  %v825_v17 = vsel %vm15943_vm7, %v549_v38, %v824_v36  ;;  %v1307_v38 = vld [vmem:[#allocation2 + $0x48] sm:$0xf]  ;;  %v15522_v18 = vld [vmem:[#allocation2 + $0xb4] sm:$0xff]  }
  0x7c   : > { %v1300_v15 = vld [vmem:[#allocation2 + $0x2c] sm:$0x1]  ;;  %v1442_v61 = vrot.slane %v1440_v40, 5  ;;  %v16186_v63 = vcombine.low %v1377_v39, %v1387_v51  ;;  %v1406_v3 = vrot.slane %v1405_v9, 4  ;;  %v1410_v4 = vrot.slane %v1408_v33, 5 }
  0x7d   : > { %v1429_v7 = vor.u32 %v1428_v20, %v16171_v34  ;;  %826 = vst [vmem:[#allocation2 + $0x44] sm:$0x1] %v825_v17  ;;  %v16189_v54 = vrot.slane %v1446_v52, 5  ;;  %v1452_v2 = vrot.slane %v1450_v53, 4  ;;  %v1461_v16 = vshrl.u32 %v1304_v55, 16 }
  0x7e   : > { %v1443_v10 = vor.u32 %v1442_v61, %v1439_v26  ;;  %v1464_v44 = vshll.u32 %v1304_v55, 16  ;;  %v1470_v5 = vshll.u32 %v1305_v62, 16  ;;  %v1474_v8 = vshrl.u32 %v1305_v62, 16  ;;  %v1308_v20 = vld [vmem:[#allocation2 + $0x4c] sm:$0xf] }
  0x7f   : > { %14148 = vmatmul.mubr.bf16.gmra.mrb[24].mxu0 %v15519_v1  ;;  %v1432_v1 = vshll.u32 %v1300_v15, 16  ;;  %v1401_v9 = vsel %vm16155_vm10, %v1396_v48, %v16159_v49  ;;  %v1420_v19 = vrot.slane %v1419_v0, 4  ;;  %v832_v33 = vsel %vm15943_vm7, %v566_v56, %v831_v14  ;;  %v838_v42 = vld [vmem:[#allocation2 + $0x5c] sm:$0x1]  ;;  %v1310_v55 = vld [vmem:[#allocation2 + $0x54] sm:$0xf] }
  0x80   : > { %14151 = vmatprep.mubr.bf16.mxu0 %v15521_v27  ;;  %v1453_v27 = vor.u32 %v1452_v2, %v16189_v54  ;;  %v1411_v36 = vsel %vm16155_vm10, %v1406_v3, %v1410_v4  ;;  %v1430_v39 = vrot.slane %v1429_v7, 4  ;;  %v1303_v51 = vld [vmem:[#allocation2 + $0x38] sm:$0x1]  ;;  %v1463_v30 = vrot.slane %v1461_v16, 4  ;;  %833 = vst [vmem:[#allocation2 + $0x50] sm:$0x1] %v832_v33 }
  0x81   : > { %v1466_v40 = vrot.slane %v1464_v44, 5  ;;  %v1434_v52 = vrot.slane %v1432_v1, 5  ;;  %v1456_v49 = vshll.u32 %v1303_v51, 16  ;;  %v16201_v48 = vrot.slane %v1470_v5, 5  ;;  %v1311_v2 = vld [vmem:[#allocation2 + $0x58] sm:$0xf] }
  0x82   : > { %v1476_v53 = vrot.slane %v1474_v8, 4  ;;  %v1444_v60 = vrot.slane %v1443_v10, 4  ;;  %v1454_v15 = vrot.slane %v1453_v27, 4  ;;  %v1485_v0 = vshrl.u32 %v1307_v38, 16  ;;  %v845_v27 = vld [vmem:[#allocation2 + $0x68] sm:$0x1] }
  0x83   : > { %v1488_v56 = vshll.u32 %v1307_v38, 16  ;;  %v1458_v26 = vrot.slane %v1456_v49, 5  ;;  %v1494_v17 = vshll.u32 %v1308_v20, 16  ;;  %v1498_v62 = vshrl.u32 %v1308_v20, 16  ;;  %v1314_v49 = vld [vmem:[#allocation2 + $0x64] sm:$0xf] }
  0x84   : > { %v1306_v61 = vld [vmem:[#allocation2 + $0x44] sm:$0x1]  ;;  %v839_v3 = vsel %vm15943_vm7, %v583_v35, %v838_v42  ;;  %v12831_v4 = vcombine.low %v1401_v9, %v1411_v36  ;;  %v1425_v7 = vsel %vm16155_vm10, %v1420_v19, %v16171_v34  ;;  %v1467_v14 = vor.u32 %v1466_v40, %v1463_v30 }
  0x85   : > { %v1487_v1 = vrot.slane %v1485_v0, 4  ;;  %840 = vst [vmem:[#allocation2 + $0x5c] sm:$0x1] %v839_v3  ;;  %v1477_v16 = vor.u32 %v1476_v53, %v16201_v48  ;;  %v1490_v10 = vrot.slane %v1488_v56, 5  ;;  %v16211_v44 = vrot.slane %v1494_v17, 5 }
  0x86   : > { %v1500_v5 = vrot.slane %v1498_v62, 4  ;;  %v1435_v13 = vsel %vm16155_vm10, %v1430_v39, %v1434_v52  ;;  %v1449_v35 = vsel %vm16155_vm10, %v1444_v60, %v16189_v54  ;;  %v1509_v8 = vshrl.u32 %v1310_v55, 16  ;;  %v1313_v39 = vld [vmem:[#allocation2 + $0x60] sm:$0xf]  ;;  %v15525_v54 = vld [vmem:[%s18256_s1 + $0x88] sm:$0xff]  }
  0x87   : > { %14152 = vmatmul.mubr.bf16.gmra.mrb[28].mxu0 %v15522_v18  ;;  %v1459_v34 = vsel %vm16155_vm10, %v1454_v15, %v1458_v26  ;;  %v1309_v38 = vld [vmem:[#allocation2 + $0x50] sm:$0x1]  ;;  %v1491_v18 = vor.u32 %v1490_v10, %v1487_v1  ;;  %v1512_v9 = vshll.u32 %v1310_v55, 16  ;;  %v1518_v19 = vshll.u32 %v1311_v2, 16  ;;  %v852_v0 = vld [vmem:[#allocation2 + $0x74] sm:$0x1] }
  0x88   : > { %14171 = vmatprep.mubr.bf16.mxu0 %v12829_v41  ;;  %v1480_v41 = vshll.u32 %v1306_v61, 16  ;;  %v1501_v33 = vor.u32 %v1500_v5, %v16211_v44  ;;  %v1504_v20 = vshll.u32 %v1309_v38, 16  ;;  %v1511_v42 = vrot.slane %v1509_v8, 4 }
  0x89   : > { %v1522_v36 = vshrl.u32 %v1311_v2, 16  ;;  %v12832_v51 = vcombine.low %v1425_v7, %v1435_v13  ;;  %v16224_v30 = vrot.slane %v1467_v14, 4  ;;  %v16226_v40 = vrot.slane %v1477_v16, 4 }
  0x8a   : > { %v1514_v52 = vrot.slane %v1512_v9, 5  ;;  %v16228_v53 = vrot.slane %v1480_v41, 5  ;;  %v16230_v55 = vrot.slane %v1518_v19, 5  ;;  %v846_v15 = vsel %vm15943_vm7, %v600_v47, %v845_v27  ;;  %v1316_v47 = vld [vmem:[#allocation2 + $0x6c] sm:$0xf] }
  0x8b   : > { %v1524_v60 = vrot.slane %v1522_v36, 4  ;;  %v12833_v56 = vcombine.low %v1449_v35, %v1459_v34  ;;  %847 = vst [vmem:[#allocation2 + $0x68] sm:$0x1] %v846_v15  ;;  %v1533_v17 = vshrl.u32 %v1313_v39, 16  ;;  %v1536_v62 = vshll.u32 %v1313_v39, 16  ;;  %v15527_v36 = vld [vmem:[%s18256_s1 + $0x98] sm:$0xff]  }
  0x8c   : > { %v1312_v26 = vld [vmem:[#allocation2 + $0x5c] sm:$0x1]  ;;  %v1515_v61 = vor.u32 %v1514_v52, %v1511_v42  ;;  %v16238_v3 = vrot.slane %v1491_v18, 4  ;;  %v16240_v7 = vrot.slane %v1501_v33, 4  ;;  %v16242_v29 = vrot.slane %v1504_v20, 5 }
  0x8d   : > { %v1542_v14 = vshll.u32 %v1314_v49, 16  ;;  %v1525_v1 = vor.u32 %v1524_v60, %v16230_v55  ;;  %v1528_v2 = vshll.u32 %v1312_v26, 16  ;;  %v1535_v16 = vrot.slane %v1533_v17, 4  ;;  %v859_v41 = vld [vmem:[#allocation2 + $0x80] sm:$0x1] }
  0x8e   : > { %v1538_v10 = vrot.slane %v1536_v62, 5  ;;  %v1483_v5 = vsel %vm16155_vm10, %v16226_v40, %v16228_v53  ;;  %v1546_v35 = vshrl.u32 %v1314_v49, 16  ;;  %v1516_v8 = vrot.slane %v1515_v61, 4  ;;  %v1319_v9 = vld [vmem:[#allocation2 + $0x78] sm:$0xf] }
  0x8f   : > { %14172 = vmatmul.mubr.bf16.vlgmr.msra.gmra.mrb[0].mxu0 %v16186_v63  ;;  %v15526_v63 = vld [vmem:[%s18256_s1 + $0x90] sm:$0xff]   ;;  %v16256_v13 = vrot.slane %v1542_v14, 5  ;;  %v853_v38 = vsel %vm15943_vm7, %v617_v21, %v852_v0  ;;  %v1557_v18 = vshrl.u32 %v1316_v47, 16  ;;  %v1320_v19 = vld [vmem:[#allocation2 + $0x7c] sm:$0xf]  ;;  %v1560_v33 = vshll.u32 %v1316_v47, 16 }
  0x90   : > { %14204 = vmatpush3.bf16.msra.mxu0 %v16118_v58  ;;  %14175 = vmatprep.mubr.bf16.mxu0 %v12831_v4  ;;  %v1317_v58 = vld [vmem:[#allocation2 + $0x70] sm:$0xf]  ;;  %v1473_v4 = vsel %vm16155_vm10, %v16224_v30, %v16201_v48  ;;  %v1539_v34 = vor.u32 %v1538_v10, %v1535_v16  ;;  %v1497_v48 = vsel %vm16155_vm10, %v16238_v3, %v16211_v44  ;;  %v1548_v27 = vrot.slane %v1546_v35, 4  ;;  %v866_v0 = vld [vmem:[#allocation2 + $0x8c] sm:$0x1] }
  0x91   : > { %14205 = vmatprep.subr.bf16.mxu0 %v15525_v54  ;;  %854 = vst [vmem:[#allocation2 + $0x74] sm:$0x1] %v853_v38  ;;  %v1566_v20 = vshll.u32 %v1317_v58, 16  ;;  %v1507_v57 = vsel %vm16155_vm10, %v16240_v7, %v16242_v29  ;;  %v1526_v21 = vrot.slane %v1525_v1, 4  ;;  %v1530_v42 = vrot.slane %v1528_v2, 5 }
  0x92   : > { %v1570_v39 = vshrl.u32 %v1317_v58, 16  ;;  %v1549_v44 = vor.u32 %v1548_v27, %v16256_v13  ;;  %v1559_v30 = vrot.slane %v1557_v18, 4  ;;  %v1562_v40 = vrot.slane %v1560_v33, 5  ;;  %v1322_v62 = vld [vmem:[#allocation2 + $0x84] sm:$0xf] }
  0x93   : > { %v860_v52 = vsel %vm15943_vm7, %v634_v43, %v859_v41  ;;  %v1521_v49 = vsel %vm16155_vm10, %v1516_v8, %v16230_v55  ;;  %v1540_v53 = vrot.slane %v1539_v34, 4  ;;  %v1581_v15 = vshrl.u32 %v1319_v9, 16  ;;  %v15528_v55 = vld [vmem:[%s18256_s1 + $0xa0] sm:$0xff]   ;;  %v873_v1 = vld [vmem:[#allocation2 + $0x98] sm:$0x1] }
  0x94   : > { %14206 = vmatpush3.bf16.msra.mxu0 %v15525_v54  ;;  %v1315_v54 = vld [vmem:[#allocation2 + $0x68] sm:$0x1]  ;;  %861 = vst [vmem:[#allocation2 + $0x80] sm:$0x1] %v860_v52  ;;  %v16281_v26 = vrot.slane %v1566_v20, 5  ;;  %v1572_v61 = vrot.slane %v1570_v39, 4  ;;  %v1531_v43 = vsel %vm16155_vm10, %v1526_v21, %v1530_v42  ;;  %v867_v47 = vsel %vm15943_vm7, %v651_v59, %v866_v0 }
  0x95   : > { %14207 = vmatprep.subr.bf16.mxu0 %v15526_v63  ;;  %v1552_v60 = vshll.u32 %v1315_v54, 16  ;;  %v1584_v17 = vshll.u32 %v1319_v9, 16  ;;  %v1590_v22 = vshll.u32 %v1320_v19, 16  ;;  %v1583_v3 = vrot.slane %v1581_v15, 4  ;;  %868 = vst [vmem:[#allocation2 + $0x8c] sm:$0x1] %v867_v47 }
  0x96   : > { %v1594_v7 = vshrl.u32 %v1320_v19, 16  ;;  %v12834_v2 = vcombine.low %v1473_v4, %v1483_v5  ;;  %v1605_v35 = vshrl.u32 %v1322_v62, 16  ;;  %v12835_v41 = vcombine.low %v1497_v48, %v1507_v57  ;;  %v1325_v59 = vld [vmem:[#allocation2 + $0x90] sm:$0xf]  ;;  %v15529_v9 = vld [vmem:[%s18256_s1 + $0xa8] sm:$0xff]  }
  0x97   : > { %14176 = vmatmul.mubr.bf16.gmra.mrb[4].mxu0 %v12832_v51  ;;  %v1550_v51 = vrot.slane %v1549_v44, 4  ;;  %v1554_v29 = vrot.slane %v1552_v60, 5  ;;  %v1586_v14 = vrot.slane %v1584_v17, 5  ;;  %v16292_v10 = vrot.slane %v1590_v22, 5  ;;  %v15530_v60 = vld [vmem:[%s18256_s1 + $0xb0] sm:$0xff]  }
  0x98   : > { %14179 = vmatprep.mubr.bf16.mxu0 %v12833_v56  ;;  %14208 = vmatpush3.bf16.msra.mxu0 %v15526_v63  ;;  %v1563_v56 = vor.u32 %v1562_v40, %v1559_v30  ;;  %v1323_v63 = vld [vmem:[#allocation2 + $0x88] sm:$0xf]  ;;  %v1318_v16 = vld [vmem:[#allocation2 + $0x74] sm:$0x1]  ;;  %v1596_v58 = vrot.slane %v1594_v7, 4  ;;  %v16294_v8 = vcombine.low %v1521_v49, %v1531_v43  ;;  %v1545_v37 = vsel %vm16155_vm10, %v1540_v53, %v16256_v13 }
  0x99   : > { %14209 = vmatprep.subr.bf16.mxu0 %v15527_v36  ;;  %v1573_v34 = vor.u32 %v1572_v61, %v16281_v26  ;;  %v1576_v38 = vshll.u32 %v1318_v16, 16  ;;  %v1587_v4 = vor.u32 %v1586_v14, %v1583_v3  ;;  %v1608_v5 = vshll.u32 %v1322_v62, 16  ;;  %v1328_v53 = vld [vmem:[#allocation2 + $0x9c] sm:$0xf]  ;;  %v1329_v3 = vld [vmem:[#allocation2 + $0xa0] sm:$0xf] }
  0x9a   : > { %v1614_v18 = vshll.u32 %v1323_v63, 16  ;;  %v1555_v19 = vsel %vm16155_vm10, %v1550_v51, %v1554_v29  ;;  %v16305_v48 = vrot.slane %v1563_v56, 4  ;;  %v1618_v33 = vshrl.u32 %v1323_v63, 16  ;;  %v15531_v16 = vld [vmem:[%s18256_s1 + $0xb8] sm:$0xff]  }
  0x9b   : > { %v1321_v27 = vld [vmem:[#allocation2 + $0x80] sm:$0x1]  ;;  %v874_v13 = vsel %vm15943_vm7, %v668_v24, %v873_v1  ;;  %v1597_v20 = vor.u32 %v1596_v58, %v16292_v10  ;;  %v1607_v21 = vrot.slane %v1605_v35, 4  ;;  %v1610_v42 = vrot.slane %v1608_v5, 5 }
  0x9c   : > { %14210 = vmatpush3.bf16.msra.mxu0 %v15527_v36  ;;  %v1600_v57 = vshll.u32 %v1321_v27, 16  ;;  %875 = vst [vmem:[#allocation2 + $0x98] sm:$0x1] %v874_v13  ;;  %v1326_v36 = vld [vmem:[#allocation2 + $0x94] sm:$0xf]  ;;  %v16312_v39 = vrot.slane %v1573_v34, 4  ;;  %v12837_v40 = vcombine.low %v1545_v37, %v1555_v19  ;;  %v1569_v15 = vsel %vm16155_vm10, %v16305_v48, %v16281_v26 }
  0x9d   : > { %14211 = vmatprep.subr.bf16.mxu0 %v15528_v55  ;;  %v16314_v54 = vrot.slane %v1614_v18, 5  ;;  %v1620_v44 = vrot.slane %v1618_v33, 4  ;;  %v1629_v30 = vshrl.u32 %v1325_v59, 16  ;;  %v1578_v52 = vrot.slane %v1576_v38, 5  ;;  %v1324_v0 = vld [vmem:[#allocation2 + $0x8c] sm:$0x1] }
  0x9e   : > { %v1588_v24 = vrot.slane %v1587_v4, 4  ;;  %v1632_v49 = vshll.u32 %v1325_v59, 16  ;;  %v1638_v17 = vshll.u32 %v1326_v36, 16  ;;  %v1642_v22 = vshrl.u32 %v1326_v36, 16  ;;  %v1331_v38 = vld [vmem:[#allocation2 + $0xa8] sm:$0xf] }
  0x9f   : > { %14180 = vmatmul.mubr.bf16.gmra.mrb[8].mxu0 %v12834_v2  ;;  %v1631_v61 = vrot.slane %v1629_v30, 4  ;;  %v1598_v62 = vrot.slane %v1597_v20, 4  ;;  %v1602_v43 = vrot.slane %v1600_v57, 5  ;;  %v1611_v51 = vor.u32 %v1610_v42, %v1607_v21  ;;  %v887_v2 = vld [vmem:[#allocation2 + $0xb0] sm:$0x1] }
  0xa0   : > { %14183 = vmatprep.mubr.bf16.mxu0 %v12835_v41  ;;  %14212 = vmatpush3.bf16.msra.mxu0 %v15528_v55  ;;  %v1634_v55 = vrot.slane %v1632_v49, 5  ;;  %v1621_v7 = vor.u32 %v1620_v44, %v16314_v54  ;;  %v1624_v29 = vshll.u32 %v1324_v0, 16  ;;  %v16324_v56 = vrot.slane %v1638_v17, 5  ;;  %v1332_v19 = vld [vmem:[#allocation2 + $0xac] sm:$0xf] }
  0xa1   : > { %14213 = vmatprep.subr.bf16.mxu0 %v15529_v9  ;;  %v1644_v14 = vrot.slane %v1642_v22, 4  ;;  %v1579_v26 = vsel %vm16155_vm10, %v16312_v39, %v1578_v52  ;;  %v1593_v47 = vsel %vm16155_vm10, %v1588_v24, %v16292_v10  ;;  %v881_v1 = vsel %vm15943_vm7, %v685_v50, %v880_v6  ;;  %v894_v36 = vld [vmem:[#allocation2 + $0xbc] sm:$0x1]  ;;  %v1334_v52 = vld [vmem:[#allocation2 + $0xb4] sm:$0xf] }
  0xa2   : > { %v1635_v63 = vor.u32 %v1634_v55, %v1631_v61  ;;  %882 = vst [vmem:[#allocation2 + $0xa4] sm:$0x1] %v881_v1  ;;  %v1653_v41 = vshrl.u32 %v1328_v53, 16  ;;  %v1656_v37 = vshll.u32 %v1328_v53, 16  ;;  %v1662_v34 = vshll.u32 %v1329_v3, 16 }
  0xa3   : > { %v1327_v58 = vld [vmem:[#allocation2 + $0x98] sm:$0x1]  ;;  %v1645_v35 = vor.u32 %v1644_v14, %v16324_v56  ;;  %v1603_v31 = vsel %vm16155_vm10, %v1598_v62, %v1602_v43  ;;  %v1612_v10 = vrot.slane %v1611_v51, 4  ;;  %v1666_v59 = vshrl.u32 %v1329_v3, 16  ;;  %v3186_v11 = vld [vmem:[#allocation2 + $0x80] sm:$0x1] }
  0xa4   : > { %14214 = vmatpush3.bf16.msra.mxu0 %v15529_v9  ;;  %v1648_v50 = vshll.u32 %v1327_v58, 16  ;;  %v1622_v4 = vrot.slane %v1621_v7, 4  ;;  %v1626_v5 = vrot.slane %v1624_v29, 5  ;;  %v1636_v18 = vrot.slane %v1635_v63, 4  ;;  %v1335_v24 = vld [vmem:[#allocation2 + $0xb8] sm:$0xf] }
  0xa5   : > { %14215 = vmatprep.subr.bf16.mxu0 %v15530_v60  ;;  %v1646_v9 = vrot.slane %v1645_v35, 4  ;;  %v1655_v27 = vrot.slane %v1653_v41, 4  ;;  %v1658_v33 = vrot.slane %v1656_v37, 5  ;;  %v16343_v13 = vrot.slane %v1662_v34, 5 }
  0xa6   : > { %v1650_v48 = vrot.slane %v1648_v50, 5  ;;  %v1668_v20 = vrot.slane %v1666_v59, 4  ;;  %v888_v57 = vsel %vm15943_vm7, %v702_v12, %v887_v2  ;;  %v1677_v21 = vshrl.u32 %v1331_v38, 16  ;;  %v2110_v50 = vld [vmem:[#allocation2] sm:$0xe] }
  0xa7   : > { %14184 = vmatmul.mubr.bf16.gmra.mrb[12].mxu0 %v16294_v8  ;;  %v16348_v8 = vld [vmem:[%s18256_s1 + $0xc0] sm:$0xff]   ;;  %v1680_v42 = vshll.u32 %v1331_v38, 16  ;;  %v12838_v39 = vcombine.low %v1569_v15, %v1579_v26  ;;  %889 = vst [vmem:[#allocation2 + $0xb0] sm:$0x1] %v888_v57  ;;  %v1686_v44 = vshll.u32 %v1332_v19, 16  ;;  %v1690_v30 = vshrl.u32 %v1332_v19, 16 }
  0xa8   : > { %14187 = vmatprep.mubr.bf16.mxu0 %v12837_v40  ;;  %14216 = vmatpush3.bf16.msra.mxu0 %v15530_v60  ;;  %v12839_v6 = vcombine.low %v1593_v47, %v1603_v31  ;;  %v1679_v40 = vrot.slane %v1677_v21, 4  ;;  %v895_v46 = vsel %vm15943_vm7, %v719_v32, %v894_v36  ;;  %v1617_v12 = vsel %vm16155_vm10, %v1612_v10, %v16314_v54  ;;  %v2111_v31 = vld [vmem:[#allocation2 + $0x4] sm:$0xf]  ;;  %v2117_v36 = vld [vmem:[#allocation2 + $0x1c] sm:$0xf] }
  0xa9   : > { %14217 = vmatprep.subr.bf16.mxu0 %v15531_v16  ;;  %v1330_v49 = vld [vmem:[#allocation2 + $0xa4] sm:$0x1]  ;;  %v1682_v53 = vrot.slane %v1680_v42, 5  ;;  %v1688_v60 = vrot.slane %v1686_v44, 5  ;;  %v1692_v0 = vrot.slane %v1690_v30, 4  ;;  %v1627_v15 = vsel %vm16155_vm10, %v1622_v4, %v1626_v5 }
  0xaa   : > { %v1641_v61 = vsel %vm16155_vm10, %v1636_v18, %v16324_v56  ;;  %896 = vst [vmem:[#allocation2 + $0xbc] sm:$0x1] %v895_v46  ;;  %v1651_v25 = vsel %vm16155_vm10, %v1646_v9, %v1650_v48  ;;  %v1659_v17 = vor.u32 %v1658_v33, %v1655_v27  ;;  %v1669_v32 = vor.u32 %v1668_v20, %v16343_v13  ;;  %v2112_v48 = vld [vmem:[#allocation2 + $0x8] sm:$0x1]  ;;  %v2116_v46 = vld [vmem:[#allocation2 + $0x18] sm:$0xe] }
  0xab   : > { %v1672_v22 = vshll.u32 %v1330_v49, 16  ;;  %v1701_v62 = vshrl.u32 %v1334_v52, 16  ;;  %v1704_v43 = vshll.u32 %v1334_v52, 16  ;;  %v1710_v54 = vshll.u32 %v1335_v24, 16  ;;  %v2115_v52 = vld [vmem:[#allocation2 + $0x14] sm:$0x1] }
  0xac   : > { %14218 = vmatpush3.bf16.msra.mxu0 %v15531_v16  ;;  %v1714_v51 = vshrl.u32 %v1335_v24, 16  ;;  %v1683_v55 = vor.u32 %v1682_v53, %v1679_v40  ;;  %v1693_v3 = vor.u32 %v1692_v0, %v1688_v60  ;;  %v12840_v7 = vcombine.low %v1617_v12, %v1627_v15  ;;  %v2113_v40 = vld [vmem:[#allocation2 + $0xc] sm:$0xe]  ;;  %v2118_v12 = vld [vmem:[#allocation2 + $0x20] sm:$0x1] }
  0xad   : > { %14251 = vmatprep.subr.bf16.mxu0 %v16348_v8  ;;  %v12841_v29 = vcombine.low %v1641_v61, %v1651_v25  ;;  %v1660_v56 = vrot.slane %v1659_v17, 4  ;;  %v1670_v26 = vrot.slane %v1669_v32, 4  ;;  %v1674_v47 = vrot.slane %v1672_v22, 5  ;;  %v2120_v32 = vld [vmem:[#allocation2 + $0x28] sm:$0xf] }
  0xae   : > { %v1333_v14 = vld [vmem:[#allocation2 + $0xb0] sm:$0x1]  ;;  %v1703_v1 = vrot.slane %v1701_v62, 4  ;;  %v1706_v2 = vrot.slane %v1704_v43, 5  ;;  %v1712_v16 = vrot.slane %v1710_v54, 5  ;;  %v1716_v58 = vrot.slane %v1714_v51, 4 }
  0xaf   : > { %14188 = vmatmul.mubr.bf16.gmra.mrb[16].mxu0 %v12838_v39  ;;  %v1696_v63 = vshll.u32 %v1333_v14, 16  ;;  %v1684_v35 = vrot.slane %v1683_v55, 4  ;;  %v1694_v41 = vrot.slane %v1693_v3, 4  ;;  %v1665_v10 = vsel %vm16155_vm10, %v1660_v56, %v16343_v13  ;;  %v2114_v13 = vld [vmem:[#allocation2 + $0x10] sm:$0xf] }
  0xb0   : > { %14191 = vmatprep.mubr.bf16.mxu0 %v12839_v6  ;;  %v1675_v59 = vsel %vm16155_vm10, %v1670_v26, %v1674_v47  ;;  %v1707_v38 = vor.u32 %v1706_v2, %v1703_v1  ;;  %v1717_v4 = vor.u32 %v1716_v58, %v1712_v16  ;;  %v2211_v19 = vrot.slane %v2111_v31, 5  ;;  %v2119_v51 = vld [vmem:[#allocation2 + $0x24] sm:$0xe]  ;;  %v2121_v55 = vld [vmem:[#allocation2 + $0x2c] sm:$0x1] }
  0xb1   : > { %v1698_v37 = vrot.slane %v1696_v63, 5  ;;  %v1336_v34 = vld [vmem:[#allocation2 + $0xbc] sm:$0x1]  ;;  %v1689_v18 = vsel %vm16155_vm10, %v1684_v35, %v1688_v60  ;;  %v12842_v27 = vcombine.low %v1665_v10, %v1675_v59  ;;  %v12853_v33 = vrot.slane %v2110_v50, 9  ;;  %v2123_v3 = vld [vmem:[#allocation2 + $0x34] sm:$0xf] }
  0xb2   : > { %v1720_v5 = vshll.u32 %v1336_v34, 16  ;;  %v1708_v57 = vrot.slane %v1707_v38, 4  ;;  %v1718_v21 = vrot.slane %v1717_v4, 4  ;;  %v2213_v39 = vrot.slane %v2211_v19, 4  ;;  %v16391_v14 = vld [vmem:[#allocation2 + $0x40] sm:$0xf] }
  0xb3   : > { %v1699_v9 = vsel %vm16155_vm10, %v1694_v41, %v1698_v37  ;;  %v2214_v44 = vrot.slane %v2112_v48, 5  ;;  %v18276_v30 = vmov 0  ;;  %v2218_v6 = vrot.slane %v2114_v13, 5  ;;  %v16397_v47 = vld [vmem:[#allocation2 + $0x3c] sm:$0xe] }
  0xb4   : > { %v12843_v20 = vcombine.low %v1689_v18, %v1699_v9  ;;  %v1722_v42 = vrot.slane %v1720_v5, 5  ;;  %v18277_v30 = vsel %vm16379_vm13, 4294967295, %v18276_v30  ;;  %v1713_v24 = vsel %vm16155_vm10, %v1708_v57, %v1712_v16  ;;  %v16399_v63 = vld [vmem:[#allocation2 + $0x44] sm:$0x1]  ;;  %v16401_v1 = vld [vmem:[#allocation2 + $0x4c] sm:$0xf] }
  0xb5   : > { %18278 = vst [vmem:[#allocation6_spill] sm:$0xff] %v18277_v30  ;;  %v2225_v53 = vrot.slane %v2117_v36, 5  ;;  %v2212_v60 = vsel %vm16379_vm13, %v12853_v33, %v2211_v19  ;;  %v2215_v0 = vsel %vm16379_vm13, %v2213_v39, %v2214_v44  ;;  %v12854_v15 = vrot.slane %v2113_v40, 9  ;;  %v2128_v37 = vld [vmem:[#allocation2 + $0x48] sm:$0xe] }
  0xb6   : > { %v1723_v49 = vsel %vm16155_vm10, %v1718_v21, %v1722_v42  ;;  %v2220_v61 = vrot.slane %v2218_v6, 4  ;;  %v2221_v25 = vrot.slane %v2115_v52, 5  ;;  %v12885_v22 = vcombine.low %v2212_v60, %v2215_v0  ;;  %v2130_v34 = vld [vmem:[#allocation2 + $0x50] sm:$0x1]  ;;  %v16408_v59 = vld [vmem:[#allocation2 + $0x54] sm:$0xe] }
  0xb7   : > { %14192 = vmatmul.mubr.bf16.gmra.mrb[20].mxu0 %v12840_v7  ;;  %v12844_v17 = vcombine.low %v1713_v24, %v1723_v49  ;;  %v12855_v62 = vrot.slane %v2116_v46, 9  ;;  %v2227_v43 = vrot.slane %v2225_v53, 4  ;;  %v2228_v54 = vrot.slane %v2118_v12, 5  ;;  %v2122_v7 = vld [vmem:[#allocation2 + $0x30] sm:$0xe] }
  0xb8   : > { %14195 = vmatprep.mubr.bf16.mxu0 %v12841_v29  ;;  %v2124_v29 = vld [vmem:[#allocation2 + $0x38] sm:$0x1]  ;;  %v2219_v56 = vsel %vm16379_vm13, %v12854_v15, %v2218_v6  ;;  %v2222_v26 = vsel %vm16379_vm13, %v2220_v61, %v2221_v25  ;;  %v2232_v2 = vrot.slane %v2120_v32, 5  ;;  %v2239_v16 = vrot.slane %v2123_v3, 5  ;;  %v16414_v19 = vld [vmem:[#allocation2 + $0x5c] sm:$0x1] }
  0xb9   : > { %v2226_v58 = vsel %vm16379_vm13, %v12855_v62, %v2225_v53  ;;  %v2229_v35 = vsel %vm16379_vm13, %v2227_v43, %v2228_v54  ;;  %v2246_v41 = vrot.slane %v16391_v14, 5  ;;  %v12886_v31 = vcombine.low %v2219_v56, %v2222_v26  ;;  %v16410_v38 = vld [vmem:[#allocation2 + $0x58] sm:$0xf]  ;;  %v16416_v48 = vld [vmem:[#allocation2 + $0x60] sm:$0xe]  ;;  %v364_v52 = vld [vmem:[%s15915_s29 + $0xf0] sm:$0xff] }
  0xba   : > { %v12856_v10 = vrot.slane %v2119_v51, 9  ;;  %v2235_v50 = vrot.slane %v2121_v55, 5  ;;  %v12857_v4 = vrot.slane %v2122_v7, 9  ;;  %v2242_v5 = vrot.slane %v2124_v29, 5  ;;  %v16424_v42 = vld [vmem:[#allocation2 + $0x68] sm:$0x1] }
  0xbb   : > { %v12858_v18 = vrot.slane %v16397_v47, 9  ;;  %v2253_v9 = vrot.slane %v16401_v1, 5  ;;  %v12887_v33 = vcombine.low %v2226_v58, %v2229_v35  ;;  %v2234_v13 = vrot.slane %v2232_v2, 4  ;;  %v15534_v60 = vld [vmem:[%s18256_s1 + $0xd0] sm:$0xff]   ;;  %v365_v51 = vld [vmem:[%s15915_s29 + $0xf8] sm:$0xff]  ;;  %v15536_v55 = vld [vmem:[%s18256_s1 + $0xe0] sm:$0xff]  }
  0xbc   : > { %v2241_v57 = vrot.slane %v2239_v16, 4  ;;  %v2249_v21 = vrot.slane %v16399_v63, 5  ;;  %v2248_v36 = vrot.slane %v2246_v41, 4  ;;  %v12859_v39 = vrot.slane %v2128_v37, 9  ;;  %v2138_v47 = vld [vmem:[#allocation2 + $0x70] sm:$0xf] }
  0xbd   : > { %v2256_v44 = vrot.slane %v2130_v34, 5  ;;  %v2260_v6 = vrot.slane %v16410_v38, 5  ;;  %v12860_v40 = vrot.slane %v16408_v59, 9  ;;  %v2255_v24 = vrot.slane %v2253_v9, 4  ;;  %v15537_v63 = vld [vmem:[%s18256_s1 + $0xe8] sm:$0xff]  }
  0xbe   : > { %v2233_v53 = vsel %vm16379_vm13, %v12856_v10, %v2232_v2  ;;  %v2263_v0 = vrot.slane %v16414_v19, 5  ;;  %v12861_v46 = vrot.slane %v16416_v48, 9  ;;  %v2236_v12 = vsel %vm16379_vm13, %v2234_v13, %v2235_v50  ;;  %v2141_v2 = vld [vmem:[#allocation2 + $0x7c] sm:$0xf]  ;;  %v897_v37 = vld [vmem:[#allocation2 + $0xc0] sm:$0xf] }
  0xbf   : > { %14196 = vmatmul.mubr.bf16.gmra.mrb[24].mxu0 %v12842_v27  ;;  %v16418_v27 = vld [vmem:[#allocation2 + $0x64] sm:$0xf]  ;;  %v2262_v15 = vrot.slane %v2260_v6, 4  ;;  %v2270_v61 = vrot.slane %v16424_v42, 5  ;;  %v13641_v25 = vpack.c.bf16 %v364_v52, %v364_v52  ;;  %v2243_v32 = vsel %vm16379_vm13, %v2241_v57, %v2242_v5  ;;  %v2137_v50 = vld [vmem:[#allocation2 + $0x6c] sm:$0xe] }
  0xc0   : > { %14199 = vmatprep.mubr.bf16.mxu0 %v12843_v20  ;;  %v15533_v20 = vld [vmem:[%s18256_s1 + $0xc8] sm:$0xff]   ;;  %v2267_v49 = vrot.slane %v16418_v27, 5  ;;  %v12888_v43 = vcombine.low %v2233_v53, %v2236_v12  ;;  %v2247_v3 = vsel %vm16379_vm13, %v12858_v18, %v2246_v41  ;;  %v2250_v7 = vsel %vm16379_vm13, %v2248_v36, %v2249_v21  ;;  %v15538_v48 = vld [vmem:[%s18256_s1 + $0xf0] sm:$0xff]   ;;  %v2142_v13 = vld [vmem:[#allocation2 + $0x80] sm:$0x1] }
  0xc1   : > { %v721_v62 = vshrl.u32 %v13641_v25, 16  ;;  %v2254_v29 = vsel %vm16379_vm13, %v12859_v39, %v2253_v9  ;;  %v2257_v14 = vsel %vm16379_vm13, %v2255_v24, %v2256_v44  ;;  %v13642_v56 = vpack.c.bf16 %v365_v51, %v365_v51  ;;  %v2139_v9 = vld [vmem:[#allocation2 + $0x74] sm:$0x1]  ;;  %v2144_v44 = vld [vmem:[#allocation2 + $0x88] sm:$0xf] }
  0xc2   : > { %v12890_v26 = vcombine.low %v2247_v3, %v2250_v7  ;;  %v12891_v1 = vcombine.low %v2254_v29, %v2257_v14  ;;  %v724_v58 = vshll.u32 %v13641_v25, 16  ;;  %v2261_v34 = vsel %vm16379_vm13, %v12860_v40, %v2260_v6  ;;  %v2153_v14 = vld [vmem:[#allocation2 + $0xac] sm:$0xf] }
  0xc3   : > { %v729_v35 = vshrl.u32 %v13642_v56, 16  ;;  %v732_v41 = vshll.u32 %v13642_v56, 16  ;;  %v2264_v10 = vsel %vm16379_vm13, %v2262_v15, %v2263_v0  ;;  %v2274_v59 = vrot.slane %v2138_v47, 5  ;;  %v2143_v0 = vld [vmem:[#allocation2 + $0x84] sm:$0xe] }
  0xc4   : > { %v2268_v5 = vsel %vm16379_vm13, %v12861_v46, %v2267_v49  ;;  %v2281_v19 = vrot.slane %v2141_v2, 5  ;;  %v12892_v57 = vcombine.low %v2261_v34, %v2264_v10  ;;  %v12862_v21 = vrot.slane %v2137_v50, 9  ;;  %v2149_v2 = vld [vmem:[#allocation2 + $0x9c] sm:$0xe] }
  0xc5   : > { %v2276_v36 = vrot.slane %v2274_v59, 4  ;;  %v2277_v39 = vrot.slane %v2139_v9, 5  ;;  %v2284_v24 = vrot.slane %v2142_v13, 5  ;;  %v2288_v46 = vrot.slane %v2144_v44, 5  ;;  %v2155_v13 = vld [vmem:[#allocation2 + $0xb4] sm:$0xe] }
  0xc6   : > { %v2283_v52 = vrot.slane %v2281_v19, 4  ;;  %v2275_v53 = vsel %vm16379_vm13, %v12862_v21, %v2274_v59 }
  0xc7   : > { %14200 = vmatmul.mubr.bf16.gmra.mrb[28].mxu0 %v12844_v17  ;;  %v2240_v17 = vsel %vm16379_vm13, %v12857_v4, %v2239_v16  ;;  %v723_v16 = vrot.slane %v721_v62, 7  ;;  %v16467_v4 = vrot.slane %v729_v35, 7  ;;  %v2290_v51 = vrot.slane %v2288_v46, 4  ;;  %v2152_v35 = vld [vmem:[#allocation2 + $0xa8] sm:$0xe] }
  0xc8   : > { %14219 = vmatprep.mubr.bf16.mxu0 %v12885_v22  ;;  %v2269_v22 = vrot.slane %v2267_v49, 4  ;;  %v12889_v54 = vcombine.low %v2240_v17, %v2243_v32  ;;  %v2147_v49 = vld [vmem:[#allocation2 + $0x94] sm:$0xf]  ;;  %v2285_v15 = vsel %vm16379_vm13, %v2283_v52, %v2284_v24  ;;  %v16496_v17 = vld [vmem:[%s18256_s1 + $0x100] sm:$0xff]   ;;  %v2146_v32 = vld [vmem:[#allocation2 + $0x90] sm:$0xe] }
  0xc9   : > { %v727_v38 = vrot.slane %v723_v16, 4  ;;  %v2295_v25 = vrot.slane %v2147_v49, 5  ;;  %v12865_v3 = vrot.slane %v2146_v32, 9  ;;  %v12867_v59 = vrot.slane %v2152_v35, 9  ;;  %v15540_v52 = vld [vmem:[#allocation2 + $0xc] sm:$0xff]   ;;  %v15541_v49 = vld [vmem:[#allocation2 + $0x18] sm:$0xff]  }
  0xca   : > { %v2271_v18 = vsel %vm16379_vm13, %v2269_v22, %v2270_v61  ;;  %v2145_v61 = vld [vmem:[#allocation2 + $0x8c] sm:$0x1]  ;;  %v2148_v22 = vld [vmem:[#allocation2 + $0x98] sm:$0x1]  ;;  %v3161_v32 = vld [vmem:[#allocation2 + $0x1c] sm:$0xf] }
  0xcb   : > { %v12893_v42 = vcombine.low %v2268_v5, %v2271_v18  ;;  %v2297_v7 = vrot.slane %v2295_v25, 4  ;;  %v2298_v29 = vrot.slane %v2148_v22, 5  ;;  %v2156_v18 = vld [vmem:[#allocation2 + $0xb8] sm:$0xf]  ;;  %v3157_v24 = vld [vmem:[#allocation2 + $0xc] sm:$0xf] }
  0xcc   : > { %v3159_v22 = vld [vmem:[#allocation2 + $0x14] sm:$0x1] }
  0xcf   : > { %14220 = vmatmul.mubr.bf16.vlgmr.msra.gmra.mrb[0].mxu0 %v12886_v31  ;;  %v726_v31 = vor.u32 %v724_v58, %v723_v16  ;;  %v2151_v16 = vld [vmem:[#allocation2 + $0xa4] sm:$0x1]  ;;  %v2309_v58 = vrot.slane %v2153_v14, 5  ;;  %v3164_v14 = vld [vmem:[#allocation2 + $0x28] sm:$0xf] }
  0xd0   : > { %14252 = vmatpush3.bf16.msra.mxu0 %v16348_v8  ;;  %14223 = vmatprep.mubr.bf16.mxu0 %v12887_v33  ;;  %v15535_v8 = vld [vmem:[%s18256_s1 + $0xd8] sm:$0xff]   ;;  %v2305_v50 = vrot.slane %v2151_v16, 5  ;;  %v3225_v16 = vshll.u32 %v3159_v22, 16 }
  0xd1   : > { %14253 = vmatprep.subr.bf16.mxu0 %v15533_v20  ;;  %v898_v27 = vsel %vm15936_vm6, %v726_v31, %v897_v37  ;;  %v2140_v33 = vld [vmem:[#allocation2 + $0x78] sm:$0xe]  ;;  %v12866_v31 = vrot.slane %v2149_v2, 9 }
  0xd2   : > { %899 = vst [vmem:[#allocation2 + $0xc0] sm:$0xf] %v898_v27  ;;  %v12863_v40 = vrot.slane %v2140_v33, 9  ;;  %v2310_v27 = vsel %vm16379_vm13, %v12867_v59, %v2309_v58 }
  0xd4   : > { %14254 = vmatpush3.bf16.msra.mxu0 %v15533_v20  ;;  %v734_v20 = vor.u32 %v732_v41, %v16467_v4  ;;  %v2282_v12 = vsel %vm16379_vm13, %v12863_v40, %v2281_v19  ;;  %v2154_v41 = vld [vmem:[#allocation2 + $0xb0] sm:$0x1] }
  0xd5   : > { %14255 = vmatprep.subr.bf16.mxu0 %v15534_v60  ;;  %v2312_v5 = vrot.slane %v2154_v41, 5 }
  0xd6   : > { %v735_v6 = vsel %vm15927_vm5, %v727_v38, %v734_v20  ;;  %v2311_v38 = vrot.slane %v2309_v58, 4  ;;  %v2157_v20 = vld [vmem:[#allocation2 + $0xbc] sm:$0x1]  ;;  %v3166_v58 = vld [vmem:[#allocation2 + $0x30] sm:$0xf] }
  0xd7   : > { %14224 = vmatmul.mubr.bf16.gmra.mrb[4].mxu0 %v12888_v43  ;;  %900 = vst.msk [vmem:[#allocation2 + $0xc4] sm:$0xf] %vm786_vm2, %v735_v6  ;;  %v2150_v43 = vld [vmem:[#allocation2 + $0xa0] sm:$0xf]  ;;  %vm17244_vm2 = vmand %vm6958_vm15, %vm462_vm0 }
  0xd8   : > { %14227 = vmatprep.mubr.bf16.mxu0 %v12889_v54  ;;  %14256 = vmatpush3.bf16.msra.mxu0 %v15534_v60  ;;  %v2278_v60 = vsel %vm16379_vm13, %v2276_v36, %v2277_v39  ;;  %v12864_v54 = vrot.slane %v2143_v0, 9  ;;  %v2302_v47 = vrot.slane %v2150_v43, 5  ;;  %v2313_v33 = vsel %vm16379_vm13, %v2311_v38, %v2312_v5  ;;  %v3165_v5 = vld [vmem:[#allocation2 + $0x2c] sm:$0x1] }
  0xd9   : > { %14257 = vmatprep.subr.bf16.mxu0 %v15535_v8  ;;  %v12894_v62 = vcombine.low %v2275_v53, %v2278_v60  ;;  %v12899_v21 = vcombine.low %v2310_v27, %v2313_v33  ;;  %v2319_v39 = vrot.slane %v2157_v20, 5  ;;  %v15543_v53 = vld [vmem:[#allocation2 + $0x24] sm:$0xff]   ;;  %v3206_v60 = vshrl.u32 %v3157_v24, 16 }
  0xda   : > { %v2289_v56 = vsel %vm16379_vm13, %v12864_v54, %v2288_v46  ;;  %v2304_v10 = vrot.slane %v2302_v47, 4  ;;  %v2303_v9 = vsel %vm16379_vm13, %v12866_v31, %v2302_v47  ;;  %v3209_v0 = vshll.u32 %v3157_v24, 16  ;;  %v15545_v46 = vld [vmem:[%s18256_s1 + $0x108] sm:$0xff]   ;;  %v3167_v31 = vld [vmem:[#allocation2 + $0x34] sm:$0xf] }
  0xdb   : > { %v736_v27 = vrot.slane %v16467_v4, 4  ;;  %v3287_v33 = vshll.u32 %v3167_v31, 16  ;;  %v15547_v20 = vld [vmem:[#allocation2 + $0x48] sm:$0xff]   ;;  %v3273_v24 = vshll.u32 %v3165_v5, 16 }
  0xdc   : > { %14258 = vmatpush3.bf16.msra.mxu0 %v15535_v8  ;;  %v12895_v8 = vcombine.low %v2282_v12, %v2285_v15  ;;  %v2306_v19 = vsel %vm16379_vm13, %v2304_v10, %v2305_v50  ;;  %v3211_v43 = vrot.slane %v3209_v0, 5 }
  0xdd   : > { %14259 = vmatprep.subr.bf16.mxu0 %v15536_v55 }
  0xdf   : > { %14228 = vmatmul.mubr.bf16.gmra.mrb[8].mxu0 %v12890_v26 }
  0xe0   : > { %14231 = vmatprep.mubr.bf16.mxu0 %v12891_v1  ;;  %14260 = vmatpush3.bf16.msra.mxu0 %v15536_v55  ;;  %v2291_v55 = vrot.slane %v2145_v61, 5  ;;  %v2299_v1 = vsel %vm16379_vm13, %v2297_v7, %v2298_v29  ;;  %v3160_v61 = vld [vmem:[#allocation2 + $0x18] sm:$0xf]  ;;  %v3239_v7 = vshll.u32 %v3161_v32, 16  ;;  %v3243_v29 = vshrl.u32 %v3161_v32, 16 }
  0xe1   : > { %14261 = vmatprep.subr.bf16.mxu0 %v15537_v63 }
  0xe2   : > { %v2292_v26 = vsel %vm16379_vm13, %v2290_v51, %v2291_v55  ;;  %v3230_v55 = vshrl.u32 %v3160_v61, 16  ;;  %v16532_v50 = vrot.slane %v3239_v7, 5  ;;  %v3245_v59 = vrot.slane %v3243_v29, 4 }
  0xe3   : > { %v12896_v37 = vcombine.low %v2289_v56, %v2292_v26  ;;  %v15544_v56 = vld [vmem:[#allocation2 + $0x30] sm:$0xff]   ;;  %v3162_v26 = vld [vmem:[#allocation2 + $0x20] sm:$0x1] }
  0xe4   : > { %14262 = vmatpush3.bf16.msra.mxu0 %v15537_v63  ;;  %v2296_v63 = vsel %vm16379_vm13, %v12865_v3, %v2295_v25  ;;  %v15548_v25 = vld [vmem:[%s18256_s1 + $0x110] sm:$0xff]   ;;  %v3233_v3 = vshll.u32 %v3160_v61, 16  ;;  %v3232_v35 = vrot.slane %v3230_v55, 4  ;;  %v3249_v38 = vshll.u32 %v3162_v26, 16 }
  0xe5   : > { %14263 = vmatprep.subr.bf16.mxu0 %v15538_v48  ;;  %v12897_v34 = vcombine.low %v2296_v63, %v2299_v1  ;;  %v15551_v1 = vld [vmem:[%s18256_s1 + $0x118] sm:$0xff]   ;;  %v16549_v61 = vrot.slane %v3287_v33, 5 }
  0xe6   : > { %v3235_v41 = vrot.slane %v3233_v3, 5  ;;  %v16546_v4 = vrot.slane %v3249_v38, 5  ;;  %v3171_v3 = vld [vmem:[#allocation2 + $0x44] sm:$0x1]  ;;  %v3174_v38 = vld [vmem:[#allocation2 + $0x50] sm:$0x1] }
  0xe7   : > { %14232 = vmatmul.mubr.bf16.gmra.mrb[12].mxu0 %v12892_v57  ;;  %v12898_v57 = vcombine.low %v2303_v9, %v2306_v19  ;;  %v3278_v19 = vshrl.u32 %v3166_v58, 16 }
  0xe8   : > { %14235 = vmatprep.mubr.bf16.mxu0 %v12893_v42  ;;  %14264 = vmatpush3.bf16.msra.mxu0 %v15538_v48  ;;  %v2316_v48 = vrot.slane %v2156_v18, 5  ;;  %v12868_v42 = vrot.slane %v2155_v13, 9  ;;  %v3291_v13 = vshrl.u32 %v3167_v31, 16 }
  0xe9   : > { %14265 = vmatprep.subr.bf16.mxu0 %v15539_v23 }
  0xea   : > { %v2318_v36 = vrot.slane %v2316_v48, 4  ;;  %v2317_v44 = vsel %vm16379_vm13, %v12868_v42, %v2316_v48  ;;  %v3281_v48 = vshll.u32 %v3166_v58, 16  ;;  %v3236_v42 = vor.u32 %v3235_v41, %v3232_v35  ;;  %v3175_v35 = vld [vmem:[#allocation2 + $0x54] sm:$0xf]  ;;  %v3176_v41 = vld [vmem:[#allocation2 + $0x58] sm:$0xf] }
  0xeb   : > { %v3353_v33 = vshll.u32 %v3175_v35, 16 }
  0xec   : > { %14266 = vmatpush3.bf16.msra.mxu0 %v15539_v23  ;;  %v2320_v6 = vsel %vm16379_vm13, %v2318_v36, %v2319_v39  ;;  %v3158_v23 = vld [vmem:[#allocation2 + $0x10] sm:$0xf]  ;;  %v3283_v0 = vrot.slane %v3281_v48, 5  ;;  %v3178_v48 = vld [vmem:[#allocation2 + $0x60] sm:$0xf] }
  0xed   : > { %14299 = vmatprep.subr.bf16.mxu0 %v16496_v17  ;;  %v12900_v40 = vcombine.low %v2317_v44, %v2320_v6  ;;  %v3215_v12 = vshll.u32 %v3158_v23, 16  ;;  %v3219_v15 = vshrl.u32 %v3158_v23, 16  ;;  %v3169_v44 = vld [vmem:[#allocation2 + $0x3c] sm:$0xf]  ;;  %v15549_v6 = vld [vmem:[#allocation2 + $0x54] sm:$0xff]  }
  0xee   : > { %v3170_v23 = vld [vmem:[#allocation2 + $0x40] sm:$0xf]  ;;  %v3302_v32 = vshrl.u32 %v3169_v44, 16  ;;  %v3305_v22 = vshll.u32 %v3169_v44, 16 }
  0xef   : > { %14236 = vmatmul.mubr.bf16.gmra.mrb[16].mxu0 %v12894_v62  ;;  %v3208_v62 = vrot.slane %v3206_v60, 4  ;;  %v16526_v54 = vrot.slane %v3215_v12, 5  ;;  %v3221_v51 = vrot.slane %v3219_v15, 4  ;;  %v3280_v60 = vrot.slane %v3278_v19, 4  ;;  %v901_v12 = vld [vmem:[#allocation2 + $0xc8] sm:$0x1] }
  0xf0   : > { %14239 = vmatprep.mubr.bf16.mxu0 %v12895_v8  ;;  %v3163_v8 = vld [vmem:[#allocation2 + $0x24] sm:$0xf]  ;;  %v3168_v15 = vld [vmem:[#allocation2 + $0x38] sm:$0x1]  ;;  %v3315_v55 = vshrl.u32 %v3170_v23, 16  ;;  %v3307_v58 = vrot.slane %v3305_v22, 5 }
  0xf1   : > { %v3254_v47 = vshrl.u32 %v3163_v8, 16  ;;  %v3257_v63 = vshll.u32 %v3163_v8, 16  ;;  %v3212_v2 = vor.u32 %v3211_v43, %v3208_v62  ;;  %v3222_v10 = vor.u32 %v3221_v51, %v16526_v54  ;;  %v15557_v62 = vld [vmem:[%s18256_s1 + $0x128] sm:$0xff]   ;;  %v3177_v22 = vld [vmem:[#allocation2 + $0x5c] sm:$0x1] }
  0xf2   : > { %v16554_v43 = vrot.slane %v3236_v42, 4  ;;  %v3311_v51 = vshll.u32 %v3170_v23, 16 }
  0xf3   : > { %v3256_v18 = vrot.slane %v3254_v47, 4  ;;  %v3259_v9 = vrot.slane %v3257_v63, 5  ;;  %v16566_v63 = vrot.slane %v3273_v24, 5  ;;  %v15563_v24 = vld [vmem:[%s18256_s1 + $0x138] sm:$0xff]  }
  0xf4   : > { %v16571_v31 = vrot.slane %v3311_v51, 5 }
  0xf7   : > { %14240 = vmatmul.mubr.bf16.gmra.mrb[20].mxu0 %v12896_v37  ;;  %v3263_v37 = vshll.u32 %v3164_v14, 16 }
  0xf8   : > { %14243 = vmatprep.mubr.bf16.mxu0 %v12897_v34  ;;  %v3267_v34 = vshrl.u32 %v3164_v14, 16  ;;  %v902_v14 = vsel %vm15943_vm7, %v736_v27, %v901_v12  ;;  %v3350_v27 = vshrl.u32 %v3175_v35, 16  ;;  %v3182_v35 = vld [vmem:[#allocation2 + $0x70] sm:$0xf] }
  0xf9   : > { %v16540_v36 = vrot.slane %v3263_v37, 5  ;;  %903 = vst [vmem:[#allocation2 + $0xc8] sm:$0x1] %v902_v14  ;;  %v15550_v37 = vld [vmem:[#allocation2 + $0x60] sm:$0xff]  }
  0xfa   : > { %v3269_v39 = vrot.slane %v3267_v34, 4 }
  0xfc   : > { %v3270_v8 = vor.u32 %v3269_v39, %v16540_v36 }
  0xfe   : > { %v16569_v34 = vrot.slane %v3270_v8, 4  ;;  %v3355_v8 = vrot.slane %v3353_v33, 5  ;;  %v3407_v33 = vshll.u32 %v3182_v35, 16 }
  0xff   : > { %14244 = vmatmul.mubr.bf16.gmra.mrb[24].mxu0 %v12898_v57  ;;  %v15554_v57 = vld [vmem:[%s18256_s1 + $0x120] sm:$0xff]  }
 0x100   : > { %14247 = vmatprep.mubr.bf16.mxu0 %v12899_v21  ;;  %v16538_v21 = vrot.slane %v3225_v16, 5  ;;  %v3304_v16 = vrot.slane %v3302_v32, 4  ;;  %v16590_v32 = vld [vmem:[%s18256_s1 + $0x140] sm:$0xff]  }
 0x107   : > { %14248 = vmatmul.mubr.bf16.gmra.mrb[28].mxu0 %v12900_v40  ;;  %v16542_v40 = vrot.slane %v3212_v2, 4  ;;  %v3284_v2 = vor.u32 %v3283_v0, %v3280_v60  ;;  %v3374_v60 = vshrl.u32 %v3178_v48, 16  ;;  %v3377_v0 = vshll.u32 %v3178_v48, 16 }
 0x108   : > { %14267 = vmatprep.mubr.bf16.mxu0 %v15540_v52  ;;  %v16544_v52 = vrot.slane %v3222_v10, 4  ;;  %v3317_v10 = vrot.slane %v3315_v55, 4 }
 0x109   : > { %v16573_v42 = vrot.slane %v3284_v2, 4  ;;  %v3376_v14 = vrot.slane %v3374_v60, 4 }
 0x10a   : > { %v3318_v23 = vor.u32 %v3317_v10, %v16571_v31 }
 0x10f   : > { %14268 = vmatmul.mubr.bf16.vlgmr.msra.gmra.mrb[0].mxu0 %v15541_v49  ;;  %v3246_v49 = vor.u32 %v3245_v59, %v16532_v50  ;;  %v3321_v59 = vshll.u32 %v3171_v3, 16  ;;  %v3180_v3 = vld [vmem:[#allocation2 + $0x68] sm:$0x1] }
 0x110   : > { %14300 = vmatpush3.bf16.msra.mxu0 %v16496_v17  ;;  %14271 = vmatprep.mubr.bf16.mxu0 %v15543_v53  ;;  %v15546_v17 = vld [vmem:[#allocation2 + $0x3c] sm:$0xff]   ;;  %v3260_v53 = vor.u32 %v3259_v9, %v3256_v18 }
 0x111   : > { %14301 = vmatprep.subr.bf16.mxu0 %v15545_v46  ;;  %v16562_v26 = vrot.slane %v3246_v49, 4  ;;  %v16583_v49 = vrot.slane %v3321_v59, 5  ;;  %v3369_v59 = vshll.u32 %v3177_v22, 16  ;;  %v15556_v22 = vld [vmem:[#allocation2 + $0x90] sm:$0xff]  }
 0x112   : > { %v16564_v47 = vrot.slane %v3260_v53, 4  ;;  %v3179_v53 = vld [vmem:[#allocation2 + $0x64] sm:$0xf] }
 0x114   : > { %14302 = vmatpush3.bf16.msra.mxu0 %v15545_v46  ;;  %v3172_v46 = vld [vmem:[#allocation2 + $0x48] sm:$0xf] }
 0x115   : > { %14303 = vmatprep.subr.bf16.mxu0 %v15548_v25  ;;  %v3326_v7 = vshrl.u32 %v3172_v46, 16  ;;  %v3329_v29 = vshll.u32 %v3172_v46, 16 }
 0x117   : > { %14272 = vmatmul.mubr.bf16.gmra.mrb[4].mxu0 %v15544_v56  ;;  %v15560_v56 = vld [vmem:[%s18256_s1 + $0x130] sm:$0xff]   ;;  %v3328_v5 = vrot.slane %v3326_v7, 4  ;;  %v3331_v18 = vrot.slane %v3329_v29, 5  ;;  %v3383_v7 = vshll.u32 %v3179_v53, 16  ;;  %v3387_v29 = vshrl.u32 %v3179_v53, 16 }
 0x118   : > { %14275 = vmatprep.mubr.bf16.mxu0 %v15546_v17  ;;  %14304 = vmatpush3.bf16.msra.mxu0 %v15548_v25  ;;  %v3293_v25 = vrot.slane %v3291_v13, 4  ;;  %v3297_v17 = vshll.u32 %v3168_v15, 16  ;;  %v3359_v13 = vshll.u32 %v3176_v41, 16  ;;  %v3185_v53 = vld [vmem:[#allocation2 + $0x7c] sm:$0xf] }
 0x119   : > { %14305 = vmatprep.subr.bf16.mxu0 %v15551_v1  ;;  %v3332_v46 = vor.u32 %v3331_v18, %v3328_v5  ;;  %v16604_v5 = vrot.slane %v3383_v7, 5  ;;  %v3389_v18 = vrot.slane %v3387_v29, 4  ;;  %v3190_v7 = vld [vmem:[#allocation2 + $0x90] sm:$0xf]  ;;  %v15558_v29 = vld [vmem:[#allocation2 + $0x9c] sm:$0xff]  }
 0x11a   : > { %v3294_v28 = vor.u32 %v3293_v25, %v16549_v61  ;;  %v16577_v44 = vrot.slane %v3297_v17, 5  ;;  %v3345_v25 = vshll.u32 %v3174_v38, 16  ;;  %v16592_v51 = vrot.slane %v3359_v13, 5  ;;  %v15555_v38 = vld [vmem:[#allocation2 + $0x84] sm:$0xff]  }
 0x11b   : > { %v3379_v17 = vrot.slane %v3377_v0, 5  ;;  %18279 = vst [vmem:[#allocation7_spill] sm:$0xff] %v16604_v5  ;;  %v3390_v0 = vor.u32 %v3389_v18, %v16604_v5  ;;  %v3470_v18 = vshrl.u32 %v3190_v7, 16 }
 0x11c   : > { %14306 = vmatpush3.bf16.msra.mxu0 %v15551_v1  ;;  %v3173_v1 = vld [vmem:[#allocation2 + $0x4c] sm:$0xf]  ;;  %v16575_v39 = vrot.slane %v3294_v28, 4  ;;  %v16596_v28 = vrot.slane %v3318_v23, 4  ;;  %v16611_v23 = vrot.slane %v3369_v59, 5 }
 0x11d   : > { %14307 = vmatprep.subr.bf16.mxu0 %v15554_v57  ;;  %v3335_v9 = vshll.u32 %v3173_v1, 16  ;;  %v3339_v19 = vshrl.u32 %v3173_v1, 16  ;;  %v3181_v1 = vld [vmem:[#allocation2 + $0x6c] sm:$0xf]  ;;  %v3380_v48 = vor.u32 %v3379_v17, %v3376_v14 }
 0x11f   : > { %14276 = vmatmul.mubr.bf16.gmra.mrb[8].mxu0 %v15547_v20  ;;  %v3363_v20 = vshrl.u32 %v3176_v41, 16  ;;  %v16585_v12 = vrot.slane %v3335_v9, 5  ;;  %v3341_v15 = vrot.slane %v3339_v19, 4  ;;  %v15553_v41 = vld [vmem:[#allocation2 + $0x78] sm:$0xff]   ;;  %v3393_v9 = vshll.u32 %v3180_v3, 16 }
 0x120   : > { %14279 = vmatprep.mubr.bf16.mxu0 %v15549_v6  ;;  %14308 = vmatpush3.bf16.msra.mxu0 %v15554_v57  ;;  %v15552_v57 = vld [vmem:[#allocation2 + $0x6c] sm:$0xff]   ;;  %v3308_v6 = vor.u32 %v3307_v58, %v3304_v16  ;;  %v16599_v58 = vrot.slane %v3345_v25, 5  ;;  %v3398_v19 = vshrl.u32 %v3181_v1, 16  ;;  %v3188_v25 = vld [vmem:[#allocation2 + $0x88] sm:$0xf]  ;;  %v16620_v3 = vrot.slane %v3407_v33, 5 }
 0x121   : > { %14309 = vmatprep.subr.bf16.mxu0 %v15557_v62  ;;  %v3365_v55 = vrot.slane %v3363_v20, 4  ;;  %v3342_v16 = vor.u32 %v3341_v15, %v16585_v12  ;;  %v3183_v20 = vld [vmem:[#allocation2 + $0x74] sm:$0x1]  ;;  %v3187_v15 = vld [vmem:[#allocation2 + $0x84] sm:$0xf]  ;;  %v3455_v59 = vshll.u32 %v3188_v25, 16 }
 0x122   : > { %v16594_v2 = vrot.slane %v3308_v6, 4  ;;  %18283 = vst [vmem:[#allocation11_spill] sm:$0xff] %v16620_v3  ;;  %v3417_v17 = vshll.u32 %v3183_v20, 16 }
 0x123   : > { %v3366_v10 = vor.u32 %v3365_v55, %v16592_v51  ;;  %v16607_v13 = vrot.slane %v3342_v16, 4 }
 0x124   : > { %14310 = vmatpush3.bf16.msra.mxu0 %v15557_v62  ;;  %v3352_v62 = vrot.slane %v3350_v27, 4  ;;  %v3401_v27 = vshll.u32 %v3181_v1, 16  ;;  %v16625_v33 = vrot.slane %v3417_v17, 5 }
 0x125   : > { %14311 = vmatprep.subr.bf16.mxu0 %v15560_v56  ;;  %v16613_v60 = vrot.slane %v3366_v10, 4  ;;  %v3449_v10 = vshll.u32 %v3187_v15, 16 }
 0x126   : > { %v3403_v55 = vrot.slane %v3401_v27, 5  ;;  %18285 = vst [vmem:[#allocation13_spill] sm:$0xff] %v16625_v33  ;;  %v3193_v33 = vld [vmem:[#allocation2 + $0x9c] sm:$0xf] }
 0x127   : > { %14280 = vmatmul.mubr.bf16.gmra.mrb[12].mxu0 %v15550_v37  ;;  %v16601_v37 = vrot.slane %v3332_v46, 4  ;;  %18280 = vst [vmem:[#allocation8_spill] sm:$0xff] %v16613_v60  ;;  %v16616_v46 = vrot.slane %v3393_v9, 5  ;;  %v3473_v9 = vshll.u32 %v3190_v7, 16  ;;  %v16629_v7 = vrot.slane %v3455_v59, 5 }
 0x128   : > { %14283 = vmatprep.mubr.bf16.mxu0 %v15552_v57  ;;  %14312 = vmatpush3.bf16.msra.mxu0 %v15560_v56  ;;  %v3356_v56 = vor.u32 %v3355_v8, %v3352_v62  ;;  %v3411_v57 = vshrl.u32 %v3182_v35, 16  ;;  %v16618_v62 = vrot.slane %v3380_v48, 4  ;;  %v3400_v8 = vrot.slane %v3398_v19, 4 }
 0x129   : > { %14313 = vmatprep.subr.bf16.mxu0 %v15563_v24  ;;  %18281 = vst [vmem:[#allocation9_spill] sm:$0xff] %v16616_v46  ;;  %v3431_v35 = vshll.u32 %v3185_v53, 16  ;;  %v16622_v48 = vrot.slane %v3390_v0, 4  ;;  %v3451_v46 = vrot.slane %v3449_v10, 5  ;;  %v3475_v17 = vrot.slane %v3473_v9, 5 }
 0x12a   : > { %v16609_v6 = vrot.slane %v3356_v56, 4  ;;  %18282 = vst [vmem:[#allocation10_spill] sm:$0xff] %v16618_v62  ;;  %v3413_v14 = vrot.slane %v3411_v57, 4  ;;  %v3446_v56 = vshrl.u32 %v3187_v15, 16  ;;  %v3404_v19 = vor.u32 %v3403_v55, %v3400_v8  ;;  %v3189_v57 = vld [vmem:[#allocation2 + $0x8c] sm:$0x1] }
 0x12b   : > { %18284 = vst [vmem:[#allocation12_spill] sm:$0xff] %v16622_v48  ;;  %v16627_v30 = vrot.slane %v3431_v35, 5  ;;  %v3191_v15 = vld [vmem:[#allocation2 + $0x94] sm:$0xf]  ;;  %v3192_v8 = vld [vmem:[#allocation2 + $0x98] sm:$0x1] }
 0x12c   : > { %14314 = vmatpush3.bf16.msra.mxu0 %v15563_v24  ;;  %v3184_v24 = vld [vmem:[#allocation2 + $0x78] sm:$0xf]  ;;  %v3414_v27 = vor.u32 %v3413_v14, %v16620_v3  ;;  %v15559_v55 = vld [vmem:[#allocation2 + $0xa8] sm:$0xff]   ;;  %v3472_v14 = vrot.slane %v3470_v18, 4  ;;  %v3194_v3 = vld [vmem:[#allocation2 + $0xa0] sm:$0xf] }
 0x12d   : > { %14347 = vmatprep.subr.bf16.mxu0 %v16590_v32  ;;  %v3422_v1 = vshrl.u32 %v3184_v24, 16  ;;  %v3425_v16 = vshll.u32 %v3184_v24, 16  ;;  %v15561_v48 = vld [vmem:[#allocation2 + $0xb4] sm:$0xff]   ;;  %v3465_v35 = vshll.u32 %v3189_v57, 16  ;;  %v3483_v10 = vshrl.u32 %v3191_v15, 16 }
 0x12e   : > { %v3489_v62 = vshll.u32 %v3192_v8, 16  ;;  %v3494_v18 = vshrl.u32 %v3193_v33, 16  ;;  %v3476_v9 = vor.u32 %v3475_v17, %v3472_v14  ;;  %v3497_v5 = vshll.u32 %v3193_v33, 16 }
 0x12f   : > { %14284 = vmatmul.mubr.bf16.gmra.mrb[16].mxu0 %v15553_v41  ;;  %v3435_v41 = vshrl.u32 %v3185_v53, 16  ;;  %v3424_v20 = vrot.slane %v3422_v1, 4  ;;  %v3427_v24 = vrot.slane %v3425_v16, 5  ;;  %v16633_v1 = vrot.slane %v3414_v27, 4 }
 0x130   : > { %14287 = vmatprep.mubr.bf16.mxu0 %v15555_v38  ;;  %v3459_v38 = vshrl.u32 %v3188_v25, 16  ;;  %v3448_v25 = vrot.slane %v3446_v56, 4  ;;  %v3441_v16 = vshll.u32 %v3186_v11, 16  ;;  %v3479_v56 = vshll.u32 %v3191_v15, 16 }
 0x131   : > { %v3437_v53 = vrot.slane %v3435_v41, 4  ;;  %v3428_v41 = vor.u32 %v3427_v24, %v3424_v20  ;;  %v3503_v60 = vshll.u32 %v3194_v3, 16  ;;  %v3228_v11 = vsel %vm16155_vm10, %v16544_v52, %v16538_v21  ;;  %v3196_v52 = vld [vmem:[#allocation2 + $0xa8] sm:$0xf] }
 0x132   : > { %v3461_v0 = vrot.slane %v3459_v38, 4  ;;  %v3452_v59 = vor.u32 %v3451_v46, %v3448_v25  ;;  %v16645_v27 = vrot.slane %v3441_v16, 5  ;;  %v3507_v46 = vshrl.u32 %v3194_v3, 16  ;;  %v15562_v3 = vld [vmem:[#allocation2 + $0xc0] sm:$0xff]   ;;  %v3197_v16 = vld [vmem:[#allocation2 + $0xac] sm:$0xf] }
 0x133   : > { %v16647_v57 = vrot.slane %v3428_v41, 4  ;;  %v16651_v33 = vrot.slane %v3479_v56, 5  ;;  %v3485_v24 = vrot.slane %v3483_v10, 4  ;;  %v16659_v21 = vrot.slane %v3489_v62, 5 }
 0x134   : > { %v3462_v38 = vor.u32 %v3461_v0, %v16629_v7  ;;  %v16653_v15 = vrot.slane %v3452_v59, 4  ;;  %v16661_v25 = vrot.slane %v3476_v9, 4  ;;  %v3496_v0 = vrot.slane %v3494_v18, 4 }
 0x135   : > { %v3499_v8 = vrot.slane %v3497_v5, 5  ;;  %v3509_v14 = vrot.slane %v3507_v46, 4  ;;  %v3518_v41 = vshrl.u32 %v3196_v52, 16  ;;  %v3527_v59 = vshll.u32 %v3197_v16, 16  ;;  %v3199_v46 = vld [vmem:[#allocation2 + $0xb4] sm:$0xf] }
 0x136   : > { %v3242_v5 = vsel %vm16155_vm10, %v16554_v43, %v16532_v50  ;;  %v3531_v18 = vshrl.u32 %v3197_v16, 16  ;;  %v3266_v9 = vsel %vm16155_vm10, %v16564_v47, %v16540_v36  ;;  %v15565_v50 = vld [vmem:[%s18256_s1 + $0x148] sm:$0xff]   ;;  %v3290_v36 = vsel %vm16155_vm10, %v16573_v42, %v16549_v61 }
 0x137   : > { %14288 = vmatmul.mubr.bf16.gmra.mrb[20].mxu0 %v15556_v22  ;;  %v16631_v22 = vrot.slane %v3404_v19, 4  ;;  %v3218_v19 = vsel %vm16155_vm10, %v16542_v40, %v16526_v54  ;;  %v16655_v54 = vrot.slane %v3462_v38, 4  ;;  %v16657_v40 = vrot.slane %v3465_v35, 5 }
 0x138   : > { %14291 = vmatprep.mubr.bf16.mxu0 %v15558_v29  ;;  %v3438_v29 = vor.u32 %v3437_v53, %v16627_v30  ;;  %v3195_v53 = vld [vmem:[#allocation2 + $0xa4] sm:$0x1]  ;;  %v12965_v56 = vcombine.low %v3218_v19, %v3228_v11  ;;  %v3520_v10 = vrot.slane %v3518_v41, 4  ;;  %v3276_v19 = vsel %vm16155_vm10, %v16569_v34, %v16566_v63  ;;  %v15566_v63 = vld [vmem:[%s18256_s1 + $0x150] sm:$0xff]  }
 0x139   : > { %v3513_v17 = vshll.u32 %v3195_v53, 16  ;;  %v3500_v43 = vor.u32 %v3499_v8, %v3496_v0  ;;  %v3300_v47 = vsel %vm16155_vm10, %v16575_v39, %v16577_v44  ;;  %v3542_v42 = vshrl.u32 %v3199_v46, 16  ;;  %v3200_v0 = vld [vmem:[#allocation2 + $0xb8] sm:$0xf] }
 0x13a   : > { %v16649_v20 = vrot.slane %v3438_v29, 4  ;;  %v3521_v29 = vshll.u32 %v3196_v52, 16  ;;  %v16706_v52 = vrot.slane %v3527_v59, 5  ;;  %v3314_v39 = vsel %vm16155_vm10, %v16594_v2, %v16571_v31  ;;  %v15568_v31 = vld [vmem:[%s18256_s1 + $0x160] sm:$0xff]   ;;  %v18286_v59 = vld [vmem:[#allocation8_spill] sm:$0xff] }
 0x13b   : > { %v16668_v62 = vrot.slane %v3513_v17, 5  ;;  %v16701_v34 = vrot.slane %v3500_v43, 4  ;;  %v3324_v44 = vsel %vm16155_vm10, %v16596_v28, %v16583_v49  ;;  %v12968_v8 = vcombine.low %v3290_v36, %v3300_v47  ;;  %v18289_v43 = vld [vmem:[#allocation9_spill] sm:$0xff]  ;;  %v18291_v36 = vld [vmem:[#allocation11_spill] sm:$0xff] }
 0x13c   : > { %v3523_v38 = vrot.slane %v3521_v29, 5  ;;  %v12969_v17 = vcombine.low %v3314_v39, %v3324_v44  ;;  %v3545_v49 = vshll.u32 %v3199_v46, 16  ;;  %v3551_v28 = vshll.u32 %v3200_v0, 16  ;;  %v15571_v39 = vld [vmem:[%s18256_s1 + $0x178] sm:$0xff]  }
 0x13d   : > { %v3348_v41 = vsel %vm16155_vm10, %v16607_v13, %v16599_v58  ;;  %v3544_v29 = vrot.slane %v3542_v42, 4  ;;  %v15569_v58 = vld [vmem:[%s18256_s1 + $0x168] sm:$0xff]   ;;  %v3410_v47 = vsel %vm16155_vm10, %v16631_v22, %v18291_v36 }
 0x13f   : > { %14292 = vmatmul.mubr.bf16.gmra.mrb[24].mxu0 %v15559_v55  ;;  %v16663_v55 = vrot.slane %v3503_v60, 5  ;;  %v3252_v60 = vsel %vm16155_vm10, %v16562_v26, %v16546_v4  ;;  %v3198_v26 = vld [vmem:[#allocation2 + $0xb0] sm:$0x1] }
 0x140   : > { %14295 = vmatprep.mubr.bf16.mxu0 %v15561_v48  ;;  %v3486_v48 = vor.u32 %v3485_v24, %v16651_v33  ;;  %v12966_v11 = vcombine.low %v3242_v5, %v3252_v60  ;;  %v12967_v24 = vcombine.low %v3266_v9, %v3276_v19  ;;  %v3537_v61 = vshll.u32 %v3198_v26, 16  ;;  %v3202_v60 = vld [vmem:[#allocation2 + $0xc0] sm:$0xf] }
 0x141   : > { %v3510_v4 = vor.u32 %v3509_v14, %v16663_v55  ;;  %v3524_v14 = vor.u32 %v3523_v38, %v3520_v10  ;;  %v3362_v10 = vsel %vm16155_vm10, %v16609_v6, %v16592_v51  ;;  %v3372_v5 = vsel %vm16155_vm10, %v18286_v59, %v16611_v23  ;;  %v15570_v6 = vld [vmem:[%s18256_s1 + $0x170] sm:$0xff]   ;;  %v18287_v19 = vld [vmem:[#allocation7_spill] sm:$0xff] }
 0x142   : > { %v16666_v35 = vrot.slane %v3486_v48, 4  ;;  %v16724_v16 = vrot.slane %v3537_v61, 5  ;;  %v3338_v48 = vsel %vm16155_vm10, %v16601_v37, %v16585_v12  ;;  %v3201_v12 = vld [vmem:[#allocation2 + $0xbc] sm:$0x1]  ;;  %v12971_v38 = vcombine.low %v3362_v10, %v3372_v5  ;;  %v3203_v61 = vld [vmem:[#allocation2 + $0xc4] sm:$0xf] }
 0x143   : > { %v16703_v53 = vrot.slane %v3510_v4, 4  ;;  %v16722_v2 = vrot.slane %v3524_v14, 4  ;;  %v12970_v37 = vcombine.low %v3338_v48, %v3348_v41  ;;  %v3547_v23 = vrot.slane %v3545_v49, 5  ;;  %v18290_v4 = vld [vmem:[#allocation12_spill] sm:$0xff] }
 0x144   : > { %v3561_v9 = vshll.u32 %v3201_v12, 16  ;;  %v3396_v26 = vsel %vm16155_vm10, %v18290_v4, %v18289_v43  ;;  %v3575_v22 = vshll.u32 %v3203_v61, 16  ;;  %v3579_v14 = vshrl.u32 %v3203_v61, 16  ;;  %v3982_v43 = vld [vmem:[#allocation2 + $0x28] sm:$0xf] }
 0x145   : > { %v3458_v48 = vsel %vm16155_vm10, %v16653_v15, %v16629_v7  ;;  %v3468_v41 = vsel %vm16155_vm10, %v16655_v54, %v16657_v40  ;;  %v3482_v15 = vsel %vm16155_vm10, %v16661_v25, %v16651_v33  ;;  %v3492_v54 = vsel %vm16155_vm10, %v16666_v35, %v16659_v21  ;;  %v3985_v61 = vld [vmem:[#allocation2 + $0x34] sm:$0xf] }
 0x146   : > { %v3577_v59 = vrot.slane %v3575_v22, 5  ;;  %v3581_v7 = vrot.slane %v3579_v14, 4  ;;  %v3506_v12 = vsel %vm16155_vm10, %v16701_v34, %v16663_v55  ;;  %v12976_v33 = vcombine.low %v3482_v15, %v3492_v54  ;;  %v3988_v14 = vld [vmem:[#allocation2 + $0x40] sm:$0xf]  ;;  %v15573_v54 = vld [vmem:[%s18256_s1 + $0x188] sm:$0xff]  }
 0x147   : > { %14296 = vmatmul.mubr.bf16.gmra.mrb[28].mxu0 %v15562_v3  ;;  %v3533_v3 = vrot.slane %v3531_v18, 4  ;;  %v16751_v18 = vrot.slane %v3551_v28, 5  ;;  %v3530_v55 = vsel %vm16155_vm10, %v16722_v2, %v16706_v52  ;;  %v3980_v2 = vld [vmem:[#allocation2 + $0x20] sm:$0x1] }
 0x148   : > { %14315 = vmatprep.mubr.bf16.mxu0 %v12965_v56  ;;  %v3555_v56 = vshrl.u32 %v3200_v0, 16  ;;  %v3548_v0 = vor.u32 %v3547_v23, %v3544_v29  ;;  %v3204_v29 = vld [vmem:[#allocation2 + $0xc8] sm:$0x1] }
 0x149   : > { %v3534_v13 = vor.u32 %v3533_v3, %v16706_v52  ;;  %v3585_v40 = vshll.u32 %v3204_v29, 16  ;;  %v3978_v52 = vld [vmem:[#allocation2 + $0x18] sm:$0xe]  ;;  %v3987_v29 = vld [vmem:[#allocation2 + $0x3c] sm:$0xe] }
 0x14a   : > { %v3557_v46 = vrot.slane %v3555_v56, 4  ;;  %v3549_v49 = vrot.slane %v3548_v0, 4  ;;  %v3976_v56 = vld [vmem:[#allocation2 + $0x10] sm:$0xf]  ;;  %v4083_v0 = vrot.slane %v3980_v2, 5 }
 0x14b   : > { %v16746_v51 = vrot.slane %v3534_v13, 4  ;;  %v4073_v5 = vrot.slane %v3976_v56, 5  ;;  %v3977_v13 = vld [vmem:[#allocation2 + $0x14] sm:$0x1]  ;;  %v3989_v56 = vld [vmem:[#allocation2 + $0x44] sm:$0x1] }
 0x14c   : > { %v4076_v23 = vrot.slane %v3977_v13, 5  ;;  %v3996_v2 = vld [vmem:[#allocation2 + $0x60] sm:$0xe] }
 0x14f   : > { %14316 = vmatmul.mubr.bf16.vlgmr.msra.gmra.mrb[0].mxu0 %v12966_v11  ;;  %v18288_v11 = vld [vmem:[#allocation10_spill] sm:$0xff] }
 0x150   : > { %14348 = vmatpush3.bf16.msra.mxu0 %v16590_v32  ;;  %14319 = vmatprep.mubr.bf16.mxu0 %v12967_v24  ;;  %v15567_v32 = vld [vmem:[%s18256_s1 + $0x158] sm:$0xff]   ;;  %v3566_v24 = vshrl.u32 %v3202_v60, 16 }
 0x151   : > { %14349 = vmatprep.subr.bf16.mxu0 %v15565_v50 }
 0x152   : > { %v3568_v28 = vrot.slane %v3566_v24, 4 }
 0x154   : > { %14350 = vmatpush3.bf16.msra.mxu0 %v15565_v50  ;;  %v3386_v50 = vsel %vm16155_vm10, %v18288_v11, %v18287_v19 }
 0x155   : > { %14351 = vmatprep.subr.bf16.mxu0 %v15566_v63  ;;  %v12972_v42 = vcombine.low %v3386_v50, %v3396_v26  ;;  %v3979_v50 = vld [vmem:[#allocation2 + $0x1c] sm:$0xf] }
 0x156   : > { %v4080_v26 = vrot.slane %v3979_v50, 5 }
 0x157   : > { %14320 = vmatmul.mubr.bf16.gmra.mrb[4].mxu0 %v12968_v8  ;;  %v3563_v8 = vrot.slane %v3561_v9, 5  ;;  %v3554_v9 = vsel %vm16155_vm10, %v3549_v49, %v16751_v18  ;;  %v3984_v49 = vld [vmem:[#allocation2 + $0x30] sm:$0xe] }
 0x158   : > { %14323 = vmatprep.mubr.bf16.mxu0 %v12969_v17  ;;  %14352 = vmatpush3.bf16.msra.mxu0 %v15566_v63  ;;  %v18292_v63 = vld [vmem:[#allocation13_spill] sm:$0xff]  ;;  %v3434_v17 = vsel %vm16155_vm10, %v16647_v57, %v16627_v30  ;;  %v3558_v57 = vor.u32 %v3557_v46, %v16751_v18  ;;  %v4087_v46 = vrot.slane %v3982_v43, 5 }
 0x159   : > { %14353 = vmatprep.subr.bf16.mxu0 %v15567_v32  ;;  %v3420_v3 = vsel %vm16155_vm10, %v16633_v1, %v18292_v63  ;;  %v16775_v1 = vld [vmem:[%s18256_s1 + $0x180] sm:$0xff]   ;;  %v3983_v63 = vld [vmem:[#allocation2 + $0x2c] sm:$0x1] }
 0x15a   : > { %v12973_v44 = vcombine.low %v3410_v47, %v3420_v3  ;;  %v3981_v47 = vld [vmem:[#allocation2 + $0x24] sm:$0xe]  ;;  %v4090_v22 = vrot.slane %v3983_v63, 5 }
 0x15b   : > { %v15576_v63 = vld [vmem:[%s18256_s1 + $0x1a0] sm:$0xff]  }
 0x15c   : > { %14354 = vmatpush3.bf16.msra.mxu0 %v15567_v32  ;;  %v3569_v32 = vshll.u32 %v3202_v60, 16 }
 0x15d   : > { %14355 = vmatprep.subr.bf16.mxu0 %v15568_v31 }
 0x15e   : > { %v3571_v10 = vrot.slane %v3569_v32, 5  ;;  %v4089_v32 = vrot.slane %v4087_v46, 4 }
 0x15f   : > { %14324 = vmatmul.mubr.bf16.gmra.mrb[8].mxu0 %v12970_v37  ;;  %v3516_v37 = vsel %vm16155_vm10, %v16703_v53, %v16668_v62  ;;  %v3540_v62 = vsel %vm16155_vm10, %v16746_v51, %v16724_v16  ;;  %v3587_v53 = vrot.slane %v3585_v40, 5  ;;  %v12993_v40 = vrot.slane %v3987_v29, 9 }
 0x160   : > { %14327 = vmatprep.mubr.bf16.mxu0 %v12971_v38  ;;  %14356 = vmatpush3.bf16.msra.mxu0 %v15568_v31  ;;  %v3444_v31 = vsel %vm16155_vm10, %v16649_v20, %v16645_v27  ;;  %v12975_v27 = vcombine.low %v3458_v48, %v3468_v41  ;;  %v3559_v20 = vrot.slane %v3558_v57, 4  ;;  %v3572_v25 = vor.u32 %v3571_v10, %v3568_v28  ;;  %v3991_v10 = vld [vmem:[#allocation2 + $0x4c] sm:$0xf] }
 0x161   : > { %14357 = vmatprep.subr.bf16.mxu0 %v15569_v58  ;;  %v12974_v30 = vcombine.low %v3434_v17, %v3444_v31  ;;  %v12977_v60 = vcombine.low %v3506_v12, %v3516_v37  ;;  %v3582_v38 = vor.u32 %v3581_v7, %v3577_v59  ;;  %v12978_v11 = vcombine.low %v3530_v55, %v3540_v62  ;;  %v3994_v37 = vld [vmem:[#allocation2 + $0x58] sm:$0xf] }
 0x162   : > { %v3573_v21 = vrot.slane %v3572_v25, 4  ;;  %v3564_v19 = vsel %vm16155_vm10, %v3559_v20, %v3563_v8  ;;  %v12991_v8 = vrot.slane %v3981_v47, 9  ;;  %v4094_v28 = vrot.slane %v3985_v61, 5  ;;  %v4001_v61 = vld [vmem:[#allocation2 + $0x74] sm:$0x1] }
 0x163   : > { %v3583_v34 = vrot.slane %v3582_v38, 4  ;;  %v12979_v4 = vcombine.low %v3554_v9, %v3564_v19  ;;  %v4091_v41 = vsel %vm16379_vm13, %v4089_v32, %v4090_v22  ;;  %v4101_v57 = vrot.slane %v3988_v14, 5  ;;  %v3997_v19 = vld [vmem:[#allocation2 + $0x64] sm:$0xf]  ;;  %v4003_v32 = vld [vmem:[#allocation2 + $0x7c] sm:$0xf] }
 0x164   : > { %14358 = vmatpush3.bf16.msra.mxu0 %v15569_v58  ;;  %v3975_v58 = vld [vmem:[#allocation2 + $0xc] sm:$0xe]  ;;  %v3578_v16 = vsel %vm16155_vm10, %v3573_v21, %v3577_v59  ;;  %v4088_v48 = vsel %vm16379_vm13, %v12991_v8, %v4087_v46  ;;  %v12992_v20 = vrot.slane %v3984_v49, 9  ;;  %v4096_v7 = vrot.slane %v4094_v28, 4  ;;  %v3992_v21 = vld [vmem:[#allocation2 + $0x50] sm:$0x1] }
 0x165   : > { %14359 = vmatprep.subr.bf16.mxu0 %v15570_v6  ;;  %v12989_v35 = vrot.slane %v3975_v58, 9  ;;  %v3588_v51 = vsel %vm16155_vm10, %v3583_v34, %v3587_v53  ;;  %v13023_v59 = vcombine.low %v4088_v48, %v4091_v41  ;;  %v4104_v12 = vrot.slane %v3989_v56, 5  ;;  %v4006_v49 = vld [vmem:[#allocation2 + $0x88] sm:$0xf]  ;;  %v4002_v41 = vld [vmem:[#allocation2 + $0x78] sm:$0xe] }
 0x166   : > { %v12980_v3 = vcombine.low %v3578_v16, %v3588_v51  ;;  %v4095_v58 = vsel %vm16379_vm13, %v12992_v20, %v4094_v28  ;;  %v4108_v25 = vrot.slane %v3991_v10, 5  ;;  %v4111_v9 = vrot.slane %v3992_v21, 5  ;;  %v3998_v16 = vld [vmem:[#allocation2 + $0x68] sm:$0x1]  ;;  %v4004_v56 = vld [vmem:[#allocation2 + $0x80] sm:$0x1] }
 0x167   : > { %14328 = vmatmul.mubr.bf16.gmra.mrb[12].mxu0 %v12972_v42  ;;  %v4074_v24 = vsel %vm16379_vm13, %v12989_v35, %v4073_v5  ;;  %v4115_v35 = vrot.slane %v3994_v37, 5  ;;  %v4122_v46 = vrot.slane %v3997_v19, 5  ;;  %v4125_v8 = vrot.slane %v3998_v16, 5  ;;  %v15578_v20 = vld [vmem:[%s18256_s1 + $0x1b0] sm:$0xff]   ;;  %v4005_v10 = vld [vmem:[#allocation2 + $0x84] sm:$0xe] }
 0x168   : > { %14331 = vmatprep.mubr.bf16.mxu0 %v12973_v44  ;;  %14360 = vmatpush3.bf16.msra.mxu0 %v15570_v6  ;;  %v4075_v6 = vrot.slane %v4073_v5, 4  ;;  %v4082_v44 = vrot.slane %v4080_v26, 4  ;;  %v4103_v5 = vrot.slane %v4101_v57, 4  ;;  %v4110_v53 = vrot.slane %v4108_v25, 4 }
 0x169   : > { %14361 = vmatprep.subr.bf16.mxu0 %v15571_v39  ;;  %v4117_v50 = vrot.slane %v4115_v35, 4  ;;  %v12999_v37 = vrot.slane %v4005_v10, 9 }
 0x16a   : > { %v4077_v36 = vsel %vm16379_vm13, %v4075_v6, %v4076_v23  ;;  %v4084_v31 = vsel %vm16379_vm13, %v4082_v44, %v4083_v0  ;;  %v4105_v38 = vsel %vm16379_vm13, %v4103_v5, %v4104_v12  ;;  %v3993_v6 = vld [vmem:[#allocation2 + $0x54] sm:$0xe]  ;;  %v3995_v23 = vld [vmem:[#allocation2 + $0x5c] sm:$0x1]  ;;  %v12996_v44 = vrot.slane %v3996_v2, 9 }
 0x16b   : > { %v13021_v42 = vcombine.low %v4074_v24, %v4077_v36  ;;  %v4118_v43 = vrot.slane %v3995_v23, 5  ;;  %v4124_v0 = vrot.slane %v4122_v46, 4  ;;  %v4139_v12 = vrot.slane %v4004_v56, 5  ;;  %v4022_v56 = vld [vmem:[#allocation2 + $0xc8] sm:$0x1] }
 0x16c   : > { %14362 = vmatpush3.bf16.msra.mxu0 %v15571_v39  ;;  %v12990_v39 = vrot.slane %v3978_v52, 9  ;;  %v4000_v52 = vld [vmem:[#allocation2 + $0x70] sm:$0xf]  ;;  %v4123_v28 = vsel %vm16379_vm13, %v12996_v44, %v4122_v46 }
 0x16d   : > { %14395 = vmatprep.subr.bf16.mxu0 %v16775_v1  ;;  %v4119_v36 = vsel %vm16379_vm13, %v4117_v50, %v4118_v43  ;;  %v4129_v47 = vrot.slane %v4000_v52, 5  ;;  %v4126_v48 = vsel %vm16379_vm13, %v4124_v0, %v4125_v8 }
 0x16e   : > { %v4081_v17 = vsel %vm16379_vm13, %v12990_v39, %v4080_v26  ;;  %v4112_v26 = vsel %vm16379_vm13, %v4110_v53, %v4111_v9  ;;  %v4013_v53 = vld [vmem:[#allocation2 + $0xa4] sm:$0x1] }
 0x16f   : > { %14332 = vmatmul.mubr.bf16.gmra.mrb[16].mxu0 %v12974_v30  ;;  %v3986_v30 = vld [vmem:[#allocation2 + $0x38] sm:$0x1]  ;;  %v4131_v14 = vrot.slane %v4129_v47, 4  ;;  %v4160_v16 = vrot.slane %v4013_v53, 5  ;;  %v5021_v53 = vld [vmem:[#allocation2 + $0x1c] sm:$0xf] }
 0x170   : > { %14335 = vmatprep.mubr.bf16.mxu0 %v12975_v27  ;;  %v13022_v27 = vcombine.low %v4081_v17, %v4084_v31  ;;  %v4097_v15 = vrot.slane %v3986_v30, 5  ;;  %v4132_v17 = vrot.slane %v4001_v61, 5  ;;  %v15577_v31 = vld [vmem:[%s18256_s1 + $0x1a8] sm:$0xff]   ;;  %v4136_v30 = vrot.slane %v4003_v32, 5 }
 0x172   : > { %v4098_v13 = vsel %vm16379_vm13, %v4096_v7, %v4097_v15  ;;  %v4133_v29 = vsel %vm16379_vm13, %v4131_v14, %v4132_v17  ;;  %v13028_v7 = vcombine.low %v4123_v28, %v4126_v48  ;;  %v4009_v15 = vld [vmem:[#allocation2 + $0x94] sm:$0xf]  ;;  %v4138_v5 = vrot.slane %v4136_v30, 4 }
 0x173   : > { %v13024_v55 = vcombine.low %v4095_v58, %v4098_v13 }
 0x174   : > { %v4140_v21 = vsel %vm16379_vm13, %v4138_v5, %v4139_v12  ;;  %v15580_v5 = vld [vmem:[#allocation2 + $0x18] sm:$0xff]   ;;  %v15581_v12 = vld [vmem:[#allocation2 + $0x24] sm:$0xff]  }
 0x177   : > { %14336 = vmatmul.mubr.bf16.gmra.mrb[20].mxu0 %v12976_v33  ;;  %v3990_v33 = vld [vmem:[#allocation2 + $0x48] sm:$0xe] }
 0x178   : > { %14339 = vmatprep.mubr.bf16.mxu0 %v12977_v60  ;;  %v4102_v60 = vsel %vm16379_vm13, %v12993_v40, %v4101_v57  ;;  %v12994_v34 = vrot.slane %v3990_v33, 9  ;;  %v12998_v40 = vrot.slane %v4002_v41, 9  ;;  %v15579_v33 = vld [vmem:[%s18256_s1 + $0x1b8] sm:$0xff]  }
 0x179   : > { %v13025_v62 = vcombine.low %v4102_v60, %v4105_v38  ;;  %v4008_v60 = vld [vmem:[#allocation2 + $0x90] sm:$0xe] }
 0x17a   : > { %v4109_v51 = vsel %vm16379_vm13, %v12994_v34, %v4108_v25  ;;  %v4012_v25 = vld [vmem:[#allocation2 + $0xa0] sm:$0xf]  ;;  %v4137_v38 = vsel %vm16379_vm13, %v12998_v40, %v4136_v30  ;;  %v4011_v34 = vld [vmem:[#allocation2 + $0x9c] sm:$0xe] }
 0x17b   : > { %v13030_v9 = vcombine.low %v4137_v38, %v4140_v21  ;;  %v13001_v52 = vrot.slane %v4011_v34, 9  ;;  %v15594_v38 = vld [vmem:[%s18256_s1 + $0x1e0] sm:$0xff]   ;;  %v15587_v21 = vld [vmem:[#allocation2 + $0x54] sm:$0xff]  }
 0x17c   : > { %v5020_v34 = vld [vmem:[#allocation2 + $0x18] sm:$0xf] }
 0x17f   : > { %14340 = vmatmul.mubr.bf16.gmra.mrb[24].mxu0 %v12978_v11  ;;  %v12995_v11 = vrot.slane %v3993_v6, 9 }
 0x180   : > { %14343 = vmatprep.mubr.bf16.mxu0 %v12979_v4  ;;  %v15575_v4 = vld [vmem:[%s18256_s1 + $0x198] sm:$0xff]  }
 0x181   : > { %v4116_v24 = vsel %vm16379_vm13, %v12995_v11, %v4115_v35  ;;  %v4150_v35 = vrot.slane %v4009_v15, 5  ;;  %v13000_v11 = vrot.slane %v4008_v60, 9  ;;  %v15591_v60 = vld [vmem:[%s18256_s1 + $0x1d8] sm:$0xff]  }
 0x182   : > { %v13027_v39 = vcombine.low %v4116_v24, %v4119_v36  ;;  %v4016_v36 = vld [vmem:[#allocation2 + $0xb0] sm:$0x1] }
 0x183   : > { %v4152_v50 = vrot.slane %v4150_v35, 4  ;;  %v4151_v46 = vsel %vm16379_vm13, %v13000_v11, %v4150_v35  ;;  %v15597_v35 = vld [vmem:[%s18256_s1 + $0x1e8] sm:$0xff]  }
 0x184   : > { %v15593_v11 = vld [vmem:[#allocation2 + $0x84] sm:$0xff]  }
 0x187   : > { %14344 = vmatmul.mubr.bf16.gmra.mrb[28].mxu0 %v12980_v3  ;;  %v3999_v3 = vld [vmem:[#allocation2 + $0x6c] sm:$0xe] }
 0x188   : > { %14363 = vmatprep.mubr.bf16.mxu0 %v13021_v42  ;;  %v13026_v42 = vcombine.low %v4109_v51, %v4112_v26  ;;  %v12997_v22 = vrot.slane %v3999_v3, 9  ;;  %v4018_v51 = vld [vmem:[#allocation2 + $0xb8] sm:$0xf]  ;;  %v4014_v26 = vld [vmem:[#allocation2 + $0xa8] sm:$0xe] }
 0x189   : > { %v13002_v0 = vrot.slane %v4014_v26, 9  ;;  %v5024_v26 = vld [vmem:[#allocation2 + $0x28] sm:$0xf] }
 0x18a   : > { %v4130_v57 = vsel %vm16379_vm13, %v12997_v22, %v4129_v47  ;;  %v4167_v22 = vrot.slane %v4016_v36, 5 }
 0x18f   : > { %14364 = vmatmul.mubr.bf16.vlgmr.msra.gmra.mrb[0].mxu0 %v13022_v27  ;;  %v4143_v27 = vrot.slane %v4006_v49, 5  ;;  %v4021_v49 = vld [vmem:[#allocation2 + $0xc4] sm:$0xf] }
 0x190   : > { %14396 = vmatpush3.bf16.msra.mxu0 %v16775_v1  ;;  %14367 = vmatprep.mubr.bf16.mxu0 %v13023_v59  ;;  %v15574_v1 = vld [vmem:[%s18256_s1 + $0x190] sm:$0xff]   ;;  %v4007_v59 = vld [vmem:[#allocation2 + $0x8c] sm:$0x1]  ;;  %v4178_v41 = vrot.slane %v4021_v49, 5 }
 0x191   : > { %14397 = vmatprep.subr.bf16.mxu0 %v15573_v54  ;;  %v4145_v58 = vrot.slane %v4143_v27, 4  ;;  %v4146_v13 = vrot.slane %v4007_v59, 5  ;;  %v4144_v6 = vsel %vm16379_vm13, %v12999_v37, %v4143_v27  ;;  %v15583_v37 = vld [vmem:[#allocation2 + $0x30] sm:$0xff]  }
 0x192   : > { %v4180_v59 = vrot.slane %v4178_v41, 4 }
 0x193   : > { %v4147_v23 = vsel %vm16379_vm13, %v4145_v58, %v4146_v13  ;;  %v15585_v58 = vld [vmem:[%s18256_s1 + $0x1c8] sm:$0xff]   ;;  %v15588_v13 = vld [vmem:[%s18256_s1 + $0x1d0] sm:$0xff]  }
 0x194   : > { %14398 = vmatpush3.bf16.msra.mxu0 %v15573_v54  ;;  %v13029_v54 = vcombine.low %v4130_v57, %v4133_v29  ;;  %v13031_v19 = vcombine.low %v4144_v6, %v4147_v23  ;;  %v4020_v29 = vld [vmem:[#allocation2 + $0xc0] sm:$0xe]  ;;  %v15600_v6 = vld [vmem:[%s18256_s1 + $0x1f0] sm:$0xff]  }
 0x195   : > { %14399 = vmatprep.subr.bf16.mxu0 %v15574_v1  ;;  %v13004_v10 = vrot.slane %v4020_v29, 9  ;;  %v15590_v23 = vld [vmem:[#allocation2 + $0x6c] sm:$0xff]  }
 0x197   : > { %14368 = vmatmul.mubr.bf16.gmra.mrb[4].mxu0 %v13024_v55  ;;  %v4157_v55 = vrot.slane %v4012_v25, 5  ;;  %v4179_v15 = vsel %vm16379_vm13, %v13004_v10, %v4178_v41  ;;  %v15586_v25 = vld [vmem:[#allocation2 + $0x48] sm:$0xff]  }
 0x198   : > { %14371 = vmatprep.mubr.bf16.mxu0 %v13025_v62  ;;  %14400 = vmatpush3.bf16.msra.mxu0 %v15574_v1  ;;  %v4010_v1 = vld [vmem:[#allocation2 + $0x98] sm:$0x1]  ;;  %v15582_v62 = vld [vmem:[%s18256_s1 + $0x1c0] sm:$0xff]  }
 0x199   : > { %14401 = vmatprep.subr.bf16.mxu0 %v15575_v4  ;;  %v4153_v43 = vrot.slane %v4010_v1, 5  ;;  %v4159_v2 = vrot.slane %v4157_v55, 4  ;;  %v4158_v3 = vsel %vm16379_vm13, %v13001_v52, %v4157_v55  ;;  %v15589_v1 = vld [vmem:[#allocation2 + $0x60] sm:$0xff]   ;;  %v15592_v55 = vld [vmem:[#allocation2 + $0x78] sm:$0xff]   ;;  %v5078_v52 = vshll.u32 %v5021_v53, 16 }
 0x19b   : > { %v4154_v24 = vsel %vm16379_vm13, %v4152_v50, %v4153_v43  ;;  %v4161_v61 = vsel %vm16379_vm13, %v4159_v2, %v4160_v16  ;;  %v15595_v50 = vld [vmem:[#allocation2 + $0x90] sm:$0xff]   ;;  %v5069_v43 = vshrl.u32 %v5020_v34, 16  ;;  %v5082_v2 = vshrl.u32 %v5021_v53, 16 }
 0x19c   : > { %14402 = vmatpush3.bf16.msra.mxu0 %v15575_v4  ;;  %v4015_v4 = vld [vmem:[#allocation2 + $0xac] sm:$0xf]  ;;  %v13032_v44 = vcombine.low %v4151_v46, %v4154_v24  ;;  %v13033_v8 = vcombine.low %v4158_v3, %v4161_v61  ;;  %v16944_v36 = vrot.slane %v5078_v52, 5  ;;  %v5102_v61 = vshll.u32 %v5024_v26, 16 }
 0x19d   : > { %14403 = vmatprep.subr.bf16.mxu0 %v15576_v63  ;;  %v4164_v47 = vrot.slane %v4015_v4, 5  ;;  %v5072_v4 = vshll.u32 %v5020_v34, 16  ;;  %v5071_v46 = vrot.slane %v5069_v43, 4 }
 0x19e   : > { %v16947_v41 = vrot.slane %v5102_v61, 5  ;;  %v5034_v61 = vld [vmem:[#allocation2 + $0x50] sm:$0x1] }
 0x19f   : > { %14372 = vmatmul.mubr.bf16.gmra.mrb[8].mxu0 %v13026_v42  ;;  %v4171_v42 = vrot.slane %v4018_v51, 5  ;;  %v4166_v32 = vrot.slane %v4164_v47, 4  ;;  %v4165_v28 = vsel %vm16379_vm13, %v13002_v0, %v4164_v47  ;;  %v5074_v24 = vrot.slane %v5072_v4, 5  ;;  %v15596_v0 = vld [vmem:[#allocation2 + $0x9c] sm:$0xff]  }
 0x1a0   : > { %14375 = vmatprep.mubr.bf16.mxu0 %v13027_v39  ;;  %14404 = vmatpush3.bf16.msra.mxu0 %v15576_v63  ;;  %v4017_v63 = vld [vmem:[#allocation2 + $0xb4] sm:$0xe]  ;;  %v4019_v39 = vld [vmem:[#allocation2 + $0xbc] sm:$0x1]  ;;  %v5084_v47 = vrot.slane %v5082_v2, 4 }
 0x1a1   : > { %14405 = vmatprep.subr.bf16.mxu0 %v15577_v31  ;;  %v13003_v14 = vrot.slane %v4017_v63, 9  ;;  %v4173_v17 = vrot.slane %v4171_v42, 4  ;;  %v4168_v48 = vsel %vm16379_vm13, %v4166_v32, %v4167_v22  ;;  %v5075_v32 = vor.u32 %v5074_v24, %v5071_v46  ;;  %v5031_v24 = vld [vmem:[#allocation2 + $0x44] sm:$0x1] }
 0x1a2   : > { %v13034_v27 = vcombine.low %v4165_v28, %v4168_v48  ;;  %v5085_v22 = vor.u32 %v5084_v47, %v16944_v36  ;;  %v5025_v28 = vld [vmem:[#allocation2 + $0x2c] sm:$0x1] }
 0x1a3   : > { %v4172_v30 = vsel %vm16379_vm13, %v13003_v14, %v4171_v42  ;;  %v5106_v42 = vshrl.u32 %v5024_v26, 16  ;;  %v5027_v14 = vld [vmem:[#allocation2 + $0x34] sm:$0xf]  ;;  %v5112_v10 = vshll.u32 %v5025_v28, 16  ;;  %v5036_v26 = vld [vmem:[#allocation2 + $0x58] sm:$0xf] }
 0x1a4   : > { %14406 = vmatpush3.bf16.msra.mxu0 %v15577_v31  ;;  %v4174_v31 = vrot.slane %v4019_v39, 5  ;;  %v5026_v39 = vld [vmem:[#allocation2 + $0x30] sm:$0xf]  ;;  %v5130_v29 = vshrl.u32 %v5027_v14, 16 }
 0x1a5   : > { %14407 = vmatprep.subr.bf16.mxu0 %v15578_v20 }
 0x1a6   : > { %v4175_v57 = vsel %vm16379_vm13, %v4173_v17, %v4174_v31  ;;  %v5117_v17 = vshrl.u32 %v5026_v39, 16  ;;  %v5120_v31 = vshll.u32 %v5026_v39, 16 }
 0x1a7   : > { %14376 = vmatmul.mubr.bf16.gmra.mrb[12].mxu0 %v13028_v7  ;;  %v4181_v7 = vrot.slane %v4022_v56, 5  ;;  %v5029_v56 = vld [vmem:[#allocation2 + $0x3c] sm:$0xf] }
 0x1a8   : > { %14379 = vmatprep.mubr.bf16.mxu0 %v13029_v54  ;;  %14408 = vmatpush3.bf16.msra.mxu0 %v15578_v20  ;;  %v13035_v20 = vcombine.low %v4172_v30, %v4175_v57  ;;  %v5108_v30 = vrot.slane %v5106_v42, 4  ;;  %v5126_v57 = vshll.u32 %v5027_v14, 16  ;;  %v5038_v14 = vld [vmem:[#allocation2 + $0x60] sm:$0xf] }
 0x1a9   : > { %14409 = vmatprep.subr.bf16.mxu0 %v15579_v33  ;;  %v4182_v54 = vsel %vm16379_vm13, %v4180_v59, %v4181_v7  ;;  %v5119_v59 = vrot.slane %v5117_v17, 4  ;;  %v5122_v7 = vrot.slane %v5120_v31, 5  ;;  %v5039_v17 = vld [vmem:[#allocation2 + $0x64] sm:$0xf] }
 0x1aa   : > { %v13036_v40 = vcombine.low %v4179_v15, %v4182_v54  ;;  %v5032_v15 = vld [vmem:[#allocation2 + $0x48] sm:$0xf]  ;;  %v5086_v54 = vrot.slane %v5085_v22, 4  ;;  %v5202_v22 = vshrl.u32 %v5036_v26, 16 }
 0x1ac   : > { %14410 = vmatpush3.bf16.msra.mxu0 %v15579_v33  ;;  %v15584_v33 = vld [vmem:[#allocation2 + $0x3c] sm:$0xff]  }
 0x1ad   : > { %14443 = vmatprep.subr.bf16.mxu0 %v15582_v62 }
 0x1af   : > { %14380 = vmatmul.mubr.bf16.gmra.mrb[16].mxu0 %v13030_v9  ;;  %v16941_v9 = vld [vmem:[%s18256_s1 + $0x200] sm:$0xff]  }
 0x1b0   : > { %14383 = vmatprep.mubr.bf16.mxu0 %v13031_v19  ;;  %v5023_v19 = vld [vmem:[#allocation2 + $0x24] sm:$0xf] }
 0x1b1   : > { %v5093_v16 = vshrl.u32 %v5023_v19, 16  ;;  %v5096_v51 = vshll.u32 %v5023_v19, 16  ;;  %v5035_v19 = vld [vmem:[#allocation2 + $0x54] sm:$0xf] }
 0x1b3   : > { %v5095_v63 = vrot.slane %v5093_v16, 4  ;;  %v5098_v3 = vrot.slane %v5096_v51, 5 }
 0x1b5   : > { %v5099_v48 = vor.u32 %v5098_v3, %v5095_v63  ;;  %v5189_v3 = vshrl.u32 %v5035_v19, 16 }
 0x1b7   : > { %14384 = vmatmul.mubr.bf16.gmra.mrb[20].mxu0 %v13032_v44  ;;  %v5022_v44 = vld [vmem:[#allocation2 + $0x20] sm:$0x1] }
 0x1b8   : > { %14387 = vmatprep.mubr.bf16.mxu0 %v13033_v8  ;;  %v15598_v8 = vld [vmem:[#allocation2 + $0xa8] sm:$0xff]   ;;  %v5088_v49 = vshll.u32 %v5022_v44, 16  ;;  %v5192_v44 = vshll.u32 %v5035_v19, 16 }
 0x1bf   : > { %14388 = vmatmul.mubr.bf16.gmra.mrb[24].mxu0 %v13034_v27  ;;  %v5030_v27 = vld [vmem:[#allocation2 + $0x40] sm:$0xf] }
 0x1c0   : > { %14391 = vmatprep.mubr.bf16.mxu0 %v13035_v20  ;;  %v5076_v20 = vrot.slane %v5075_v32, 4  ;;  %v5198_v32 = vshll.u32 %v5036_v26, 16 }
 0x1c7   : > { %14392 = vmatmul.mubr.bf16.gmra.mrb[28].mxu0 %v13036_v40  ;;  %v5090_v40 = vrot.slane %v5088_v49, 5 }
 0x1c8   : > { %14411 = vmatprep.mubr.bf16.mxu0 %v15580_v5  ;;  %v16949_v5 = vrot.slane %v5099_v48, 4  ;;  %v5160_v48 = vshll.u32 %v5031_v24, 16 }
 0x1cf   : > { %14412 = vmatmul.mubr.bf16.vlgmr.msra.gmra.mrb[0].mxu0 %v15581_v12  ;;  %v5109_v12 = vor.u32 %v5108_v30, %v16947_v41  ;;  %v15602_v30 = vld [vmem:[#allocation2 + $0xcc] sm:$0xff]  }
 0x1d0   : > { %14444 = vmatpush3.bf16.msra.mxu0 %v15582_v62  ;;  %14415 = vmatprep.mubr.bf16.mxu0 %v15583_v37  ;;  %v15603_v62 = vld [vmem:[%s18256_s1 + $0x1f8] sm:$0xff]   ;;  %v5033_v37 = vld [vmem:[#allocation2 + $0x4c] sm:$0xf] }
 0x1d1   : > { %14445 = vmatprep.subr.bf16.mxu0 %v15585_v58  ;;  %v5174_v34 = vshll.u32 %v5033_v37, 16  ;;  %v5178_v53 = vshrl.u32 %v5033_v37, 16  ;;  %v16961_v43 = vrot.slane %v5109_v12, 4 }
 0x1d3   : > { %v16966_v42 = vrot.slane %v5174_v34, 5  ;;  %v5180_v39 = vrot.slane %v5178_v53, 4  ;;  %v5042_v34 = vld [vmem:[#allocation2 + $0x70] sm:$0xf] }
 0x1d4   : > { %14446 = vmatpush3.bf16.msra.mxu0 %v15585_v58  ;;  %v5028_v58 = vld [vmem:[#allocation2 + $0x38] sm:$0x1]  ;;  %v5246_v24 = vshll.u32 %v5042_v34, 16 }
 0x1d5   : > { %14447 = vmatprep.subr.bf16.mxu0 %v15588_v13  ;;  %v5136_v4 = vshll.u32 %v5028_v58, 16 }
 0x1d7   : > { %14416 = vmatmul.mubr.bf16.gmra.mrb[4].mxu0 %v15584_v33  ;;  %v5144_v33 = vshll.u32 %v5029_v56, 16  ;;  %v5138_v31 = vrot.slane %v5136_v4, 5 }
 0x1d8   : > { %14419 = vmatprep.mubr.bf16.mxu0 %v15586_v25  ;;  %14448 = vmatpush3.bf16.msra.mxu0 %v15588_v13  ;;  %v5141_v13 = vshrl.u32 %v5029_v56, 16  ;;  %v5150_v25 = vshll.u32 %v5030_v27, 16  ;;  %v5184_v56 = vshll.u32 %v5034_v61, 16 }
 0x1d9   : > { %14449 = vmatprep.subr.bf16.mxu0 %v15591_v60  ;;  %v5146_v2 = vrot.slane %v5144_v33, 5 }
 0x1da   : > { %v5143_v52 = vrot.slane %v5141_v13, 4  ;;  %v16963_v16 = vrot.slane %v5150_v25, 5  ;;  %v16984_v13 = vrot.slane %v5160_v48, 5 }
 0x1dc   : > { %14450 = vmatpush3.bf16.msra.mxu0 %v15591_v60  ;;  %v5154_v60 = vshrl.u32 %v5030_v27, 16  ;;  %v5147_v49 = vor.u32 %v5146_v2, %v5143_v52  ;;  %v5191_v27 = vrot.slane %v5189_v3, 4  ;;  %v5045_v3 = vld [vmem:[#allocation2 + $0x7c] sm:$0xf] }
 0x1dd   : > { %14451 = vmatprep.subr.bf16.mxu0 %v15594_v38  ;;  %v5274_v48 = vshrl.u32 %v5045_v3, 16 }
 0x1de   : > { %v5156_v51 = vrot.slane %v5154_v60, 4  ;;  %v16980_v37 = vrot.slane %v5147_v49, 4  ;;  %v16991_v60 = vrot.slane %v5184_v56, 5 }
 0x1df   : > { %14420 = vmatmul.mubr.bf16.gmra.mrb[8].mxu0 %v15587_v21  ;;  %v16952_v21 = vrot.slane %v5126_v57, 5 }
 0x1e0   : > { %14423 = vmatprep.mubr.bf16.mxu0 %v15589_v1  ;;  %14452 = vmatpush3.bf16.msra.mxu0 %v15594_v38  ;;  %v15599_v38 = vld [vmem:[#allocation2 + $0xb4] sm:$0xff]   ;;  %v5132_v1 = vrot.slane %v5130_v29, 4  ;;  %v5157_v28 = vor.u32 %v5156_v51, %v16963_v16  ;;  %v5153_v26 = vsel %vm16155_vm10, %v16980_v37, %v16963_v16 }
 0x1e1   : > { %14453 = vmatprep.subr.bf16.mxu0 %v15597_v35 }
 0x1e2   : > { %v5133_v46 = vor.u32 %v5132_v1, %v16952_v21  ;;  %v16982_v58 = vrot.slane %v5157_v28, 4  ;;  %v5041_v1 = vld [vmem:[#allocation2 + $0x6c] sm:$0xf]  ;;  %v5270_v28 = vshll.u32 %v5045_v3, 16 }
 0x1e3   : > { %v5237_v2 = vshrl.u32 %v5041_v1, 16  ;;  %v5240_v51 = vshll.u32 %v5041_v1, 16 }
 0x1e4   : > { %14454 = vmatpush3.bf16.msra.mxu0 %v15597_v35  ;;  %v5165_v35 = vshrl.u32 %v5032_v15, 16  ;;  %v5134_v57 = vrot.slane %v5133_v46, 4  ;;  %v5163_v46 = vsel %vm16155_vm10, %v16982_v58, %v16984_v13  ;;  %v17032_v58 = vrot.slane %v5270_v28, 5  ;;  %v5054_v28 = vld [vmem:[#allocation2 + $0xa0] sm:$0xf] }
 0x1e5   : > { %14455 = vmatprep.subr.bf16.mxu0 %v15600_v6  ;;  %v5276_v13 = vrot.slane %v5274_v48, 4  ;;  %v5056_v48 = vld [vmem:[#allocation2 + $0xa8] sm:$0xf] }
 0x1e6   : > { %v5167_v47 = vrot.slane %v5165_v35, 4  ;;  %v5139_v25 = vsel %vm16155_vm10, %v5134_v57, %v5138_v31  ;;  %v15612_v35 = vld [vmem:[%s18258_s3] sm:$0xff]   ;;  %v5239_v57 = vrot.slane %v5237_v2, 4 }
 0x1e7   : > { %14424 = vmatmul.mubr.bf16.gmra.mrb[12].mxu0 %v15590_v23  ;;  %v15601_v23 = vld [vmem:[#allocation2 + $0xc0] sm:$0xff]   ;;  %14539 = vmatprep.subr.bf16.mxu1 %v15612_v35 }
 0x1e8   : > { %14427 = vmatprep.mubr.bf16.mxu0 %v15592_v55  ;;  %14456 = vmatpush3.bf16.msra.mxu0 %v15600_v6  ;;  %v5168_v6 = vshll.u32 %v5032_v15, 16  ;;  %v16954_v55 = vrot.slane %v5112_v10, 5  ;;  %v5213_v10 = vshrl.u32 %v5038_v14, 16  ;;  %v5226_v15 = vshrl.u32 %v5039_v17, 16 }
 0x1e9   : > { %14457 = vmatprep.subr.bf16.mxu0 %v15603_v62  ;;  %14540 = vmatpush3.bf16.msra.mxu1 %v15612_v35 }
 0x1ea   : > { %v5170_v63 = vrot.slane %v5168_v6, 5  ;;  %v5115_v12 = vsel %vm16155_vm10, %v16961_v43, %v16954_v55  ;;  %v15613_v6 = vld [vmem:[%s18258_s3 + $0x8] sm:$0xff]  }
 0x1eb   : > { %v5040_v43 = vld [vmem:[#allocation2 + $0x68] sm:$0x1]  ;;  %14541 = vmatprep.subr.bf16.mxu1 %v15613_v6 }
 0x1ec   : > { %14458 = vmatpush3.bf16.msra.mxu0 %v15603_v62  ;;  %v5123_v62 = vor.u32 %v5122_v7, %v5119_v59  ;;  %v5171_v29 = vor.u32 %v5170_v63, %v5167_v47  ;;  %v5216_v59 = vshll.u32 %v5038_v14, 16  ;;  %v5222_v7 = vshll.u32 %v5039_v17, 16  ;;  %v5044_v63 = vld [vmem:[#allocation2 + $0x78] sm:$0xf]  ;;  %v5043_v14 = vld [vmem:[#allocation2 + $0x74] sm:$0x1] }
 0x1ed   : > { %14491 = vmatprep.subr.bf16.mxu0 %v16941_v9  ;;  %v5250_v47 = vshrl.u32 %v5042_v34, 16  ;;  %v5232_v16 = vshll.u32 %v5040_v43, 16  ;;  %v5047_v17 = vld [vmem:[#allocation2 + $0x84] sm:$0xf]  ;;  %v5261_v31 = vshrl.u32 %v5044_v63, 16  ;;  %v5264_v49 = vshll.u32 %v5044_v63, 16  ;;  %14542 = vmatpush3.bf16.msra.mxu1 %v15613_v6 }
 0x1ee   : > { %v5218_v55 = vrot.slane %v5216_v59, 5  ;;  %v5172_v53 = vrot.slane %v5171_v29, 4  ;;  %v5242_v29 = vrot.slane %v5240_v51, 5  ;;  %v5256_v59 = vshll.u32 %v5043_v14, 16 }
 0x1ef   : > { %14428 = vmatmul.mubr.bf16.gmra.mrb[16].mxu0 %v15593_v11  ;;  %v5081_v11 = vsel %vm16155_vm10, %v5076_v20, %v16944_v36  ;;  %v5124_v36 = vrot.slane %v5123_v62, 4  ;;  %v5037_v20 = vld [vmem:[#allocation2 + $0x5c] sm:$0x1]  ;;  %v16999_v62 = vrot.slane %v5222_v7, 5  ;;  %v5252_v56 = vrot.slane %v5250_v47, 4  ;;  %v15606_v7 = vld [vmem:[%s18256_s1 + $0x210] sm:$0xff]  }
 0x1f0   : > { %14431 = vmatprep.mubr.bf16.mxu0 %v15595_v50  ;;  %v5091_v50 = vsel %vm16155_vm10, %v5086_v54, %v5090_v40  ;;  %v5194_v54 = vrot.slane %v5192_v44, 5  ;;  %v16974_v40 = vrot.slane %v5198_v32, 5  ;;  %v5266_v37 = vrot.slane %v5264_v49, 5 }
 0x1f1   : > { %v5129_v33 = vsel %vm16155_vm10, %v5124_v36, %v16952_v21  ;;  %v5228_v21 = vrot.slane %v5226_v15, 4  ;;  %v15605_v36 = vld [vmem:[%s18256_s1 + $0x208] sm:$0xff]   ;;  %v5285_v15 = vshrl.u32 %v5047_v17, 16 }
 0x1f2   : > { %v13103_v52 = vcombine.low %v5129_v33, %v5139_v25  ;;  %v5243_v25 = vor.u32 %v5242_v29, %v5239_v57 }
 0x1f3   : > { %v5229_v44 = vor.u32 %v5228_v21, %v16999_v62  ;;  %v5050_v21 = vld [vmem:[#allocation2 + $0x90] sm:$0xf]  ;;  %v5287_v34 = vrot.slane %v5285_v15, 4  ;;  %v5342_v15 = vshll.u32 %v5054_v28, 16 }
 0x1f4   : > { %v17056_v2 = vrot.slane %v5243_v25, 4 }
 0x1f7   : > { %14432 = vmatmul.mubr.bf16.gmra.mrb[20].mxu0 %v15596_v0  ;;  %v13101_v0 = vcombine.low %v5081_v11, %v5091_v50  ;;  %v5195_v11 = vor.u32 %v5194_v54, %v5191_v27 }
 0x1f8   : > { %14435 = vmatprep.mubr.bf16.mxu0 %v15598_v8  ;;  %v5105_v8 = vsel %vm16155_vm10, %v16949_v5, %v16947_v41  ;;  %v5181_v41 = vor.u32 %v5180_v39, %v16966_v42  ;;  %v5204_v5 = vrot.slane %v5202_v22, 4 }
 0x1f9   : > { %v13102_v4 = vcombine.low %v5105_v8, %v5115_v12  ;;  %v17022_v32 = vrot.slane %v5195_v11, 4  ;;  %v5263_v12 = vrot.slane %v5261_v31, 4  ;;  %v5051_v11 = vld [vmem:[#allocation2 + $0x94] sm:$0xf] }
 0x1fa   : > { %v5182_v19 = vrot.slane %v5181_v41, 4  ;;  %v5205_v50 = vor.u32 %v5204_v5, %v16974_v40  ;;  %v5288_v41 = vshll.u32 %v5047_v17, 16  ;;  %v5322_v47 = vshrl.u32 %v5051_v11, 16 }
 0x1fb   : > { %v5201_v1 = vsel %vm16155_vm10, %v17022_v32, %v16974_v40  ;;  %v5267_v43 = vor.u32 %v5266_v37, %v5263_v12 }
 0x1fc   : > { %v5187_v8 = vsel %vm16155_vm10, %v5182_v19, %v16991_v60  ;;  %v17024_v22 = vrot.slane %v5205_v50, 4  ;;  %v5324_v57 = vrot.slane %v5322_v47, 4 }
 0x1ff   : > { %14436 = vmatmul.mubr.bf16.gmra.mrb[24].mxu0 %v15599_v38  ;;  %v5208_v38 = vshll.u32 %v5037_v20, 16  ;;  %v5230_v20 = vrot.slane %v5229_v44, 4  ;;  %v5053_v44 = vld [vmem:[#allocation2 + $0x9c] sm:$0xf] }
 0x200   : > { %14439 = vmatprep.mubr.bf16.mxu0 %v15601_v23  ;;  %v5215_v23 = vrot.slane %v5213_v10, 4  ;;  %v5234_v10 = vrot.slane %v5232_v16, 5  ;;  %v5333_v29 = vshrl.u32 %v5053_v44, 16 }
 0x201   : > { %v17013_v61 = vrot.slane %v5208_v38, 5  ;;  %v5046_v38 = vld [vmem:[#allocation2 + $0x80] sm:$0x1] }
 0x202   : > { %v5219_v39 = vor.u32 %v5218_v55, %v5215_v23  ;;  %v17046_v23 = vrot.slane %v5256_v59, 5  ;;  %v15607_v55 = vld [vmem:[%s18256_s1 + $0x218] sm:$0xff]   ;;  %v5235_v50 = vsel %vm16155_vm10, %v5230_v20, %v5234_v10 }
 0x203   : > { %v5211_v35 = vsel %vm16155_vm10, %v17024_v22, %v17013_v61  ;;  %v5052_v22 = vld [vmem:[#allocation2 + $0x98] sm:$0x1] }
 0x204   : > { %v5220_v27 = vrot.slane %v5219_v39, 4  ;;  %v13106_v63 = vcombine.low %v5201_v1, %v5211_v35  ;;  %v15608_v39 = vld [vmem:[%s18256_s1 + $0x220] sm:$0xff]  }
 0x206   : > { %v5225_v6 = vsel %vm16155_vm10, %v5220_v27, %v16999_v62  ;;  %v5277_v62 = vor.u32 %v5276_v13, %v17032_v58  ;;  %v5057_v27 = vld [vmem:[#allocation2 + $0xac] sm:$0xf] }
 0x207   : > { %14440 = vmatmul.mubr.bf16.gmra.mrb[28].mxu0 %v15602_v30  ;;  %v5048_v30 = vld [vmem:[#allocation2 + $0x88] sm:$0xf]  ;;  %v13107_v16 = vcombine.low %v5225_v6, %v5235_v50  ;;  %v5366_v13 = vshll.u32 %v5057_v27, 16  ;;  %v5055_v6 = vld [vmem:[#allocation2 + $0xa4] sm:$0x1] }
 0x208   : > { %14459 = vmatprep.mubr.bf16.mxu0 %v13101_v0  ;;  %v5177_v0 = vsel %vm16155_vm10, %v5172_v53, %v16966_v42  ;;  %v17026_v42 = vrot.slane %v5246_v24, 5  ;;  %v5294_v54 = vshll.u32 %v5048_v30, 16  ;;  %v5298_v5 = vshrl.u32 %v5048_v30, 16  ;;  %v5058_v50 = vld [vmem:[#allocation2 + $0xb0] sm:$0x1] }
 0x209   : > { %v13105_v33 = vcombine.low %v5177_v0, %v5187_v8  ;;  %v5290_v53 = vrot.slane %v5288_v41, 5  ;;  %v5318_v24 = vshll.u32 %v5051_v11, 16  ;;  %v5268_v0 = vrot.slane %v5267_v43, 4 }
 0x20a   : > { %v5253_v60 = vor.u32 %v5252_v56, %v17026_v42  ;;  %v17051_v40 = vrot.slane %v5294_v54, 5  ;;  %v5300_v19 = vrot.slane %v5298_v5, 4  ;;  %v5278_v8 = vrot.slane %v5277_v62, 4  ;;  %v5059_v62 = vld [vmem:[#allocation2 + $0xb4] sm:$0xf] }
 0x20b   : > { %v5291_v3 = vor.u32 %v5290_v53, %v5287_v34  ;;  %v5249_v14 = vsel %vm16155_vm10, %v17056_v2, %v17026_v42  ;;  %v17072_v30 = vrot.slane %v5318_v24, 5  ;;  %v5336_v56 = vshll.u32 %v5053_v44, 16  ;;  %v15611_v24 = vld [vmem:[%s18256_s1 + $0x238] sm:$0xff]  }
 0x20c   : > { %v17058_v51 = vrot.slane %v5253_v60, 4  ;;  %v5328_v42 = vshll.u32 %v5052_v22, 16  ;;  %v5346_v41 = vshrl.u32 %v5054_v28, 16  ;;  %v5357_v54 = vshrl.u32 %v5056_v48, 16 }
 0x20d   : > { %v5292_v20 = vrot.slane %v5291_v3, 4  ;;  %v5360_v5 = vshll.u32 %v5056_v48, 16  ;;  %v5273_v12 = vsel %vm16155_vm10, %v5268_v0, %v17032_v58  ;;  %v5325_v25 = vor.u32 %v5324_v57, %v17072_v30 }
 0x20e   : > { %v5259_v17 = vsel %vm16155_vm10, %v17058_v51, %v17046_v23  ;;  %v5335_v60 = vrot.slane %v5333_v29, 4  ;;  %v5330_v58 = vrot.slane %v5328_v42, 5  ;;  %v15610_v23 = vld [vmem:[%s18256_s1 + $0x230] sm:$0xff]   ;;  %v5359_v34 = vrot.slane %v5357_v54, 4 }
 0x20f   : > { %14460 = vmatmul.mubr.bf16.vlgmr.msra.gmra.mrb[0].mxu0 %v13102_v4  ;;  %v5280_v4 = vshll.u32 %v5046_v38, 16  ;;  %v5338_v38 = vrot.slane %v5336_v56, 5  ;;  %v5297_v1 = vsel %vm16155_vm10, %v5292_v20, %v17051_v40  ;;  %v5362_v53 = vrot.slane %v5360_v5, 5 }
 0x210   : > { %14492 = vmatpush3.bf16.msra.mxu0 %v16941_v9  ;;  %14463 = vmatprep.mubr.bf16.mxu0 %v13103_v52  ;;  %v13104_v9 = vcombine.low %v5153_v26, %v5163_v46  ;;  %v5049_v52 = vld [vmem:[#allocation2 + $0x8c] sm:$0x1]  ;;  %v5309_v26 = vshrl.u32 %v5050_v21, 16  ;;  %v5312_v46 = vshll.u32 %v5050_v21, 16  ;;  %v5348_v21 = vrot.slane %v5346_v41, 4 }
 0x211   : > { %14493 = vmatprep.subr.bf16.mxu0 %v15605_v36  ;;  %v5304_v61 = vshll.u32 %v5049_v52, 16  ;;  %v5282_v32 = vrot.slane %v5280_v4, 5  ;;  %v17093_v43 = vrot.slane %v5366_v13, 5  ;;  %v5326_v52 = vrot.slane %v5325_v25, 4  ;;  %v5064_v25 = vld [vmem:[#allocation2 + $0xc8] sm:$0x1] }
 0x212   : > { %v5311_v31 = vrot.slane %v5309_v26, 4  ;;  %v5314_v49 = vrot.slane %v5312_v46, 5  ;;  %v5339_v2 = vor.u32 %v5338_v38, %v5335_v60  ;;  %v5352_v51 = vshll.u32 %v5055_v6, 16  ;;  %v5060_v26 = vld [vmem:[#allocation2 + $0xb8] sm:$0xf] }
 0x213   : > { %v5306_v59 = vrot.slane %v5304_v61, 5  ;;  %v5283_v37 = vsel %vm16155_vm10, %v5278_v8, %v5282_v32  ;;  %v5376_v3 = vshll.u32 %v5058_v50, 16  ;;  %v5062_v61 = vld [vmem:[#allocation2 + $0xc0] sm:$0xf]  ;;  %v5390_v0 = vshll.u32 %v5060_v26, 16 }
 0x214   : > { %14494 = vmatpush3.bf16.msra.mxu0 %v15605_v36  ;;  %v5301_v36 = vor.u32 %v5300_v19, %v17051_v40  ;;  %v13108_v19 = vcombine.low %v5249_v14, %v5259_v17  ;;  %v13109_v11 = vcombine.low %v5273_v12, %v5283_v37  ;;  %v5394_v8 = vshrl.u32 %v5060_v26, 16  ;;  %v5066_v37 = vld [vmem:[#allocation2 + $0xd0] sm:$0xf] }
 0x215   : > { %14495 = vmatprep.subr.bf16.mxu0 %v15606_v7  ;;  %v5331_v22 = vsel %vm16155_vm10, %v5326_v52, %v5330_v58  ;;  %v5340_v14 = vrot.slane %v5339_v2, 4  ;;  %v5354_v17 = vrot.slane %v5352_v51, 5  ;;  %v5378_v56 = vrot.slane %v5376_v3, 5 }
 0x216   : > { %v5302_v10 = vrot.slane %v5301_v36, 4  ;;  %v5381_v36 = vshrl.u32 %v5059_v62, 16  ;;  %v5392_v42 = vrot.slane %v5390_v0, 5 }
 0x217   : > { %14464 = vmatmul.mubr.bf16.gmra.mrb[4].mxu0 %v13104_v9  ;;  %v5370_v9 = vshrl.u32 %v5057_v27, 16 }
 0x218   : > { %14467 = vmatprep.mubr.bf16.mxu0 %v13105_v33  ;;  %14496 = vmatpush3.bf16.msra.mxu0 %v15606_v7  ;;  %v15609_v7 = vld [vmem:[%s18256_s1 + $0x228] sm:$0xff]   ;;  %v5315_v33 = vor.u32 %v5314_v49, %v5311_v31  ;;  %v5307_v35 = vsel %vm16155_vm10, %v5302_v10, %v5306_v59  ;;  %v5405_v31 = vshrl.u32 %v5062_v61, 16  ;;  %v5408_v49 = vshll.u32 %v5062_v61, 16  ;;  %v5061_v10 = vld [vmem:[#allocation2 + $0xbc] sm:$0x1] }
 0x219   : > { %14497 = vmatprep.subr.bf16.mxu0 %v15607_v55  ;;  %v5372_v40 = vrot.slane %v5370_v9, 4  ;;  %v13110_v46 = vcombine.low %v5297_v1, %v5307_v35  ;;  %v5383_v27 = vrot.slane %v5381_v36, 4 }
 0x21a   : > { %v5316_v4 = vrot.slane %v5315_v33, 4  ;;  %v5407_v41 = vrot.slane %v5405_v31, 4  ;;  %v5410_v54 = vrot.slane %v5408_v49, 5  ;;  %v5400_v33 = vshll.u32 %v5061_v10, 16 }
 0x21b   : > { %v5373_v44 = vor.u32 %v5372_v40, %v17093_v43 }
 0x21c   : > { %14498 = vmatpush3.bf16.msra.mxu0 %v15607_v55  ;;  %v17091_v55 = vrot.slane %v5342_v15, 5  ;;  %v5321_v32 = vsel %vm16155_vm10, %v5316_v4, %v17072_v30  ;;  %v5396_v30 = vrot.slane %v5394_v8, 4  ;;  %v5065_v15 = vld [vmem:[#allocation2 + $0xcc] sm:$0xf]  ;;  %v5838_v8 = vld [vmem:[#allocation2 + $0x18] sm:$0xe] }
 0x21d   : > { %14499 = vmatprep.subr.bf16.mxu0 %v15608_v39  ;;  %v5374_v20 = vrot.slane %v5373_v44, 4  ;;  %v5429_v58 = vshrl.u32 %v5065_v15, 16  ;;  %v5432_v6 = vshll.u32 %v5065_v15, 16 }
 0x21e   : > { %v5349_v47 = vor.u32 %v5348_v21, %v17091_v55  ;;  %v5345_v13 = vsel %vm16155_vm10, %v5340_v14, %v17091_v55  ;;  %v5397_v35 = vor.u32 %v5396_v30, %v5392_v42  ;;  %v5442_v55 = vshrl.u32 %v5066_v37, 16  ;;  %v5841_v30 = vld [vmem:[#allocation2 + $0x24] sm:$0xe] }
 0x21f   : > { %14468 = vmatmul.mubr.bf16.gmra.mrb[8].mxu0 %v13106_v63  ;;  %v5363_v63 = vor.u32 %v5362_v53, %v5359_v34  ;;  %v5379_v38 = vsel %vm16155_vm10, %v5374_v20, %v5378_v56  ;;  %v5411_v21 = vor.u32 %v5410_v54, %v5407_v41  ;;  %v5424_v53 = vshll.u32 %v5064_v25, 16  ;;  %v5845_v56 = vld [vmem:[#allocation2 + $0x34] sm:$0xf]  ;;  %v5844_v41 = vld [vmem:[#allocation2 + $0x30] sm:$0xe] }
 0x220   : > { %14471 = vmatprep.mubr.bf16.mxu0 %v13107_v16  ;;  %14500 = vmatpush3.bf16.msra.mxu0 %v15608_v39  ;;  %v5063_v39 = vld [vmem:[#allocation2 + $0xc4] sm:$0xf]  ;;  %v5384_v16 = vshll.u32 %v5059_v62, 16  ;;  %v5350_v57 = vrot.slane %v5349_v47, 4  ;;  %v5398_v40 = vrot.slane %v5397_v35, 4  ;;  %v5402_v62 = vrot.slane %v5400_v33, 5 }
 0x221   : > { %14501 = vmatprep.subr.bf16.mxu0 %v15609_v7  ;;  %v5414_v28 = vshll.u32 %v5063_v39, 16  ;;  %v5418_v48 = vshrl.u32 %v5063_v39, 16  ;;  %v5364_v29 = vrot.slane %v5363_v63, 4  ;;  %v5431_v4 = vrot.slane %v5429_v58, 4  ;;  %v5839_v47 = vld [vmem:[#allocation2 + $0x1c] sm:$0xf] }
 0x222   : > { %v5386_v59 = vrot.slane %v5384_v16, 5  ;;  %v5355_v9 = vsel %vm16155_vm10, %v5350_v57, %v5354_v17  ;;  %v5444_v2 = vrot.slane %v5442_v55, 4  ;;  %v5412_v51 = vrot.slane %v5411_v21, 4  ;;  %v5846_v54 = vld [vmem:[#allocation2 + $0x38] sm:$0x1] }
 0x223   : > { %v5416_v5 = vrot.slane %v5414_v28, 5  ;;  %v5420_v12 = vrot.slane %v5418_v48, 4  ;;  %v5369_v60 = vsel %vm16155_vm10, %v5364_v29, %v17093_v43  ;;  %v5434_v43 = vrot.slane %v5432_v6, 5  ;;  %v5842_v29 = vld [vmem:[#allocation2 + $0x28] sm:$0xf] }
 0x224   : > { %14502 = vmatpush3.bf16.msra.mxu0 %v15609_v7  ;;  %v13111_v7 = vcombine.low %v5321_v32, %v5331_v22  ;;  %v5387_v1 = vor.u32 %v5386_v59, %v5383_v27  ;;  %v5403_v3 = vsel %vm16155_vm10, %v5398_v40, %v5402_v62  ;;  %v5936_v0 = vrot.slane %v5839_v47, 5  ;;  %v5840_v32 = vld [vmem:[#allocation2 + $0x20] sm:$0x1]  ;;  %v5847_v21 = vld [vmem:[#allocation2 + $0x3c] sm:$0xe] }
 0x225   : > { %14503 = vmatprep.subr.bf16.mxu0 %v15610_v23  ;;  %v5421_v34 = vor.u32 %v5420_v12, %v5416_v5  ;;  %v5435_v36 = vor.u32 %v5434_v43, %v5431_v4  ;;  %v5417_v44 = vsel %vm16155_vm10, %v5412_v51, %v5416_v5  ;;  %v13125_v28 = vrot.slane %v5838_v8, 9 }
 0x226   : > { %v5388_v50 = vrot.slane %v5387_v1, 4  ;;  %v5938_v48 = vrot.slane %v5936_v0, 4  ;;  %v5939_v57 = vrot.slane %v5840_v32, 5  ;;  %v5943_v10 = vrot.slane %v5842_v29, 5  ;;  %v5851_v1 = vld [vmem:[#allocation2 + $0x4c] sm:$0xf] }
 0x227   : > { %14472 = vmatmul.mubr.bf16.gmra.mrb[12].mxu0 %v13108_v19  ;;  %v13112_v19 = vcombine.low %v5345_v13, %v5355_v9  ;;  %v5422_v26 = vrot.slane %v5421_v34, 4  ;;  %v5436_v17 = vrot.slane %v5435_v36, 4  ;;  %v5937_v59 = vsel %vm16379_vm13, %v13125_v28, %v5936_v0  ;;  %v5849_v34 = vld [vmem:[#allocation2 + $0x44] sm:$0x1]  ;;  %v5858_v0 = vld [vmem:[#allocation2 + $0x68] sm:$0x1] }
 0x228   : > { %14475 = vmatprep.mubr.bf16.mxu0 %v13109_v11  ;;  %14504 = vmatpush3.bf16.msra.mxu0 %v15610_v23  ;;  %v5438_v23 = vshll.u32 %v5066_v37, 16  ;;  %v13113_v11 = vcombine.low %v5369_v60, %v5379_v38  ;;  %v5393_v63 = vsel %vm16155_vm10, %v5388_v50, %v5392_v42  ;;  %v5940_v42 = vsel %vm16379_vm13, %v5938_v48, %v5939_v57  ;;  %v5848_v38 = vld [vmem:[#allocation2 + $0x40] sm:$0xf]  ;;  %v5860_v48 = vld [vmem:[#allocation2 + $0x70] sm:$0xf] }
 0x229   : > { %14505 = vmatprep.subr.bf16.mxu0 %v15611_v24  ;;  %v13114_v22 = vcombine.low %v5393_v63, %v5403_v3  ;;  %v5950_v15 = vrot.slane %v5845_v56, 5  ;;  %v13157_v12 = vcombine.low %v5937_v59, %v5940_v42  ;;  %v13126_v37 = vrot.slane %v5841_v30, 9  ;;  %v5863_v57 = vld [vmem:[#allocation2 + $0x7c] sm:$0xf]  ;;  %v5859_v59 = vld [vmem:[#allocation2 + $0x6c] sm:$0xe] }
 0x22a   : > { %v5440_v52 = vrot.slane %v5438_v23, 5  ;;  %v5945_v13 = vrot.slane %v5943_v10, 4  ;;  %v13127_v33 = vrot.slane %v5844_v41, 9  ;;  %v5953_v60 = vrot.slane %v5846_v54, 5  ;;  %v5861_v42 = vld [vmem:[#allocation2 + $0x74] sm:$0x1] }
 0x22b   : > { %v5952_v25 = vrot.slane %v5950_v15, 4  ;;  %v5944_v35 = vsel %vm16379_vm13, %v13126_v37, %v5943_v10  ;;  %v5957_v6 = vrot.slane %v5848_v38, 5  ;;  %v13128_v62 = vrot.slane %v5847_v21, 9 }
 0x22c   : > { %14506 = vmatpush3.bf16.msra.mxu0 %v15611_v24  ;;  %v5067_v24 = vld [vmem:[#allocation2 + $0xd4] sm:$0x1]  ;;  %v5445_v61 = vor.u32 %v5444_v2, %v5440_v52  ;;  %v5441_v27 = vsel %vm16155_vm10, %v5436_v17, %v5440_v52  ;;  %v5951_v23 = vsel %vm16379_vm13, %v13127_v33, %v5950_v15  ;;  %v5960_v43 = vrot.slane %v5849_v34, 5  ;;  %v5864_v15 = vld [vmem:[#allocation2 + $0x80] sm:$0x1] }
 0x22d   : > { %v5448_v39 = vshll.u32 %v5067_v24, 16  ;;  %v5954_v55 = vsel %vm16379_vm13, %v5952_v25, %v5953_v60  ;;  %v5959_v4 = vrot.slane %v5957_v6, 4  ;;  %v5958_v24 = vsel %vm16379_vm13, %v13128_v62, %v5957_v6  ;;  %v5866_v25 = vld [vmem:[#allocation2 + $0x88] sm:$0xf]  ;;  %v5869_v60 = vld [vmem:[#allocation2 + $0x94] sm:$0xf] }
 0x22e   : > { %v5446_v31 = vrot.slane %v5445_v61, 4  ;;  %v13159_v40 = vcombine.low %v5951_v23, %v5954_v55  ;;  %v5853_v61 = vld [vmem:[#allocation2 + $0x54] sm:$0xe]  ;;  %v5981_v28 = vrot.slane %v5858_v0, 5  ;;  %v5992_v30 = vrot.slane %v5863_v57, 5 }
 0x22f   : > { %14476 = vmatmul.mubr.bf16.gmra.mrb[16].mxu0 %v13110_v46  ;;  %v5426_v46 = vrot.slane %v5424_v53, 5  ;;  %v5450_v49 = vrot.slane %v5448_v39, 5  ;;  %v5964_v53 = vrot.slane %v5851_v1, 5  ;;  %v5961_v47 = vsel %vm16379_vm13, %v5959_v4, %v5960_v43  ;;  %v5855_v39 = vld [vmem:[#allocation2 + $0x5c] sm:$0x1] }
 0x230   : > { %14479 = vmatprep.mubr.bf16.mxu0 %v13111_v7  ;;  %v5843_v7 = vld [vmem:[#allocation2 + $0x2c] sm:$0x1]  ;;  %v13160_v8 = vcombine.low %v5958_v24, %v5961_v47  ;;  %v5974_v17 = vrot.slane %v5855_v39, 5  ;;  %v5988_v37 = vrot.slane %v5861_v42, 5  ;;  %v5995_v33 = vrot.slane %v5864_v15, 5 }
 0x231   : > { %v5427_v16 = vsel %vm16155_vm10, %v5422_v26, %v5426_v46  ;;  %v5451_v20 = vsel %vm16155_vm10, %v5446_v31, %v5450_v49  ;;  %v5946_v9 = vrot.slane %v5843_v7, 5  ;;  %v5966_v2 = vrot.slane %v5964_v53, 4  ;;  %v5854_v26 = vld [vmem:[#allocation2 + $0x58] sm:$0xf]  ;;  %v5857_v46 = vld [vmem:[#allocation2 + $0x64] sm:$0xf] }
 0x232   : > { %v13115_v14 = vcombine.low %v5417_v44, %v5427_v16  ;;  %v13116_v5 = vcombine.low %v5441_v27, %v5451_v20  ;;  %v5971_v63 = vrot.slane %v5854_v26, 5  ;;  %v5978_v44 = vrot.slane %v5857_v46, 5  ;;  %v5856_v16 = vld [vmem:[#allocation2 + $0x60] sm:$0xe]  ;;  %v5862_v7 = vld [vmem:[#allocation2 + $0x78] sm:$0xe] }
 0x233   : > { %v5947_v58 = vsel %vm16379_vm13, %v5945_v13, %v5946_v9  ;;  %v13131_v31 = vrot.slane %v5856_v16, 9  ;;  %v5985_v27 = vrot.slane %v5860_v48, 5  ;;  %v13133_v13 = vrot.slane %v5862_v7, 9  ;;  %v5865_v23 = vld [vmem:[#allocation2 + $0x84] sm:$0xe] }
 0x234   : > { %v13158_v50 = vcombine.low %v5944_v35, %v5947_v58  ;;  %v5980_v49 = vrot.slane %v5978_v44, 4  ;;  %v5994_v9 = vrot.slane %v5992_v30, 4  ;;  %v5999_v35 = vrot.slane %v5866_v25, 5  ;;  %v5867_v55 = vld [vmem:[#allocation2 + $0x8c] sm:$0x1] }
 0x235   : > { %v5979_v20 = vsel %vm16379_vm13, %v13131_v31, %v5978_v44  ;;  %v5993_v58 = vsel %vm16379_vm13, %v13133_v13, %v5992_v30  ;;  %v6006_v21 = vrot.slane %v5869_v60, 5  ;;  %v5868_v34 = vld [vmem:[#allocation2 + $0x90] sm:$0xe]  ;;  %v6002_v62 = vrot.slane %v5867_v55, 5  ;;  %v5874_v39 = vld [vmem:[#allocation2 + $0xa8] sm:$0xe] }
 0x236   : > { %v5982_v10 = vsel %vm16379_vm13, %v5980_v49, %v5981_v28  ;;  %v5996_v6 = vsel %vm16379_vm13, %v5994_v9, %v5995_v33  ;;  %v13135_v4 = vrot.slane %v5868_v34, 9  ;;  %v5876_v44 = vld [vmem:[#allocation2 + $0xb0] sm:$0x1]  ;;  %v5878_v49 = vld [vmem:[#allocation2 + $0xb8] sm:$0xf] }
 0x237   : > { %14480 = vmatmul.mubr.bf16.gmra.mrb[20].mxu0 %v13112_v19  ;;  %v5850_v19 = vld [vmem:[#allocation2 + $0x48] sm:$0xe]  ;;  %v13163_v54 = vcombine.low %v5979_v20, %v5982_v10  ;;  %v6008_v43 = vrot.slane %v6006_v21, 4  ;;  %v6023_v31 = vrot.slane %v5876_v44, 5  ;;  %v5881_v28 = vld [vmem:[#allocation2 + $0xc4] sm:$0xf] }
 0x238   : > { %14483 = vmatprep.mubr.bf16.mxu0 %v13113_v11  ;;  %v5852_v11 = vld [vmem:[#allocation2 + $0x50] sm:$0x1]  ;;  %v13129_v52 = vrot.slane %v5850_v19, 9  ;;  %v6007_v47 = vsel %vm16379_vm13, %v13135_v4, %v6006_v21  ;;  %v5877_v20 = vld [vmem:[#allocation2 + $0xb4] sm:$0xe]  ;;  %v15617_v4 = vld [vmem:[%s18258_s3 + $0x28] sm:$0xff]  }
 0x239   : > { %v5967_v51 = vrot.slane %v5852_v11, 5  ;;  %v13165_v11 = vcombine.low %v5993_v58, %v5996_v6  ;;  %v5879_v10 = vld [vmem:[#allocation2 + $0xbc] sm:$0x1]  ;;  %v5880_v42 = vld [vmem:[#allocation2 + $0xc0] sm:$0xe] }
 0x23a   : > { %v5965_v3 = vsel %vm16379_vm13, %v13129_v52, %v5964_v53  ;;  %v5870_v53 = vld [vmem:[#allocation2 + $0x98] sm:$0x1]  ;;  %v5882_v30 = vld [vmem:[#allocation2 + $0xc8] sm:$0x1]  ;;  %v5884_v9 = vld [vmem:[#allocation2 + $0xd0] sm:$0xf] }
 0x23b   : > { %v5968_v36 = vsel %vm16379_vm13, %v5966_v2, %v5967_v51  ;;  %v6009_v52 = vrot.slane %v5870_v53, 5  ;;  %v5872_v2 = vld [vmem:[#allocation2 + $0xa0] sm:$0xf]  ;;  %v5875_v51 = vld [vmem:[#allocation2 + $0xac] sm:$0xf]  ;;  %v6037_v13 = vrot.slane %v5882_v30, 5 }
 0x23c   : > { %v13161_v32 = vcombine.low %v5965_v3, %v5968_v36  ;;  %v6013_v24 = vrot.slane %v5872_v2, 5  ;;  %v5871_v3 = vld [vmem:[#allocation2 + $0x9c] sm:$0xe]  ;;  %v5873_v36 = vld [vmem:[#allocation2 + $0xa4] sm:$0x1]  ;;  %v6041_v60 = vrot.slane %v5884_v9, 5 }
 0x23d   : > { %v5885_v58 = vld [vmem:[#allocation2 + $0xd4] sm:$0x1]  ;;  %v15620_v2 = vld [vmem:[#allocation3] sm:$0xff]  }
 0x23e   : > { %v6043_v21 = vrot.slane %v6041_v60, 4  ;;  %v6044_v34 = vrot.slane %v5885_v58, 5  ;;  %14555 = vmatprep.mubr.bf16.mxu1 %v15620_v2  ;;  %v6960_v2 = vld [vmem:[#allocation3 + $0x14] sm:$0x1] }
 0x23f   : > { %14484 = vmatmul.mubr.bf16.gmra.mrb[24].mxu0 %v13114_v22  ;;  %v13130_v22 = vrot.slane %v5853_v61, 9  ;;  %v6020_v61 = vrot.slane %v5875_v51, 5  ;;  %v17212_v51 = vld [vmem:[%s18258_s3 + $0x40] sm:$0xff]  }
 0x240   : > { %14487 = vmatprep.mubr.bf16.mxu0 %v13115_v14  ;;  %v5973_v14 = vrot.slane %v5971_v63, 4 }
 0x241   : > { %v5972_v29 = vsel %vm16379_vm13, %v13130_v22, %v5971_v63  ;;  %v6010_v63 = vsel %vm16379_vm13, %v6008_v43, %v6009_v52  ;;  %v6016_v22 = vrot.slane %v5873_v36, 5  ;;  %v15618_v43 = vld [vmem:[%s18258_s3 + $0x30] sm:$0xff]   ;;  %v15619_v52 = vld [vmem:[%s18258_s3 + $0x38] sm:$0xff]  }
 0x242   : > { %v5975_v56 = vsel %vm16379_vm13, %v5973_v14, %v5974_v17  ;;  %v13167_v0 = vcombine.low %v6007_v47, %v6010_v63  ;;  %v13137_v14 = vrot.slane %v5874_v39, 9  ;;  %v6022_v17 = vrot.slane %v6020_v61, 4 }
 0x243   : > { %v13162_v41 = vcombine.low %v5972_v29, %v5975_v56  ;;  %v6027_v29 = vrot.slane %v5878_v49, 5 }
 0x244   : > { %v6021_v56 = vsel %vm16379_vm13, %v13137_v14, %v6020_v61 }
 0x247   : > { %14488 = vmatmul.mubr.bf16.gmra.mrb[28].mxu0 %v13116_v5  ;;  %v13132_v5 = vrot.slane %v5859_v59, 9  ;;  %v6034_v59 = vrot.slane %v5881_v28, 5 }
 0x248   : > { %14507 = vmatprep.mubr.bf16.mxu0 %v13157_v12  ;;  %v5987_v12 = vrot.slane %v5985_v27, 4 }
 0x249   : > { %v5986_v38 = vsel %vm16379_vm13, %v13132_v5, %v5985_v27  ;;  %v6024_v27 = vsel %vm16379_vm13, %v6022_v17, %v6023_v31  ;;  %v6030_v5 = vrot.slane %v5879_v10, 5 }
 0x24a   : > { %v5989_v1 = vsel %vm16379_vm13, %v5987_v12, %v5988_v37  ;;  %v13169_v15 = vcombine.low %v6021_v56, %v6024_v27  ;;  %v13139_v12 = vrot.slane %v5880_v42, 9  ;;  %v6036_v37 = vrot.slane %v6034_v59, 4 }
 0x24b   : > { %v13164_v19 = vcombine.low %v5986_v38, %v5989_v1 }
 0x24c   : > { %v6035_v38 = vsel %vm16379_vm13, %v13139_v12, %v6034_v59  ;;  %v6038_v1 = vsel %vm16379_vm13, %v6036_v37, %v6037_v13 }
 0x24f   : > { %14508 = vmatmul.mubr.bf16.vlgmr.msra.gmra.mrb[0].mxu0 %v13158_v50  ;;  %v13134_v50 = vrot.slane %v5865_v23, 9  ;;  %v13171_v23 = vcombine.low %v6035_v38, %v6038_v1 }
 0x250   : > { %14511 = vmatprep.mubr.bf16.mxu0 %v13159_v40  ;;  %v6001_v40 = vrot.slane %v5999_v35, 4 }
 0x251   : > { %v6000_v26 = vsel %vm16379_vm13, %v13134_v50, %v5999_v35  ;;  %v5883_v35 = vld [vmem:[#allocation2 + $0xcc] sm:$0xe]  ;;  %v15614_v50 = vld [vmem:[%s18258_s3 + $0x10] sm:$0xff]  }
 0x252   : > { %v6003_v46 = vsel %vm16379_vm13, %v6001_v40, %v6002_v62  ;;  %v13140_v55 = vrot.slane %v5883_v35, 9  ;;  %14543 = vmatprep.subr.bf16.mxu1 %v15614_v50  ;;  %v15615_v40 = vld [vmem:[%s18258_s3 + $0x18] sm:$0xff]   ;;  %v15616_v62 = vld [vmem:[%s18258_s3 + $0x20] sm:$0xff]  }
 0x253   : > { %v13166_v16 = vcombine.low %v6000_v26, %v6003_v46  ;;  %14544 = vmatpush3.bf16.msra.mxu1 %v15614_v50  ;;  %v7453_v26 = vld [vmem:[#allocation3] sm:$0xf]  ;;  %v17218_v46 = vld [vmem:[%s18257_s2] ss:$0 sm:$0xff] }
 0x254   : > { %v6042_v53 = vsel %vm16379_vm13, %v13140_v55, %v6041_v60  ;;  %14545 = vmatprep.subr.bf16.mxu1 %v15615_v40  ;;  %v7502_v47 = vshrl.u32 %v7453_v26, 16  ;;  %v7505_v63 = vshll.u32 %v7453_v26, 16  ;;  %v6967_v50 = vld [vmem:[#allocation3 + $0x20] sm:$0x1] }
 0x256   : > { %v17223_v14 = vrot.slane %v7502_v47, 4  ;;  %v17225_v17 = vrot.slane %v7505_v63, 5 }
 0x257   : > { %14512 = vmatmul.mubr.bf16.gmra.mrb[4].mxu0 %v13160_v8  ;;  %v13136_v8 = vrot.slane %v5871_v3, 9  ;;  %14546 = vmatpush3.bf16.msra.mxu1 %v15615_v40 }
 0x258   : > { %14515 = vmatprep.mubr.bf16.mxu0 %v13161_v32  ;;  %v6015_v32 = vrot.slane %v6013_v24, 4  ;;  %14547 = vmatprep.subr.bf16.mxu1 %v15616_v62  ;;  %v7508_v10 = vor.u32 %v17225_v17, %v17223_v14 }
 0x259   : > { %v6014_v48 = vsel %vm16379_vm13, %v13136_v8, %v6013_v24  ;;  %v7454_v24 = vld [vmem:[#allocation3 + $0x4] sm:$0xf] }
 0x25a   : > { %v6017_v57 = vsel %vm16379_vm13, %v6015_v32, %v6016_v22 }
 0x25b   : > { %v13168_v7 = vcombine.low %v6014_v48, %v6017_v57  ;;  %14548 = vmatpush3.bf16.msra.mxu1 %v15616_v62 }
 0x25c   : > { %14549 = vmatprep.subr.bf16.mxu1 %v15617_v4 }
 0x25f   : > { %14516 = vmatmul.mubr.bf16.gmra.mrb[8].mxu0 %v13162_v41  ;;  %v13138_v41 = vrot.slane %v5877_v20, 9  ;;  %14550 = vmatpush3.bf16.msra.mxu1 %v15617_v4 }
 0x260   : > { %14519 = vmatprep.mubr.bf16.mxu0 %v13163_v54  ;;  %v6029_v54 = vrot.slane %v6027_v29, 4  ;;  %14551 = vmatprep.subr.bf16.mxu1 %v15618_v43 }
 0x261   : > { %v6028_v33 = vsel %vm16379_vm13, %v13138_v41, %v6027_v29 }
 0x262   : > { %v6031_v25 = vsel %vm16379_vm13, %v6029_v54, %v6030_v5 }
 0x263   : > { %v13170_v6 = vcombine.low %v6028_v33, %v6031_v25  ;;  %14552 = vmatpush3.bf16.msra.mxu1 %v15618_v43  ;;  %v6963_v33 = vld [vmem:[#allocation3 + $0x18] sm:$0xf] }
 0x264   : > { %14553 = vmatprep.subr.bf16.mxu1 %v15619_v52 }
 0x267   : > { %14520 = vmatmul.mubr.bf16.gmra.mrb[12].mxu0 %v13164_v19  ;;  %v6045_v19 = vsel %vm16379_vm13, %v6043_v21, %v6044_v34  ;;  %14554 = vmatpush3.bf16.msra.mxu1 %v15619_v52 }
 0x268   : > { %14523 = vmatprep.mubr.bf16.mxu0 %v13165_v11  ;;  %v13172_v11 = vcombine.low %v6042_v53, %v6045_v19  ;;  %14587 = vmatprep.subr.bf16.mxu1 %v17212_v51 }
 0x26f   : > { %14524 = vmatmul.mubr.bf16.gmra.mrb[16].mxu0 %v13166_v16  ;;  %v7511_v16 = vshll.u32 %v7454_v24, 16 }
 0x270   : > { %14527 = vmatprep.mubr.bf16.mxu0 %v13167_v0  ;;  %v7515_v0 = vshrl.u32 %v7454_v24, 16 }
 0x271   : > { %v17228_v56 = vrot.slane %v7511_v16, 5  ;;  %v17256_v16 = vld [vmem:[#allocation3 + $0x8] sm:$0x1] }
 0x272   : > { %v17232_v59 = vrot.slane %v7515_v0, 4 }
 0x274   : > { %v7518_v0 = vor.u32 %v17232_v59, %v17228_v56 }
 0x277   : > { %14528 = vmatmul.mubr.bf16.gmra.mrb[20].mxu0 %v13168_v7 }
 0x278   : > { %14531 = vmatprep.mubr.bf16.mxu0 %v13169_v15 }
 0x27f   : > { %14532 = vmatmul.mubr.bf16.gmra.mrb[24].mxu0 %v13170_v6 }
 0x280   : > { %14535 = vmatprep.mubr.bf16.mxu0 %v13171_v23  ;;  %v6954_v23 = vld [vmem:[#allocation3 + $0xc] sm:$0xf] }
 0x287   : > { %14536 = vmatmul.mubr.bf16.gmra.mrb[28].mxu0 %v13172_v11 }
 0x322   : > { %v14509_v3 = vpop.f32.mrb[0].mxu0 }
 0x323   : > { %v6473_v36 = vadd.f32 %v14509_v3, %v17218_v46  ;;  %v6209_v61 = vpop.f32.mrb[1].mxu0 }
 0x324   : > { %v6471_v39 = vadd.f32 %v17218_v46, %v6209_v61  ;;  %v14510_v44 = vpop.f32.mrb[2].mxu0 }
 0x325   : > { %v6505_v8 = vmax.f32 %v6473_v36, 0.0  ;;  %v6474_v32 = vadd.f32 %v14510_v44, %v17218_v46  ;;  %v6212_v22 = vpop.f32.mrb[3].mxu0 }
 0x326   : > { %v6503_v31 = vmax.f32 %v6471_v39, 0.0  ;;  %v6472_v49 = vadd.f32 %v17218_v46, %v6212_v22 }
 0x327   : > { %v13645_v28 = vpack.c.bf16 %v6505_v8, %v6505_v8  ;;  %v6506_v48 = vmax.f32 %v6474_v32, 0.0 }
 0x328   : > { %v13643_v57 = vpack.c.bf16 %v6503_v31, %v6503_v31  ;;  %v6504_v29 = vmax.f32 %v6472_v49, 0.0 }
 0x329   : > { %v6649_v27 = vshrl.u32 %v13645_v28, 16  ;;  %v13646_v20 = vpack.c.bf16 %v6506_v48, %v6506_v48  ;;  %v6652_v42 = vshll.u32 %v13645_v28, 16 }
 0x32a   : > { %v6632_v30 = vshrl.u32 %v13643_v57, 16  ;;  %v6635_v7 = vshll.u32 %v13643_v57, 16  ;;  %v13644_v15 = vpack.c.bf16 %v6504_v29, %v6504_v29  ;;  %v14513_v41 = vpop.f32.mrb[4].mxu0 }
 0x32b   : > { %v6651_v54 = vrot.slane %v6649_v27, 7  ;;  %v6657_v5 = vshrl.u32 %v13646_v20, 16  ;;  %v6660_v12 = vshll.u32 %v13646_v20, 16  ;;  %v6477_v37 = vadd.f32 %v14513_v41, %v17218_v46  ;;  %v6225_v13 = vpop.f32.mrb[5].mxu0  ;;  %v6977_v20 = vld [vmem:[#allocation3 + $0x30] sm:$0xf] }
 0x32c   : > { %v6634_v25 = vrot.slane %v6632_v30, 7  ;;  %v6640_v60 = vshrl.u32 %v13644_v15, 16  ;;  %v6643_v38 = vshll.u32 %v13644_v15, 16  ;;  %v6475_v1 = vadd.f32 %v17218_v46, %v6225_v13  ;;  %v14514_v35 = vpop.f32.mrb[6].mxu0 }
 0x32d   : > { %v6654_v58 = vor.u32 %v6652_v42, %v6651_v54  ;;  %v6655_v6 = vrot.slane %v6651_v54, 4  ;;  %v6659_v55 = vrot.slane %v6657_v5, 7  ;;  %v6509_v21 = vmax.f32 %v6477_v37, 0.0  ;;  %v6228_v34 = vpop.f32.mrb[7].mxu0 }
 0x32e   : > { %v6637_v53 = vor.u32 %v6635_v7, %v6634_v25  ;;  %v6638_v19 = vrot.slane %v6634_v25, 4  ;;  %v6642_v40 = vrot.slane %v6640_v60, 7  ;;  %v6507_v62 = vmax.f32 %v6475_v1, 0.0 }
 0x32f   : > { %v6964_v4 = vsel %vm17237_vm1, %v6654_v58, %v6963_v33  ;;  %v6662_v43 = vor.u32 %v6660_v12, %v6659_v55  ;;  %v6664_v52 = vrot.slane %v6659_v55, 4  ;;  %v13649_v26 = vpack.c.bf16 %v6509_v21, %v6509_v21  ;;  %v6970_v12 = vld [vmem:[#allocation3 + $0x24] sm:$0xf] }
 0x330   : > { %6965 = vst [vmem:[#allocation3 + $0x18] sm:$0xf] %v6964_v4  ;;  %v6955_v24 = vsel %vm17237_vm1, %v6637_v53, %v6954_v23  ;;  %v6645_v47 = vor.u32 %v6643_v38, %v6642_v40  ;;  %v6647_v63 = vrot.slane %v6642_v40, 4  ;;  %v13647_v3 = vpack.c.bf16 %v6507_v62, %v6507_v62 }
 0x331   : > { %6956 = vst [vmem:[#allocation3 + $0xc] sm:$0xf] %v6955_v24  ;;  %v6663_v61 = vsel %vm15927_vm5, %v6655_v6, %v6662_v43  ;;  %v6968_v39 = vsel %vm17244_vm2, %v6664_v52, %v6967_v50  ;;  %v6683_v44 = vshrl.u32 %v13649_v26, 16  ;;  %v6686_v22 = vshll.u32 %v13649_v26, 16  ;;  %v6981_v43 = vld [vmem:[#allocation3 + $0x38] sm:$0x1] }
 0x332   : > { %6966 = vst [vmem:[#allocation3 + $0x1c] sm:$0xf] %v6663_v61  ;;  %6969 = vst [vmem:[#allocation3 + $0x20] sm:$0x1] %v6968_v39  ;;  %v6646_v8 = vsel %vm15927_vm5, %v6638_v19, %v6645_v47  ;;  %v6961_v32 = vsel %vm17244_vm2, %v6647_v63, %v6960_v2  ;;  %v6666_v31 = vshrl.u32 %v13647_v3, 16  ;;  %v14517_v49 = vpop.f32.mrb[8].mxu0  ;;  %v6478_v48 = vadd.f32 %v14514_v35, %v17218_v46 }
 0x333   : > { %6957 = vst [vmem:[#allocation3 + $0x10] sm:$0xf] %v6646_v8  ;;  %6962 = vst [vmem:[#allocation3 + $0x14] sm:$0x1] %v6961_v32  ;;  %v17264_v28 = vrot.slane %v6683_v44, 7  ;;  %v6476_v57 = vadd.f32 %v17218_v46, %v6228_v34  ;;  %v6481_v29 = vadd.f32 %v14517_v49, %v17218_v46  ;;  %v6241_v27 = vpop.f32.mrb[9].mxu0 }
 0x334   : > { %v17269_v42 = vrot.slane %v6666_v31, 7  ;;  %v6669_v30 = vshll.u32 %v13647_v3, 16  ;;  %v6479_v7 = vadd.f32 %v17218_v46, %v6241_v27  ;;  %v14518_v15 = vpop.f32.mrb[10].mxu0  ;;  %v7521_v41 = vshll.u32 %v17256_v16, 16  ;;  %v15625_v19 = vld [vmem:[%s18258_s3 + $0x48] sm:$0xff]  }
 0x335   : > { %v6688_v54 = vor.u32 %v6686_v22, %v17264_v28  ;;  %v6689_v5 = vrot.slane %v17264_v28, 4  ;;  %v6510_v37 = vmax.f32 %v6478_v48, 0.0  ;;  %v6508_v13 = vmax.f32 %v6476_v57, 0.0  ;;  %v6244_v33 = vpop.f32.mrb[11].mxu0  ;;  %v6974_v52 = vld [vmem:[#allocation3 + $0x2c] sm:$0x1] }
 0x336   : > { %v6671_v25 = vor.u32 %v6669_v30, %v17269_v42  ;;  %v6672_v60 = vrot.slane %v17269_v42, 4  ;;  %v6513_v38 = vmax.f32 %v6481_v29, 0.0  ;;  %v6511_v1 = vmax.f32 %v6479_v7, 0.0  ;;  %v6991_v44 = vld [vmem:[#allocation3 + $0x48] sm:$0xf] }
 0x337   : > { %v6978_v35 = vsel %vm17237_vm1, %v6688_v54, %v6977_v20  ;;  %v13650_v58 = vpack.c.bf16 %v6510_v37, %v6510_v37  ;;  %v13648_v6 = vpack.c.bf16 %v6508_v13, %v6508_v13  ;;  %v6482_v23 = vadd.f32 %v14518_v15, %v17218_v46  ;;  %v6984_v7 = vld [vmem:[#allocation3 + $0x3c] sm:$0xf]  ;;  %v7459_v17 = vld [vmem:[#allocation3 + $0x18] sm:$0xf] }
 0x338   : > { %6979 = vst [vmem:[#allocation3 + $0x30] sm:$0xf] %v6978_v35  ;;  %v6971_v55 = vsel %vm17237_vm1, %v6671_v25, %v6970_v12  ;;  %v13653_v21 = vpack.c.bf16 %v6513_v38, %v6513_v38  ;;  %v13651_v34 = vpack.c.bf16 %v6511_v1, %v6511_v1  ;;  %v6480_v53 = vadd.f32 %v17218_v46, %v6244_v33  ;;  %v15628_v33 = vld [vmem:[%s18258_s3 + $0x50] sm:$0xff]  }
 0x339   : > { %6972 = vst [vmem:[#allocation3 + $0x24] sm:$0xf] %v6971_v55  ;;  %v6691_v50 = vshrl.u32 %v13650_v58, 16  ;;  %v6694_v40 = vshll.u32 %v13650_v58, 16  ;;  %v6674_v62 = vshrl.u32 %v13648_v6, 16  ;;  %v6677_v4 = vshll.u32 %v13648_v6, 16 }
 0x33a   : > { %v6717_v2 = vshrl.u32 %v13653_v21, 16  ;;  %v6720_v26 = vshll.u32 %v13653_v21, 16  ;;  %v6700_v24 = vshrl.u32 %v13651_v34, 16  ;;  %v6703_v47 = vshll.u32 %v13651_v34, 16  ;;  %v14521_v63 = vpop.f32.mrb[12].mxu0  ;;  %v15621_v3 = vld [vmem:[#allocation3 + $0xc] sm:$0xff]  }
 0x33b   : > { %v6693_v61 = vrot.slane %v6691_v50, 7  ;;  %v6676_v39 = vrot.slane %v6674_v62, 7  ;;  %v6514_v8 = vmax.f32 %v6482_v23, 0.0  ;;  %v6512_v32 = vmax.f32 %v6480_v53, 0.0  ;;  %v6257_v22 = vpop.f32.mrb[13].mxu0  ;;  %v15623_v31 = vld [vmem:[#allocation3 + $0x18] sm:$0xff]   ;;  %14556 = vmatmul.mubr.bf16.vlgmr.msra.gmra.mrb[0].mxu1 %v15621_v3 }
 0x33c   : > { %v17286_v49 = vrot.slane %v6717_v2, 7  ;;  %v17288_v28 = vrot.slane %v6700_v24, 7  ;;  %v6485_v48 = vadd.f32 %v14521_v63, %v17218_v46  ;;  %v6483_v57 = vadd.f32 %v17218_v46, %v6257_v22  ;;  %v14522_v29 = vpop.f32.mrb[14].mxu0  ;;  %14559 = vmatprep.mubr.bf16.mxu1 %v15623_v31  ;;  %14588 = vmatpush3.bf16.msra.mxu1 %v17212_v51 }
 0x33d   : > { %v6696_v27 = vor.u32 %v6694_v40, %v6693_v61  ;;  %v6698_v20 = vrot.slane %v6693_v61, 4  ;;  %v6679_v42 = vor.u32 %v6677_v4, %v6676_v39  ;;  %v6681_v30 = vrot.slane %v6676_v39, 4  ;;  %v6260_v15 = vpop.f32.mrb[15].mxu0  ;;  %14589 = vmatprep.subr.bf16.mxu1 %v15625_v19  ;;  %v15631_v4 = vld [vmem:[%s18258_s3 + $0x58] sm:$0xff]  }
 0x33e   : > { %v6722_v54 = vor.u32 %v6720_v26, %v17286_v49  ;;  %v6723_v12 = vrot.slane %v17286_v49, 4  ;;  %v6705_v37 = vor.u32 %v6703_v47, %v17288_v28  ;;  %v6706_v13 = vrot.slane %v17288_v28, 4  ;;  %v6988_v61 = vld [vmem:[#allocation3 + $0x44] sm:$0x1] }
 0x33f   : > { %v6697_v25 = vsel %vm15927_vm5, %v6689_v5, %v6696_v27  ;;  %v6982_v38 = vsel %vm17244_vm2, %v6698_v20, %v6981_v43  ;;  %v6680_v51 = vsel %vm15927_vm5, %v6672_v60, %v6679_v42  ;;  %v6975_v1 = vsel %vm17244_vm2, %v6681_v30, %v6974_v52  ;;  %v6995_v43 = vld [vmem:[#allocation3 + $0x50] sm:$0x1]  ;;  %v7005_v42 = vld [vmem:[#allocation3 + $0x60] sm:$0xf]  ;;  %v6998_v30 = vld [vmem:[#allocation3 + $0x54] sm:$0xf] }
 0x340   : > { %6980 = vst [vmem:[#allocation3 + $0x34] sm:$0xf] %v6697_v25  ;;  %6983 = vst [vmem:[#allocation3 + $0x38] sm:$0x1] %v6982_v38  ;;  %v6992_v35 = vsel %vm17237_vm1, %v6722_v54, %v6991_v44  ;;  %v6985_v58 = vsel %vm17237_vm1, %v6705_v37, %v6984_v7  ;;  %v13654_v5 = vpack.c.bf16 %v6514_v8, %v6514_v8  ;;  %v6517_v23 = vmax.f32 %v6485_v48, 0.0  ;;  %v15634_v7 = vld [vmem:[%s18258_s3 + $0x60] sm:$0xff]  }
 0x341   : > { %6973 = vst [vmem:[#allocation3 + $0x28] sm:$0xf] %v6680_v51  ;;  %6976 = vst [vmem:[#allocation3 + $0x2c] sm:$0x1] %v6975_v1  ;;  %v13652_v6 = vpack.c.bf16 %v6512_v32, %v6512_v32  ;;  %v6515_v55 = vmax.f32 %v6483_v57, 0.0  ;;  %v6486_v60 = vadd.f32 %v14522_v29, %v17218_v46  ;;  %v6484_v21 = vadd.f32 %v17218_v46, %v6260_v15 }
 0x342   : > { %6993 = vst [vmem:[#allocation3 + $0x48] sm:$0xf] %v6992_v35  ;;  %6986 = vst [vmem:[#allocation3 + $0x3c] sm:$0xf] %v6985_v58  ;;  %14590 = vmatpush3.bf16.msra.mxu1 %v15625_v19  ;;  %v6725_v34 = vshrl.u32 %v13654_v5, 16  ;;  %v6728_v53 = vshll.u32 %v13654_v5, 16  ;;  %v13657_v52 = vpack.c.bf16 %v6517_v23, %v6517_v23 }
 0x343   : > { %v6708_v50 = vshrl.u32 %v13652_v6, 16  ;;  %v6711_v40 = vshll.u32 %v13652_v6, 16  ;;  %v14525_v62 = vpop.f32.mrb[16].mxu0  ;;  %14591 = vmatprep.subr.bf16.mxu1 %v15628_v33  ;;  %v13655_v2 = vpack.c.bf16 %v6515_v55, %v6515_v55  ;;  %v6518_v26 = vmax.f32 %v6486_v60, 0.0  ;;  %v11999_v45 = vld [vmem:[#allocation3 + $0x24] sm:$0xe] }
 0x344   : > { %v6516_v24 = vmax.f32 %v6484_v21, 0.0  ;;  %v6273_v47 = vpop.f32.mrb[17].mxu0  ;;  %v6727_v63 = vrot.slane %v6725_v34, 7  ;;  %v6489_v19 = vadd.f32 %v14525_v62, %v17218_v46  ;;  %v6751_v8 = vshrl.u32 %v13657_v52, 16  ;;  %v15637_v62 = vld [vmem:[%s18258_s3 + $0x68] sm:$0xff]  }
 0x345   : > { %v6710_v3 = vrot.slane %v6708_v50, 7  ;;  %v6487_v39 = vadd.f32 %v17218_v46, %v6273_v47  ;;  %v14526_v44 = vpop.f32.mrb[18].mxu0  ;;  %v6754_v32 = vshll.u32 %v13657_v52, 16  ;;  %v6734_v22 = vshrl.u32 %v13655_v2, 16  ;;  %v7002_v47 = vld [vmem:[#allocation3 + $0x5c] sm:$0x1] }
 0x346   : > { %v6737_v31 = vshll.u32 %v13655_v2, 16  ;;  %v6276_v48 = vpop.f32.mrb[19].mxu0  ;;  %14592 = vmatpush3.bf16.msra.mxu1 %v15628_v33  ;;  %v6730_v57 = vor.u32 %v6728_v53, %v6727_v63  ;;  %v6732_v29 = vrot.slane %v6727_v63, 4  ;;  %v6753_v15 = vrot.slane %v6751_v8, 7 }
 0x347   : > { %v6713_v27 = vor.u32 %v6711_v40, %v6710_v3  ;;  %v6715_v20 = vrot.slane %v6710_v3, 4  ;;  %14593 = vmatprep.subr.bf16.mxu1 %v15631_v4  ;;  %v6736_v54 = vrot.slane %v6734_v22, 7  ;;  %v13658_v37 = vpack.c.bf16 %v6518_v26, %v6518_v26  ;;  %v15626_v51 = vld [vmem:[#allocation3 + $0x30] sm:$0xff]  }
 0x348   : > { %v13656_v25 = vpack.c.bf16 %v6516_v24, %v6516_v24  ;;  %v15624_v38 = vld [vmem:[#allocation3 + $0x24] sm:$0xff]   ;;  %v6731_v33 = vsel %vm15927_vm5, %v6723_v12, %v6730_v57  ;;  %v6996_v1 = vsel %vm17244_vm2, %v6732_v29, %v6995_v43  ;;  %v6756_v5 = vor.u32 %v6754_v32, %v6753_v15 }
 0x349   : > { %v6714_v35 = vsel %vm15927_vm5, %v6706_v13, %v6713_v27  ;;  %v6989_v58 = vsel %vm17244_vm2, %v6715_v20, %v6988_v61  ;;  %6994 = vst [vmem:[#allocation3 + $0x4c] sm:$0xf] %v6731_v33  ;;  %6997 = vst [vmem:[#allocation3 + $0x50] sm:$0x1] %v6996_v1  ;;  %v6757_v49 = vrot.slane %v6753_v15, 4  ;;  %v6739_v6 = vor.u32 %v6737_v31, %v6736_v54 }
 0x34a   : > { %6987 = vst [vmem:[#allocation3 + $0x40] sm:$0xf] %v6714_v35  ;;  %6990 = vst [vmem:[#allocation3 + $0x44] sm:$0x1] %v6989_v58  ;;  %v6740_v23 = vrot.slane %v6736_v54, 4  ;;  %14560 = vmatmul.mubr.bf16.gmra.mrb[4].mxu1 %v15624_v38  ;;  %v6759_v12 = vshrl.u32 %v13658_v37, 16  ;;  %v7006_v13 = vsel %vm17237_vm1, %v6756_v5, %v7005_v42  ;;  %v6488_v2 = vadd.f32 %v17218_v46, %v6276_v48 }
 0x34b   : > { %v6762_v55 = vshll.u32 %v13658_v37, 16  ;;  %v6742_v60 = vshrl.u32 %v13656_v25, 16  ;;  %v6745_v21 = vshll.u32 %v13656_v25, 16  ;;  %14563 = vmatprep.mubr.bf16.mxu1 %v15626_v51  ;;  %v14529_v28 = vpop.f32.mrb[20].mxu0  ;;  %14594 = vmatpush3.bf16.msra.mxu1 %v15631_v4  ;;  %v6999_v34 = vsel %vm17237_vm1, %v6739_v6, %v6998_v30  ;;  %7007 = vst [vmem:[#allocation3 + $0x60] sm:$0xf] %v7006_v13 }
 0x34c   : > { %v6521_v53 = vmax.f32 %v6489_v19, 0.0  ;;  %v6519_v50 = vmax.f32 %v6487_v39, 0.0  ;;  %v6289_v40 = vpop.f32.mrb[21].mxu0  ;;  %14595 = vmatprep.subr.bf16.mxu1 %v15634_v7  ;;  %7000 = vst [vmem:[#allocation3 + $0x54] sm:$0xf] %v6999_v34  ;;  %v6761_v43 = vrot.slane %v6759_v12, 7  ;;  %v6490_v4 = vadd.f32 %v14526_v44, %v17218_v46 }
 0x34d   : > { %v6744_v52 = vrot.slane %v6742_v60, 7  ;;  %v14530_v26 = vpop.f32.mrb[22].mxu0  ;;  %v7009_v24 = vld [vmem:[#allocation3 + $0x68] sm:$0x1]  ;;  %v6493_v61 = vadd.f32 %v14529_v28, %v17218_v46  ;;  %v6491_v19 = vadd.f32 %v17218_v46, %v6289_v40  ;;  %v15640_v48 = vld [vmem:[%s18258_s3 + $0x70] sm:$0xff]   ;;  %v6520_v51 = vmax.f32 %v6488_v2, 0.0 }
 0x34e   : > { %v13661_v63 = vpack.c.bf16 %v6521_v53, %v6521_v53  ;;  %v13659_v3 = vpack.c.bf16 %v6519_v50, %v6519_v50  ;;  %v6292_v39 = vpop.f32.mrb[23].mxu0  ;;  %v6764_v8 = vor.u32 %v6762_v55, %v6761_v43  ;;  %v6766_v32 = vrot.slane %v6761_v43, 4  ;;  %v7019_v15 = vld [vmem:[#allocation3 + $0x78] sm:$0xf]  ;;  %v7012_v1 = vld [vmem:[#allocation3 + $0x6c] sm:$0xf] }
 0x34f   : > { %v6747_v22 = vor.u32 %v6745_v21, %v6744_v52  ;;  %v6749_v31 = vrot.slane %v6744_v52, 4  ;;  %14596 = vmatpush3.bf16.msra.mxu1 %v15634_v7  ;;  %v6522_v38 = vmax.f32 %v6490_v4, 0.0  ;;  %v6525_v35 = vmax.f32 %v6493_v61, 0.0  ;;  %v15643_v40 = vld [vmem:[%s18258_s3 + $0x78] sm:$0xff]   ;;  %v7016_v61 = vld [vmem:[#allocation3 + $0x74] sm:$0x1] }
 0x350   : > { %v6785_v57 = vshrl.u32 %v13661_v63, 16  ;;  %v6788_v29 = vshll.u32 %v13661_v63, 16  ;;  %v6768_v44 = vshrl.u32 %v13659_v3, 16  ;;  %v6771_v27 = vshll.u32 %v13659_v3, 16  ;;  %14597 = vmatprep.subr.bf16.mxu1 %v15637_v62  ;;  %v15629_v33 = vld [vmem:[#allocation3 + $0x48] sm:$0xff]  }
 0x351   : > { %v6765_v20 = vsel %vm15927_vm5, %v6757_v49, %v6764_v8  ;;  %v7010_v42 = vsel %vm17244_vm2, %v6766_v32, %v7009_v24  ;;  %v6748_v30 = vsel %vm15927_vm5, %v6740_v23, %v6747_v22  ;;  %v7003_v7 = vsel %vm17244_vm2, %v6749_v31, %v7002_v47  ;;  %v15627_v54 = vld [vmem:[#allocation3 + $0x3c] sm:$0xff]  }
 0x352   : > { %7008 = vst [vmem:[#allocation3 + $0x64] sm:$0xf] %v6765_v20  ;;  %7011 = vst [vmem:[#allocation3 + $0x68] sm:$0x1] %v7010_v42  ;;  %v17356_v37 = vrot.slane %v6785_v57, 7  ;;  %v17358_v25 = vrot.slane %v6768_v44, 7  ;;  %v6494_v5 = vadd.f32 %v14530_v26, %v17218_v46  ;;  %v6492_v49 = vadd.f32 %v17218_v46, %v6292_v39  ;;  %14564 = vmatmul.mubr.bf16.gmra.mrb[8].mxu1 %v15627_v54 }
 0x353   : > { %7001 = vst [vmem:[#allocation3 + $0x58] sm:$0xf] %v6748_v30  ;;  %7004 = vst [vmem:[#allocation3 + $0x5c] sm:$0x1] %v7003_v7  ;;  %v6523_v58 = vmax.f32 %v6491_v19, 0.0  ;;  %v14533_v6 = vpop.f32.mrb[24].mxu0  ;;  %14567 = vmatprep.mubr.bf16.mxu1 %v15629_v33  ;;  %14598 = vmatpush3.bf16.msra.mxu1 %v15637_v62  ;;  %v13662_v28 = vpack.c.bf16 %v6522_v38, %v6522_v38  ;;  %v13660_v13 = vpack.c.bf16 %v6520_v51, %v6520_v51 }
 0x354   : > { %v6790_v23 = vor.u32 %v6788_v29, %v17356_v37  ;;  %v6791_v12 = vrot.slane %v17356_v37, 4  ;;  %v6773_v55 = vor.u32 %v6771_v27, %v17358_v25  ;;  %v6774_v60 = vrot.slane %v17358_v25, 4  ;;  %v6305_v21 = vpop.f32.mrb[25].mxu0  ;;  %14599 = vmatprep.subr.bf16.mxu1 %v15640_v48  ;;  %v7023_v3 = vld [vmem:[#allocation3 + $0x80] sm:$0x1]  ;;  %v17380_v20 = vld [vmem:[%s18258_s3 + $0x80] sm:$0xff]  }
 0x355   : > { %v13665_v34 = vpack.c.bf16 %v6525_v35, %v6525_v35  ;;  %v13663_v53 = vpack.c.bf16 %v6523_v58, %v6523_v58  ;;  %v17366_v50 = vpop.f32.mrb[26].mxu0  ;;  %v6526_v4 = vmax.f32 %v6494_v5, 0.0  ;;  %v6524_v2 = vmax.f32 %v6492_v49, 0.0  ;;  %v7033_v57 = vld [vmem:[#allocation3 + $0x90] sm:$0xf] }
 0x356   : > { %v7020_v43 = vsel %vm17237_vm1, %v6790_v23, %v7019_v15  ;;  %v7013_v52 = vsel %vm17237_vm1, %v6773_v55, %v7012_v1  ;;  %v17375_v62 = vpop.f32.mrb[27].mxu0  ;;  %v6793_v26 = vshrl.u32 %v13662_v28, 16  ;;  %v6796_v24 = vshll.u32 %v13662_v28, 16  ;;  %v7026_v51 = vld [vmem:[#allocation3 + $0x84] sm:$0xf] }
 0x357   : > { %7021 = vst [vmem:[#allocation3 + $0x78] sm:$0xf] %v7020_v43  ;;  %7014 = vst [vmem:[#allocation3 + $0x6c] sm:$0xf] %v7013_v52  ;;  %v6776_v47 = vshrl.u32 %v13660_v13, 16  ;;  %v6779_v63 = vshll.u32 %v13660_v13, 16  ;;  %14600 = vmatpush3.bf16.msra.mxu1 %v15640_v48  ;;  %v13666_v29 = vpack.c.bf16 %v6526_v4, %v6526_v4  ;;  %v13664_v44 = vpack.c.bf16 %v6524_v2, %v6524_v2 }
 0x358   : > { %v6819_v19 = vshrl.u32 %v13665_v34, 16  ;;  %v6822_v39 = vshll.u32 %v13665_v34, 16  ;;  %v6802_v8 = vshrl.u32 %v13663_v53, 16  ;;  %v6805_v32 = vshll.u32 %v13663_v53, 16  ;;  %14601 = vmatprep.subr.bf16.mxu1 %v15643_v40 }
 0x359   : > { %v6795_v22 = vrot.slane %v6793_v26, 7  ;;  %v6778_v31 = vrot.slane %v6776_v47, 7  ;;  %v6497_v7 = vadd.f32 %v14533_v6, %v17218_v46  ;;  %v6495_v15 = vadd.f32 %v17218_v46, %v6305_v21  ;;  %v15632_v48 = vld [vmem:[#allocation3 + $0x60] sm:$0xff]  }
 0x35a   : > { %v15630_v27 = vld [vmem:[#allocation3 + $0x54] sm:$0xff]   ;;  %v6821_v42 = vrot.slane %v6819_v19, 7  ;;  %v17382_v30 = vrot.slane %v6802_v8, 7  ;;  %v14537_v33 = vpop.f32.mrb[28].mxu0  ;;  %v6827_v34 = vshrl.u32 %v13666_v29, 16  ;;  %v6830_v53 = vshll.u32 %v13666_v29, 16 }
 0x35b   : > { %v6798_v54 = vor.u32 %v6796_v24, %v6795_v22  ;;  %v6800_v37 = vrot.slane %v6795_v22, 4  ;;  %v6781_v25 = vor.u32 %v6779_v63, %v6778_v31  ;;  %v6783_v38 = vrot.slane %v6778_v31, 4  ;;  %14568 = vmatmul.mubr.bf16.gmra.mrb[12].mxu1 %v15630_v27  ;;  %v6321_v49 = vpop.f32.mrb[29].mxu0  ;;  %v7037_v63 = vld [vmem:[#allocation3 + $0x98] sm:$0x1] }
 0x35c   : > { %v6824_v1 = vor.u32 %v6822_v39, %v6821_v42  ;;  %v6825_v35 = vrot.slane %v6821_v42, 4  ;;  %v6807_v58 = vor.u32 %v6805_v32, %v17382_v30  ;;  %v6808_v5 = vrot.slane %v17382_v30, 4  ;;  %14571 = vmatprep.mubr.bf16.mxu1 %v15632_v48  ;;  %14602 = vmatpush3.bf16.msra.mxu1 %v15643_v40  ;;  %v17396_v28 = vpop.f32.mrb[30].mxu0  ;;  %v7030_v22 = vld [vmem:[#allocation3 + $0x8c] sm:$0x1] }
 0x35d   : > { %v6799_v6 = vsel %vm15927_vm5, %v6791_v12, %v6798_v54  ;;  %v7024_v23 = vsel %vm17244_vm2, %v6800_v37, %v7023_v3  ;;  %v6782_v55 = vsel %vm15927_vm5, %v6774_v60, %v6781_v25  ;;  %v7017_v21 = vsel %vm17244_vm2, %v6783_v38, %v7016_v61  ;;  %14635 = vmatprep.subr.bf16.mxu1 %v17380_v20  ;;  %v17403_v60 = vpop.f32.mrb[31].mxu0  ;;  %v7047_v30 = vld [vmem:[#allocation3 + $0xa8] sm:$0xf]  ;;  %v7040_v25 = vld [vmem:[#allocation3 + $0x9c] sm:$0xf] }
 0x35e   : > { %7022 = vst [vmem:[#allocation3 + $0x7c] sm:$0xf] %v6799_v6  ;;  %7025 = vst [vmem:[#allocation3 + $0x80] sm:$0x1] %v7024_v23  ;;  %v7034_v12 = vsel %vm17237_vm1, %v6824_v1, %v7033_v57  ;;  %v7027_v13 = vsel %vm17237_vm1, %v6807_v58, %v7026_v51  ;;  %v6810_v40 = vshrl.u32 %v13664_v44, 16  ;;  %v6813_v43 = vshll.u32 %v13664_v44, 16 }
 0x35f   : > { %7015 = vst [vmem:[#allocation3 + $0x70] sm:$0xf] %v6782_v55  ;;  %7018 = vst [vmem:[#allocation3 + $0x74] sm:$0x1] %v7017_v21  ;;  %v6529_v52 = vmax.f32 %v6497_v7, 0.0  ;;  %v6527_v4 = vmax.f32 %v6495_v15, 0.0  ;;  %v6498_v26 = vadd.f32 %v17366_v50, %v17218_v46  ;;  %v6496_v24 = vadd.f32 %v17218_v46, %v17375_v62 }
 0x360   : > { %7035 = vst [vmem:[#allocation3 + $0x90] sm:$0xf] %v7034_v12  ;;  %7028 = vst [vmem:[#allocation3 + $0x84] sm:$0xf] %v7027_v13  ;;  %v6829_v2 = vrot.slane %v6827_v34, 7  ;;  %v6501_v47 = vadd.f32 %v14537_v33, %v17218_v46  ;;  %v6812_v3 = vrot.slane %v6810_v40, 7  ;;  %v6499_v39 = vadd.f32 %v17218_v46, %v6321_v49 }
 0x361   : > { %v13669_v61 = vpack.c.bf16 %v6529_v52, %v6529_v52  ;;  %v13667_v19 = vpack.c.bf16 %v6527_v4, %v6527_v4  ;;  %v6530_v31 = vmax.f32 %v6498_v26, 0.0  ;;  %v6528_v57 = vmax.f32 %v6496_v24, 0.0  ;;  %v7044_v24 = vld [vmem:[#allocation3 + $0xa4] sm:$0x1] }
 0x362   : > { %v6832_v8 = vor.u32 %v6830_v53, %v6829_v2  ;;  %v6834_v32 = vrot.slane %v6829_v2, 4  ;;  %v6815_v29 = vor.u32 %v6813_v43, %v6812_v3  ;;  %v6817_v44 = vrot.slane %v6812_v3, 4  ;;  %v7051_v2 = vld [vmem:[#allocation3 + $0xb0] sm:$0x1] }
 0x363   : > { %v6853_v27 = vshrl.u32 %v13669_v61, 16  ;;  %v6856_v50 = vshll.u32 %v13669_v61, 16  ;;  %v6836_v7 = vshrl.u32 %v13667_v19, 16  ;;  %v6839_v15 = vshll.u32 %v13667_v19, 16 }
 0x364   : > { %v6833_v62 = vsel %vm15927_vm5, %v6825_v35, %v6832_v8  ;;  %v7038_v42 = vsel %vm17244_vm2, %v6834_v32, %v7037_v63  ;;  %v6816_v48 = vsel %vm15927_vm5, %v6808_v5, %v6815_v29  ;;  %v7031_v54 = vsel %vm17244_vm2, %v6817_v44, %v7030_v22  ;;  %v7456_v8 = vld [vmem:[#allocation3 + $0xc] sm:$0xf] }
 0x365   : > { %7036 = vst [vmem:[#allocation3 + $0x94] sm:$0xf] %v6833_v62  ;;  %7039 = vst [vmem:[#allocation3 + $0x98] sm:$0x1] %v7038_v42  ;;  %v6855_v37 = vrot.slane %v6853_v27, 7  ;;  %v13670_v38 = vpack.c.bf16 %v6530_v31, %v6530_v31  ;;  %v6838_v33 = vrot.slane %v6836_v7, 7  ;;  %v13668_v1 = vpack.c.bf16 %v6528_v57, %v6528_v57 }
 0x366   : > { %v15633_v51 = vld [vmem:[#allocation3 + $0x6c] sm:$0xff]   ;;  %7029 = vst [vmem:[#allocation3 + $0x88] sm:$0xf] %v6816_v48  ;;  %7032 = vst [vmem:[#allocation3 + $0x8c] sm:$0x1] %v7031_v54  ;;  %v6533_v35 = vmax.f32 %v6501_v47, 0.0  ;;  %v6502_v47 = vadd.f32 %v17396_v28, %v17218_v46  ;;  %v6500_v63 = vadd.f32 %v17218_v46, %v17403_v60 }
 0x367   : > { %v6531_v58 = vmax.f32 %v6499_v39, 0.0  ;;  %v15635_v49 = vld [vmem:[#allocation3 + $0x78] sm:$0xff]   ;;  %v6858_v6 = vor.u32 %v6856_v50, %v6855_v37  ;;  %v6859_v23 = vrot.slane %v6855_v37, 4  ;;  %v6861_v55 = vshrl.u32 %v13670_v38, 16  ;;  %14572 = vmatmul.mubr.bf16.gmra.mrb[16].mxu1 %v15633_v51  ;;  %v7061_v62 = vld [vmem:[#allocation3 + $0xc0] sm:$0xf] }
 0x368   : > { %v6864_v21 = vshll.u32 %v13670_v38, 16  ;;  %v6841_v5 = vor.u32 %v6839_v15, %v6838_v33  ;;  %v6842_v12 = vrot.slane %v6838_v33, 4  ;;  %v6844_v13 = vshrl.u32 %v13668_v1, 16  ;;  %14575 = vmatprep.mubr.bf16.mxu1 %v15635_v49  ;;  %v7054_v48 = vld [vmem:[#allocation3 + $0xb4] sm:$0xf] }
 0x369   : > { %v6847_v34 = vshll.u32 %v13668_v1, 16  ;;  %v7048_v53 = vsel %vm17237_vm1, %v6858_v6, %v7047_v30  ;;  %v6863_v40 = vrot.slane %v6861_v55, 7  ;;  %v13673_v43 = vpack.c.bf16 %v6533_v35, %v6533_v35  ;;  %v7457_v1 = vld [vmem:[#allocation3 + $0x10] sm:$0xf]  ;;  %v7065_v55 = vld [vmem:[#allocation3 + $0xc8] sm:$0x1] }
 0x36a   : > { %v13671_v52 = vpack.c.bf16 %v6531_v58, %v6531_v58  ;;  %7049 = vst [vmem:[#allocation3 + $0xa8] sm:$0xf] %v7048_v53  ;;  %v7041_v4 = vsel %vm17237_vm1, %v6841_v5, %v7040_v25  ;;  %v6846_v26 = vrot.slane %v6844_v13, 7  ;;  %v6534_v27 = vmax.f32 %v6502_v47, 0.0  ;;  %v7458_v5 = vld [vmem:[#allocation3 + $0x14] sm:$0x1] }
 0x36b   : > { %7042 = vst [vmem:[#allocation3 + $0x9c] sm:$0xf] %v7041_v4  ;;  %v6866_v3 = vor.u32 %v6864_v21, %v6863_v40  ;;  %v6868_v61 = vrot.slane %v6863_v40, 4  ;;  %v6887_v19 = vshrl.u32 %v13673_v43, 16  ;;  %v6890_v39 = vshll.u32 %v13673_v43, 16 }
 0x36c   : > { %v6849_v32 = vor.u32 %v6847_v34, %v6846_v26  ;;  %v6851_v22 = vrot.slane %v6846_v26, 4  ;;  %v6870_v31 = vshrl.u32 %v13671_v52, 16  ;;  %v6873_v57 = vshll.u32 %v13671_v52, 16  ;;  %v15638_v7 = vld [vmem:[#allocation3 + $0x90] sm:$0xff]   ;;  %v7058_v21 = vld [vmem:[#allocation3 + $0xbc] sm:$0x1] }
 0x36d   : > { %v6867_v29 = vsel %vm15927_vm5, %v6859_v23, %v6866_v3  ;;  %v7052_v44 = vsel %vm17244_vm2, %v6868_v61, %v7051_v2  ;;  %v6889_v28 = vrot.slane %v6887_v19, 7  ;;  %v15636_v50 = vld [vmem:[#allocation3 + $0x84] sm:$0xff]   ;;  %v6532_v30 = vmax.f32 %v6500_v63, 0.0 }
 0x36e   : > { %7050 = vst [vmem:[#allocation3 + $0xac] sm:$0xf] %v6867_v29  ;;  %7053 = vst [vmem:[#allocation3 + $0xb0] sm:$0x1] %v7052_v44  ;;  %v6850_v46 = vsel %vm15927_vm5, %v6842_v12, %v6849_v32  ;;  %v7045_v60 = vsel %vm17244_vm2, %v6851_v22, %v7044_v24  ;;  %v6872_v42 = vrot.slane %v6870_v31, 7  ;;  %v13674_v54 = vpack.c.bf16 %v6534_v27, %v6534_v27 }
 0x36f   : > { %7043 = vst [vmem:[#allocation3 + $0xa0] sm:$0xf] %v6850_v46  ;;  %7046 = vst [vmem:[#allocation3 + $0xa4] sm:$0x1] %v7045_v60  ;;  %v6892_v15 = vor.u32 %v6890_v39, %v6889_v28  ;;  %14576 = vmatmul.mubr.bf16.gmra.mrb[20].mxu1 %v15636_v50  ;;  %v17438_v37 = vrot.slane %v7508_v10, 4  ;;  %v7526_v25 = vshrl.u32 %v7456_v8, 16  ;;  %v13672_v51 = vpack.c.bf16 %v6532_v30, %v6532_v30 }
 0x370   : > { %v6875_v38 = vor.u32 %v6873_v57, %v6872_v42  ;;  %14579 = vmatprep.mubr.bf16.mxu1 %v15638_v7  ;;  %v17443_v33 = vrot.slane %v7518_v0, 4  ;;  %v7529_v35 = vshll.u32 %v7456_v8, 16  ;;  %v6895_v49 = vshrl.u32 %v13674_v54, 16  ;;  %v7462_v22 = vld [vmem:[#allocation3 + $0x24] sm:$0xf] }
 0x371   : > { %v7062_v58 = vsel %vm17237_vm1, %v6892_v15, %v7061_v62  ;;  %v7523_v14 = vrot.slane %v7521_v41, 5  ;;  %v6893_v10 = vrot.slane %v6889_v28, 4  ;;  %v6898_v23 = vshll.u32 %v13674_v54, 16  ;;  %v7460_v41 = vld [vmem:[#allocation3 + $0x1c] sm:$0xf] }
 0x372   : > { %7063 = vst [vmem:[#allocation3 + $0xc0] sm:$0xf] %v7062_v58  ;;  %v7055_v6 = vsel %vm17237_vm1, %v6875_v38, %v7054_v48  ;;  %v6878_v59 = vshrl.u32 %v13672_v51, 16  ;;  %v6897_v0 = vrot.slane %v6895_v49, 7  ;;  %v7528_v12 = vrot.slane %v7526_v25, 4 }
 0x373   : > { %7056 = vst [vmem:[#allocation3 + $0xb4] sm:$0xf] %v7055_v6  ;;  %v7535_v13 = vshll.u32 %v7457_v1, 16  ;;  %v7539_v34 = vshrl.u32 %v7457_v1, 16  ;;  %v6881_v40 = vshll.u32 %v13672_v51, 16  ;;  %v7531_v16 = vrot.slane %v7529_v35, 5 }
 0x374   : > { %v6880_v53 = vrot.slane %v6878_v59, 7  ;;  %v7550_v43 = vshrl.u32 %v7459_v17, 16  ;;  %v6900_v52 = vor.u32 %v6898_v23, %v6897_v0  ;;  %v6902_v4 = vrot.slane %v6897_v0, 4  ;;  %v7463_v31 = vld [vmem:[#allocation3 + $0x28] sm:$0xf] }
 0x375   : > { %v17451_v2 = vrot.slane %v7535_v13, 5  ;;  %v7541_v9 = vrot.slane %v7539_v34, 4  ;;  %v6876_v26 = vrot.slane %v6872_v42, 4  ;;  %v7553_v3 = vshll.u32 %v7459_v17, 16  ;;  %v15641_v39 = vld [vmem:[#allocation3 + $0xa8] sm:$0xff]  }
 0x376   : > { %v6883_v24 = vor.u32 %v6881_v40, %v6880_v53  ;;  %v6885_v47 = vrot.slane %v6880_v53, 4  ;;  %v15639_v63 = vld [vmem:[#allocation3 + $0x9c] sm:$0xff]   ;;  %v6901_v61 = vsel %vm15927_vm5, %v6893_v10, %v6900_v52  ;;  %v7066_v19 = vsel %vm17244_vm2, %v6902_v4, %v7065_v55  ;;  %v7465_v62 = vld [vmem:[#allocation3 + $0x30] sm:$0xf]  ;;  %v7464_v54 = vld [vmem:[#allocation3 + $0x2c] sm:$0x1] }
 0x377   : > { %v7514_v8 = vsel %vm16155_vm10, %v17438_v37, %v17228_v56  ;;  %v7542_v32 = vor.u32 %v7541_v9, %v17451_v2  ;;  %7064 = vst [vmem:[#allocation3 + $0xc4] sm:$0xf] %v6901_v61  ;;  %7067 = vst [vmem:[#allocation3 + $0xc8] sm:$0x1] %v7066_v19  ;;  %14580 = vmatmul.mubr.bf16.gmra.mrb[24].mxu1 %v15639_v63  ;;  %v7532_v44 = vor.u32 %v7531_v16, %v7528_v12  ;;  %v7461_v27 = vld [vmem:[#allocation3 + $0x20] sm:$0x1] }
 0x378   : > { %v6884_v57 = vsel %vm15927_vm5, %v6876_v26, %v6883_v24  ;;  %v7059_v29 = vsel %vm17244_vm2, %v6885_v47, %v7058_v21  ;;  %v7545_v28 = vshll.u32 %v7458_v5, 16  ;;  %14583 = vmatprep.mubr.bf16.mxu1 %v15641_v39  ;;  %v7524_v56 = vsel %vm16155_vm10, %v17443_v33, %v7523_v14  ;;  %v7466_v1 = vld [vmem:[#allocation3 + $0x34] sm:$0xf]  ;;  %v7468_v21 = vld [vmem:[#allocation3 + $0x3c] sm:$0xf] }
 0x379   : > { %7057 = vst [vmem:[#allocation3 + $0xb8] sm:$0xf] %v6884_v57  ;;  %7060 = vst [vmem:[#allocation3 + $0xbc] sm:$0x1] %v7059_v29  ;;  %v7552_v50 = vrot.slane %v7550_v43, 4  ;;  %v7559_v46 = vshll.u32 %v7460_v41, 16  ;;  %v13254_v37 = vcombine.low %v7514_v8, %v7524_v56 }
 0x37a   : > { %v7563_v60 = vshrl.u32 %v7460_v41, 16  ;;  %v7555_v36 = vrot.slane %v7553_v3, 5  ;;  %v7574_v42 = vshrl.u32 %v7462_v22, 16  ;;  %v7577_v30 = vshll.u32 %v7462_v22, 16  ;;  %v7469_v52 = vld [vmem:[#allocation3 + $0x40] sm:$0xf] }
 0x37b   : > { %v7583_v11 = vshll.u32 %v7463_v31, 16  ;;  %v7543_v7 = vrot.slane %v7542_v32, 4  ;;  %v7561_v15 = vrot.slane %v7559_v46, 5  ;;  %v7533_v25 = vrot.slane %v7532_v44, 4  ;;  %v7467_v63 = vld [vmem:[#allocation3 + $0x38] sm:$0x1] }
 0x37c   : > { %v7565_v48 = vrot.slane %v7563_v60, 4  ;;  %v7547_v38 = vrot.slane %v7545_v28, 5  ;;  %v7576_v51 = vrot.slane %v7574_v42, 4  ;;  %v7579_v33 = vrot.slane %v7577_v30, 5  ;;  %v7471_v22 = vld [vmem:[#allocation3 + $0x48] sm:$0xf] }
 0x37d   : > { %v17469_v58 = vrot.slane %v7583_v11, 5  ;;  %v7587_v49 = vshrl.u32 %v7463_v31, 16  ;;  %v7556_v14 = vor.u32 %v7555_v36, %v7552_v50  ;;  %v7569_v17 = vshll.u32 %v7461_v27, 16  ;;  %v7472_v28 = vld [vmem:[#allocation3 + $0x4c] sm:$0xf]  ;;  %v15645_v36 = vld [vmem:[%s18258_s3 + $0x88] sm:$0xff]  }
 0x37e   : > { %v7566_v35 = vor.u32 %v7565_v48, %v7561_v15  ;;  %v7598_v10 = vshrl.u32 %v7465_v62, 16  ;;  %v7601_v6 = vshll.u32 %v7465_v62, 16  ;;  %v7548_v23 = vsel %vm16155_vm10, %v7543_v7, %v7547_v38  ;;  %v7470_v30 = vld [vmem:[#allocation3 + $0x44] sm:$0x1] }
 0x37f   : > { %v7589_v55 = vrot.slane %v7587_v49, 4  ;;  %v7593_v59 = vshll.u32 %v7464_v54, 16  ;;  %v7607_v0 = vshll.u32 %v7466_v1, 16  ;;  %v7538_v12 = vsel %vm16155_vm10, %v7533_v25, %v17451_v2 }
 0x380   : > { %v15642_v5 = vld [vmem:[#allocation3 + $0xb4] sm:$0xff]   ;;  %v7567_v13 = vrot.slane %v7566_v35, 4  ;;  %v7600_v34 = vrot.slane %v7598_v10, 4  ;;  %v7603_v53 = vrot.slane %v7601_v6, 5  ;;  %v7580_v40 = vor.u32 %v7579_v33, %v7576_v51 }
 0x381   : > { %v7590_v16 = vor.u32 %v7589_v55, %v17469_v58  ;;  %v17477_v41 = vrot.slane %v7607_v0, 5  ;;  %v7611_v43 = vshrl.u32 %v7466_v1, 16  ;;  %14584 = vmatmul.mubr.bf16.gmra.mrb[28].mxu1 %v15642_v5  ;;  %v13255_v4 = vcombine.low %v7538_v12, %v7548_v23  ;;  %v7475_v35 = vld [vmem:[#allocation3 + $0x58] sm:$0xf] }
 0x382   : > { %v7557_v9 = vrot.slane %v7556_v14, 4  ;;  %v7571_v26 = vrot.slane %v7569_v17, 5  ;;  %v7604_v24 = vor.u32 %v7603_v53, %v7600_v34  ;;  %14603 = vmatprep.mubr.bf16.mxu1 %v13254_v37  ;;  %v7622_v2 = vshrl.u32 %v7468_v21, 16  ;;  %v15646_v0 = vld [vmem:[%s18258_s3 + $0x90] sm:$0xff]  }
 0x383   : > { %v7591_v47 = vrot.slane %v7590_v16, 4  ;;  %v7613_v3 = vrot.slane %v7611_v43, 4  ;;  %v7625_v61 = vshll.u32 %v7468_v21, 16  ;;  %v7595_v39 = vrot.slane %v7593_v59, 5  ;;  %v7478_v16 = vld [vmem:[#allocation3 + $0x64] sm:$0xf] }
 0x384   : > { %v7572_v19 = vsel %vm16155_vm10, %v7567_v13, %v7571_v26  ;;  %v7631_v8 = vshll.u32 %v7469_v52, 16  ;;  %v7635_v32 = vshrl.u32 %v7469_v52, 16  ;;  %v7581_v31 = vrot.slane %v7580_v40, 4 }
 0x385   : > { %v7614_v57 = vor.u32 %v7613_v3, %v17477_v41  ;;  %v7624_v29 = vrot.slane %v7622_v2, 4  ;;  %v7627_v44 = vrot.slane %v7625_v61, 5  ;;  %v7562_v56 = vsel %vm16155_vm10, %v7557_v9, %v7561_v15  ;;  %v7474_v15 = vld [vmem:[#allocation3 + $0x54] sm:$0xf] }
 0x386   : > { %v7617_v27 = vshll.u32 %v7467_v63, 16  ;;  %v17484_v50 = vrot.slane %v7631_v8, 5  ;;  %v7637_v46 = vrot.slane %v7635_v32, 4  ;;  %v13256_v60 = vcombine.low %v7562_v56, %v7572_v19  ;;  %v15647_v19 = vld [vmem:[%s18258_s3 + $0x98] sm:$0xff]   ;;  %v7480_v8 = vld [vmem:[#allocation3 + $0x6c] sm:$0xf] }
 0x387   : > { %v7596_v62 = vsel %vm16155_vm10, %v7591_v47, %v7595_v39  ;;  %v7605_v42 = vrot.slane %v7604_v24, 4  ;;  %v7646_v11 = vshrl.u32 %v7471_v22, 16  ;;  %v7615_v7 = vrot.slane %v7614_v57, 4  ;;  %v7476_v24 = vld [vmem:[#allocation3 + $0x5c] sm:$0x1] }
 0x388   : > { %v7649_v48 = vshll.u32 %v7471_v22, 16  ;;  %v7655_v54 = vshll.u32 %v7472_v28, 16  ;;  %v7659_v37 = vshrl.u32 %v7472_v28, 16  ;;  %v7586_v25 = vsel %vm16155_vm10, %v7581_v31, %v17469_v58  ;;  %v7473_v58 = vld [vmem:[#allocation3 + $0x50] sm:$0x1] }
 0x389   : > { %v7628_v38 = vor.u32 %v7627_v44, %v7624_v29  ;;  %v7638_v51 = vor.u32 %v7637_v46, %v17484_v50  ;;  %v7648_v1 = vrot.slane %v7646_v11, 4  ;;  %14604 = vmatmul.mubr.bf16.vlgmr.msra.gmra.mrb[0].mxu1 %v13255_v4  ;;  %v13257_v33 = vcombine.low %v7586_v25, %v7596_v62  ;;  %v7481_v29 = vld [vmem:[#allocation3 + $0x70] sm:$0xf]  ;;  %v7479_v46 = vld [vmem:[#allocation3 + $0x68] sm:$0x1] }
 0x38a   : > { %v7619_v49 = vrot.slane %v7617_v27, 5  ;;  %v7651_v14 = vrot.slane %v7649_v48, 5  ;;  %v17495_v17 = vrot.slane %v7655_v54, 5  ;;  %14607 = vmatprep.mubr.bf16.mxu1 %v13256_v60  ;;  %14636 = vmatpush3.bf16.msra.mxu1 %v17380_v20  ;;  %v7610_v10 = vsel %vm16155_vm10, %v7605_v42, %v17477_v41  ;;  %v7477_v20 = vld [vmem:[#allocation3 + $0x60] sm:$0xf]  ;;  %v15648_v54 = vld [vmem:[%s18258_s3 + $0xa0] sm:$0xff]  }
 0x38b   : > { %v7641_v6 = vshll.u32 %v7470_v30, 16  ;;  %v7661_v23 = vrot.slane %v7659_v37, 4  ;;  %v7670_v55 = vshrl.u32 %v7474_v15, 16  ;;  %14637 = vmatprep.subr.bf16.mxu1 %v15645_v36  ;;  %v7673_v5 = vshll.u32 %v7474_v15, 16  ;;  %v7483_v42 = vld [vmem:[#allocation3 + $0x78] sm:$0xf] }
 0x38c   : > { %v7620_v59 = vsel %vm16155_vm10, %v7615_v7, %v7619_v49  ;;  %v7652_v21 = vor.u32 %v7651_v14, %v7648_v1  ;;  %v7679_v12 = vshll.u32 %v7475_v35, 16  ;;  %v7629_v13 = vrot.slane %v7628_v38, 4  ;;  %v7484_v37 = vld [vmem:[#allocation3 + $0x7c] sm:$0xf] }
 0x38d   : > { %v7639_v34 = vrot.slane %v7638_v51, 4  ;;  %v7662_v53 = vor.u32 %v7661_v23, %v17495_v17  ;;  %v7672_v40 = vrot.slane %v7670_v55, 4  ;;  %v7665_v41 = vshll.u32 %v7473_v58, 16 }
 0x38e   : > { %v7675_v43 = vrot.slane %v7673_v5, 5  ;;  %v17507_v52 = vrot.slane %v7679_v12, 5  ;;  %v7683_v4 = vshrl.u32 %v7475_v35, 16  ;;  %14638 = vmatpush3.bf16.msra.mxu1 %v15645_v36  ;;  %v7643_v9 = vrot.slane %v7641_v6, 5  ;;  %v7482_v35 = vld [vmem:[#allocation3 + $0x74] sm:$0x1] }
 0x38f   : > { %v7653_v26 = vrot.slane %v7652_v21, 4  ;;  %v7694_v47 = vshrl.u32 %v7477_v20, 16  ;;  %v7697_v63 = vshll.u32 %v7477_v20, 16  ;;  %14639 = vmatprep.subr.bf16.mxu1 %v15646_v0  ;;  %v7663_v3 = vrot.slane %v7662_v53, 4  ;;  %v7486_v21 = vld [vmem:[#allocation3 + $0x84] sm:$0xf] }
 0x390   : > { %v7676_v2 = vor.u32 %v7675_v43, %v7672_v40  ;;  %v7685_v61 = vrot.slane %v7683_v4, 4  ;;  %v7703_v39 = vshll.u32 %v7478_v16, 16  ;;  %v13258_v32 = vcombine.low %v7610_v10, %v7620_v59  ;;  %v15649_v5 = vld [vmem:[%s18258_s3 + $0xa8] sm:$0xff]   ;;  %v7485_v43 = vld [vmem:[#allocation3 + $0x80] sm:$0x1] }
 0x391   : > { %v7634_v22 = vsel %vm16155_vm10, %v7629_v13, %v17484_v50  ;;  %v7696_v31 = vrot.slane %v7694_v47, 4  ;;  %v7699_v57 = vrot.slane %v7697_v63, 5  ;;  %14608 = vmatmul.mubr.bf16.gmra.mrb[4].mxu1 %v13257_v33  ;;  %v7644_v44 = vsel %vm16155_vm10, %v7639_v34, %v7643_v9  ;;  %v7487_v4 = vld [vmem:[#allocation3 + $0x88] sm:$0xf]  ;;  %v15650_v9 = vld [vmem:[%s18258_s3 + $0xb0] sm:$0xff]  }
 0x392   : > { %v7667_v28 = vrot.slane %v7665_v41, 5  ;;  %v7686_v56 = vor.u32 %v7685_v61, %v17507_v52  ;;  %v7689_v27 = vshll.u32 %v7476_v24, 16  ;;  %14611 = vmatprep.mubr.bf16.mxu1 %v13258_v32  ;;  %v7658_v60 = vsel %vm16155_vm10, %v7653_v26, %v17495_v17  ;;  %14640 = vmatpush3.bf16.msra.mxu1 %v15646_v0  ;;  %v7489_v61 = vld [vmem:[#allocation3 + $0x90] sm:$0xf] }
 0x393   : > { %v17521_v62 = vrot.slane %v7703_v39, 5  ;;  %v7707_v50 = vshrl.u32 %v7478_v16, 16  ;;  %v7718_v36 = vshrl.u32 %v7480_v8, 16  ;;  %v7677_v11 = vrot.slane %v7676_v2, 4  ;;  %14641 = vmatprep.subr.bf16.mxu1 %v15647_v19 }
 0x394   : > { %v7668_v30 = vsel %vm16155_vm10, %v7663_v3, %v7667_v28  ;;  %v7721_v7 = vshll.u32 %v7480_v8, 16  ;;  %v7727_v48 = vshll.u32 %v7481_v29, 16  ;;  %v7687_v15 = vrot.slane %v7686_v56, 4  ;;  %v7488_v8 = vld [vmem:[#allocation3 + $0x8c] sm:$0x1]  ;;  %v15651_v56 = vld [vmem:[%s18258_s3 + $0xb8] sm:$0xff]  }
 0x395   : > { %v7700_v25 = vor.u32 %v7699_v57, %v7696_v31  ;;  %v7709_v38 = vrot.slane %v7707_v50, 4  ;;  %v7720_v51 = vrot.slane %v7718_v36, 4  ;;  %v7713_v1 = vshll.u32 %v7479_v46, 16  ;;  %v7490_v28 = vld [vmem:[#allocation3 + $0x94] sm:$0xf] }
 0x396   : > { %v7723_v33 = vrot.slane %v7721_v7, 5  ;;  %v17528_v49 = vrot.slane %v7727_v48, 5  ;;  %v7731_v14 = vshrl.u32 %v7481_v29, 16  ;;  %v13259_v17 = vcombine.low %v7634_v22, %v7644_v44  ;;  %14642 = vmatpush3.bf16.msra.mxu1 %v15647_v19 }
 0x397   : > { %v13260_v10 = vcombine.low %v7658_v60, %v7668_v30  ;;  %v7691_v6 = vrot.slane %v7689_v27, 5  ;;  %v7710_v58 = vor.u32 %v7709_v38, %v17521_v62  ;;  %14643 = vmatprep.subr.bf16.mxu1 %v15648_v54  ;;  %v7742_v59 = vshrl.u32 %v7483_v42, 16 }
 0x398   : > { %v7724_v23 = vor.u32 %v7723_v33, %v7720_v51  ;;  %v7733_v55 = vrot.slane %v7731_v14, 4  ;;  %v7745_v0 = vshll.u32 %v7483_v42, 16  ;;  %v7751_v13 = vshll.u32 %v7484_v37, 16 }
 0x399   : > { %v7692_v12 = vsel %vm16155_vm10, %v7687_v15, %v7691_v6  ;;  %v7711_v20 = vrot.slane %v7710_v58, 4  ;;  %v7755_v34 = vshrl.u32 %v7484_v37, 16  ;;  %14612 = vmatmul.mubr.bf16.gmra.mrb[8].mxu1 %v13259_v17  ;;  %v7682_v53 = vsel %vm16155_vm10, %v7677_v11, %v17507_v52  ;;  %v7493_v15 = vld [vmem:[#allocation3 + $0xa0] sm:$0xf]  ;;  %v7495_v6 = vld [vmem:[#allocation3 + $0xa8] sm:$0xf] }
 0x39a   : > { %v7701_v40 = vrot.slane %v7700_v25, 4  ;;  %v7715_v16 = vrot.slane %v7713_v1, 5  ;;  %v7734_v41 = vor.u32 %v7733_v55, %v17528_v49  ;;  %14615 = vmatprep.mubr.bf16.mxu1 %v13260_v10  ;;  %v7725_v26 = vrot.slane %v7724_v23, 4  ;;  %14644 = vmatpush3.bf16.msra.mxu1 %v15648_v54  ;;  %v7491_v1 = vld [vmem:[#allocation3 + $0x98] sm:$0x1] }
 0x39b   : > { %v7737_v24 = vshll.u32 %v7482_v35, 16  ;;  %v17543_v47 = vrot.slane %v7751_v13, 5  ;;  %v7757_v63 = vrot.slane %v7755_v34, 4  ;;  %v13261_v3 = vcombine.low %v7682_v53, %v7692_v12  ;;  %14645 = vmatprep.subr.bf16.mxu1 %v15649_v5  ;;  %v7496_v12 = vld [vmem:[#allocation3 + $0xac] sm:$0xf] }
 0x39c   : > { %v7744_v2 = vrot.slane %v7742_v59, 4  ;;  %v7747_v52 = vrot.slane %v7745_v0, 5  ;;  %v7716_v19 = vsel %vm16155_vm10, %v7711_v20, %v7715_v16  ;;  %v7735_v39 = vrot.slane %v7734_v41, 4 }
 0x39d   : > { %v7766_v32 = vshrl.u32 %v7486_v21, 16  ;;  %v7769_v22 = vshll.u32 %v7486_v21, 16  ;;  %v7706_v31 = vsel %vm16155_vm10, %v7701_v40, %v17521_v62  ;;  %v7758_v57 = vor.u32 %v7757_v63, %v17543_v47  ;;  %v7492_v62 = vld [vmem:[#allocation3 + $0x9c] sm:$0xf] }
 0x39e   : > { %v7775_v29 = vshll.u32 %v7487_v4, 16  ;;  %v7779_v44 = vshrl.u32 %v7487_v4, 16  ;;  %v7739_v27 = vrot.slane %v7737_v24, 5  ;;  %v7761_v46 = vshll.u32 %v7485_v43, 16  ;;  %14646 = vmatpush3.bf16.msra.mxu1 %v15649_v5 }
 0x39f   : > { %v7768_v60 = vrot.slane %v7766_v32, 4  ;;  %v7771_v50 = vrot.slane %v7769_v22, 5  ;;  %v13262_v36 = vcombine.low %v7706_v31, %v7716_v19  ;;  %v7748_v42 = vor.u32 %v7747_v52, %v7744_v2  ;;  %14647 = vmatprep.subr.bf16.mxu1 %v15650_v9  ;;  %v7494_v2 = vld [vmem:[#allocation3 + $0xa4] sm:$0x1]  ;;  %v7498_v22 = vld [vmem:[#allocation3 + $0xb4] sm:$0xf] }
 0x3a0   : > { %v17554_v30 = vrot.slane %v7775_v29, 5  ;;  %v7781_v11 = vrot.slane %v7779_v44, 4  ;;  %v7730_v7 = vsel %vm16155_vm10, %v7725_v26, %v17528_v49  ;;  %v7740_v48 = vsel %vm16155_vm10, %v7735_v39, %v7739_v27  ;;  %v17565_v49 = vld [vmem:[%s18258_s3 + $0xc0] sm:$0xff]   ;;  %v7499_v31 = vld [vmem:[#allocation3 + $0xb8] sm:$0xf] }
 0x3a1   : > { %v7790_v54 = vshrl.u32 %v7489_v61, 16  ;;  %v7793_v37 = vshll.u32 %v7489_v61, 16  ;;  %14616 = vmatmul.mubr.bf16.gmra.mrb[12].mxu1 %v13261_v3  ;;  %v7759_v25 = vrot.slane %v7758_v57, 4  ;;  %v7785_v51 = vshll.u32 %v7488_v8, 16 }
 0x3a2   : > { %v7782_v38 = vor.u32 %v7781_v11, %v17554_v30  ;;  %v7799_v35 = vshll.u32 %v7490_v28, 16  ;;  %14619 = vmatprep.mubr.bf16.mxu1 %v13262_v36  ;;  %v7772_v33 = vor.u32 %v7771_v50, %v7768_v60  ;;  %v7803_v10 = vshrl.u32 %v7490_v28, 16  ;;  %14648 = vmatpush3.bf16.msra.mxu1 %v15650_v9  ;;  %v7497_v50 = vld [vmem:[#allocation3 + $0xb0] sm:$0x1] }
 0x3a3   : > { %v7792_v14 = vrot.slane %v7790_v54, 4  ;;  %v7795_v17 = vrot.slane %v7793_v37, 5  ;;  %v7749_v58 = vrot.slane %v7748_v42, 4  ;;  %v7763_v23 = vrot.slane %v7761_v46, 5  ;;  %14649 = vmatprep.subr.bf16.mxu1 %v15651_v56 }
 0x3a4   : > { %v7783_v55 = vrot.slane %v7782_v38, 4  ;;  %v7801_v59 = vrot.slane %v7799_v35, 5  ;;  %v13263_v0 = vcombine.low %v7730_v7, %v7740_v48  ;;  %v7805_v21 = vrot.slane %v7803_v10, 4 }
 0x3a5   : > { %v7814_v5 = vshrl.u32 %v7492_v62, 16  ;;  %v7764_v20 = vsel %vm16155_vm10, %v7759_v25, %v7763_v23  ;;  %v7787_v13 = vrot.slane %v7785_v51, 5  ;;  %v7817_v34 = vshll.u32 %v7492_v62, 16 }
 0x3a6   : > { %v7823_v53 = vshll.u32 %v7493_v15, 16  ;;  %v7773_v40 = vrot.slane %v7772_v33, 4  ;;  %v7796_v16 = vor.u32 %v7795_v17, %v7792_v14  ;;  %v7806_v41 = vor.u32 %v7805_v21, %v7801_v59  ;;  %14650 = vmatpush3.bf16.msra.mxu1 %v15651_v56  ;;  %v8272_v14 = vld [vmem:[#allocation3 + $0x4] sm:$0xf] }
 0x3a7   : > { %v7809_v43 = vshll.u32 %v7491_v1, 16  ;;  %v7754_v4 = vsel %vm16155_vm10, %v7749_v58, %v17543_v47  ;;  %v7827_v26 = vshrl.u32 %v7493_v15, 16  ;;  %v7838_v24 = vshrl.u32 %v7495_v6, 16  ;;  %14683 = vmatprep.subr.bf16.mxu1 %v17565_v49 }
 0x3a8   : > { %v7825_v9 = vrot.slane %v7823_v53, 5  ;;  %v13264_v63 = vcombine.low %v7754_v4, %v7764_v20  ;;  %v7788_v3 = vsel %vm16155_vm10, %v7783_v55, %v7787_v13  ;;  %v7816_v52 = vrot.slane %v7814_v5, 4  ;;  %v8271_v20 = vld [vmem:[#allocation3] sm:$0xe]  ;;  %v8273_v13 = vld [vmem:[#allocation3 + $0x8] sm:$0x1] }
 0x3a9   : > { %v7841_v61 = vshll.u32 %v7495_v6, 16  ;;  %14620 = vmatmul.mubr.bf16.gmra.mrb[16].mxu1 %v13263_v0  ;;  %v7807_v19 = vrot.slane %v7806_v41, 4  ;;  %v7819_v39 = vrot.slane %v7817_v34, 5  ;;  %v7829_v8 = vrot.slane %v7827_v26, 4 }
 0x3aa   : > { %v7847_v32 = vshll.u32 %v7496_v12, 16  ;;  %14623 = vmatprep.mubr.bf16.mxu1 %v13264_v63  ;;  %v7778_v47 = vsel %vm16155_vm10, %v7773_v40, %v17554_v30  ;;  %v7797_v57 = vrot.slane %v7796_v16, 4  ;;  %v7811_v29 = vrot.slane %v7809_v43, 5 }
 0x3ab   : > { %v7851_v44 = vshrl.u32 %v7496_v12, 16  ;;  %v7830_v28 = vor.u32 %v7829_v8, %v7825_v9  ;;  %v7840_v56 = vrot.slane %v7838_v24, 4  ;;  %v7843_v27 = vrot.slane %v7841_v61, 5 }
 0x3ac   : > { %v7849_v46 = vrot.slane %v7847_v32, 5  ;;  %v13265_v60 = vcombine.low %v7778_v47, %v7788_v3  ;;  %v7812_v42 = vsel %vm16155_vm10, %v7807_v19, %v7811_v29  ;;  %v7820_v11 = vor.u32 %v7819_v39, %v7816_v52  ;;  %v8276_v29 = vld [vmem:[#allocation3 + $0x14] sm:$0x1] }
 0x3ad   : > { %v7853_v36 = vrot.slane %v7851_v44, 4  ;;  %v7833_v62 = vshll.u32 %v7494_v2, 16  ;;  %v7871_v7 = vshll.u32 %v7499_v31, 16  ;;  %v7862_v54 = vshrl.u32 %v7498_v22, 16  ;;  %v8275_v2 = vld [vmem:[#allocation3 + $0x10] sm:$0xf] }
 0x3ae   : > { %v7865_v37 = vshll.u32 %v7498_v22, 16  ;;  %v7875_v30 = vshrl.u32 %v7499_v31, 16  ;;  %v7802_v15 = vsel %vm16155_vm10, %v7797_v57, %v7801_v59  ;;  %v7831_v25 = vrot.slane %v7830_v28, 4  ;;  %v7500_v59 = vld [vmem:[#allocation3 + $0xbc] sm:$0x1] }
 0x3af   : > { %v7854_v48 = vor.u32 %v7853_v36, %v7849_v46  ;;  %v7844_v38 = vor.u32 %v7843_v27, %v7840_v56  ;;  %v7857_v51 = vshll.u32 %v7497_v50, 16  ;;  %v13266_v1 = vcombine.low %v7802_v15, %v7812_v42  ;;  %v8279_v28 = vld [vmem:[#allocation3 + $0x20] sm:$0x1]  ;;  %v8274_v56 = vld [vmem:[#allocation3 + $0xc] sm:$0xe] }
 0x3b0   : > { %v7873_v35 = vrot.slane %v7871_v7, 5  ;;  %v7877_v33 = vrot.slane %v7875_v30, 4  ;;  %v7821_v17 = vrot.slane %v7820_v11, 4  ;;  %v7835_v10 = vrot.slane %v7833_v62, 5  ;;  %v8277_v50 = vld [vmem:[#allocation3 + $0x18] sm:$0xe] }
 0x3b1   : > { %14624 = vmatmul.mubr.bf16.gmra.mrb[20].mxu1 %v13265_v60  ;;  %v7855_v6 = vrot.slane %v7854_v48, 4  ;;  %v7864_v58 = vrot.slane %v7862_v54, 4  ;;  %v7867_v23 = vrot.slane %v7865_v37, 5  ;;  %v7845_v0 = vrot.slane %v7844_v38, 4  ;;  %v8284_v36 = vld [vmem:[#allocation3 + $0x34] sm:$0xf] }
 0x3b2   : > { %14627 = vmatprep.mubr.bf16.mxu1 %v13266_v1  ;;  %v7836_v55 = vsel %vm16155_vm10, %v7831_v25, %v7835_v10  ;;  %v7859_v21 = vrot.slane %v7857_v51, 5  ;;  %v8369_v5 = vrot.slane %v8272_v14, 5  ;;  %v7878_v12 = vor.u32 %v7877_v33, %v7873_v35  ;;  %v8282_v38 = vld [vmem:[#allocation3 + $0x2c] sm:$0x1]  ;;  %v15653_v51 = vld [vmem:[%s18258_s3 + $0xc8] sm:$0xff]  }
 0x3b3   : > { %v7826_v34 = vsel %vm16155_vm10, %v7821_v17, %v7825_v9  ;;  %v7868_v16 = vor.u32 %v7867_v23, %v7864_v58  ;;  %v7881_v41 = vshll.u32 %v7500_v59, 16  ;;  %v7850_v43 = vsel %vm16155_vm10, %v7845_v0, %v7849_v46  ;;  %v8278_v9 = vld [vmem:[#allocation3 + $0x1c] sm:$0xf]  ;;  %v8281_v46 = vld [vmem:[#allocation3 + $0x28] sm:$0xf] }
 0x3b4   : > { %v7860_v53 = vsel %vm16155_vm10, %v7855_v6, %v7859_v21  ;;  %v13267_v40 = vcombine.low %v7826_v34, %v7836_v55  ;;  %v13278_v4 = vrot.slane %v8271_v20, 9  ;;  %v8371_v26 = vrot.slane %v8369_v5, 4  ;;  %v8285_v33 = vld [vmem:[#allocation3 + $0x38] sm:$0x1]  ;;  %v8280_v14 = vld [vmem:[#allocation3 + $0x24] sm:$0xe] }
 0x3b5   : > { %v8372_v24 = vrot.slane %v8273_v13, 5  ;;  %v13268_v63 = vcombine.low %v7850_v43, %v7860_v53  ;;  %v7879_v3 = vrot.slane %v7878_v12, 4  ;;  %v7869_v52 = vrot.slane %v7868_v16, 4  ;;  %v8287_v10 = vld [vmem:[#allocation3 + $0x40] sm:$0xf]  ;;  %v15654_v0 = vld [vmem:[%s18258_s3 + $0xd0] sm:$0xff]  }
 0x3b6   : > { %v7883_v61 = vrot.slane %v7881_v41, 5  ;;  %v8370_v19 = vsel %vm16379_vm13, %v13278_v4, %v8369_v5  ;;  %v8376_v32 = vrot.slane %v8275_v2, 5  ;;  %v8383_v22 = vrot.slane %v8278_v9, 5  ;;  %v8283_v58 = vld [vmem:[#allocation3 + $0x30] sm:$0xe]  ;;  %v15655_v16 = vld [vmem:[%s18258_s3 + $0xd8] sm:$0xff]  }
 0x3b7   : > { %v8373_v39 = vsel %vm16379_vm13, %v8371_v26, %v8372_v24  ;;  %v7874_v31 = vsel %vm16155_vm10, %v7869_v52, %v7873_v35  ;;  %v8379_v60 = vrot.slane %v8276_v29, 5  ;;  %v8386_v42 = vrot.slane %v8279_v28, 5  ;;  %v8290_v23 = vld [vmem:[#allocation3 + $0x4c] sm:$0xf]  ;;  %v8291_v4 = vld [vmem:[#allocation3 + $0x50] sm:$0x1] }
 0x3b8   : > { %v7884_v8 = vsel %vm16155_vm10, %v7879_v3, %v7883_v61  ;;  %v13310_v47 = vcombine.low %v8370_v19, %v8373_v39  ;;  %v8378_v44 = vrot.slane %v8376_v32, 4  ;;  %v8385_v27 = vrot.slane %v8383_v22, 4  ;;  %v8286_v26 = vld [vmem:[#allocation3 + $0x3c] sm:$0xe]  ;;  %v8289_v2 = vld [vmem:[#allocation3 + $0x48] sm:$0xe] }
 0x3b9   : > { %14628 = vmatmul.mubr.bf16.gmra.mrb[24].mxu1 %v13267_v40  ;;  %v13269_v57 = vcombine.low %v7874_v31, %v7884_v8  ;;  %v13279_v11 = vrot.slane %v8274_v56, 9  ;;  %v8390_v7 = vrot.slane %v8281_v46, 5  ;;  %v13280_v48 = vrot.slane %v8277_v50, 9  ;;  %v8288_v40 = vld [vmem:[#allocation3 + $0x44] sm:$0x1]  ;;  %v15656_v9 = vld [vmem:[%s18258_s3 + $0xe0] sm:$0xff]  }
 0x3ba   : > { %14631 = vmatprep.mubr.bf16.mxu1 %v13268_v63  ;;  %v8380_v62 = vsel %vm16379_vm13, %v8378_v44, %v8379_v60  ;;  %v8387_v54 = vsel %vm16379_vm13, %v8385_v27, %v8386_v42  ;;  %v8397_v37 = vrot.slane %v8284_v36, 5  ;;  %v8393_v6 = vrot.slane %v8282_v38, 5  ;;  %v8293_v63 = vld [vmem:[#allocation3 + $0x58] sm:$0xf]  ;;  %v8296_v52 = vld [vmem:[#allocation3 + $0x64] sm:$0xf] }
 0x3bb   : > { %v8377_v30 = vsel %vm16379_vm13, %v13279_v11, %v8376_v32  ;;  %v8384_v25 = vsel %vm16379_vm13, %v13280_v48, %v8383_v22  ;;  %v8392_v35 = vrot.slane %v8390_v7, 4  ;;  %v8400_v55 = vrot.slane %v8285_v33, 5  ;;  %v8294_v44 = vld [vmem:[#allocation3 + $0x5c] sm:$0x1]  ;;  %v15657_v28 = vld [vmem:[%s18258_s3 + $0xe8] sm:$0xff]  }
 0x3bc   : > { %v13311_v15 = vcombine.low %v8377_v30, %v8380_v62  ;;  %v13312_v1 = vcombine.low %v8384_v25, %v8387_v54  ;;  %v8399_v17 = vrot.slane %v8397_v37, 4  ;;  %v13281_v21 = vrot.slane %v8280_v14, 9  ;;  %v8297_v46 = vld [vmem:[#allocation3 + $0x68] sm:$0x1]  ;;  %v8292_v60 = vld [vmem:[#allocation3 + $0x54] sm:$0xe] }
 0x3bd   : > { %v8394_v59 = vsel %vm16379_vm13, %v8392_v35, %v8393_v6  ;;  %v8404_v5 = vrot.slane %v8287_v10, 5  ;;  %v13282_v12 = vrot.slane %v8283_v58, 9  ;;  %v8411_v13 = vrot.slane %v8290_v23, 5  ;;  %v8299_v36 = vld [vmem:[#allocation3 + $0x70] sm:$0xf]  ;;  %v15658_v48 = vld [vmem:[%s18258_s3 + $0xf0] sm:$0xff]  }
 0x3be   : > { %v8401_v20 = vsel %vm16379_vm13, %v8399_v17, %v8400_v55  ;;  %v8407_v3 = vrot.slane %v8288_v40, 5  ;;  %v8414_v61 = vrot.slane %v8291_v4, 5  ;;  %v13283_v19 = vrot.slane %v8286_v26, 9  ;;  %v8295_v11 = vld [vmem:[#allocation3 + $0x60] sm:$0xe] }
 0x3bf   : > { %v8398_v53 = vsel %vm16379_vm13, %v13282_v12, %v8397_v37  ;;  %v8406_v43 = vrot.slane %v8404_v5, 4  ;;  %v8413_v24 = vrot.slane %v8411_v13, 4  ;;  %v8418_v8 = vrot.slane %v8293_v63, 5  ;;  %v8302_v62 = vld [vmem:[#allocation3 + $0x7c] sm:$0xf]  ;;  %v15659_v14 = vld [vmem:[%s18258_s3 + $0xf8] sm:$0xff]  }
 0x3c0   : > { %v13314_v41 = vcombine.low %v8398_v53, %v8401_v20  ;;  %v13284_v32 = vrot.slane %v8289_v2, 9  ;;  %v8425_v31 = vrot.slane %v8296_v52, 5  ;;  %v8421_v42 = vrot.slane %v8294_v44, 5  ;;  %v8300_v33 = vld [vmem:[#allocation3 + $0x74] sm:$0x1]  ;;  %v17655_v12 = vld [vmem:[%s18258_s3 + $0x100] sm:$0xff]  }
 0x3c1   : > { %14632 = vmatmul.mubr.bf16.gmra.mrb[28].mxu1 %v13269_v57  ;;  %v8408_v39 = vsel %vm16379_vm13, %v8406_v43, %v8407_v3  ;;  %v8415_v22 = vsel %vm16379_vm13, %v8413_v24, %v8414_v61  ;;  %v8420_v27 = vrot.slane %v8418_v8, 4  ;;  %v13285_v54 = vrot.slane %v8292_v60, 9  ;;  %v8303_v6 = vld [vmem:[#allocation3 + $0x80] sm:$0x1]  ;;  %v8298_v58 = vld [vmem:[#allocation3 + $0x6c] sm:$0xe] }
 0x3c2   : > { %14651 = vmatprep.mubr.bf16.mxu1 %v13310_v47  ;;  %v8405_v47 = vsel %vm16379_vm13, %v13283_v19, %v8404_v5  ;;  %v8412_v29 = vsel %vm16379_vm13, %v13284_v32, %v8411_v13  ;;  %v8427_v50 = vrot.slane %v8425_v31, 4  ;;  %v8432_v30 = vrot.slane %v8299_v36, 5  ;;  %v8305_v55 = vld [vmem:[#allocation3 + $0x88] sm:$0xf]  ;;  %v8306_v4 = vld [vmem:[#allocation3 + $0x8c] sm:$0x1] }
 0x3c3   : > { %v13315_v57 = vcombine.low %v8405_v47, %v8408_v39  ;;  %v13316_v56 = vcombine.low %v8412_v29, %v8415_v22  ;;  %v8422_v37 = vsel %vm16379_vm13, %v8420_v27, %v8421_v42  ;;  %v8439_v38 = vrot.slane %v8302_v62, 5  ;;  %v8309_v63 = vld [vmem:[#allocation3 + $0x98] sm:$0x1]  ;;  %v8304_v3 = vld [vmem:[#allocation3 + $0x84] sm:$0xe] }
 0x3c4   : > { %v8434_v10 = vrot.slane %v8432_v30, 4  ;;  %v8442_v5 = vrot.slane %v8303_v6, 5  ;;  %v13287_v20 = vrot.slane %v8298_v58, 9  ;;  %v8311_v52 = vld [vmem:[#allocation3 + $0xa0] sm:$0xf]  ;;  %v8449_v61 = vrot.slane %v8306_v4, 5 }
 0x3c5   : > { %v8441_v23 = vrot.slane %v8439_v38, 4  ;;  %v8314_v19 = vld [vmem:[#allocation3 + $0xac] sm:$0xf]  ;;  %v8456_v39 = vrot.slane %v8309_v63, 5  ;;  %v8460_v22 = vrot.slane %v8311_v52, 5  ;;  %v15675_v63 = vld [vmem:[#allocation3 + $0x84] sm:$0xff]  }
 0x3c6   : > { %v8312_v27 = vld [vmem:[#allocation3 + $0xa4] sm:$0x1]  ;;  %v8315_v36 = vld [vmem:[#allocation3 + $0xb0] sm:$0x1] }
 0x3c7   : > { %v8443_v53 = vsel %vm16379_vm13, %v8441_v23, %v8442_v5  ;;  %v8462_v60 = vrot.slane %v8460_v22, 4  ;;  %v8463_v62 = vrot.slane %v8312_v27, 5  ;;  %v15668_v5 = vld [vmem:[%s18258_s3 + $0x110] sm:$0xff]   ;;  %v15672_v4 = vld [vmem:[#allocation3 + $0x6c] sm:$0xff]  }
 0x3c9   : > { %14652 = vmatmul.mubr.bf16.vlgmr.msra.gmra.mrb[0].mxu1 %v13311_v15  ;;  %v13286_v15 = vrot.slane %v8295_v11, 9  ;;  %v8317_v11 = vld [vmem:[#allocation3 + $0xb8] sm:$0xf] }
 0x3ca   : > { %14655 = vmatprep.mubr.bf16.mxu1 %v13312_v1  ;;  %14684 = vmatpush3.bf16.msra.mxu1 %v17565_v49  ;;  %v8391_v49 = vsel %vm16379_vm13, %v13281_v21, %v8390_v7  ;;  %v8428_v7 = vrot.slane %v8297_v46, 5  ;;  %v8301_v21 = vld [vmem:[#allocation3 + $0x78] sm:$0xe] }
 0x3cb   : > { %14685 = vmatprep.subr.bf16.mxu1 %v15653_v51  ;;  %v13313_v34 = vcombine.low %v8391_v49, %v8394_v59  ;;  %v8426_v35 = vsel %vm16379_vm13, %v13286_v15, %v8425_v31  ;;  %v8308_v59 = vld [vmem:[#allocation3 + $0x94] sm:$0xf]  ;;  %v8446_v49 = vrot.slane %v8305_v55, 5  ;;  %v15660_v55 = vld [vmem:[#allocation3 + $0xc] sm:$0xff]  }
 0x3cc   : > { %v8429_v25 = vsel %vm16379_vm13, %v8427_v50, %v8428_v7  ;;  %v8453_v40 = vrot.slane %v8308_v59, 5  ;;  %v8313_v50 = vld [vmem:[#allocation3 + $0xa8] sm:$0xe]  ;;  %v8470_v7 = vrot.slane %v8315_v36, 5 }
 0x3cd   : > { %v13318_v17 = vcombine.low %v8426_v35, %v8429_v25  ;;  %v8448_v24 = vrot.slane %v8446_v49, 4  ;;  %v15663_v59 = vld [vmem:[#allocation3 + $0x24] sm:$0xff]  }
 0x3ce   : > { %14686 = vmatpush3.bf16.msra.mxu1 %v15653_v51  ;;  %v8419_v51 = vsel %vm16379_vm13, %v13285_v54, %v8418_v8  ;;  %v8455_v2 = vrot.slane %v8453_v40, 4  ;;  %v13289_v8 = vrot.slane %v8304_v3, 9  ;;  %v8464_v54 = vsel %vm16379_vm13, %v8462_v60, %v8463_v62  ;;  %v9315_v3 = vld [vmem:[#allocation3 + $0xc] sm:$0xf]  ;;  %v9325_v60 = vld [vmem:[#allocation3 + $0x34] sm:$0xf] }
 0x3cf   : > { %14687 = vmatprep.subr.bf16.mxu1 %v15654_v0  ;;  %v13317_v1 = vcombine.low %v8419_v51, %v8422_v37  ;;  %v8450_v32 = vsel %vm16379_vm13, %v8448_v24, %v8449_v61  ;;  %v8474_v37 = vrot.slane %v8317_v11, 5  ;;  %v15673_v24 = vld [vmem:[#allocation3 + $0x78] sm:$0xff]   ;;  %v9364_v52 = vshrl.u32 %v9315_v3, 16 }
 0x3d0   : > { %v8457_v47 = vsel %vm16379_vm13, %v8455_v2, %v8456_v39  ;;  %v8447_v29 = vsel %vm16379_vm13, %v13289_v8, %v8446_v49  ;;  %v15666_v49 = vld [vmem:[#allocation3 + $0x3c] sm:$0xff]   ;;  %v9316_v2 = vld [vmem:[#allocation3 + $0x10] sm:$0xf]  ;;  %v9367_v61 = vshll.u32 %v9315_v3, 16  ;;  %v9318_v39 = vld [vmem:[#allocation3 + $0x18] sm:$0xf] }
 0x3d1   : > { %14656 = vmatmul.mubr.bf16.gmra.mrb[4].mxu1 %v13313_v34  ;;  %v13288_v34 = vrot.slane %v8301_v21, 9  ;;  %v13321_v44 = vcombine.low %v8447_v29, %v8450_v32  ;;  %v15665_v21 = vld [vmem:[%s18258_s3 + $0x108] sm:$0xff]   ;;  %v9319_v8 = vld [vmem:[#allocation3 + $0x1c] sm:$0xf]  ;;  %v9391_v27 = vshll.u32 %v9318_v39, 16 }
 0x3d2   : > { %14659 = vmatprep.mubr.bf16.mxu1 %v13314_v41  ;;  %14688 = vmatpush3.bf16.msra.mxu1 %v15654_v0  ;;  %v8435_v0 = vrot.slane %v8300_v33, 5  ;;  %v8476_v33 = vrot.slane %v8474_v37, 4  ;;  %v15676_v32 = vld [vmem:[#allocation3 + $0x90] sm:$0xff]   ;;  %v9369_v29 = vrot.slane %v9367_v61, 5  ;;  %v9401_v36 = vshrl.u32 %v9319_v8, 16 }
 0x3d3   : > { %14689 = vmatprep.subr.bf16.mxu1 %v15655_v16  ;;  %v8440_v43 = vsel %vm16379_vm13, %v13288_v34, %v8439_v38  ;;  %v15667_v34 = vld [vmem:[#allocation3 + $0x48] sm:$0xff]  }
 0x3d4   : > { %v8436_v13 = vsel %vm16379_vm13, %v8434_v10, %v8435_v0  ;;  %v13320_v26 = vcombine.low %v8440_v43, %v8443_v53  ;;  %v15661_v0 = vld [vmem:[#allocation3 + $0x18] sm:$0xff]   ;;  %v15677_v53 = vld [vmem:[%s18258_s3 + $0x128] sm:$0xff]   ;;  %v15683_v43 = vld [vmem:[%s18258_s3 + $0x138] sm:$0xff]  }
 0x3d6   : > { %14690 = vmatpush3.bf16.msra.mxu1 %v15655_v16  ;;  %v8433_v16 = vsel %vm16379_vm13, %v13287_v20, %v8432_v30  ;;  %v13292_v30 = vrot.slane %v8313_v50, 9  ;;  %v15664_v20 = vld [vmem:[#allocation3 + $0x30] sm:$0xff]  }
 0x3d7   : > { %14691 = vmatprep.subr.bf16.mxu1 %v15656_v9  ;;  %v13319_v41 = vcombine.low %v8433_v16, %v8436_v13  ;;  %v15671_v13 = vld [vmem:[%s18258_s3 + $0x118] sm:$0xff]   ;;  %v15680_v16 = vld [vmem:[%s18258_s3 + $0x130] sm:$0xff]  }
 0x3d9   : > { %14660 = vmatmul.mubr.bf16.gmra.mrb[8].mxu1 %v13315_v57  ;;  %v8467_v57 = vrot.slane %v8314_v19, 5  ;;  %v9377_v19 = vshrl.u32 %v9316_v2, 16 }
 0x3da   : > { %14663 = vmatprep.mubr.bf16.mxu1 %v13316_v56  ;;  %14692 = vmatpush3.bf16.msra.mxu1 %v15656_v9  ;;  %v8307_v9 = vld [vmem:[#allocation3 + $0x90] sm:$0xe]  ;;  %v8310_v56 = vld [vmem:[#allocation3 + $0x9c] sm:$0xe] }
 0x3db   : > { %14693 = vmatprep.subr.bf16.mxu1 %v15657_v28  ;;  %v13290_v31 = vrot.slane %v8307_v9, 9  ;;  %v8469_v42 = vrot.slane %v8467_v57, 4  ;;  %v8468_v51 = vsel %vm16379_vm13, %v13292_v30, %v8467_v57  ;;  %v9373_v9 = vshll.u32 %v9316_v2, 16 }
 0x3dc   : > { %v9366_v57 = vrot.slane %v9364_v52, 4  ;;  %v9379_v50 = vrot.slane %v9377_v19, 4  ;;  %v9449_v30 = vshrl.u32 %v9325_v60, 16 }
 0x3dd   : > { %v8471_v15 = vsel %vm16379_vm13, %v8469_v42, %v8470_v7 }
 0x3de   : > { %14694 = vmatpush3.bf16.msra.mxu1 %v15657_v28  ;;  %v8454_v28 = vsel %vm16379_vm13, %v13290_v31, %v8453_v40  ;;  %v13324_v35 = vcombine.low %v8468_v51, %v8471_v15  ;;  %v15669_v40 = vld [vmem:[#allocation3 + $0x54] sm:$0xff]   ;;  %v9321_v31 = vld [vmem:[#allocation3 + $0x24] sm:$0xf]  ;;  %v9370_v15 = vor.u32 %v9369_v29, %v9366_v57  ;;  %v9330_v57 = vld [vmem:[#allocation3 + $0x48] sm:$0xf] }
 0x3df   : > { %14695 = vmatprep.subr.bf16.mxu1 %v15658_v48  ;;  %v13322_v46 = vcombine.low %v8454_v28, %v8457_v47  ;;  %v9317_v47 = vld [vmem:[#allocation3 + $0x14] sm:$0x1]  ;;  %v17714_v28 = vrot.slane %v9373_v9, 5  ;;  %v9412_v42 = vshrl.u32 %v9321_v31, 16  ;;  %v9415_v11 = vshll.u32 %v9321_v31, 16  ;;  %v15682_v29 = vld [vmem:[#allocation3 + $0xc0] sm:$0xff]  }
 0x3e1   : > { %14664 = vmatmul.mubr.bf16.gmra.mrb[12].mxu1 %v13317_v1  ;;  %v8318_v1 = vld [vmem:[#allocation3 + $0xbc] sm:$0x1] }
 0x3e2   : > { %14667 = vmatprep.mubr.bf16.mxu1 %v13318_v17  ;;  %14696 = vmatpush3.bf16.msra.mxu1 %v15658_v48  ;;  %v13291_v48 = vrot.slane %v8310_v56, 9  ;;  %v8477_v17 = vrot.slane %v8318_v1, 5  ;;  %v9388_v56 = vshrl.u32 %v9318_v39, 16  ;;  %v9380_v1 = vor.u32 %v9379_v50, %v17714_v28 }
 0x3e3   : > { %14697 = vmatprep.subr.bf16.mxu1 %v15659_v14 }
 0x3e4   : > { %v8461_v25 = vsel %vm16379_vm13, %v13291_v48, %v8460_v22  ;;  %v8478_v6 = vsel %vm16379_vm13, %v8476_v33, %v8477_v17  ;;  %v15678_v22 = vld [vmem:[#allocation3 + $0x9c] sm:$0xff]   ;;  %v9383_v48 = vshll.u32 %v9317_v47, 16  ;;  %v9403_v33 = vrot.slane %v9401_v36, 4  ;;  %v9329_v36 = vld [vmem:[#allocation3 + $0x44] sm:$0x1] }
 0x3e5   : > { %v13323_v38 = vcombine.low %v8461_v25, %v8464_v54  ;;  %v9324_v54 = vld [vmem:[#allocation3 + $0x30] sm:$0xf]  ;;  %v9390_v25 = vrot.slane %v9388_v56, 4  ;;  %v9417_v17 = vrot.slane %v9415_v11, 5 }
 0x3e6   : > { %14698 = vmatpush3.bf16.msra.mxu1 %v15659_v14  ;;  %v8316_v14 = vld [vmem:[#allocation3 + $0xb4] sm:$0xe] }
 0x3e7   : > { %14731 = vmatprep.subr.bf16.mxu1 %v17655_v12  ;;  %v13293_v10 = vrot.slane %v8316_v14, 9  ;;  %v9414_v14 = vrot.slane %v9412_v42, 4 }
 0x3e9   : > { %14668 = vmatmul.mubr.bf16.gmra.mrb[16].mxu1 %v13319_v41  ;;  %v8475_v58 = vsel %vm16379_vm13, %v13293_v10, %v8474_v37  ;;  %v15670_v41 = vld [vmem:[#allocation3 + $0x60] sm:$0xff]   ;;  %v9445_v37 = vshll.u32 %v9325_v60, 16  ;;  %v9331_v60 = vld [vmem:[#allocation3 + $0x4c] sm:$0xf] }
 0x3ea   : > { %14671 = vmatprep.mubr.bf16.mxu1 %v13320_v26  ;;  %v13325_v23 = vcombine.low %v8475_v58, %v8478_v6  ;;  %v17711_v26 = vld [vmem:[%s18258_s3 + $0x140] sm:$0xff]   ;;  %v9436_v58 = vshrl.u32 %v9324_v54, 16 }
 0x3f1   : > { %14672 = vmatmul.mubr.bf16.gmra.mrb[20].mxu1 %v13321_v44  ;;  %v9322_v44 = vld [vmem:[#allocation3 + $0x28] sm:$0xf] }
 0x3f2   : > { %14675 = vmatprep.mubr.bf16.mxu1 %v13322_v46  ;;  %v9397_v46 = vshll.u32 %v9319_v8, 16  ;;  %v9421_v62 = vshll.u32 %v9322_v44, 16  ;;  %v9425_v7 = vshrl.u32 %v9322_v44, 16 }
 0x3f4   : > { %v17716_v51 = vrot.slane %v9397_v46, 5  ;;  %v17719_v10 = vrot.slane %v9421_v62, 5  ;;  %v9427_v6 = vrot.slane %v9425_v7, 4 }
 0x3f9   : > { %14676 = vmatmul.mubr.bf16.gmra.mrb[24].mxu1 %v13323_v38  ;;  %v9393_v38 = vrot.slane %v9391_v27, 5 }
 0x3fa   : > { %14679 = vmatprep.mubr.bf16.mxu1 %v13324_v35  ;;  %v9320_v35 = vld [vmem:[#allocation3 + $0x20] sm:$0x1] }
 0x401   : > { %14680 = vmatmul.mubr.bf16.gmra.mrb[28].mxu1 %v13325_v23  ;;  %v9439_v23 = vshll.u32 %v9324_v54, 16  ;;  %v9487_v54 = vshll.u32 %v9330_v57, 16 }
 0x402   : > { %14699 = vmatprep.mubr.bf16.mxu1 %v15660_v55  ;;  %v15679_v55 = vld [vmem:[#allocation3 + $0xa8] sm:$0xff]  }
 0x409   : > { %14700 = vmatmul.mubr.bf16.vlgmr.msra.gmra.mrb[0].mxu1 %v15661_v0  ;;  %v17721_v0 = vrot.slane %v9445_v37, 5 }
 0x40a   : > { %14703 = vmatprep.mubr.bf16.mxu1 %v15663_v59  ;;  %14732 = vmatpush3.bf16.msra.mxu1 %v17655_v12  ;;  %v15674_v12 = vld [vmem:[%s18258_s3 + $0x120] sm:$0xff]   ;;  %v9327_v59 = vld [vmem:[#allocation3 + $0x3c] sm:$0xf] }
 0x40b   : > { %14733 = vmatprep.subr.bf16.mxu1 %v15665_v21  ;;  %v9460_v3 = vshrl.u32 %v9327_v59, 16  ;;  %v9463_v52 = vshll.u32 %v9327_v59, 16  ;;  %v9489_v59 = vrot.slane %v9487_v54, 5 }
 0x40d   : > { %v9462_v46 = vrot.slane %v9460_v3, 4  ;;  %v9465_v42 = vrot.slane %v9463_v52, 5  ;;  %v9339_v52 = vld [vmem:[#allocation3 + $0x6c] sm:$0xf] }
 0x40e   : > { %14734 = vmatpush3.bf16.msra.mxu1 %v15665_v21  ;;  %v9451_v21 = vrot.slane %v9449_v30, 4 }
 0x40f   : > { %14735 = vmatprep.subr.bf16.mxu1 %v15668_v5 }
 0x410   : > { %v9452_v2 = vor.u32 %v9451_v21, %v17721_v0 }
 0x411   : > { %14704 = vmatmul.mubr.bf16.gmra.mrb[4].mxu1 %v15664_v20  ;;  %v9371_v20 = vrot.slane %v9370_v15, 4  ;;  %v9493_v15 = vshll.u32 %v9331_v60, 16 }
 0x412   : > { %14707 = vmatprep.mubr.bf16.mxu1 %v15666_v49  ;;  %14736 = vmatpush3.bf16.msra.mxu1 %v15668_v5  ;;  %v15681_v5 = vld [vmem:[#allocation3 + $0xb4] sm:$0xff]   ;;  %v9407_v49 = vshll.u32 %v9320_v35, 16  ;;  %v9453_v50 = vrot.slane %v9452_v2, 4 }
 0x413   : > { %14737 = vmatprep.subr.bf16.mxu1 %v15671_v13  ;;  %v9376_v19 = vsel %vm16155_vm10, %v9371_v20, %v17714_v28 }
 0x414   : > { %v9409_v8 = vrot.slane %v9407_v49, 5 }
 0x416   : > { %14738 = vmatpush3.bf16.msra.mxu1 %v15671_v13  ;;  %v9394_v13 = vor.u32 %v9393_v38, %v9390_v25  ;;  %v9497_v25 = vshrl.u32 %v9331_v60, 16  ;;  %v9333_v38 = vld [vmem:[#allocation3 + $0x54] sm:$0xf]  ;;  %v15686_v60 = vld [vmem:[%s18258_s3 + $0x150] sm:$0xff]  }
 0x417   : > { %14739 = vmatprep.subr.bf16.mxu1 %v15674_v12  ;;  %v9511_v20 = vshll.u32 %v9333_v38, 16 }
 0x418   : > { %v9395_v39 = vrot.slane %v9394_v13, 4  ;;  %v17746_v13 = vrot.slane %v9493_v15, 5 }
 0x419   : > { %14708 = vmatmul.mubr.bf16.gmra.mrb[8].mxu1 %v15667_v34  ;;  %v9381_v34 = vrot.slane %v9380_v1, 4 }
 0x41a   : > { %14711 = vmatprep.mubr.bf16.mxu1 %v15669_v40  ;;  %14740 = vmatpush3.bf16.msra.mxu1 %v15674_v12  ;;  %v9328_v12 = vld [vmem:[#allocation3 + $0x40] sm:$0xf]  ;;  %v9404_v40 = vor.u32 %v9403_v33, %v17716_v51  ;;  %v9400_v7 = vsel %vm16155_vm10, %v9395_v39, %v17716_v51 }
 0x41b   : > { %14741 = vmatprep.subr.bf16.mxu1 %v15677_v53  ;;  %v9469_v61 = vshll.u32 %v9328_v12, 16  ;;  %v9473_v9 = vshrl.u32 %v9328_v12, 16 }
 0x41d   : > { %v17731_v11 = vrot.slane %v9469_v61, 5  ;;  %v9475_v28 = vrot.slane %v9473_v9, 4  ;;  %v9513_v9 = vrot.slane %v9511_v20, 5  ;;  %v9341_v20 = vld [vmem:[#allocation3 + $0x74] sm:$0x1] }
 0x41e   : > { %14742 = vmatpush3.bf16.msra.mxu1 %v15677_v53  ;;  %v9385_v53 = vrot.slane %v9383_v48, 5  ;;  %v9484_v48 = vshrl.u32 %v9330_v57, 16 }
 0x41f   : > { %14743 = vmatprep.subr.bf16.mxu1 %v15680_v16 }
 0x420   : > { %v9486_v21 = vrot.slane %v9484_v48, 4 }
 0x421   : > { %14712 = vmatmul.mubr.bf16.gmra.mrb[12].mxu1 %v15670_v41  ;;  %v9418_v41 = vor.u32 %v9417_v17, %v9414_v14  ;;  %v9479_v14 = vshll.u32 %v9329_v36, 16  ;;  %v9334_v17 = vld [vmem:[#allocation3 + $0x58] sm:$0xf] }
 0x422   : > { %14715 = vmatprep.mubr.bf16.mxu1 %v15672_v4  ;;  %14744 = vmatpush3.bf16.msra.mxu1 %v15680_v16  ;;  %v9323_v16 = vld [vmem:[#allocation3 + $0x2c] sm:$0x1]  ;;  %v9326_v4 = vld [vmem:[#allocation3 + $0x38] sm:$0x1]  ;;  %v9517_v49 = vshll.u32 %v9334_v17, 16  ;;  %v9521_v12 = vshrl.u32 %v9334_v17, 16 }
 0x423   : > { %14745 = vmatprep.subr.bf16.mxu1 %v15683_v43  ;;  %v9431_v31 = vshll.u32 %v9323_v16, 16  ;;  %v9455_v47 = vshll.u32 %v9326_v4, 16  ;;  %v9419_v44 = vrot.slane %v9418_v41, 4  ;;  %v9481_v41 = vrot.slane %v9479_v14, 5 }
 0x425   : > { %v9433_v37 = vrot.slane %v9431_v31, 5  ;;  %v9457_v30 = vrot.slane %v9455_v47, 5  ;;  %v9424_v35 = vsel %vm16155_vm10, %v9419_v44, %v17719_v10  ;;  %v9523_v31 = vrot.slane %v9521_v12, 4  ;;  %v9335_v47 = vld [vmem:[#allocation3 + $0x5c] sm:$0x1] }
 0x426   : > { %14746 = vmatpush3.bf16.msra.mxu1 %v15683_v43  ;;  %v9428_v43 = vor.u32 %v9427_v6, %v17719_v10  ;;  %v9499_v10 = vrot.slane %v9497_v25, 4  ;;  %v9556_v44 = vshrl.u32 %v9339_v52, 16 }
 0x427   : > { %14779 = vmatprep.subr.bf16.mxu1 %v17711_v26  ;;  %v9458_v6 = vsel %vm16155_vm10, %v9453_v50, %v9457_v30  ;;  %v9527_v30 = vshll.u32 %v9335_v47, 16 }
 0x428   : > { %v9429_v56 = vrot.slane %v9428_v43, 4  ;;  %v9337_v43 = vld [vmem:[#allocation3 + $0x64] sm:$0xf]  ;;  %v9558_v25 = vrot.slane %v9556_v44, 4 }
 0x429   : > { %14716 = vmatmul.mubr.bf16.gmra.mrb[16].mxu1 %v15673_v24  ;;  %v9438_v24 = vrot.slane %v9436_v58, 4  ;;  %v9466_v58 = vor.u32 %v9465_v42, %v9462_v46  ;;  %v9541_v57 = vshll.u32 %v9337_v43, 16 }
 0x42a   : > { %14719 = vmatprep.mubr.bf16.mxu1 %v15675_v63  ;;  %v9441_v63 = vrot.slane %v9439_v23, 5  ;;  %v9434_v51 = vsel %vm16155_vm10, %v9429_v56, %v9433_v37  ;;  %v9476_v23 = vor.u32 %v9475_v28, %v17731_v11  ;;  %v9559_v56 = vshll.u32 %v9339_v52, 16 }
 0x42c   : > { %v9442_v27 = vor.u32 %v9441_v63, %v9438_v24  ;;  %v15685_v24 = vld [vmem:[%s18258_s3 + $0x148] sm:$0xff]   ;;  %v9467_v63 = vrot.slane %v9466_v58, 4  ;;  %v9477_v3 = vrot.slane %v9476_v23, 4 }
 0x42e   : > { %v9443_v33 = vrot.slane %v9442_v27, 4  ;;  %v9472_v27 = vsel %vm16155_vm10, %v9467_v63, %v17731_v11  ;;  %v9482_v46 = vsel %vm16155_vm10, %v9477_v3, %v9481_v41  ;;  %v17767_v11 = vrot.slane %v9541_v57, 5 }
 0x430   : > { %v9448_v16 = vsel %vm16155_vm10, %v9443_v33, %v17721_v0  ;;  %v9500_v0 = vor.u32 %v9499_v10, %v17746_v13  ;;  %v9529_v10 = vrot.slane %v9527_v30, 5 }
 0x431   : > { %14720 = vmatmul.mubr.bf16.gmra.mrb[20].mxu1 %v15676_v32  ;;  %v9386_v32 = vsel %vm16155_vm10, %v9381_v34, %v9385_v53  ;;  %v9336_v34 = vld [vmem:[#allocation3 + $0x60] sm:$0xf]  ;;  %v13393_v4 = vcombine.low %v9448_v16, %v9458_v6  ;;  %v13394_v6 = vcombine.low %v9472_v27, %v9482_v46  ;;  %v9348_v46 = vld [vmem:[#allocation3 + $0x90] sm:$0xf] }
 0x432   : > { %14723 = vmatprep.mubr.bf16.mxu1 %v15678_v22  ;;  %v9405_v22 = vrot.slane %v9404_v40, 4  ;;  %v13390_v62 = vcombine.low %v9376_v19, %v9386_v32  ;;  %v13392_v40 = vcombine.low %v9424_v35, %v9434_v51  ;;  %v9532_v19 = vshrl.u32 %v9336_v34, 16  ;;  %v15687_v35 = vld [vmem:[%s18258_s3 + $0x158] sm:$0xff]  }
 0x433   : > { %v9535_v39 = vshll.u32 %v9336_v34, 16  ;;  %v9490_v32 = vor.u32 %v9489_v59, %v9486_v21  ;;  %v9501_v54 = vrot.slane %v9500_v0, 4 }
 0x434   : > { %v9410_v1 = vsel %vm16155_vm10, %v9405_v22, %v9409_v8  ;;  %v9340_v8 = vld [vmem:[#allocation3 + $0x70] sm:$0xf]  ;;  %v17755_v22 = vrot.slane %v9517_v49, 5  ;;  %v9534_v28 = vrot.slane %v9532_v19, 4 }
 0x435   : > { %v13391_v53 = vcombine.low %v9400_v7, %v9410_v1  ;;  %v9565_v50 = vshll.u32 %v9340_v8, 16  ;;  %v9569_v36 = vshrl.u32 %v9340_v8, 16  ;;  %v9343_v7 = vld [vmem:[#allocation3 + $0x7c] sm:$0xf]  ;;  %v9491_v48 = vrot.slane %v9490_v32, 4 }
 0x436   : > { %v9524_v37 = vor.u32 %v9523_v31, %v17755_v22  ;;  %v9342_v1 = vld [vmem:[#allocation3 + $0x78] sm:$0xf]  ;;  %v9589_v17 = vshll.u32 %v9343_v7, 16  ;;  %v9593_v51 = vshrl.u32 %v9343_v7, 16 }
 0x437   : > { %v17772_v33 = vrot.slane %v9565_v50, 5  ;;  %v9571_v14 = vrot.slane %v9569_v36, 4  ;;  %v9580_v12 = vshrl.u32 %v9342_v1, 16  ;;  %v9583_v34 = vshll.u32 %v9342_v1, 16 }
 0x438   : > { %v9525_v59 = vrot.slane %v9524_v37, 4  ;;  %v17781_v41 = vrot.slane %v9589_v17, 5  ;;  %v9628_v1 = vshrl.u32 %v9348_v46, 16 }
 0x439   : > { %14724 = vmatmul.mubr.bf16.gmra.mrb[24].mxu1 %v15679_v55  ;;  %v9332_v55 = vld [vmem:[#allocation3 + $0x50] sm:$0x1]  ;;  %v9572_v16 = vor.u32 %v9571_v14, %v17772_v33  ;;  %v9582_v8 = vrot.slane %v9580_v12, 4  ;;  %v9585_v32 = vrot.slane %v9583_v34, 5  ;;  %v15691_v34 = vld [vmem:[%s18258_s3 + $0x178] sm:$0xff]  }
 0x43a   : > { %14727 = vmatprep.mubr.bf16.mxu1 %v15681_v5  ;;  %v9508_v5 = vshrl.u32 %v9333_v38, 16  ;;  %v9503_v2 = vshll.u32 %v9332_v55, 16  ;;  %v9561_v38 = vrot.slane %v9559_v56, 5  ;;  %v9496_v55 = vsel %vm16155_vm10, %v9491_v48, %v17746_v13 }
 0x43b   : > { %v9595_v13 = vrot.slane %v9593_v51, 4  ;;  %v9530_v52 = vsel %vm16155_vm10, %v9525_v59, %v9529_v10  ;;  %v9351_v51 = vld [vmem:[#allocation3 + $0x9c] sm:$0xf] }
 0x43c   : > { %v9510_v61 = vrot.slane %v9508_v5, 4  ;;  %v9338_v5 = vld [vmem:[#allocation3 + $0x68] sm:$0x1]  ;;  %v9655_v12 = vshll.u32 %v9351_v51, 16 }
 0x43d   : > { %v9596_v44 = vor.u32 %v9595_v13, %v17781_v41 }
 0x43e   : > { %v9514_v42 = vor.u32 %v9513_v9, %v9510_v61  ;;  %v9575_v61 = vshll.u32 %v9341_v20, 16 }
 0x440   : > { %v9515_v58 = vrot.slane %v9514_v42, 4  ;;  %v9349_v42 = vld [vmem:[#allocation3 + $0x94] sm:$0xf] }
 0x441   : > { %14728 = vmatmul.mubr.bf16.gmra.mrb[28].mxu1 %v15682_v29  ;;  %v9545_v29 = vshrl.u32 %v9337_v43, 16  ;;  %v15688_v43 = vld [vmem:[%s18258_s3 + $0x160] sm:$0xff]   ;;  %v9637_v14 = vshll.u32 %v9349_v42, 16  ;;  %v9641_v17 = vshrl.u32 %v9349_v42, 16 }
 0x442   : > { %14747 = vmatprep.mubr.bf16.mxu1 %v13390_v62  ;;  %v9537_v62 = vrot.slane %v9535_v39, 5  ;;  %v9520_v63 = vsel %vm16155_vm10, %v9515_v58, %v17755_v22  ;;  %v9344_v39 = vld [vmem:[#allocation3 + $0x80] sm:$0x1]  ;;  %v15689_v22 = vld [vmem:[%s18258_s3 + $0x168] sm:$0xff]  }
 0x443   : > { %v9547_v15 = vrot.slane %v9545_v29, 4  ;;  %v9573_v29 = vrot.slane %v9572_v16, 4  ;;  %v13396_v56 = vcombine.low %v9520_v63, %v9530_v52  ;;  %v9599_v50 = vshll.u32 %v9344_v39, 16  ;;  %v9355_v63 = vld [vmem:[#allocation3 + $0xac] sm:$0xf] }
 0x444   : > { %v9538_v23 = vor.u32 %v9537_v62, %v9534_v28  ;;  %v9586_v62 = vor.u32 %v9585_v32, %v9582_v8  ;;  %v17816_v16 = vrot.slane %v9637_v14, 5  ;;  %v9643_v13 = vrot.slane %v9641_v17, 4  ;;  %v9350_v52 = vld [vmem:[#allocation3 + $0x98] sm:$0x1]  ;;  %v9354_v32 = vld [vmem:[#allocation3 + $0xa8] sm:$0xf] }
 0x445   : > { %v9548_v49 = vor.u32 %v9547_v15, %v17767_v11  ;;  %v9657_v8 = vrot.slane %v9655_v12, 5  ;;  %v9679_v42 = vshll.u32 %v9354_v32, 16  ;;  %v9356_v14 = vld [vmem:[#allocation3 + $0xb0] sm:$0x1] }
 0x446   : > { %v9539_v3 = vrot.slane %v9538_v23, 4  ;;  %v9587_v59 = vrot.slane %v9586_v62, 4 }
 0x447   : > { %v9549_v47 = vrot.slane %v9548_v49, 4  ;;  %v9652_v49 = vshrl.u32 %v9351_v51, 16  ;;  %v9681_v51 = vrot.slane %v9679_v42, 5 }
 0x448   : > { %v9544_v28 = vsel %vm16155_vm10, %v9539_v3, %v17767_v11  ;;  %v15690_v11 = vld [vmem:[%s18258_s3 + $0x170] sm:$0xff]   ;;  %v9592_v3 = vsel %vm16155_vm10, %v9587_v59, %v17781_v41  ;;  %v9685_v41 = vshll.u32 %v9355_v63, 16 }
 0x449   : > { %14748 = vmatmul.mubr.bf16.vlgmr.msra.gmra.mrb[0].mxu1 %v13391_v53  ;;  %v9346_v53 = vld [vmem:[#allocation3 + $0x88] sm:$0xf]  ;;  %v9654_v39 = vrot.slane %v9652_v49, 4 }
 0x44a   : > { %14751 = vmatprep.mubr.bf16.mxu1 %v13392_v40  ;;  %14780 = vmatpush3.bf16.msra.mxu1 %v17711_v26  ;;  %v9505_v26 = vrot.slane %v9503_v2, 5  ;;  %v9562_v40 = vor.u32 %v9561_v38, %v9558_v25  ;;  %v9551_v2 = vshll.u32 %v9338_v5, 16  ;;  %v9613_v9 = vshll.u32 %v9346_v53, 16  ;;  %v9347_v38 = vld [vmem:[#allocation3 + $0x8c] sm:$0x1] }
 0x44b   : > { %14781 = vmatprep.subr.bf16.mxu1 %v15685_v24  ;;  %v9617_v19 = vshrl.u32 %v9346_v53, 16  ;;  %v9597_v25 = vrot.slane %v9596_v44, 4  ;;  %v9623_v10 = vshll.u32 %v9347_v38, 16  ;;  %v9630_v53 = vrot.slane %v9628_v1, 4  ;;  %v9357_v44 = vld [vmem:[#allocation3 + $0xb4] sm:$0xf] }
 0x44c   : > { %v9506_v21 = vsel %vm16155_vm10, %v9501_v54, %v9505_v26  ;;  %v9563_v57 = vrot.slane %v9562_v40, 4  ;;  %v9553_v27 = vrot.slane %v9551_v2, 5  ;;  %v17795_v36 = vrot.slane %v9613_v9, 5  ;;  %v9352_v54 = vld [vmem:[#allocation3 + $0xa0] sm:$0xf] }
 0x44d   : > { %v9619_v26 = vrot.slane %v9617_v19, 4  ;;  %v9661_v23 = vshll.u32 %v9352_v54, 16  ;;  %v9625_v19 = vrot.slane %v9623_v10, 5 }
 0x44e   : > { %14782 = vmatpush3.bf16.msra.mxu1 %v15685_v24  ;;  %v13395_v24 = vcombine.low %v9496_v55, %v9506_v21  ;;  %v9554_v37 = vsel %vm16155_vm10, %v9549_v47, %v9553_v27  ;;  %v9568_v30 = vsel %vm16155_vm10, %v9563_v57, %v17772_v33  ;;  %v9665_v33 = vshrl.u32 %v9352_v54, 16  ;;  %v9353_v57 = vld [vmem:[#allocation3 + $0xa4] sm:$0x1] }
 0x44f   : > { %14783 = vmatprep.subr.bf16.mxu1 %v15686_v60  ;;  %v9620_v58 = vor.u32 %v9619_v26, %v17795_v36  ;;  %v13397_v55 = vcombine.low %v9544_v28, %v9554_v37  ;;  %v9644_v47 = vor.u32 %v9643_v13, %v17816_v16  ;;  %v9676_v26 = vshrl.u32 %v9354_v32, 16 }
 0x450   : > { %v9658_v28 = vor.u32 %v9657_v8, %v9654_v39  ;;  %v9671_v62 = vshll.u32 %v9353_v57, 16 }
 0x451   : > { %14752 = vmatmul.mubr.bf16.gmra.mrb[4].mxu1 %v13393_v4  ;;  %v9345_v4 = vld [vmem:[#allocation3 + $0x84] sm:$0xf]  ;;  %v9645_v37 = vrot.slane %v9644_v47, 4  ;;  %v9678_v17 = vrot.slane %v9676_v26, 4  ;;  %v10134_v47 = vld [vmem:[#allocation3 + $0x10] sm:$0xf] }
 0x452   : > { %14755 = vmatprep.mubr.bf16.mxu1 %v13394_v6  ;;  %14784 = vmatpush3.bf16.msra.mxu1 %v15686_v60  ;;  %v9604_v0 = vshrl.u32 %v9345_v4, 16  ;;  %v9607_v31 = vshll.u32 %v9345_v4, 16  ;;  %v9577_v60 = vrot.slane %v9575_v61, 5  ;;  %v9601_v6 = vrot.slane %v9599_v50, 5  ;;  %v9358_v61 = vld [vmem:[#allocation3 + $0xb8] sm:$0xf] }
 0x453   : > { %14785 = vmatprep.subr.bf16.mxu1 %v15687_v35  ;;  %v17818_v4 = vrot.slane %v9661_v23, 5  ;;  %v9709_v27 = vshll.u32 %v9358_v61, 16  ;;  %v9647_v50 = vshll.u32 %v9350_v52, 16 }
 0x454   : > { %v9606_v7 = vrot.slane %v9604_v0, 4  ;;  %v9609_v48 = vrot.slane %v9607_v31, 5  ;;  %v9578_v15 = vsel %vm16155_vm10, %v9573_v29, %v9577_v60  ;;  %v9602_v20 = vsel %vm16155_vm10, %v9597_v25, %v9601_v6  ;;  %v17826_v0 = vld [vmem:[%s18258_s3 + $0x180] sm:$0xff]  }
 0x455   : > { %v13398_v21 = vcombine.low %v9568_v30, %v9578_v15  ;;  %v13399_v9 = vcombine.low %v9592_v3, %v9602_v20  ;;  %v9689_v29 = vshrl.u32 %v9355_v63, 16  ;;  %v9687_v30 = vrot.slane %v9685_v41, 5 }
 0x456   : > { %14786 = vmatpush3.bf16.msra.mxu1 %v15687_v35  ;;  %v9631_v35 = vshll.u32 %v9348_v46, 16  ;;  %v9610_v5 = vor.u32 %v9609_v48, %v9606_v7  ;;  %v9713_v46 = vshrl.u32 %v9358_v61, 16  ;;  %v9700_v7 = vshrl.u32 %v9357_v44, 16 }
 0x457   : > { %14787 = vmatprep.subr.bf16.mxu1 %v15688_v43  ;;  %v9703_v48 = vshll.u32 %v9357_v44, 16  ;;  %v9691_v15 = vrot.slane %v9689_v29, 4  ;;  %v9659_v6 = vrot.slane %v9658_v28, 4  ;;  %v9362_v29 = vld [vmem:[#allocation3 + $0xc8] sm:$0x1] }
 0x458   : > { %v9633_v40 = vrot.slane %v9631_v35, 5  ;;  %v9611_v2 = vrot.slane %v9610_v5, 4  ;;  %v9715_v1 = vrot.slane %v9713_v46, 4  ;;  %v9649_v35 = vrot.slane %v9647_v50, 5  ;;  %v9359_v5 = vld [vmem:[#allocation3 + $0xbc] sm:$0x1] }
 0x459   : > { %14756 = vmatmul.mubr.bf16.gmra.mrb[8].mxu1 %v13395_v24  ;;  %v9667_v24 = vrot.slane %v9665_v33, 4  ;;  %v9702_v23 = vrot.slane %v9700_v7, 4  ;;  %v9705_v33 = vrot.slane %v9703_v48, 5  ;;  %v9692_v59 = vor.u32 %v9691_v15, %v9687_v30  ;;  %v10137_v48 = vld [vmem:[#allocation3 + $0x1c] sm:$0xf] }
 0x45a   : > { %14759 = vmatprep.mubr.bf16.mxu1 %v13396_v56  ;;  %14788 = vmatpush3.bf16.msra.mxu1 %v15688_v43  ;;  %v9621_v43 = vrot.slane %v9620_v58, 4  ;;  %v9634_v31 = vor.u32 %v9633_v40, %v9630_v53  ;;  %v9616_v60 = vsel %vm16155_vm10, %v9611_v2, %v17795_v36  ;;  %v9361_v36 = vld [vmem:[#allocation3 + $0xc4] sm:$0xf]  ;;  %v9673_v58 = vrot.slane %v9671_v62, 5  ;;  %v10135_v62 = vld [vmem:[#allocation3 + $0x14] sm:$0x1] }
 0x45b   : > { %14789 = vmatprep.subr.bf16.mxu1 %v15689_v22  ;;  %v9668_v56 = vor.u32 %v9667_v24, %v17818_v4  ;;  %v9733_v20 = vshll.u32 %v9361_v36, 16  ;;  %v9737_v10 = vshrl.u32 %v9361_v36, 16  ;;  %v9682_v53 = vor.u32 %v9681_v51, %v9678_v17  ;;  %v10133_v15 = vld [vmem:[#allocation3 + $0xc] sm:$0xe] }
 0x45c   : > { %v9635_v25 = vrot.slane %v9634_v31, 4  ;;  %v9695_v40 = vshll.u32 %v9356_v14, 16  ;;  %v9664_v63 = vsel %vm16155_vm10, %v9659_v6, %v17818_v4  ;;  %v9706_v3 = vor.u32 %v9705_v33, %v9702_v23  ;;  %v10138_v6 = vld [vmem:[#allocation3 + $0x20] sm:$0x1]  ;;  %v10141_v33 = vld [vmem:[#allocation3 + $0x2c] sm:$0x1] }
 0x45d   : > { %v9669_v38 = vrot.slane %v9668_v56, 4  ;;  %v9719_v2 = vshll.u32 %v9359_v5, 16  ;;  %v9693_v61 = vrot.slane %v9692_v59, 4  ;;  %v9683_v39 = vrot.slane %v9682_v53, 4  ;;  %v10143_v59 = vld [vmem:[#allocation3 + $0x34] sm:$0xf] }
 0x45e   : > { %14790 = vmatpush3.bf16.msra.mxu1 %v15689_v22  ;;  %v9626_v22 = vsel %vm16155_vm10, %v9621_v43, %v9625_v19  ;;  %v9640_v49 = vsel %vm16155_vm10, %v9635_v25, %v17816_v16  ;;  %v9739_v19 = vrot.slane %v9737_v10, 4  ;;  %v9697_v8 = vrot.slane %v9695_v40, 5  ;;  %v10140_v25 = vld [vmem:[#allocation3 + $0x28] sm:$0xf]  ;;  %v10146_v10 = vld [vmem:[#allocation3 + $0x40] sm:$0xf] }
 0x45f   : > { %14791 = vmatprep.subr.bf16.mxu1 %v15690_v11  ;;  %v13400_v54 = vcombine.low %v9616_v60, %v9626_v22  ;;  %v9674_v12 = vsel %vm16155_vm10, %v9669_v38, %v9673_v58  ;;  %v9707_v57 = vrot.slane %v9706_v3, 4  ;;  %v9721_v41 = vrot.slane %v9719_v2, 5  ;;  %v10144_v2 = vld [vmem:[#allocation3 + $0x38] sm:$0x1] }
 0x460   : > { %v13402_v52 = vcombine.low %v9664_v63, %v9674_v12  ;;  %v9698_v4 = vsel %vm16155_vm10, %v9693_v61, %v9697_v8  ;;  %v10231_v56 = vrot.slane %v10134_v47, 5  ;;  %v9743_v60 = vshll.u32 %v9362_v29, 16  ;;  %v10149_v8 = vld [vmem:[#allocation3 + $0x4c] sm:$0xf]  ;;  %v10152_v47 = vld [vmem:[#allocation3 + $0x58] sm:$0xf] }
 0x461   : > { %14760 = vmatmul.mubr.bf16.gmra.mrb[12].mxu1 %v13397_v55  ;;  %v9360_v55 = vld [vmem:[#allocation3 + $0xc0] sm:$0xf]  ;;  %v10234_v38 = vrot.slane %v10135_v62, 5  ;;  %v13414_v36 = vrot.slane %v10133_v15, 9  ;;  %v10241_v5 = vrot.slane %v10138_v6, 5  ;;  %v10252_v53 = vrot.slane %v10143_v59, 5 }
 0x462   : > { %14763 = vmatprep.mubr.bf16.mxu1 %v13398_v21  ;;  %14792 = vmatpush3.bf16.msra.mxu1 %v15690_v11  ;;  %v9711_v11 = vrot.slane %v9709_v27, 5  ;;  %v9650_v21 = vsel %vm16155_vm10, %v9645_v37, %v9649_v35  ;;  %v9724_v13 = vshrl.u32 %v9360_v55, 16  ;;  %v9727_v43 = vshll.u32 %v9360_v55, 16  ;;  %v10136_v55 = vld [vmem:[#allocation3 + $0x18] sm:$0xe] }
 0x463   : > { %14793 = vmatprep.subr.bf16.mxu1 %v15691_v34  ;;  %v13401_v24 = vcombine.low %v9640_v49, %v9650_v21  ;;  %v9688_v27 = vsel %vm16155_vm10, %v9683_v39, %v9687_v30  ;;  %v10233_v7 = vrot.slane %v10231_v56, 4  ;;  %v9745_v37 = vrot.slane %v9743_v60, 5  ;;  %v10153_v62 = vld [vmem:[#allocation3 + $0x5c] sm:$0x1]  ;;  %v10151_v15 = vld [vmem:[#allocation3 + $0x54] sm:$0xe] }
 0x464   : > { %v9726_v32 = vrot.slane %v9724_v13, 4  ;;  %v9729_v31 = vrot.slane %v9727_v43, 5  ;;  %v13403_v50 = vcombine.low %v9688_v27, %v9698_v4  ;;  %v9712_v26 = vsel %vm16155_vm10, %v9707_v57, %v9711_v11  ;;  %v10159_v59 = vld [vmem:[#allocation3 + $0x74] sm:$0x1] }
 0x465   : > { %v10245_v35 = vrot.slane %v10140_v25, 5  ;;  %v10232_v51 = vsel %vm16379_vm13, %v13414_v36, %v10231_v56  ;;  %v10248_v49 = vrot.slane %v10141_v33, 5  ;;  %v13415_v12 = vrot.slane %v10136_v55, 9  ;;  %v10158_v25 = vld [vmem:[#allocation3 + $0x70] sm:$0xf] }
 0x466   : > { %14794 = vmatpush3.bf16.msra.mxu1 %v15691_v34  ;;  %v9716_v34 = vor.u32 %v9715_v1, %v9711_v11  ;;  %v9730_v46 = vor.u32 %v9729_v31, %v9726_v32  ;;  %v10238_v1 = vrot.slane %v10137_v48, 5  ;;  %v10235_v11 = vsel %vm16379_vm13, %v10233_v7, %v10234_v38  ;;  %v10145_v31 = vld [vmem:[#allocation3 + $0x3c] sm:$0xe]  ;;  %v10148_v7 = vld [vmem:[#allocation3 + $0x48] sm:$0xe]  ;;  %v15697_v33 = vld [vmem:[%s18258_s3 + $0x1a8] sm:$0xff]  }
 0x467   : > { %14827 = vmatprep.subr.bf16.mxu1 %v17826_v0  ;;  %v13446_v58 = vcombine.low %v10232_v51, %v10235_v11  ;;  %v10247_v21 = vrot.slane %v10245_v35, 4  ;;  %v10259_v43 = vrot.slane %v10146_v10, 5  ;;  %v10255_v32 = vrot.slane %v10144_v2, 5  ;;  %v10161_v10 = vld [vmem:[#allocation3 + $0x7c] sm:$0xf] }
 0x468   : > { %v9717_v16 = vrot.slane %v9716_v34, 4  ;;  %v10240_v23 = vrot.slane %v10238_v1, 4  ;;  %v10273_v27 = vrot.slane %v10152_v47, 5  ;;  %v10276_v38 = vrot.slane %v10153_v62, 5  ;;  %v10168_v62 = vld [vmem:[#allocation3 + $0x98] sm:$0x1] }
 0x469   : > { %14764 = vmatmul.mubr.bf16.gmra.mrb[16].mxu1 %v13399_v9  ;;  %v9735_v9 = vrot.slane %v9733_v20, 5  ;;  %v10139_v20 = vld [vmem:[#allocation3 + $0x24] sm:$0xe]  ;;  %v10249_v13 = vsel %vm16379_vm13, %v10247_v21, %v10248_v49  ;;  %v10261_v39 = vrot.slane %v10259_v43, 4 }
 0x46a   : > { %14767 = vmatprep.mubr.bf16.mxu1 %v13400_v54  ;;  %v9722_v22 = vsel %vm16155_vm10, %v9717_v16, %v9721_v41  ;;  %v9731_v54 = vrot.slane %v9730_v46, 4  ;;  %v10242_v34 = vsel %vm16379_vm13, %v10240_v23, %v10241_v5  ;;  %v13416_v40 = vrot.slane %v10139_v20, 9  ;;  %v10142_v16 = vld [vmem:[#allocation3 + $0x30] sm:$0xe]  ;;  %v15694_v41 = vld [vmem:[%s18258_s3 + $0x190] sm:$0xff]  }
 0x46b   : > { %v9740_v44 = vor.u32 %v9739_v19, %v9735_v9  ;;  %v13404_v42 = vcombine.low %v9712_v26, %v9722_v22  ;;  %v10147_v19 = vld [vmem:[#allocation3 + $0x44] sm:$0x1]  ;;  %v13417_v29 = vrot.slane %v10142_v16, 9  ;;  %v13418_v22 = vrot.slane %v10145_v31, 9  ;;  %v10156_v23 = vld [vmem:[#allocation3 + $0x68] sm:$0x1] }
 0x46c   : > { %v9736_v14 = vsel %vm16155_vm10, %v9731_v54, %v9735_v9  ;;  %v10246_v3 = vsel %vm16379_vm13, %v13416_v40, %v10245_v35  ;;  %v10254_v9 = vrot.slane %v10252_v53, 4  ;;  %v10262_v57 = vrot.slane %v10147_v19, 5  ;;  %v15695_v26 = vld [vmem:[%s18258_s3 + $0x198] sm:$0xff]   ;;  %v15698_v40 = vld [vmem:[%s18258_s3 + $0x1b0] sm:$0xff]  }
 0x46d   : > { %v9741_v28 = vrot.slane %v9740_v44, 4  ;;  %v13448_v61 = vcombine.low %v10246_v3, %v10249_v13  ;;  %v10266_v44 = vrot.slane %v10149_v8, 5  ;;  %v10260_v60 = vsel %vm16379_vm13, %v13418_v22, %v10259_v43  ;;  %v10155_v54 = vld [vmem:[#allocation3 + $0x64] sm:$0xf]  ;;  %v10154_v5 = vld [vmem:[#allocation3 + $0x60] sm:$0xe] }
 0x46e   : > { %v10256_v4 = vsel %vm16379_vm13, %v10254_v9, %v10255_v32  ;;  %v10263_v56 = vsel %vm16379_vm13, %v10261_v39, %v10262_v57  ;;  %v10275_v48 = vrot.slane %v10273_v27, 4  ;;  %v10280_v11 = vrot.slane %v10155_v54, 5  ;;  %v10162_v19 = vld [vmem:[#allocation3 + $0x80] sm:$0x1]  ;;  %v10165_v32 = vld [vmem:[#allocation3 + $0x8c] sm:$0x1] }
 0x46f   : > { %v9746_v30 = vsel %vm16155_vm10, %v9741_v28, %v9745_v37  ;;  %v10268_v28 = vrot.slane %v10266_v44, 4  ;;  %v13420_v35 = vrot.slane %v10151_v15, 9  ;;  %v10283_v49 = vrot.slane %v10156_v23, 5  ;;  %v15699_v16 = vld [vmem:[%s18258_s3 + $0x1b8] sm:$0xff]   ;;  %v10160_v31 = vld [vmem:[#allocation3 + $0x78] sm:$0xe] }
 0x470   : > { %v13405_v17 = vcombine.low %v9736_v14, %v9746_v30  ;;  %v15696_v30 = vld [vmem:[%s18258_s3 + $0x1a0] sm:$0xff]   ;;  %v10277_v14 = vsel %vm16379_vm13, %v10275_v48, %v10276_v38  ;;  %v10282_v21 = vrot.slane %v10280_v11, 4  ;;  %v13421_v13 = vrot.slane %v10154_v5, 9  ;;  %v10167_v57 = vld [vmem:[#allocation3 + $0x94] sm:$0xf] }
 0x471   : > { %14768 = vmatmul.mubr.bf16.gmra.mrb[20].mxu1 %v13401_v24  ;;  %v10239_v24 = vsel %vm16379_vm13, %v13415_v12, %v10238_v1  ;;  %v13419_v1 = vrot.slane %v10148_v7, 9  ;;  %v10157_v12 = vld [vmem:[#allocation3 + $0x6c] sm:$0xe]  ;;  %v10171_v54 = vld [vmem:[#allocation3 + $0xa4] sm:$0x1]  ;;  %v10311_v38 = vrot.slane %v10168_v62, 5 }
 0x472   : > { %14771 = vmatprep.mubr.bf16.mxu1 %v13402_v52  ;;  %v13447_v63 = vcombine.low %v10239_v24, %v10242_v34  ;;  %v15693_v52 = vld [vmem:[%s18258_s3 + $0x188] sm:$0xff]   ;;  %v10164_v34 = vld [vmem:[#allocation3 + $0x88] sm:$0xf]  ;;  %v10284_v43 = vsel %vm16379_vm13, %v10282_v21, %v10283_v49  ;;  %v10294_v24 = vrot.slane %v10161_v10, 5  ;;  %v10177_v5 = vld [vmem:[#allocation3 + $0xbc] sm:$0x1] }
 0x473   : > { %v10267_v51 = vsel %vm16379_vm13, %v13419_v1, %v10266_v44  ;;  %v10301_v2 = vrot.slane %v10164_v34, 5  ;;  %v10304_v44 = vrot.slane %v10165_v32, 5  ;;  %v17919_v22 = vld [vmem:[%s18258_s3 + $0x1c0] sm:$0xff]   ;;  %v10176_v1 = vld [vmem:[#allocation3 + $0xb8] sm:$0xf] }
 0x474   : > { %v10296_v8 = vrot.slane %v10294_v24, 4  ;;  %v10179_v49 = vld [vmem:[#allocation3 + $0xc4] sm:$0xf]  ;;  %v10175_v34 = vld [vmem:[#allocation3 + $0xb4] sm:$0xe]  ;;  %v15712_v62 = vld [vmem:[#allocation3 + $0x78] sm:$0xff]  }
 0x475   : > { %v10303_v47 = vrot.slane %v10301_v2, 4 }
 0x479   : > { %14772 = vmatmul.mubr.bf16.gmra.mrb[24].mxu1 %v13403_v50  ;;  %v10150_v50 = vld [vmem:[#allocation3 + $0x50] sm:$0x1] }
 0x47a   : > { %14775 = vmatprep.mubr.bf16.mxu1 %v13404_v42  ;;  %v13450_v42 = vcombine.low %v10260_v60, %v10263_v56  ;;  %v10269_v37 = vrot.slane %v10150_v50, 5  ;;  %v13423_v56 = vrot.slane %v10160_v31, 9  ;;  %v10305_v60 = vsel %vm16379_vm13, %v10303_v47, %v10304_v44  ;;  %v15708_v44 = vld [vmem:[%s18258_s3 + $0x1d0] sm:$0xff]  }
 0x47c   : > { %v10270_v36 = vsel %vm16379_vm13, %v10268_v28, %v10269_v37  ;;  %v10166_v37 = vld [vmem:[#allocation3 + $0x90] sm:$0xe] }
 0x47d   : > { %v13451_v6 = vcombine.low %v10267_v51, %v10270_v36  ;;  %v10318_v36 = vrot.slane %v10171_v54, 5  ;;  %v15713_v54 = vld [vmem:[#allocation3 + $0x84] sm:$0xff]  }
 0x481   : > { %14776 = vmatmul.mubr.bf16.gmra.mrb[28].mxu1 %v13405_v17  ;;  %v10287_v17 = vrot.slane %v10158_v25, 5  ;;  %v10173_v25 = vld [vmem:[#allocation3 + $0xac] sm:$0xf] }
 0x482   : > { %14795 = vmatprep.mubr.bf16.mxu1 %v13446_v58  ;;  %v10274_v58 = vsel %vm16379_vm13, %v13420_v35, %v10273_v27 }
 0x483   : > { %v13452_v55 = vcombine.low %v10274_v58, %v10277_v14  ;;  %v10289_v20 = vrot.slane %v10287_v17, 4  ;;  %v10322_v14 = vrot.slane %v10173_v25, 5 }
 0x489   : > { %14796 = vmatmul.mubr.bf16.vlgmr.msra.gmra.mrb[0].mxu1 %v13447_v63  ;;  %v13422_v63 = vrot.slane %v10157_v12, 9 }
 0x48a   : > { %14799 = vmatprep.mubr.bf16.mxu1 %v13448_v61  ;;  %14828 = vmatpush3.bf16.msra.mxu1 %v17826_v0  ;;  %v10253_v0 = vsel %vm16379_vm13, %v13417_v29, %v10252_v53  ;;  %v10290_v53 = vrot.slane %v10159_v59, 5  ;;  %v10163_v29 = vld [vmem:[#allocation3 + $0x84] sm:$0xe]  ;;  %v10324_v59 = vrot.slane %v10322_v14, 4 }
 0x48b   : > { %14829 = vmatprep.subr.bf16.mxu1 %v15693_v52  ;;  %v13449_v46 = vcombine.low %v10253_v0, %v10256_v4  ;;  %v10288_v9 = vsel %vm16379_vm13, %v13422_v63, %v10287_v17  ;;  %v10170_v4 = vld [vmem:[#allocation3 + $0xa0] sm:$0xf]  ;;  %v10308_v0 = vrot.slane %v10167_v57, 5  ;;  %v15700_v57 = vld [vmem:[#allocation3 + $0x18] sm:$0xff]  }
 0x48c   : > { %v10291_v3 = vsel %vm16379_vm13, %v10289_v20, %v10290_v53  ;;  %v10315_v50 = vrot.slane %v10170_v4, 5  ;;  %v10172_v20 = vld [vmem:[#allocation3 + $0xa8] sm:$0xe]  ;;  %v10332_v53 = vrot.slane %v10177_v5, 5  ;;  %v15703_v4 = vld [vmem:[#allocation3 + $0x30] sm:$0xff]  }
 0x48d   : > { %v13454_v39 = vcombine.low %v10288_v9, %v10291_v3  ;;  %v10310_v48 = vrot.slane %v10308_v0, 4 }
 0x48e   : > { %14830 = vmatpush3.bf16.msra.mxu1 %v15693_v52  ;;  %v10281_v52 = vsel %vm16379_vm13, %v13421_v13, %v10280_v11  ;;  %v10317_v15 = vrot.slane %v10315_v50, 4  ;;  %v13425_v11 = vrot.slane %v10166_v37, 9  ;;  %v11178_v37 = vld [vmem:[#allocation3 + $0x18] sm:$0xf] }
 0x48f   : > { %14831 = vmatprep.subr.bf16.mxu1 %v15694_v41  ;;  %v13453_v61 = vcombine.low %v10281_v52, %v10284_v43  ;;  %v10312_v35 = vsel %vm16379_vm13, %v10310_v48, %v10311_v38  ;;  %v10336_v43 = vrot.slane %v10179_v49, 5  ;;  %v11179_v48 = vld [vmem:[#allocation3 + $0x1c] sm:$0xf] }
 0x490   : > { %v10319_v51 = vsel %vm16379_vm13, %v10317_v15, %v10318_v36  ;;  %v10309_v58 = vsel %vm16379_vm13, %v13425_v11, %v10308_v0  ;;  %v15706_v0 = vld [vmem:[#allocation3 + $0x48] sm:$0xff]   ;;  %v15715_v15 = vld [vmem:[#allocation3 + $0x90] sm:$0xff]   ;;  %v11236_v25 = vshll.u32 %v11179_v48, 16  ;;  %v11240_v38 = vshrl.u32 %v11179_v48, 16  ;;  %v11181_v36 = vld [vmem:[#allocation3 + $0x24] sm:$0xf] }
 0x491   : > { %14800 = vmatmul.mubr.bf16.gmra.mrb[4].mxu1 %v13449_v46  ;;  %v13424_v46 = vrot.slane %v10163_v29, 9  ;;  %v13457_v23 = vcombine.low %v10309_v58, %v10312_v35  ;;  %v15705_v29 = vld [vmem:[%s18258_s3 + $0x1c8] sm:$0xff]   ;;  %v11180_v58 = vld [vmem:[#allocation3 + $0x20] sm:$0x1] }
 0x492   : > { %14803 = vmatprep.mubr.bf16.mxu1 %v13450_v42  ;;  %14832 = vmatpush3.bf16.msra.mxu1 %v15694_v41  ;;  %v10297_v41 = vrot.slane %v10162_v19, 5  ;;  %v10338_v19 = vrot.slane %v10336_v43, 4  ;;  %v11238_v11 = vrot.slane %v11236_v25, 5  ;;  %v11242_v35 = vrot.slane %v11240_v38, 4  ;;  %v11193_v25 = vld [vmem:[#allocation3 + $0x54] sm:$0xf] }
 0x493   : > { %14833 = vmatprep.subr.bf16.mxu1 %v15695_v26  ;;  %v10302_v28 = vsel %vm16379_vm13, %v13424_v46, %v10301_v2  ;;  %v15707_v46 = vld [vmem:[#allocation3 + $0x54] sm:$0xff]  }
 0x494   : > { %v10298_v27 = vsel %vm16379_vm13, %v10296_v8, %v10297_v41  ;;  %v13456_v7 = vcombine.low %v10302_v28, %v10305_v60  ;;  %v15701_v41 = vld [vmem:[#allocation3 + $0x24] sm:$0xff]   ;;  %v15717_v60 = vld [vmem:[%s18258_s3 + $0x1e8] sm:$0xff]  }
 0x495   : > { %v15723_v28 = vld [vmem:[%s18258_s3 + $0x1f8] sm:$0xff]  }
 0x496   : > { %14834 = vmatpush3.bf16.msra.mxu1 %v15695_v26  ;;  %v10295_v26 = vsel %vm16379_vm13, %v13423_v56, %v10294_v24  ;;  %v13428_v24 = vrot.slane %v10175_v34, 9  ;;  %v15704_v56 = vld [vmem:[#allocation3 + $0x3c] sm:$0xff]  }
 0x497   : > { %14835 = vmatprep.subr.bf16.mxu1 %v15696_v30  ;;  %v13455_v42 = vcombine.low %v10295_v26, %v10298_v27  ;;  %v15711_v27 = vld [vmem:[%s18258_s3 + $0x1d8] sm:$0xff]   ;;  %v15720_v26 = vld [vmem:[%s18258_s3 + $0x1f0] sm:$0xff]  }
 0x499   : > { %14804 = vmatmul.mubr.bf16.gmra.mrb[8].mxu1 %v13451_v6  ;;  %v10329_v6 = vrot.slane %v10176_v1, 5  ;;  %v11230_v1 = vshll.u32 %v11178_v37, 16 }
 0x49a   : > { %14807 = vmatprep.mubr.bf16.mxu1 %v13452_v55  ;;  %14836 = vmatpush3.bf16.msra.mxu1 %v15696_v30  ;;  %v10169_v30 = vld [vmem:[#allocation3 + $0x9c] sm:$0xe]  ;;  %v10174_v55 = vld [vmem:[#allocation3 + $0xb0] sm:$0x1] }
 0x49b   : > { %14837 = vmatprep.subr.bf16.mxu1 %v15697_v33  ;;  %v13426_v17 = vrot.slane %v10169_v30, 9  ;;  %v10331_v10 = vrot.slane %v10329_v6, 4  ;;  %v10325_v12 = vrot.slane %v10174_v55, 5  ;;  %v10330_v52 = vsel %vm16379_vm13, %v13428_v24, %v10329_v6  ;;  %v11185_v55 = vld [vmem:[#allocation3 + $0x34] sm:$0xf] }
 0x49c   : > { %v11227_v30 = vshrl.u32 %v11178_v37, 16  ;;  %v11232_v6 = vrot.slane %v11230_v1, 5  ;;  %v11284_v34 = vshll.u32 %v11185_v55, 16 }
 0x49d   : > { %v10326_v13 = vsel %vm16379_vm13, %v10324_v59, %v10325_v12  ;;  %v10333_v63 = vsel %vm16379_vm13, %v10331_v10, %v10332_v53  ;;  %v11243_v10 = vor.u32 %v11242_v35, %v11238_v11  ;;  %v11246_v12 = vshll.u32 %v11180_v58, 16  ;;  %v11194_v35 = vld [vmem:[#allocation3 + $0x58] sm:$0xf] }
 0x49e   : > { %14838 = vmatpush3.bf16.msra.mxu1 %v15697_v33  ;;  %v10316_v33 = vsel %vm16379_vm13, %v13426_v17, %v10315_v50  ;;  %v13460_v9 = vcombine.low %v10330_v52, %v10333_v63  ;;  %v15709_v50 = vld [vmem:[#allocation3 + $0x60] sm:$0xff]   ;;  %v11288_v53 = vshrl.u32 %v11185_v55, 16  ;;  %v11350_v55 = vshll.u32 %v11193_v25, 16 }
 0x49f   : > { %14839 = vmatprep.subr.bf16.mxu1 %v15698_v40  ;;  %v13458_v21 = vcombine.low %v10316_v33, %v10319_v51  ;;  %v15716_v17 = vld [vmem:[#allocation3 + $0x9c] sm:$0xff]   ;;  %v11229_v51 = vrot.slane %v11227_v30, 4  ;;  %v11254_v33 = vshll.u32 %v11181_v36, 16  ;;  %v11244_v52 = vrot.slane %v11243_v10, 4 }
 0x4a1   : > { %14808 = vmatmul.mubr.bf16.gmra.mrb[12].mxu1 %v13453_v61  ;;  %v10180_v61 = vld [vmem:[#allocation3 + $0xc8] sm:$0x1]  ;;  %v11233_v49 = vor.u32 %v11232_v6, %v11229_v51 }
 0x4a2   : > { %14811 = vmatprep.mubr.bf16.mxu1 %v13454_v39  ;;  %14840 = vmatpush3.bf16.msra.mxu1 %v15698_v40  ;;  %v13427_v40 = vrot.slane %v10172_v20, 9  ;;  %v10339_v39 = vrot.slane %v10180_v61, 5  ;;  %v11184_v20 = vld [vmem:[#allocation3 + $0x30] sm:$0xf]  ;;  %v11187_v61 = vld [vmem:[#allocation3 + $0x3c] sm:$0xf] }
 0x4a3   : > { %14841 = vmatprep.subr.bf16.mxu1 %v15699_v16  ;;  %v11275_v24 = vshrl.u32 %v11184_v20, 16  ;;  %v11278_v63 = vshll.u32 %v11184_v20, 16  ;;  %v11360_v20 = vshrl.u32 %v11194_v35, 16 }
 0x4a4   : > { %v10323_v3 = vsel %vm16379_vm13, %v13427_v40, %v10322_v14  ;;  %v10340_v32 = vsel %vm16379_vm13, %v10338_v19, %v10339_v39  ;;  %v11182_v14 = vld [vmem:[#allocation3 + $0x28] sm:$0xf]  ;;  %v11183_v40 = vld [vmem:[#allocation3 + $0x2c] sm:$0x1]  ;;  %v11290_v39 = vrot.slane %v11288_v53, 4 }
 0x4a5   : > { %v13459_v2 = vcombine.low %v10323_v3, %v10326_v13  ;;  %v11260_v59 = vshll.u32 %v11182_v14, 16  ;;  %v11264_v5 = vshrl.u32 %v11182_v14, 16  ;;  %v11270_v19 = vshll.u32 %v11183_v40, 16  ;;  %v15722_v14 = vld [vmem:[#allocation3 + $0xcc] sm:$0xff]  }
 0x4a6   : > { %14842 = vmatpush3.bf16.msra.mxu1 %v15699_v16  ;;  %v10178_v16 = vld [vmem:[#allocation3 + $0xc0] sm:$0xe] }
 0x4a7   : > { %14875 = vmatprep.subr.bf16.mxu1 %v17919_v22  ;;  %v13429_v8 = vrot.slane %v10178_v16, 9  ;;  %v17978_v3 = vrot.slane %v11260_v59, 5  ;;  %v17980_v16 = vrot.slane %v11284_v34, 5 }
 0x4a9   : > { %14812 = vmatmul.mubr.bf16.gmra.mrb[16].mxu1 %v13455_v42  ;;  %v10337_v31 = vsel %vm16379_vm13, %v13429_v8, %v10336_v43  ;;  %v15710_v42 = vld [vmem:[#allocation3 + $0x6c] sm:$0xff]   ;;  %v11256_v43 = vrot.slane %v11254_v33, 5  ;;  %v11188_v8 = vld [vmem:[#allocation3 + $0x40] sm:$0xf]  ;;  %v11347_v33 = vshrl.u32 %v11193_v25, 16 }
 0x4aa   : > { %14815 = vmatprep.mubr.bf16.mxu1 %v13456_v7  ;;  %v13461_v47 = vcombine.low %v10337_v31, %v10340_v32  ;;  %v17975_v7 = vld [vmem:[%s18258_s3 + $0x200] sm:$0xff]   ;;  %v15719_v32 = vld [vmem:[#allocation3 + $0xb4] sm:$0xff]   ;;  %v11248_v31 = vrot.slane %v11246_v12, 5 }
 0x4b1   : > { %14816 = vmatmul.mubr.bf16.gmra.mrb[20].mxu1 %v13457_v23  ;;  %v11251_v23 = vshrl.u32 %v11181_v36, 16 }
 0x4b2   : > { %14819 = vmatprep.mubr.bf16.mxu1 %v13458_v21  ;;  %v15718_v21 = vld [vmem:[#allocation3 + $0xa8] sm:$0xff]  }
 0x4b3   : > { %v11253_v13 = vrot.slane %v11251_v23, 4 }
 0x4b9   : > { %14820 = vmatmul.mubr.bf16.gmra.mrb[24].mxu1 %v13459_v2  ;;  %v11266_v2 = vrot.slane %v11264_v5, 4  ;;  %v11356_v5 = vshll.u32 %v11194_v35, 16 }
 0x4ba   : > { %14823 = vmatprep.mubr.bf16.mxu1 %v13460_v9  ;;  %v11234_v9 = vrot.slane %v11233_v49, 4 }
 0x4c1   : > { %14824 = vmatmul.mubr.bf16.gmra.mrb[28].mxu1 %v13461_v47  ;;  %v11257_v47 = vor.u32 %v11256_v43, %v11253_v13 }
 0x4c2   : > { %14843 = vmatprep.mubr.bf16.mxu1 %v15700_v57  ;;  %v11277_v57 = vrot.slane %v11275_v24, 4  ;;  %v11197_v24 = vld [vmem:[#allocation3 + $0x64] sm:$0xf] }
 0x4c9   : > { %14844 = vmatmul.mubr.bf16.vlgmr.msra.gmra.mrb[0].mxu1 %v15701_v41  ;;  %v11280_v41 = vrot.slane %v11278_v63, 5 }
 0x4ca   : > { %14847 = vmatprep.mubr.bf16.mxu1 %v15703_v4  ;;  %14876 = vmatpush3.bf16.msra.mxu1 %v17919_v22  ;;  %v15714_v22 = vld [vmem:[%s18258_s3 + $0x1e0] sm:$0xff]   ;;  %v11267_v4 = vor.u32 %v11266_v2, %v17978_v3 }
 0x4cb   : > { %14877 = vmatprep.subr.bf16.mxu1 %v15705_v29  ;;  %v11281_v48 = vor.u32 %v11280_v41, %v11277_v57  ;;  %v11380_v57 = vshll.u32 %v11197_v24, 16  ;;  %v11384_v41 = vshrl.u32 %v11197_v24, 16 }
 0x4cc   : > { %v11268_v30 = vrot.slane %v11267_v4, 4 }
 0x4cd   : > { %v11282_v49 = vrot.slane %v11281_v48, 4 }
 0x4ce   : > { %14878 = vmatpush3.bf16.msra.mxu1 %v15705_v29  ;;  %v15721_v29 = vld [vmem:[#allocation3 + $0xc0] sm:$0xff]  }
 0x4cf   : > { %14879 = vmatprep.subr.bf16.mxu1 %v15708_v44 }
 0x4d1   : > { %14848 = vmatmul.mubr.bf16.gmra.mrb[4].mxu1 %v15704_v56  ;;  %v11191_v56 = vld [vmem:[#allocation3 + $0x4c] sm:$0xf] }
 0x4d2   : > { %14851 = vmatprep.mubr.bf16.mxu1 %v15706_v0  ;;  %14880 = vmatpush3.bf16.msra.mxu1 %v15708_v44  ;;  %v11299_v44 = vshrl.u32 %v11187_v61, 16  ;;  %v11186_v0 = vld [vmem:[#allocation3 + $0x38] sm:$0x1]  ;;  %v11332_v37 = vshll.u32 %v11191_v56, 16 }
 0x4d3   : > { %14881 = vmatprep.subr.bf16.mxu1 %v15711_v27  ;;  %v11294_v1 = vshll.u32 %v11186_v0, 16  ;;  %v11200_v0 = vld [vmem:[#allocation3 + $0x70] sm:$0xf] }
 0x4d4   : > { %v11301_v36 = vrot.slane %v11299_v44, 4  ;;  %v11408_v25 = vshrl.u32 %v11200_v0, 16 }
 0x4d5   : > { %v11296_v12 = vrot.slane %v11294_v1, 5 }
 0x4d6   : > { %14882 = vmatpush3.bf16.msra.mxu1 %v15711_v27  ;;  %v11249_v27 = vsel %vm16155_vm10, %v11244_v52, %v11248_v31  ;;  %v11192_v52 = vld [vmem:[#allocation3 + $0x50] sm:$0x1]  ;;  %v11287_v31 = vsel %vm16155_vm10, %v11282_v49, %v17980_v16  ;;  %v11202_v49 = vld [vmem:[#allocation3 + $0x78] sm:$0xf] }
 0x4d7   : > { %14883 = vmatprep.subr.bf16.mxu1 %v15714_v22 }
 0x4d9   : > { %14852 = vmatmul.mubr.bf16.gmra.mrb[8].mxu1 %v15707_v46  ;;  %v11312_v46 = vshrl.u32 %v11188_v8, 16 }
 0x4da   : > { %14855 = vmatprep.mubr.bf16.mxu1 %v15709_v50  ;;  %14884 = vmatpush3.bf16.msra.mxu1 %v15714_v22  ;;  %v11308_v22 = vshll.u32 %v11188_v8, 16  ;;  %v11272_v50 = vrot.slane %v11270_v19, 5  ;;  %v18001_v8 = vrot.slane %v11356_v5, 5 }
 0x4db   : > { %14885 = vmatprep.subr.bf16.mxu1 %v15717_v60 }
 0x4dc   : > { %v11273_v10 = vsel %vm16155_vm10, %v11268_v30, %v11272_v50 }
 0x4de   : > { %14886 = vmatpush3.bf16.msra.mxu1 %v15717_v60  ;;  %v11239_v60 = vsel %vm16155_vm10, %v11234_v9, %v11238_v11  ;;  %v11314_v11 = vrot.slane %v11312_v46, 4  ;;  %v11352_v9 = vrot.slane %v11350_v55, 5  ;;  %v11195_v46 = vld [vmem:[#allocation3 + $0x5c] sm:$0x1]  ;;  %v11198_v55 = vld [vmem:[#allocation3 + $0x68] sm:$0x1] }
 0x4df   : > { %14887 = vmatprep.subr.bf16.mxu1 %v15720_v26  ;;  %v13526_v38 = vcombine.low %v11239_v60, %v11249_v27  ;;  %v11342_v27 = vshll.u32 %v11192_v52, 16  ;;  %v11205_v52 = vld [vmem:[#allocation3 + $0x84] sm:$0xf] }
 0x4e1   : > { %14856 = vmatmul.mubr.bf16.gmra.mrb[12].mxu1 %v15710_v42  ;;  %v11302_v42 = vshll.u32 %v11187_v61, 16  ;;  %v11349_v61 = vrot.slane %v11347_v33, 4  ;;  %v11344_v1 = vrot.slane %v11342_v27, 5  ;;  %v15726_v33 = vld [vmem:[%s18258_s3 + $0x210] sm:$0xff]  }
 0x4e2   : > { %14859 = vmatprep.mubr.bf16.mxu1 %v15712_v62  ;;  %14888 = vmatpush3.bf16.msra.mxu1 %v15720_v26  ;;  %v11291_v26 = vor.u32 %v11290_v39, %v17980_v16  ;;  %v11258_v62 = vrot.slane %v11257_v47, 4 }
 0x4e3   : > { %14889 = vmatprep.subr.bf16.mxu1 %v15723_v28  ;;  %v11304_v23 = vrot.slane %v11302_v42, 5  ;;  %v11353_v60 = vor.u32 %v11352_v9, %v11349_v61  ;;  %v15725_v42 = vld [vmem:[%s18258_s3 + $0x208] sm:$0xff]  }
 0x4e4   : > { %v11292_v58 = vrot.slane %v11291_v26, 4  ;;  %v11263_v53 = vsel %vm16155_vm10, %v11258_v62, %v17978_v3  ;;  %v11196_v3 = vld [vmem:[#allocation3 + $0x60] sm:$0xf]  ;;  %v11201_v9 = vld [vmem:[#allocation3 + $0x74] sm:$0x1] }
 0x4e5   : > { %v11305_v2 = vor.u32 %v11304_v23, %v11301_v36  ;;  %v13527_v19 = vcombine.low %v11263_v53, %v11273_v10  ;;  %v11371_v50 = vshrl.u32 %v11196_v3, 16  ;;  %v11374_v26 = vshll.u32 %v11196_v3, 16 }
 0x4e6   : > { %14890 = vmatpush3.bf16.msra.mxu1 %v15723_v28  ;;  %v11190_v28 = vld [vmem:[#allocation3 + $0x48] sm:$0xf]  ;;  %v11297_v63 = vsel %vm16155_vm10, %v11292_v58, %v11296_v12  ;;  %v11366_v36 = vshll.u32 %v11195_v46, 16  ;;  %v11410_v10 = vrot.slane %v11408_v25, 4  ;;  %v11208_v46 = vld [vmem:[#allocation3 + $0x90] sm:$0xf] }
 0x4e7   : > { %14923 = vmatprep.subr.bf16.mxu1 %v17975_v7  ;;  %v11323_v51 = vshrl.u32 %v11190_v28, 16  ;;  %v11326_v6 = vshll.u32 %v11190_v28, 16  ;;  %v13528_v4 = vcombine.low %v11287_v31, %v11297_v63 }
 0x4e9   : > { %14860 = vmatmul.mubr.bf16.gmra.mrb[16].mxu1 %v15713_v54  ;;  %v11189_v54 = vld [vmem:[#allocation3 + $0x44] sm:$0x1]  ;;  %v11325_v13 = vrot.slane %v11323_v51, 4  ;;  %v11328_v43 = vrot.slane %v11326_v6, 5  ;;  %v11376_v51 = vrot.slane %v11374_v26, 5  ;;  %v15728_v26 = vld [vmem:[%s18258_s3 + $0x220] sm:$0xff]  }
 0x4ea   : > { %14863 = vmatprep.mubr.bf16.mxu1 %v15715_v15  ;;  %v11336_v15 = vshrl.u32 %v11191_v56, 16  ;;  %v11318_v34 = vshll.u32 %v11189_v54, 16  ;;  %v18010_v54 = vrot.slane %v11380_v57, 5  ;;  %v11203_v6 = vld [vmem:[#allocation3 + $0x7c] sm:$0xf] }
 0x4eb   : > { %v11329_v56 = vor.u32 %v11328_v43, %v11325_v13  ;;  %v11428_v53 = vshll.u32 %v11203_v6, 16  ;;  %v11206_v13 = vld [vmem:[#allocation3 + $0x88] sm:$0xf]  ;;  %v11209_v57 = vld [vmem:[#allocation3 + $0x94] sm:$0xf] }
 0x4ec   : > { %v11338_v59 = vrot.slane %v11336_v15, 4  ;;  %v11320_v47 = vrot.slane %v11318_v34, 5  ;;  %v11404_v15 = vshll.u32 %v11200_v0, 16  ;;  %v11368_v34 = vrot.slane %v11366_v36, 5 }
 0x4ed   : > { %v11330_v30 = vrot.slane %v11329_v56, 4 }
 0x4f1   : > { %14864 = vmatmul.mubr.bf16.gmra.mrb[20].mxu1 %v15716_v17  ;;  %v17988_v17 = vrot.slane %v11308_v22, 5  ;;  %v11306_v22 = vrot.slane %v11305_v2, 4  ;;  %v11390_v2 = vshll.u32 %v11198_v55, 16  ;;  %v11211_v55 = vld [vmem:[#allocation3 + $0x9c] sm:$0xf] }
 0x4f2   : > { %14867 = vmatprep.mubr.bf16.mxu1 %v15718_v21  ;;  %v17990_v21 = vrot.slane %v11332_v37, 5  ;;  %v11386_v37 = vrot.slane %v11384_v41, 4  ;;  %v18038_v41 = vrot.slane %v11428_v53, 5  ;;  %v11212_v53 = vld [vmem:[#allocation3 + $0xa0] sm:$0xf] }
 0x4f3   : > { %v11315_v40 = vor.u32 %v11314_v11, %v17988_v17  ;;  %v11311_v35 = vsel %vm16155_vm10, %v11306_v22, %v17988_v17  ;;  %v11373_v11 = vrot.slane %v11371_v50, 4  ;;  %v18024_v17 = vrot.slane %v11404_v15, 5 }
 0x4f4   : > { %v11339_v39 = vor.u32 %v11338_v59, %v17990_v21  ;;  %v11335_v12 = vsel %vm16155_vm10, %v11330_v30, %v17990_v21  ;;  %v15727_v21 = vld [vmem:[%s18258_s3 + $0x218] sm:$0xff]   ;;  %v11392_v0 = vrot.slane %v11390_v2, 5  ;;  %v11414_v22 = vshll.u32 %v11201_v9, 16  ;;  %v11207_v30 = vld [vmem:[#allocation3 + $0x8c] sm:$0x1] }
 0x4f5   : > { %v11316_v44 = vrot.slane %v11315_v40, 4  ;;  %v11432_v40 = vshrl.u32 %v11203_v6, 16  ;;  %v11377_v63 = vor.u32 %v11376_v51, %v11373_v11  ;;  %v11411_v31 = vor.u32 %v11410_v10, %v18024_v17 }
 0x4f6   : > { %v11340_v28 = vrot.slane %v11339_v39, 4  ;;  %v11419_v39 = vshrl.u32 %v11202_v49, 16  ;;  %v11467_v11 = vshrl.u32 %v11208_v46, 16  ;;  %v11470_v51 = vshll.u32 %v11208_v46, 16 }
 0x4f7   : > { %v11378_v27 = vrot.slane %v11377_v63, 4  ;;  %v11215_v63 = vld [vmem:[#allocation3 + $0xac] sm:$0xf] }
 0x4f8   : > { %v11345_v58 = vsel %vm16155_vm10, %v11340_v28, %v11344_v1  ;;  %v11480_v28 = vshrl.u32 %v11209_v57, 16 }
 0x4f9   : > { %14868 = vmatmul.mubr.bf16.gmra.mrb[24].mxu1 %v15719_v32  ;;  %v11362_v32 = vrot.slane %v11360_v20, 4  ;;  %v11387_v20 = vor.u32 %v11386_v37, %v18010_v54  ;;  %v13530_v43 = vcombine.low %v11335_v12, %v11345_v58 }
 0x4fa   : > { %14871 = vmatprep.mubr.bf16.mxu1 %v15721_v29  ;;  %v11199_v29 = vld [vmem:[#allocation3 + $0x6c] sm:$0xf] }
 0x4fb   : > { %v11363_v16 = vor.u32 %v11362_v32, %v18001_v8  ;;  %v11395_v62 = vshrl.u32 %v11199_v29, 16  ;;  %v11398_v48 = vshll.u32 %v11199_v29, 16  ;;  %v11422_v32 = vshll.u32 %v11202_v49, 16 }
 0x4fc   : > { %v11388_v3 = vrot.slane %v11387_v20, 4  ;;  %v11434_v29 = vrot.slane %v11432_v40, 4  ;;  %v11462_v20 = vshll.u32 %v11207_v30, 16  ;;  %v11469_v40 = vrot.slane %v11467_v11, 4 }
 0x4fd   : > { %v11364_v23 = vrot.slane %v11363_v16, 4  ;;  %v11397_v59 = vrot.slane %v11395_v62, 4  ;;  %v11424_v50 = vrot.slane %v11422_v32, 5  ;;  %v11412_v62 = vrot.slane %v11411_v31, 4 }
 0x4fe   : > { %v11393_v25 = vsel %vm16155_vm10, %v11388_v3, %v11392_v0  ;;  %v11504_v32 = vshrl.u32 %v11212_v53, 16  ;;  %v11214_v3 = vld [vmem:[#allocation3 + $0xa8] sm:$0xf] }
 0x4ff   : > { %v11369_v61 = vsel %vm16155_vm10, %v11364_v23, %v11368_v34  ;;  %v11210_v34 = vld [vmem:[#allocation3 + $0x98] sm:$0x1]  ;;  %v11515_v46 = vshrl.u32 %v11214_v3, 16 }
 0x501   : > { %14872 = vmatmul.mubr.bf16.gmra.mrb[28].mxu1 %v15722_v14  ;;  %v11354_v14 = vrot.slane %v11353_v60, 4  ;;  %v11421_v60 = vrot.slane %v11419_v39, 4  ;;  %v11500_v39 = vshll.u32 %v11212_v53, 16 }
 0x502   : > { %14891 = vmatprep.mubr.bf16.mxu1 %v13526_v38  ;;  %v11321_v38 = vsel %vm16155_vm10, %v11316_v44, %v11320_v47  ;;  %v11452_v47 = vshll.u32 %v11206_v13, 16  ;;  %v11446_v44 = vshll.u32 %v11205_v52, 16 }
 0x503   : > { %v13529_v5 = vcombine.low %v11311_v35, %v11321_v38  ;;  %v11359_v24 = vsel %vm16155_vm10, %v11354_v14, %v18001_v8  ;;  %v11456_v8 = vshrl.u32 %v11206_v13, 16  ;;  %v11435_v38 = vor.u32 %v11434_v29, %v18038_v41 }
 0x504   : > { %v13531_v56 = vcombine.low %v11359_v24, %v11369_v61  ;;  %v18043_v37 = vrot.slane %v11452_v47, 5  ;;  %v11448_v36 = vrot.slane %v11446_v44, 5  ;;  %v11383_v35 = vsel %vm16155_vm10, %v11378_v27, %v18010_v54 }
 0x505   : > { %v11458_v15 = vrot.slane %v11456_v8, 4  ;;  %v11416_v14 = vrot.slane %v11414_v22, 5  ;;  %v11425_v6 = vor.u32 %v11424_v50, %v11421_v60  ;;  %v11436_v49 = vrot.slane %v11435_v38, 4  ;;  %v11213_v22 = vld [vmem:[#allocation3 + $0xa4] sm:$0x1] }
 0x506   : > { %v11472_v13 = vrot.slane %v11470_v51, 5  ;;  %v11494_v24 = vshll.u32 %v11211_v55, 16  ;;  %v11486_v47 = vshll.u32 %v11210_v34, 16  ;;  %v11524_v8 = vshll.u32 %v11215_v63, 16  ;;  %v15731_v50 = vld [vmem:[%s18258_s3 + $0x238] sm:$0xff]  }
 0x507   : > { %v11459_v54 = vor.u32 %v11458_v15, %v18043_v37  ;;  %v11518_v60 = vshll.u32 %v11214_v3, 16  ;;  %v11216_v51 = vld [vmem:[#allocation3 + $0xb0] sm:$0x1] }
 0x508   : > { %v11534_v53 = vshll.u32 %v11216_v51, 16 }
 0x509   : > { %14892 = vmatmul.mubr.bf16.vlgmr.msra.gmra.mrb[0].mxu1 %v13527_v19 }
 0x50a   : > { %14895 = vmatprep.mubr.bf16.mxu1 %v13528_v4  ;;  %14924 = vmatpush3.bf16.msra.mxu1 %v17975_v7  ;;  %v11400_v7 = vrot.slane %v11398_v48, 5  ;;  %v11443_v4 = vshrl.u32 %v11205_v52, 16  ;;  %v11204_v48 = vld [vmem:[#allocation3 + $0x80] sm:$0x1]  ;;  %v11426_v52 = vrot.slane %v11425_v6, 4  ;;  %v11517_v6 = vrot.slane %v11515_v46, 4 }
 0x50b   : > { %14925 = vmatprep.subr.bf16.mxu1 %v15725_v42  ;;  %v11438_v58 = vshll.u32 %v11204_v48, 16  ;;  %v11488_v48 = vrot.slane %v11486_v47, 5 }
 0x50c   : > { %v11401_v19 = vor.u32 %v11400_v7, %v11397_v59  ;;  %v11445_v1 = vrot.slane %v11443_v4, 4  ;;  %v15729_v59 = vld [vmem:[%s18258_s3 + $0x228] sm:$0xff]   ;;  %v13532_v7 = vcombine.low %v11383_v35, %v11393_v25  ;;  %v11473_v4 = vor.u32 %v11472_v13, %v11469_v40  ;;  %v11218_v25 = vld [vmem:[#allocation3 + $0xb8] sm:$0xf]  ;;  %v11221_v35 = vld [vmem:[#allocation3 + $0xc4] sm:$0xf] }
 0x50d   : > { %v11440_v61 = vrot.slane %v11438_v58, 5  ;;  %v11431_v27 = vsel %vm16155_vm10, %v11426_v52, %v18038_v41  ;;  %v18078_v41 = vrot.slane %v11524_v8, 5  ;;  %v11520_v58 = vrot.slane %v11518_v60, 5 }
 0x50e   : > { %14926 = vmatpush3.bf16.msra.mxu1 %v15725_v42  ;;  %v11476_v42 = vshll.u32 %v11209_v57, 16  ;;  %v11402_v16 = vrot.slane %v11401_v19, 4  ;;  %v11449_v12 = vor.u32 %v11448_v36, %v11445_v1  ;;  %v11460_v19 = vrot.slane %v11459_v54, 4 }
 0x50f   : > { %14927 = vmatprep.subr.bf16.mxu1 %v15726_v33  ;;  %v11441_v31 = vsel %vm16155_vm10, %v11436_v49, %v11440_v61  ;;  %v11528_v57 = vshrl.u32 %v11215_v63, 16  ;;  %v11474_v30 = vrot.slane %v11473_v4, 4  ;;  %v11510_v36 = vshll.u32 %v11213_v22, 16  ;;  %v11223_v63 = vld [vmem:[#allocation3 + $0xcc] sm:$0xf] }
 0x510   : > { %v18051_v23 = vrot.slane %v11476_v42, 5  ;;  %v11407_v10 = vsel %vm16155_vm10, %v11402_v16, %v18024_v17  ;;  %v15730_v17 = vld [vmem:[%s18258_s3 + $0x230] sm:$0xff]   ;;  %v11450_v29 = vrot.slane %v11449_v12, 4  ;;  %v11506_v16 = vrot.slane %v11504_v32, 4  ;;  %v11222_v22 = vld [vmem:[#allocation3 + $0xc8] sm:$0x1] }
 0x511   : > { %14896 = vmatmul.mubr.bf16.gmra.mrb[4].mxu1 %v13529_v5  ;;  %v11417_v5 = vsel %vm16155_vm10, %v11412_v62, %v11416_v14  ;;  %v11217_v62 = vld [vmem:[#allocation3 + $0xb4] sm:$0xf]  ;;  %v11530_v15 = vrot.slane %v11528_v57, 4  ;;  %v11512_v34 = vrot.slane %v11510_v36, 5  ;;  %v11521_v13 = vor.u32 %v11520_v58, %v11517_v6 }
 0x512   : > { %14899 = vmatprep.mubr.bf16.mxu1 %v13530_v43  ;;  %14928 = vmatpush3.bf16.msra.mxu1 %v15726_v33  ;;  %v11482_v33 = vrot.slane %v11480_v28, 4  ;;  %v11491_v43 = vshrl.u32 %v11211_v55, 16  ;;  %v13533_v2 = vcombine.low %v11407_v10, %v11417_v5  ;;  %v18076_v28 = vrot.slane %v11500_v39, 5  ;;  %v11220_v5 = vld [vmem:[#allocation3 + $0xc0] sm:$0xf] }
 0x513   : > { %14929 = vmatprep.subr.bf16.mxu1 %v15727_v21  ;;  %v11455_v38 = vsel %vm16155_vm10, %v11450_v29, %v18043_v37  ;;  %v11539_v55 = vshrl.u32 %v11217_v62, 16  ;;  %v11531_v37 = vor.u32 %v11530_v15, %v18078_v41  ;;  %v11542_v54 = vshll.u32 %v11217_v62, 16 }
 0x514   : > { %v11483_v9 = vor.u32 %v11482_v33, %v18051_v23  ;;  %v11493_v44 = vrot.slane %v11491_v43, 4  ;;  %v11507_v33 = vor.u32 %v11506_v16, %v18076_v28  ;;  %v11576_v10 = vshrl.u32 %v11221_v35, 16 }
 0x515   : > { %v11479_v49 = vsel %vm16155_vm10, %v11474_v30, %v18051_v23  ;;  %v11563_v43 = vshrl.u32 %v11220_v5, 16  ;;  %v11541_v61 = vrot.slane %v11539_v55, 4  ;;  %v11219_v23 = vld [vmem:[#allocation3 + $0xbc] sm:$0x1]  ;;  %v11587_v3 = vshrl.u32 %v11223_v63, 16 }
 0x516   : > { %14930 = vmatpush3.bf16.msra.mxu1 %v15727_v21  ;;  %v11464_v21 = vrot.slane %v11462_v20, 5  ;;  %v11484_v0 = vrot.slane %v11483_v9, 4  ;;  %v11572_v20 = vshll.u32 %v11221_v35, 16  ;;  %v11508_v52 = vrot.slane %v11507_v33, 4  ;;  %v11225_v30 = vld [vmem:[#allocation3 + $0xd4] sm:$0x1] }
 0x517   : > { %14931 = vmatprep.subr.bf16.mxu1 %v15728_v26  ;;  %v11578_v32 = vrot.slane %v11576_v10, 4  ;;  %v11522_v57 = vrot.slane %v11521_v13, 4  ;;  %v11536_v29 = vrot.slane %v11534_v53, 5  ;;  %v11565_v4 = vrot.slane %v11563_v43, 4  ;;  %v11997_v33 = vld [vmem:[#allocation3 + $0x1c] sm:$0xf] }
 0x518   : > { %v11465_v42 = vsel %vm16155_vm10, %v11460_v19, %v11464_v21  ;;  %v11489_v11 = vsel %vm16155_vm10, %v11484_v0, %v11488_v48  ;;  %v11532_v19 = vrot.slane %v11531_v37, 4  ;;  %v11544_v21 = vrot.slane %v11542_v54, 5  ;;  %v11998_v53 = vld [vmem:[#allocation3 + $0x20] sm:$0x1]  ;;  %v12000_v13 = vld [vmem:[#allocation3 + $0x28] sm:$0xf] }
 0x519   : > { %14900 = vmatmul.mubr.bf16.gmra.mrb[8].mxu1 %v13531_v56  ;;  %v11496_v56 = vrot.slane %v11494_v24, 5  ;;  %v13535_v14 = vcombine.low %v11455_v38, %v11465_v42  ;;  %v13536_v40 = vcombine.low %v11479_v49, %v11489_v11  ;;  %v11566_v24 = vshll.u32 %v11220_v5, 16 }
 0x51a   : > { %14903 = vmatprep.mubr.bf16.mxu1 %v13532_v7  ;;  %14932 = vmatpush3.bf16.msra.mxu1 %v15728_v26  ;;  %v13534_v26 = vcombine.low %v11431_v27, %v11441_v31  ;;  %v11552_v7 = vshrl.u32 %v11218_v25, 16  ;;  %v11574_v39 = vrot.slane %v11572_v20, 5  ;;  %v11590_v31 = vshll.u32 %v11223_v63, 16  ;;  %v11996_v63 = vld [vmem:[#allocation3 + $0x18] sm:$0xe] }
 0x51b   : > { %14933 = vmatprep.subr.bf16.mxu1 %v15729_v59  ;;  %v11497_v1 = vor.u32 %v11496_v56, %v11493_v44  ;;  %v11568_v44 = vrot.slane %v11566_v24, 5  ;;  %v11513_v27 = vsel %vm16155_vm10, %v11508_v52, %v11512_v34  ;;  %v11537_v46 = vsel %vm16155_vm10, %v11532_v19, %v11536_v29  ;;  %v12002_v29 = vld [vmem:[#allocation3 + $0x30] sm:$0xe] }
 0x51c   : > { %v11545_v60 = vor.u32 %v11544_v21, %v11541_v61  ;;  %v11589_v42 = vrot.slane %v11587_v3, 4  ;;  %v11592_v16 = vrot.slane %v11590_v31, 5  ;;  %v11582_v38 = vshll.u32 %v11222_v22, 16  ;;  %v12004_v31 = vld [vmem:[#allocation3 + $0x38] sm:$0x1] }
 0x51d   : > { %v11498_v12 = vrot.slane %v11497_v1, 4  ;;  %v11606_v58 = vshll.u32 %v11225_v30, 16  ;;  %v12094_v5 = vrot.slane %v11997_v33, 5  ;;  %v12097_v52 = vrot.slane %v11998_v53, 5  ;;  %v12021_v53 = vld [vmem:[#allocation3 + $0x7c] sm:$0xf] }
 0x51e   : > { %14934 = vmatpush3.bf16.msra.mxu1 %v15729_v59  ;;  %v11548_v59 = vshll.u32 %v11218_v25, 16  ;;  %v11569_v25 = vor.u32 %v11568_v44, %v11565_v4  ;;  %v11546_v11 = vrot.slane %v11545_v60, 4  ;;  %v11593_v51 = vor.u32 %v11592_v16, %v11589_v42  ;;  %v12009_v4 = vld [vmem:[#allocation3 + $0x4c] sm:$0xf]  ;;  %v12007_v16 = vld [vmem:[#allocation3 + $0x44] sm:$0x1] }
 0x51f   : > { %14935 = vmatprep.subr.bf16.mxu1 %v15730_v17  ;;  %v11503_v56 = vsel %vm16155_vm10, %v11498_v12, %v18076_v28  ;;  %v11527_v28 = vsel %vm16155_vm10, %v11522_v57, %v18078_v41  ;;  %v11608_v10 = vrot.slane %v11606_v58, 5  ;;  %v12101_v61 = vrot.slane %v12000_v13, 5 }
 0x520   : > { %v11550_v9 = vrot.slane %v11548_v59, 5  ;;  %v13537_v15 = vcombine.low %v11503_v56, %v11513_v27  ;;  %v13538_v1 = vcombine.low %v11527_v28, %v11537_v46  ;;  %v11570_v55 = vrot.slane %v11569_v25, 4  ;;  %v12005_v28 = vld [vmem:[#allocation3 + $0x3c] sm:$0xe] }
 0x521   : > { %14904 = vmatmul.mubr.bf16.gmra.mrb[12].mxu1 %v13533_v2  ;;  %v11224_v2 = vld [vmem:[#allocation3 + $0xd0] sm:$0xf]  ;;  %v11584_v59 = vrot.slane %v11582_v38, 5  ;;  %v11594_v54 = vrot.slane %v11593_v51, 4  ;;  %v12103_v3 = vrot.slane %v12101_v61, 4  ;;  %v12111_v44 = vrot.slane %v12004_v31, 5 }
 0x522   : > { %14907 = vmatprep.mubr.bf16.mxu1 %v13534_v26  ;;  %14936 = vmatpush3.bf16.msra.mxu1 %v15730_v17  ;;  %v11554_v17 = vrot.slane %v11552_v7, 4  ;;  %v11596_v47 = vshll.u32 %v11224_v2, 16  ;;  %v11600_v8 = vshrl.u32 %v11224_v2, 16  ;;  %v11579_v26 = vor.u32 %v11578_v32, %v11574_v39  ;;  %v12003_v2 = vld [vmem:[#allocation3 + $0x34] sm:$0xf] }
 0x523   : > { %14937 = vmatprep.subr.bf16.mxu1 %v15731_v50  ;;  %v11551_v37 = vsel %vm16155_vm10, %v11546_v11, %v11550_v9  ;;  %v11575_v12 = vsel %vm16155_vm10, %v11570_v55, %v11574_v39  ;;  %v12108_v21 = vrot.slane %v12003_v2, 5  ;;  %v12001_v32 = vld [vmem:[#allocation3 + $0x2c] sm:$0x1]  ;;  %v13551_v56 = vrot.slane %v11999_v45, 9  ;;  %v12012_v38 = vld [vmem:[#allocation3 + $0x58] sm:$0xf] }
 0x524   : > { %v11555_v0 = vor.u32 %v11554_v17, %v11550_v9  ;;  %v11598_v62 = vrot.slane %v11596_v47, 5  ;;  %v11602_v48 = vrot.slane %v11600_v8, 4  ;;  %v13550_v17 = vrot.slane %v11996_v63, 9  ;;  %v12006_v8 = vld [vmem:[#allocation3 + $0x40] sm:$0xf] }
 0x525   : > { %v12110_v47 = vrot.slane %v12108_v21, 4  ;;  %v12104_v57 = vrot.slane %v12001_v32, 5  ;;  %v13552_v22 = vrot.slane %v12002_v29, 9  ;;  %v12122_v60 = vrot.slane %v12009_v4, 5  ;;  %v12022_v32 = vld [vmem:[#allocation3 + $0x80] sm:$0x1] }
 0x526   : > { %14938 = vmatpush3.bf16.msra.mxu1 %v15731_v50  ;;  %v11558_v50 = vshll.u32 %v11219_v23, 16  ;;  %v11556_v36 = vrot.slane %v11555_v0, 4  ;;  %v11603_v6 = vor.u32 %v11602_v48, %v11598_v62  ;;  %v11599_v43 = vsel %vm16155_vm10, %v11594_v54, %v11598_v62  ;;  %v12016_v54 = vld [vmem:[#allocation3 + $0x68] sm:$0x1] }
 0x527   : > { %v12095_v39 = vsel %vm16379_vm13, %v13550_v17, %v12094_v5  ;;  %v12105_v27 = vsel %vm16379_vm13, %v12103_v3, %v12104_v57  ;;  %v12115_v0 = vrot.slane %v12006_v8, 5  ;;  %v12112_v46 = vsel %vm16379_vm13, %v12110_v47, %v12111_v44  ;;  %v12024_v31 = vld [vmem:[#allocation3 + $0x88] sm:$0xf]  ;;  %v12020_v47 = vld [vmem:[#allocation3 + $0x78] sm:$0xe] }
 0x528   : > { %v11560_v35 = vrot.slane %v11558_v50, 5  ;;  %v11604_v20 = vrot.slane %v11603_v6, 4  ;;  %v12102_v50 = vsel %vm16379_vm13, %v13551_v56, %v12101_v61  ;;  %v12109_v42 = vsel %vm16379_vm13, %v13552_v22, %v12108_v21  ;;  %v12027_v8 = vld [vmem:[#allocation3 + $0x94] sm:$0xf] }
 0x529   : > { %14908 = vmatmul.mubr.bf16.gmra.mrb[16].mxu1 %v13535_v14  ;;  %v11580_v14 = vrot.slane %v11579_v26, 4  ;;  %v13583_v26 = vcombine.low %v12102_v50, %v12105_v27  ;;  %v13584_v62 = vcombine.low %v12109_v42, %v12112_v46  ;;  %v12117_v48 = vrot.slane %v12115_v0, 4  ;;  %v12025_v50 = vld [vmem:[#allocation3 + $0x8c] sm:$0x1] }
 0x52a   : > { %14911 = vmatprep.mubr.bf16.mxu1 %v13536_v40  ;;  %v11561_v7 = vsel %vm16155_vm10, %v11556_v36, %v11560_v35  ;;  %v12096_v40 = vrot.slane %v12094_v5, 4  ;;  %v11609_v24 = vsel %vm16155_vm10, %v11604_v20, %v11608_v10  ;;  %v12124_v25 = vrot.slane %v12122_v60, 4  ;;  %v12015_v36 = vld [vmem:[#allocation3 + $0x64] sm:$0xf]  ;;  %v12011_v20 = vld [vmem:[#allocation3 + $0x54] sm:$0xe] }
 0x52b   : > { %v11585_v41 = vsel %vm16155_vm10, %v11580_v14, %v11584_v59  ;;  %v13539_v49 = vcombine.low %v11551_v37, %v11561_v7  ;;  %v13541_v9 = vcombine.low %v11599_v43, %v11609_v24  ;;  %v12118_v30 = vrot.slane %v12007_v16, 5  ;;  %v12028_v16 = vld [vmem:[#allocation3 + $0x98] sm:$0x1] }
 0x52c   : > { %v13540_v34 = vcombine.low %v11575_v12, %v11585_v41  ;;  %v12098_v19 = vsel %vm16379_vm13, %v12096_v40, %v12097_v52  ;;  %v13553_v14 = vrot.slane %v12005_v28, 9  ;;  %v12129_v51 = vrot.slane %v12012_v38, 5  ;;  %v12013_v41 = vld [vmem:[#allocation3 + $0x5c] sm:$0x1]  ;;  %v12033_v38 = vld [vmem:[#allocation3 + $0xac] sm:$0xf] }
 0x52d   : > { %v13582_v23 = vcombine.low %v12095_v39, %v12098_v19  ;;  %v12119_v11 = vsel %vm16379_vm13, %v12117_v48, %v12118_v30  ;;  %v12136_v33 = vrot.slane %v12015_v36, 5  ;;  %v12132_v12 = vrot.slane %v12013_v41, 5  ;;  %v12019_v19 = vld [vmem:[#allocation3 + $0x74] sm:$0x1]  ;;  %v12034_v41 = vld [vmem:[#allocation3 + $0xb0] sm:$0x1] }
 0x52e   : > { %v12116_v55 = vsel %vm16379_vm13, %v13553_v14, %v12115_v0  ;;  %v12131_v37 = vrot.slane %v12129_v51, 4  ;;  %v12139_v40 = vrot.slane %v12016_v54, 5  ;;  %v13555_v13 = vrot.slane %v12011_v20, 9  ;;  %v12036_v54 = vld [vmem:[#allocation3 + $0xb8] sm:$0xf] }
 0x52f   : > { %v13585_v59 = vcombine.low %v12116_v55, %v12119_v11  ;;  %v12138_v10 = vrot.slane %v12136_v33, 4  ;;  %v12150_v52 = vrot.slane %v12021_v53, 5  ;;  %v12146_v45 = vrot.slane %v12019_v19, 5  ;;  %v12031_v55 = vld [vmem:[#allocation3 + $0xa4] sm:$0x1] }
 0x530   : > { %v12133_v43 = vsel %vm16379_vm13, %v12131_v37, %v12132_v12  ;;  %v12130_v61 = vsel %vm16379_vm13, %v13555_v13, %v12129_v51  ;;  %v12153_v57 = vrot.slane %v12022_v32, 5  ;;  %v12157_v44 = vrot.slane %v12024_v31, 5 }
 0x531   : > { %14912 = vmatmul.mubr.bf16.gmra.mrb[20].mxu1 %v13537_v15  ;;  %v12010_v15 = vld [vmem:[#allocation3 + $0x50] sm:$0x1]  ;;  %v12140_v2 = vsel %vm16379_vm13, %v12138_v10, %v12139_v40  ;;  %v12152_v3 = vrot.slane %v12150_v52, 4  ;;  %v13558_v56 = vrot.slane %v12020_v47, 9  ;;  %v12164_v0 = vrot.slane %v12027_v8, 5 }
 0x532   : > { %14915 = vmatprep.mubr.bf16.mxu1 %v13538_v1  ;;  %v12008_v1 = vld [vmem:[#allocation3 + $0x48] sm:$0xe]  ;;  %v12125_v35 = vrot.slane %v12010_v15, 5  ;;  %v12159_v42 = vrot.slane %v12157_v44, 4  ;;  %v12030_v15 = vld [vmem:[#allocation3 + $0xa0] sm:$0xf] }
 0x533   : > { %v13554_v6 = vrot.slane %v12008_v1, 9  ;;  %v12154_v27 = vsel %vm16379_vm13, %v12152_v3, %v12153_v57  ;;  %v12166_v48 = vrot.slane %v12164_v0, 4  ;;  %v12160_v28 = vrot.slane %v12025_v50, 5  ;;  %v12032_v10 = vld [vmem:[#allocation3 + $0xa8] sm:$0xe] }
 0x534   : > { %v12126_v58 = vsel %vm16379_vm13, %v12124_v25, %v12125_v35  ;;  %v12026_v25 = vld [vmem:[#allocation3 + $0x90] sm:$0xe]  ;;  %v12167_v30 = vrot.slane %v12028_v16, 5  ;;  %v12171_v35 = vrot.slane %v12030_v15, 5  ;;  %v12178_v51 = vrot.slane %v12033_v38, 5 }
 0x535   : > { %v12123_v7 = vsel %vm16379_vm13, %v13554_v6, %v12122_v60  ;;  %v12151_v60 = vsel %vm16379_vm13, %v13558_v56, %v12150_v52  ;;  %v12161_v36 = vsel %vm16379_vm13, %v12159_v42, %v12160_v28  ;;  %v13560_v14 = vrot.slane %v12026_v25, 9  ;;  %v12038_v3 = vld [vmem:[#allocation3 + $0xc0] sm:$0xe]  ;;  %v12041_v47 = vld [vmem:[#allocation3 + $0xcc] sm:$0xe] }
 0x536   : > { %v13586_v5 = vcombine.low %v12123_v7, %v12126_v58  ;;  %v12168_v11 = vsel %vm16379_vm13, %v12166_v48, %v12167_v30  ;;  %v12173_v7 = vrot.slane %v12171_v35, 4  ;;  %v12180_v37 = vrot.slane %v12178_v51, 4  ;;  %v12043_v8 = vld [vmem:[#allocation3 + $0xd4] sm:$0x1] }
 0x537   : > { %v12174_v20 = vrot.slane %v12031_v55, 5  ;;  %v12181_v12 = vrot.slane %v12034_v41, 5  ;;  %v12185_v40 = vrot.slane %v12036_v54, 5  ;;  %v13562_v13 = vrot.slane %v12032_v10, 9 }
 0x539   : > { %14916 = vmatmul.mubr.bf16.gmra.mrb[24].mxu1 %v13539_v49  ;;  %v12018_v49 = vld [vmem:[#allocation3 + $0x70] sm:$0xf]  ;;  %v12175_v53 = vsel %vm16379_vm13, %v12173_v7, %v12174_v20  ;;  %v12179_v52 = vsel %vm16379_vm13, %v13562_v13, %v12178_v51  ;;  %v12187_v19 = vrot.slane %v12185_v40, 4 }
 0x53a   : > { %14919 = vmatprep.mubr.bf16.mxu1 %v13540_v34  ;;  %v12014_v34 = vld [vmem:[#allocation3 + $0x60] sm:$0xe]  ;;  %v12143_v24 = vrot.slane %v12018_v49, 5  ;;  %v12039_v49 = vld [vmem:[#allocation3 + $0xc4] sm:$0xf] }
 0x53b   : > { %v13556_v63 = vrot.slane %v12014_v34, 9 }
 0x53c   : > { %v12145_v39 = vrot.slane %v12143_v24, 4 }
 0x53d   : > { %v12137_v17 = vsel %vm16379_vm13, %v13556_v63, %v12136_v33  ;;  %v12165_v33 = vsel %vm16379_vm13, %v13560_v14, %v12164_v0 }
 0x53e   : > { %v13588_v21 = vcombine.low %v12137_v17, %v12140_v2  ;;  %v12147_v4 = vsel %vm16379_vm13, %v12145_v39, %v12146_v45  ;;  %v12035_v39 = vld [vmem:[#allocation3 + $0xb4] sm:$0xe] }
 0x53f   : > { %v13563_v57 = vrot.slane %v12035_v39, 9 }
 0x541   : > { %14920 = vmatmul.mubr.bf16.gmra.mrb[28].mxu1 %v13541_v9  ;;  %v13587_v9 = vcombine.low %v12130_v61, %v12133_v43  ;;  %v12182_v43 = vsel %vm16379_vm13, %v12180_v37, %v12181_v12  ;;  %v12037_v61 = vld [vmem:[#allocation3 + $0xbc] sm:$0x1]  ;;  %v12186_v56 = vsel %vm16379_vm13, %v13563_v57, %v12185_v40 }
 0x542   : > { %14939 = vmatprep.mubr.bf16.mxu1 %v13582_v23  ;;  %v12017_v23 = vld [vmem:[#allocation3 + $0x6c] sm:$0xe]  ;;  %v13594_v17 = vcombine.low %v12179_v52, %v12182_v43 }
 0x543   : > { %v13557_v29 = vrot.slane %v12017_v23, 9  ;;  %v12188_v23 = vrot.slane %v12037_v61, 5 }
 0x545   : > { %v12144_v22 = vsel %vm16379_vm13, %v13557_v29, %v12143_v24  ;;  %v12192_v24 = vrot.slane %v12039_v49, 5  ;;  %v12189_v29 = vsel %vm16379_vm13, %v12187_v19, %v12188_v23 }
 0x546   : > { %v13589_v46 = vcombine.low %v12144_v22, %v12147_v4  ;;  %v13564_v4 = vrot.slane %v12038_v3, 9  ;;  %v12202_v22 = vrot.slane %v12043_v8, 5 }
 0x547   : > { %v12194_v32 = vrot.slane %v12192_v24, 4 }
 0x549   : > { %14940 = vmatmul.mubr.bf16.vlgmr.msra.gmra.mrb[0].mxu1 %v13583_v26  ;;  %v13590_v26 = vcombine.low %v12151_v60, %v12154_v27  ;;  %v13565_v27 = vrot.slane %v12041_v47, 9  ;;  %v12193_v60 = vsel %vm16379_vm13, %v13564_v4, %v12192_v24 }
 0x54a   : > { %14943 = vmatprep.mubr.bf16.mxu1 %v13584_v62  ;;  %v12023_v62 = vld [vmem:[#allocation3 + $0x84] sm:$0xe] }
 0x54b   : > { %v13559_v1 = vrot.slane %v12023_v62, 9  ;;  %v18179_v62 = vld [vmem:[%s18259_s4] ss:$0 sm:$0xff] }
 0x54d   : > { %v12158_v6 = vsel %vm16379_vm13, %v13559_v1, %v12157_v44 }
 0x54e   : > { %v13591_v58 = vcombine.low %v12158_v6, %v12161_v36 }
 0x551   : > { %14944 = vmatmul.mubr.bf16.gmra.mrb[4].mxu1 %v13585_v59  ;;  %v13592_v59 = vcombine.low %v12165_v33, %v12168_v11 }
 0x552   : > { %14947 = vmatprep.mubr.bf16.mxu1 %v13586_v5  ;;  %v12029_v5 = vld [vmem:[#allocation3 + $0x9c] sm:$0xe] }
 0x553   : > { %v13561_v34 = vrot.slane %v12029_v5, 9 }
 0x555   : > { %v12172_v63 = vsel %vm16379_vm13, %v13561_v34, %v12171_v35 }
 0x556   : > { %v13593_v2 = vcombine.low %v12172_v63, %v12175_v53 }
 0x559   : > { %14948 = vmatmul.mubr.bf16.gmra.mrb[8].mxu1 %v13587_v9  ;;  %v12042_v9 = vld [vmem:[#allocation3 + $0xd0] sm:$0xf] }
 0x55a   : > { %14951 = vmatprep.mubr.bf16.mxu1 %v13588_v21  ;;  %v12040_v21 = vld [vmem:[#allocation3 + $0xc8] sm:$0x1]  ;;  %v12199_v31 = vrot.slane %v12042_v9, 5 }
 0x55b   : > { %v12195_v45 = vrot.slane %v12040_v21, 5 }
 0x55c   : > { %v12201_v0 = vrot.slane %v12199_v31, 4 }
 0x55d   : > { %v12196_v44 = vsel %vm16379_vm13, %v12194_v32, %v12195_v45 }
 0x55e   : > { %v13596_v50 = vcombine.low %v12193_v60, %v12196_v44  ;;  %v12203_v42 = vsel %vm16379_vm13, %v12201_v0, %v12202_v22 }
 0x561   : > { %14952 = vmatmul.mubr.bf16.gmra.mrb[12].mxu1 %v13589_v46  ;;  %v13595_v46 = vcombine.low %v12186_v56, %v12189_v29 }
 0x562   : > { %14955 = vmatprep.mubr.bf16.mxu1 %v13590_v26  ;;  %v12200_v26 = vsel %vm16379_vm13, %v13565_v27, %v12199_v31 }
 0x563   : > { %v13597_v16 = vcombine.low %v12200_v26, %v12203_v42 }
 0x569   : > { %14956 = vmatmul.mubr.bf16.gmra.mrb[16].mxu1 %v13591_v58 }
 0x56a   : > { %14959 = vmatprep.mubr.bf16.mxu1 %v13592_v59 }
 0x571   : > { %14960 = vmatmul.mubr.bf16.gmra.mrb[20].mxu1 %v13593_v2 }
 0x572   : > { %14963 = vmatprep.mubr.bf16.mxu1 %v13594_v17 }
 0x579   : > { %14964 = vmatmul.mubr.bf16.gmra.mrb[24].mxu1 %v13595_v46 }
 0x57a   : > { %14967 = vmatprep.mubr.bf16.mxu1 %v13596_v50 }
 0x581   : > { %14968 = vmatmul.mubr.bf16.gmra.mrb[28].mxu1 %v13597_v16 }
 0x61c   : > { %v14941_v48 = vpop.f32.mrb[0].mxu1 }
 0x61d   : > { %v12631_v18 = vadd.f32 %v14941_v48, %v18179_v62  ;;  %v12367_v15 = vpop.f32.mrb[1].mxu1 }
 0x61e   : > { %v12629_v28 = vadd.f32 %v18179_v62, %v12367_v15  ;;  %v14942_v25 = vpop.f32.mrb[2].mxu1 }
 0x61f   : > { %12663 = vst [vmem:[%s18186_s9 + $0x10] sm:$0xff] %v12631_v18  ;;  %v12632_v38 = vadd.f32 %v14942_v25, %v18179_v62  ;;  %v12370_v30 = vpop.f32.mrb[3].mxu1 }
 0x620   : > { %12661 = vst [vmem:[%s18186_s9] sm:$0xff] %v12629_v28  ;;  %v12630_v1 = vadd.f32 %v18179_v62, %v12370_v30 }
 0x621   : > { %12664 = vst [vmem:[%s18186_s9 + $0x18] sm:$0xff] %v12632_v38 }
 0x622   : > { %12662 = vst [vmem:[%s18186_s9 + $0x8] sm:$0xff] %v12630_v1 }
 0x624   : > { %v14945_v36 = vpop.f32.mrb[4].mxu1 }
 0x625   : > { %v12635_v35 = vadd.f32 %v14945_v36, %v18179_v62  ;;  %v12383_v14 = vpop.f32.mrb[5].mxu1 }
 0x626   : > { %v12633_v11 = vadd.f32 %v18179_v62, %v12383_v14  ;;  %v14946_v51 = vpop.f32.mrb[6].mxu1 }
 0x627   : > { %12667 = vst [vmem:[%s18186_s9 + $0x30] sm:$0xff] %v12635_v35  ;;  %v12636_v6 = vadd.f32 %v14946_v51, %v18179_v62  ;;  %v12386_v58 = vpop.f32.mrb[7].mxu1 }
 0x628   : > { %12665 = vst [vmem:[%s18186_s9 + $0x20] sm:$0xff] %v12633_v11  ;;  %v12634_v33 = vadd.f32 %v18179_v62, %v12386_v58 }
 0x629   : > { %12668 = vst [vmem:[%s18186_s9 + $0x38] sm:$0xff] %v12636_v6 }
 0x62a   : > { %12666 = vst [vmem:[%s18186_s9 + $0x28] sm:$0xff] %v12634_v33 }
 0x62c   : > { %v14949_v55 = vpop.f32.mrb[8].mxu1 }
 0x62d   : > { %v12639_v59 = vadd.f32 %v14949_v55, %v18179_v62  ;;  %v12399_v7 = vpop.f32.mrb[9].mxu1 }
 0x62e   : > { %v12637_v41 = vadd.f32 %v18179_v62, %v12399_v7  ;;  %v14950_v5 = vpop.f32.mrb[10].mxu1 }
 0x62f   : > { %12671 = vst [vmem:[%s18186_s9 + $0x50] sm:$0xff] %v12639_v59  ;;  %v12640_v37 = vadd.f32 %v14950_v5, %v18179_v62  ;;  %v12402_v54 = vpop.f32.mrb[11].mxu1 }
 0x630   : > { %12669 = vst [vmem:[%s18186_s9 + $0x40] sm:$0xff] %v12637_v41  ;;  %v12638_v20 = vadd.f32 %v18179_v62, %v12402_v54 }
 0x631   : > { %12672 = vst [vmem:[%s18186_s9 + $0x58] sm:$0xff] %v12640_v37 }
 0x632   : > { %12670 = vst [vmem:[%s18186_s9 + $0x48] sm:$0xff] %v12638_v20 }
 0x634   : > { %v14953_v10 = vpop.f32.mrb[12].mxu1 }
 0x635   : > { %v12643_v49 = vadd.f32 %v14953_v10, %v18179_v62  ;;  %v12415_v12 = vpop.f32.mrb[13].mxu1 }
 0x636   : > { %v12641_v34 = vadd.f32 %v18179_v62, %v12415_v12  ;;  %v14954_v53 = vpop.f32.mrb[14].mxu1 }
 0x637   : > { %12675 = vst [vmem:[%s18186_s9 + $0x70] sm:$0xff] %v12643_v49  ;;  %v12644_v40 = vadd.f32 %v14954_v53, %v18179_v62  ;;  %v12418_v13 = vpop.f32.mrb[15].mxu1 }
 0x638   : > { %12673 = vst [vmem:[%s18186_s9 + $0x60] sm:$0xff] %v12641_v34  ;;  %v12642_v43 = vadd.f32 %v18179_v62, %v12418_v13 }
 0x639   : > { %12676 = vst [vmem:[%s18186_s9 + $0x78] sm:$0xff] %v12644_v40 }
 0x63a   : > { %12674 = vst [vmem:[%s18186_s9 + $0x68] sm:$0xff] %v12642_v43 }
 0x63c   : > { %v14957_v24 = vpop.f32.mrb[16].mxu1 }
 0x63d   : > { %v12647_v63 = vadd.f32 %v14957_v24, %v18179_v62  ;;  %v12431_v2 = vpop.f32.mrb[17].mxu1 }
 0x63e   : > { %v12645_v52 = vadd.f32 %v18179_v62, %v12431_v2  ;;  %v14958_v61 = vpop.f32.mrb[18].mxu1 }
 0x63f   : > { %12679 = vst [vmem:[%s18186_s9 + $0x90] sm:$0xff] %v12647_v63  ;;  %v12648_v9 = vadd.f32 %v14958_v61, %v18179_v62  ;;  %v12434_v17 = vpop.f32.mrb[19].mxu1 }
 0x640   : > { %12677 = vst [vmem:[%s18186_s9 + $0x80] sm:$0xff] %v12645_v52  ;;  %v12646_v19 = vadd.f32 %v18179_v62, %v12434_v17 }
 0x641   : > { %12680 = vst [vmem:[%s18186_s9 + $0x98] sm:$0xff] %v12648_v9 }
 0x642   : > { %12678 = vst [vmem:[%s18186_s9 + $0x88] sm:$0xff] %v12646_v19 }
 0x644   : > { %v14961_v21 = vpop.f32.mrb[20].mxu1 }
 0x645   : > { %v12651_v39 = vadd.f32 %v14961_v21, %v18179_v62  ;;  %v12447_v32 = vpop.f32.mrb[21].mxu1 }
 0x646   : > { %v12649_v23 = vadd.f32 %v18179_v62, %v12447_v32  ;;  %v14962_v3 = vpop.f32.mrb[22].mxu1 }
 0x647   : > { %12683 = vst [vmem:[%s18186_s9 + $0xb0] sm:$0xff] %v12651_v39  ;;  %v12652_v31 = vadd.f32 %v14962_v3, %v18179_v62  ;;  %v12450_v45 = vpop.f32.mrb[23].mxu1 }
 0x648   : > { %12681 = vst [vmem:[%s18186_s9 + $0xa0] sm:$0xff] %v12649_v23  ;;  %v12650_v47 = vadd.f32 %v18179_v62, %v12450_v45 }
 0x649   : > { %12684 = vst [vmem:[%s18186_s9 + $0xb8] sm:$0xff] %v12652_v31 }
 0x64a   : > { %12682 = vst [vmem:[%s18186_s9 + $0xa8] sm:$0xff] %v12650_v47 }
 0x64c   : > { %v14965_v8 = vpop.f32.mrb[24].mxu1 }
 0x64d   : > { %v12655_v57 = vadd.f32 %v14965_v8, %v18179_v62  ;;  %v12463_v29 = vpop.f32.mrb[25].mxu1 }
 0x64e   : > { %v12653_v4 = vadd.f32 %v18179_v62, %v12463_v29  ;;  %v14966_v44 = vpop.f32.mrb[26].mxu1 }
 0x64f   : > { %12687 = vst [vmem:[%s18186_s9 + $0xd0] sm:$0xff] %v12655_v57  ;;  %v12656_v56 = vadd.f32 %v14966_v44, %v18179_v62  ;;  %v12466_v27 = vpop.f32.mrb[27].mxu1 }
 0x650   : > { %12685 = vst [vmem:[%s18186_s9 + $0xc0] sm:$0xff] %v12653_v4  ;;  %v12654_v0 = vadd.f32 %v18179_v62, %v12466_v27 }
 0x651   : > { %12688 = vst [vmem:[%s18186_s9 + $0xd8] sm:$0xff] %v12656_v56 }
 0x652   : > { %12686 = vst [vmem:[%s18186_s9 + $0xc8] sm:$0xff] %v12654_v0 }
 0x654   : > { %v14969_v22 = vpop.f32.mrb[28].mxu1 }
 0x655   : > { %v12659_v46 = vadd.f32 %v14969_v22, %v18179_v62  ;;  %v12479_v60 = vpop.f32.mrb[29].mxu1 }
 0x656   : > { %v12657_v50 = vadd.f32 %v18179_v62, %v12479_v60  ;;  %v14970_v26 = vpop.f32.mrb[30].mxu1 }
 0x657   : > { %12691 = vst [vmem:[%s18186_s9 + $0xf0] sm:$0xff] %v12659_v46  ;;  %v12660_v42 = vadd.f32 %v14970_v26, %v18179_v62  ;;  %v12482_v16 = vpop.f32.mrb[31].mxu1 }
 0x658   : > { %12689 = vst [vmem:[%s18186_s9 + $0xe0] sm:$0xff] %v12657_v50  ;;  %v12658_v48 = vadd.f32 %v18179_v62, %v12482_v16 }
 0x659   : > { %12692 = vst [vmem:[%s18186_s9 + $0xf8] sm:$0xff] %v12660_v42 }
 0x65a   : > { %12690 = vst [vmem:[%s18186_s9 + $0xe8] sm:$0xff] %v12658_v48 }
 0x65b PF: > { %s15_s18 = sadd.s32 1, %s15738_s18  }
 0x65c   : > { %p12_p4 = scmp.ge.s32.totalorder %s15_s18, 4  }
 0x65e   :  { %14 = sbr.rel (!%p12_p4) target bundleno = 1 (0x1), region = 90 }

</bundles_post_ra>
